<compile_context>
chip_gen: v6e
topology: v6e:2x2x1
jax: 0.10.0
libtpu: 0.0.40
codegen_flags: <defaults>
</compile_context>

<pallas_src>
import functools

import jax
import jax.numpy as jnp
from jax.experimental import pallas as pl
from jax.experimental.pallas import tpu as pltpu

_VMEM_LIMIT = 32 * 1024 * 1024  # <= half of v7x's 64 MiB per TensorCore


def _round_up(x, m):
    return ((x + m - 1) // m) * m


# ----------------------------- Pallas kernels -----------------------------

def _matmul_bias_act_kernel(x_ref, w_ref, b_ref, o_ref, *, activation):
    """o = act(x @ w + b); bf16 inputs, f32 MXU accumulation, bias in f32."""
    acc = jnp.dot(x_ref[...], w_ref[...], preferred_element_type=jnp.float32)
    y = acc + b_ref[...]
    if activation == "relu":
        y = jnp.maximum(y, 0.0)
    o_ref[...] = y.astype(o_ref.dtype)


def matmul_bias_act(x, w, bias, activation, *, tm=512, tn=128,
                    out_dtype=jnp.bfloat16):
    """(M,K)@(K,N)+bias -> act, tiled over a 2-D parallel (M, N) grid."""
    M, K = x.shape
    K2, N = w.shape
    assert K == K2 and N % tn == 0
    tm = min(tm, _round_up(M, 8))
    bias2 = bias.reshape(1, N).astype(jnp.float32)
    kernel = functools.partial(_matmul_bias_act_kernel, activation=activation)
    return pl.pallas_call(
        kernel,
        out_shape=jax.ShapeDtypeStruct((M, N), out_dtype),
        grid=(pl.cdiv(M, tm), N // tn),
        in_specs=[
            pl.BlockSpec((tm, K), lambda i, j: (i, 0)),
            pl.BlockSpec((K, tn), lambda i, j: (0, j)),
            pl.BlockSpec((1, tn), lambda i, j: (0, j)),
        ],
        out_specs=pl.BlockSpec((tm, tn), lambda i, j: (i, j)),
        compiler_params=pltpu.CompilerParams(
            dimension_semantics=("parallel", "parallel"),
            vmem_limit_bytes=_VMEM_LIMIT,
        ),
    )(x, w, bias2)


def _maxpool_kernel(x_ref, o_ref):
    """x: (t, 2, Wp, 2*C) -> o: (t, Wp, C): max over the 2x2 pool window."""
    c = o_ref.shape[-1]
    xv = x_ref[...]
    v = jnp.maximum(xv[:, 0, :, :], xv[:, 1, :, :])      # max over the H pair
    o_ref[...] = jnp.maximum(v[:, :, :c], v[:, :, c:])   # max over the W pair


def maxpool2x2(x):
    """nn.MaxPool2d(2,2) on NHWC via one gridded kernel over a free reshape."""
    n, h, w, c = x.shape
    hp, wp = h // 2, w // 2
    x = x[:, :2 * hp, :2 * wp, :]                 # no-op when H, W are even
    xr = x.reshape(n * hp, 2, wp, 2 * c)          # contiguity-preserving
    rows = n * hp
    t = rows // 2 if rows % 2 == 0 else rows      # >= 2 grid steps when possible
    out = pl.pallas_call(
        _maxpool_kernel,
        out_shape=jax.ShapeDtypeStruct((rows, wp, c), x.dtype),
        grid=(pl.cdiv(rows, t),),
        in_specs=[pl.BlockSpec((t, 2, wp, 2 * c), lambda i: (i, 0, 0, 0))],
        out_specs=pl.BlockSpec((t, wp, c), lambda i: (i, 0, 0)),
        compiler_params=pltpu.CompilerParams(
            dimension_semantics=("parallel",),
            vmem_limit_bytes=_VMEM_LIMIT,
        ),
    )(xr)
    return out.reshape(n, hp, wp, c)


def _fc_head_kernel(x_ref, w1_ref, b1_ref, w2_ref, b2_ref, w3_ref, b3_ref,
                    w4_ref, b4_ref, o_ref):
    """fc1..fc3 (+ReLU) then fc4 + softmax, fused; f32 math on tiny M."""
    h = x_ref[...].astype(jnp.float32)
    layers = ((w1_ref, b1_ref, True), (w2_ref, b2_ref, True),
              (w3_ref, b3_ref, True), (w4_ref, b4_ref, False))
    for w_ref, b_ref, relu in layers:
        h = jnp.dot(h, w_ref[...], preferred_element_type=jnp.float32) + b_ref[...]
        if relu:
            h = jnp.maximum(h, 0.0)
    m = jnp.max(h, axis=-1, keepdims=True)
    e = jnp.exp(h - m)
    o_ref[...] = (e / jnp.sum(e, axis=-1, keepdims=True)).astype(o_ref.dtype)


def fc_head(x, params):
    n = x.shape[0]
    args = [x]
    for li in range(1, 5):
        args.append(params[f"fc{li}_w"].astype(jnp.float32))
        args.append(params[f"fc{li}_b"].reshape(1, -1).astype(jnp.float32))
    return pl.pallas_call(
        _fc_head_kernel,
        out_shape=jax.ShapeDtypeStruct((n, 2), jnp.float32),
    )(*args)


# ----------------------------- Glue / layers -------------------------------

def im2col(x, kh, kw):
    """(N,H,W,C) -> ((N*Ho*Wo, kh*kw*C), (N,Ho,Wo)); K ordered (kh, kw, cin)."""
    n, h, w, c = x.shape
    ho, wo = h - kh + 1, w - kw + 1
    cols = [x[:, i:i + ho, j:j + wo, :] for i in range(kh) for j in range(kw)]
    patches = jnp.concatenate(cols, axis=-1)
    return patches.reshape(n * ho * wo, kh * kw * c), (n, ho, wo)


def conv_bn_relu_pool(x, w_hwio, b, gamma, beta, mean, var, eps=1e-5):
    """Conv2d(valid, stride 1) + BatchNorm2d(eval) + ReLU (one fused matmul
    kernel) followed by MaxPool2d(2,2) (one gridded kernel)."""
    kh, kw, cin, cout = w_hwio.shape
    scale = gamma / jnp.sqrt(var + eps)           # BN folded: scale -> weights
    shift = (b - mean) * scale + beta             #            shift -> bias
    w_f = w_hwio * scale

    cin_p = _round_up(cin, 8)                     # conv1: 3 -> 8  (K = 128)
    cout_p = _round_up(cout, 128)                 # conv1: 64 -> 128
    if cin_p != cin:
        x = jnp.pad(x, ((0, 0), (0, 0), (0, 0), (0, cin_p - cin)))
        w_f = jnp.pad(w_f, ((0, 0), (0, 0), (0, cin_p - cin), (0, 0)))
    if cout_p != cout:
        w_f = jnp.pad(w_f, ((0, 0), (0, 0), (0, 0), (0, cout_p - cout)))
        shift = jnp.pad(shift, (0, cout_p - cout))

    cols, (n, ho, wo) = im2col(x.astype(jnp.bfloat16), kh, kw)
    wmat = w_f.reshape(kh * kw * cin_p, cout_p).astype(jnp.bfloat16)
    y = matmul_bias_act(cols, wmat, shift, "relu")          # (M, cout_p) bf16
    y = maxpool2x2(y.reshape(n, ho, wo, cout_p))
    return y[..., :cout] if cout_p != cout else y


def init_params(key):
    params = {}
    keys = jax.random.split(key, 40)
    ki = 0

    def nrm(shape, s=0.05):
        nonlocal ki
        v = jax.random.normal(keys[ki], shape, jnp.float32) * s
        ki += 1
        return v

    conv_shapes = [(4, 4, 3, 64), (4, 4, 64, 128), (4, 4, 128, 256),
                   (4, 4, 256, 128)]
    for li, shp in enumerate(conv_shapes, start=1):
        cout = shp[-1]
        params[f"conv{li}_w"] = nrm(shp)
        params[f"conv{li}_b"] = nrm((cout,))
        params[f"bn{li}_gamma"] = 1.0 + nrm((cout,))
        params[f"bn{li}_beta"] = nrm((cout,))
        params[f"bn{li}_mean"] = nrm((cout,))
        params[f"bn{li}_var"] = 1.0 + jnp.abs(nrm((cout,)))

    fc_shapes = [(128, 64), (64, 32), (32, 16), (16, 2)]
    for li, (fin, fout) in enumerate(fc_shapes, start=1):
        params[f"fc{li}_w"] = nrm((fin, fout), s=0.1)
        params[f"fc{li}_b"] = nrm((fout,), s=0.1)
    return params


def cnn_forward(params, x_nchw):
    x = jnp.transpose(x_nchw, (0, 2, 3, 1)).astype(jnp.float32)  # NCHW -> NHWC
    for li in range(1, 5):
        x = conv_bn_relu_pool(x, params[f"conv{li}_w"], params[f"conv{li}_b"],
                              params[f"bn{li}_gamma"], params[f"bn{li}_beta"],
                              params[f"bn{li}_mean"], params[f"bn{li}_var"])
    n = x.shape[0]
    x = x.reshape(n, -1)   # final map is (N,1,1,128) -> (N,128), matches view()
    return fc_head(x, params)


if __name__ == "__main__":
    key = jax.random.PRNGKey(0)
    kp, kx = jax.random.split(key)
    params = init_params(kp)
    # 61x61 is the smallest input whose forward yields the 1x1x128 feature map
    # that fc1's in_features=128 implies (the real Iceberg images are 75x75).
    x = jax.random.normal(kx, (2, 3, 61, 61), jnp.float32)
    fwd = jax.jit(cnn_forward)
    out = jax.block_until_ready(fwd(params, x))
    assert out.shape == (2, 2)
    assert bool(jnp.all(jnp.isfinite(out)))
    assert bool(jnp.allclose(jnp.sum(out, axis=-1), 1.0, atol=1e-5))
    print("KERNEL_OK")
</pallas_src>

<mosaic_0001>
module attributes {stable_mosaic.version = 11 : i64} {
  func.func @_matmul_bias_act_kernel(%arg0: i32, %arg1: i32, %arg2: memref<512x128xbf16, #tpu.memory_space<vmem>>, %arg3: memref<128x128xbf16, #tpu.memory_space<vmem>>, %arg4: memref<1x128xf32, #tpu.memory_space<vmem>>, %arg5: memref<512x128xbf16, #tpu.memory_space<vmem>>) attributes {dimension_semantics = [#tpu.dimension_semantics<parallel>, #tpu.dimension_semantics<parallel>], iteration_bounds = array<i64: 14, 1>, scalar_prefetch = 0 : i64, scratch_operands = 0 : i64, tpu.core_type = #tpu.core_type<tc>, window_params = [{transform_indices = @transform_0, window_bounds = array<i64: 512, 128>}, {transform_indices = @transform_1, window_bounds = array<i64: 128, 128>}, {transform_indices = @transform_2, window_bounds = array<i64: 1, 128>}, {transform_indices = @transform_3, window_bounds = array<i64: 512, 128>}]} {
    %c0 = arith.constant 0 : index
    %c0_0 = arith.constant 0 : index
    %0 = vector.load %arg2[%c0, %c0_0] : memref<512x128xbf16, #tpu.memory_space<vmem>>, vector<512x128xbf16>
    %c0_1 = arith.constant 0 : index
    %c0_2 = arith.constant 0 : index
    %1 = vector.load %arg3[%c0_1, %c0_2] : memref<128x128xbf16, #tpu.memory_space<vmem>>, vector<128x128xbf16>
    %cst = arith.constant dense<0.000000e+00> : vector<512x128xf32>
    %2 = tpu.matmul %0, %1, %cst {dimension_numbers = #tpu.dot_dimension_numbers<[1], [0], [0], [1], [0, 0, 1, 1], [], []>} : vector<512x128xbf16>, vector<128x128xbf16>, vector<512x128xf32> -> vector<512x128xf32>
    %c0_3 = arith.constant 0 : index
    %c0_4 = arith.constant 0 : index
    %3 = vector.load %arg4[%c0_3, %c0_4] : memref<1x128xf32, #tpu.memory_space<vmem>>, vector<1x128xf32>
    %4 = vector.broadcast %3 : vector<1x128xf32> to vector<512x128xf32>
    %5 = arith.addf %2, %4 : vector<512x128xf32>
    %cst_5 = arith.constant 0.000000e+00 : f32
    %6 = vector.broadcast %cst_5 : f32 to vector<512x128xf32>
    %7 = arith.maximumf %5, %6 : vector<512x128xf32>
    %8 = arith.truncf %7 : vector<512x128xf32> to vector<512x128xbf16>
    %c0_6 = arith.constant 0 : index
    %c0_7 = arith.constant 0 : index
    %9 = vector.load %arg5[%c0_6, %c0_7] : memref<512x128xbf16, #tpu.memory_space<vmem>>, vector<512x128xbf16>
    tpu.vector_store %arg5[%c0_6, %c0_7], %8 {strides = array<i32>} : memref<512x128xbf16, #tpu.memory_space<vmem>>, vector<512x128xbf16>,
    return
  }
  func.func @transform_0(%arg0: i32, %arg1: i32) -> (i32, i32) {
    %c0_i32 = arith.constant 0 : i32
    %c0_i32_0 = arith.constant 0 : i32
    return %arg0, %c0_i32 : i32, i32
  }
  func.func @transform_1(%arg0: i32, %arg1: i32) -> (i32, i32) {
    %c0_i32 = arith.constant 0 : i32
    %c0_i32_0 = arith.constant 0 : i32
    return %c0_i32, %arg1 : i32, i32
  }
  func.func @transform_2(%arg0: i32, %arg1: i32) -> (i32, i32) {
    %c0_i32 = arith.constant 0 : i32
    %c0_i32_0 = arith.constant 0 : i32
    return %c0_i32, %arg1 : i32, i32
  }
  func.func @transform_3(%arg0: i32, %arg1: i32) -> (i32, i32) {
    %c0_i32 = arith.constant 0 : i32
    return %arg0, %arg1 : i32, i32
  }
}

module attributes {stable_mosaic.version = 11 : i64} {
  func.func @_maxpool_kernel(%arg0: i32, %arg1: memref<29x2x29x256xbf16, #tpu.memory_space<vmem>>, %arg2: memref<29x29x128xbf16, #tpu.memory_space<vmem>>) attributes {dimension_semantics = [#tpu.dimension_semantics<parallel>], iteration_bounds = array<i64: 2>, scalar_prefetch = 0 : i64, scratch_operands = 0 : i64, tpu.core_type = #tpu.core_type<tc>, window_params = [{transform_indices = @transform_0, window_bounds = array<i64: 29, 2, 29, 256>}, {transform_indices = @transform_1, window_bounds = array<i64: 29, 29, 128>}]} {
    %c0 = arith.constant 0 : index
    %c0_0 = arith.constant 0 : index
    %c0_1 = arith.constant 0 : index
    %c0_2 = arith.constant 0 : index
    %0 = vector.load %arg1[%c0, %c0_0, %c0_1, %c0_2] : memref<29x2x29x256xbf16, #tpu.memory_space<vmem>>, vector<29x2x29x256xbf16>
    %1 = vector.extract_strided_slice %0 {offsets = [0, 0, 0, 0], sizes = [29, 1, 29, 256], strides = [1, 1, 1, 1]} : vector<29x2x29x256xbf16> to vector<29x1x29x256xbf16>
    %2 = vector.shape_cast %1 : vector<29x1x29x256xbf16> to vector<29x29x256xbf16>
    %3 = vector.extract_strided_slice %0 {offsets = [0, 1, 0, 0], sizes = [29, 1, 29, 256], strides = [1, 1, 1, 1]} : vector<29x2x29x256xbf16> to vector<29x1x29x256xbf16>
    %4 = vector.shape_cast %3 : vector<29x1x29x256xbf16> to vector<29x29x256xbf16>
    %5 = arith.maximumf %2, %4 : vector<29x29x256xbf16>
    %6 = vector.extract_strided_slice %5 {offsets = [0, 0, 0], sizes = [29, 29, 128], strides = [1, 1, 1]} : vector<29x29x256xbf16> to vector<29x29x128xbf16>
    %7 = vector.extract_strided_slice %5 {offsets = [0, 0, 128], sizes = [29, 29, 128], strides = [1, 1, 1]} : vector<29x29x256xbf16> to vector<29x29x128xbf16>
    %8 = arith.maximumf %6, %7 : vector<29x29x128xbf16>
    %c0_3 = arith.constant 0 : index
    %c0_4 = arith.constant 0 : index
    %c0_5 = arith.constant 0 : index
    %9 = vector.load %arg2[%c0_3, %c0_4, %c0_5] : memref<29x29x128xbf16, #tpu.memory_space<vmem>>, vector<29x29x128xbf16>
    tpu.vector_store %arg2[%c0_3, %c0_4, %c0_5], %8 {strides = array<i32>} : memref<29x29x128xbf16, #tpu.memory_space<vmem>>, vector<29x29x128xbf16>,
    return
  }
  func.func @transform_0(%arg0: i32) -> (i32, i32, i32, i32) {
    %c0_i32 = arith.constant 0 : i32
    %c0_i32_0 = arith.constant 0 : i32
    %c0_i32_1 = arith.constant 0 : i32
    %c0_i32_2 = arith.constant 0 : i32
    return %arg0, %c0_i32, %c0_i32_0, %c0_i32_1 : i32, i32, i32, i32
  }
  func.func @transform_1(%arg0: i32) -> (i32, i32, i32) {
    %c0_i32 = arith.constant 0 : i32
    %c0_i32_0 = arith.constant 0 : i32
    %c0_i32_1 = arith.constant 0 : i32
    return %arg0, %c0_i32, %c0_i32_0 : i32, i32, i32
  }
}

module attributes {stable_mosaic.version = 11 : i64} {
  func.func @_matmul_bias_act_kernel(%arg0: i32, %arg1: i32, %arg2: memref<512x1024xbf16, #tpu.memory_space<vmem>>, %arg3: memref<1024x128xbf16, #tpu.memory_space<vmem>>, %arg4: memref<1x128xf32, #tpu.memory_space<vmem>>, %arg5: memref<512x128xbf16, #tpu.memory_space<vmem>>) attributes {dimension_semantics = [#tpu.dimension_semantics<parallel>, #tpu.dimension_semantics<parallel>], iteration_bounds = array<i64: 3, 1>, scalar_prefetch = 0 : i64, scratch_operands = 0 : i64, tpu.core_type = #tpu.core_type<tc>, window_params = [{transform_indices = @transform_0, window_bounds = array<i64: 512, 1024>}, {transform_indices = @transform_1, window_bounds = array<i64: 1024, 128>}, {transform_indices = @transform_2, window_bounds = array<i64: 1, 128>}, {transform_indices = @transform_3, window_bounds = array<i64: 512, 128>}]} {
    %c0 = arith.constant 0 : index
    %c0_0 = arith.constant 0 : index
    %0 = vector.load %arg2[%c0, %c0_0] : memref<512x1024xbf16, #tpu.memory_space<vmem>>, vector<512x1024xbf16>
    %c0_1 = arith.constant 0 : index
    %c0_2 = arith.constant 0 : index
    %1 = vector.load %arg3[%c0_1, %c0_2] : memref<1024x128xbf16, #tpu.memory_space<vmem>>, vector<1024x128xbf16>
    %cst = arith.constant dense<0.000000e+00> : vector<512x128xf32>
    %2 = tpu.matmul %0, %1, %cst {dimension_numbers = #tpu.dot_dimension_numbers<[1], [0], [0], [1], [0, 0, 1, 1], [], []>} : vector<512x1024xbf16>, vector<1024x128xbf16>, vector<512x128xf32> -> vector<512x128xf32>
    %c0_3 = arith.constant 0 : index
    %c0_4 = arith.constant 0 : index
    %3 = vector.load %arg4[%c0_3, %c0_4] : memref<1x128xf32, #tpu.memory_space<vmem>>, vector<1x128xf32>
    %4 = vector.broadcast %3 : vector<1x128xf32> to vector<512x128xf32>
    %5 = arith.addf %2, %4 : vector<512x128xf32>
    %cst_5 = arith.constant 0.000000e+00 : f32
    %6 = vector.broadcast %cst_5 : f32 to vector<512x128xf32>
    %7 = arith.maximumf %5, %6 : vector<512x128xf32>
    %8 = arith.truncf %7 : vector<512x128xf32> to vector<512x128xbf16>
    %c0_6 = arith.constant 0 : index
    %c0_7 = arith.constant 0 : index
    %9 = vector.load %arg5[%c0_6, %c0_7] : memref<512x128xbf16, #tpu.memory_space<vmem>>, vector<512x128xbf16>
    tpu.vector_store %arg5[%c0_6, %c0_7], %8 {strides = array<i32>} : memref<512x128xbf16, #tpu.memory_space<vmem>>, vector<512x128xbf16>,
    return
  }
  func.func @transform_0(%arg0: i32, %arg1: i32) -> (i32, i32) {
    %c0_i32 = arith.constant 0 : i32
    %c0_i32_0 = arith.constant 0 : i32
    return %arg0, %c0_i32 : i32, i32
  }
  func.func @transform_1(%arg0: i32, %arg1: i32) -> (i32, i32) {
    %c0_i32 = arith.constant 0 : i32
    %c0_i32_0 = arith.constant 0 : i32
    return %c0_i32, %arg1 : i32, i32
  }
  func.func @transform_2(%arg0: i32, %arg1: i32) -> (i32, i32) {
    %c0_i32 = arith.constant 0 : i32
    %c0_i32_0 = arith.constant 0 : i32
    return %c0_i32, %arg1 : i32, i32
  }
  func.func @transform_3(%arg0: i32, %arg1: i32) -> (i32, i32) {
    %c0_i32 = arith.constant 0 : i32
    return %arg0, %arg1 : i32, i32
  }
}

module attributes {stable_mosaic.version = 11 : i64} {
  func.func @_maxpool_kernel(%arg0: i32, %arg1: memref<13x2x13x256xbf16, #tpu.memory_space<vmem>>, %arg2: memref<13x13x128xbf16, #tpu.memory_space<vmem>>) attributes {dimension_semantics = [#tpu.dimension_semantics<parallel>], iteration_bounds = array<i64: 2>, scalar_prefetch = 0 : i64, scratch_operands = 0 : i64, tpu.core_type = #tpu.core_type<tc>, window_params = [{transform_indices = @transform_0, window_bounds = array<i64: 13, 2, 13, 256>}, {transform_indices = @transform_1, window_bounds = array<i64: 13, 13, 128>}]} {
    %c0 = arith.constant 0 : index
    %c0_0 = arith.constant 0 : index
    %c0_1 = arith.constant 0 : index
    %c0_2 = arith.constant 0 : index
    %0 = vector.load %arg1[%c0, %c0_0, %c0_1, %c0_2] : memref<13x2x13x256xbf16, #tpu.memory_space<vmem>>, vector<13x2x13x256xbf16>
    %1 = vector.extract_strided_slice %0 {offsets = [0, 0, 0, 0], sizes = [13, 1, 13, 256], strides = [1, 1, 1, 1]} : vector<13x2x13x256xbf16> to vector<13x1x13x256xbf16>
    %2 = vector.shape_cast %1 : vector<13x1x13x256xbf16> to vector<13x13x256xbf16>
    %3 = vector.extract_strided_slice %0 {offsets = [0, 1, 0, 0], sizes = [13, 1, 13, 256], strides = [1, 1, 1, 1]} : vector<13x2x13x256xbf16> to vector<13x1x13x256xbf16>
    %4 = vector.shape_cast %3 : vector<13x1x13x256xbf16> to vector<13x13x256xbf16>
    %5 = arith.maximumf %2, %4 : vector<13x13x256xbf16>
    %6 = vector.extract_strided_slice %5 {offsets = [0, 0, 0], sizes = [13, 13, 128], strides = [1, 1, 1]} : vector<13x13x256xbf16> to vector<13x13x128xbf16>
    %7 = vector.extract_strided_slice %5 {offsets = [0, 0, 128], sizes = [13, 13, 128], strides = [1, 1, 1]} : vector<13x13x256xbf16> to vector<13x13x128xbf16>
    %8 = arith.maximumf %6, %7 : vector<13x13x128xbf16>
    %c0_3 = arith.constant 0 : index
    %c0_4 = arith.constant 0 : index
    %c0_5 = arith.constant 0 : index
    %9 = vector.load %arg2[%c0_3, %c0_4, %c0_5] : memref<13x13x128xbf16, #tpu.memory_space<vmem>>, vector<13x13x128xbf16>
    tpu.vector_store %arg2[%c0_3, %c0_4, %c0_5], %8 {strides = array<i32>} : memref<13x13x128xbf16, #tpu.memory_space<vmem>>, vector<13x13x128xbf16>,
    return
  }
  func.func @transform_0(%arg0: i32) -> (i32, i32, i32, i32) {
    %c0_i32 = arith.constant 0 : i32
    %c0_i32_0 = arith.constant 0 : i32
    %c0_i32_1 = arith.constant 0 : i32
    %c0_i32_2 = arith.constant 0 : i32
    return %arg0, %c0_i32, %c0_i32_0, %c0_i32_1 : i32, i32, i32, i32
  }
  func.func @transform_1(%arg0: i32) -> (i32, i32, i32) {
    %c0_i32 = arith.constant 0 : i32
    %c0_i32_0 = arith.constant 0 : i32
    %c0_i32_1 = arith.constant 0 : i32
    return %arg0, %c0_i32, %c0_i32_0 : i32, i32, i32
  }
}

module attributes {stable_mosaic.version = 11 : i64} {
  func.func @_matmul_bias_act_kernel(%arg0: i32, %arg1: i32, %arg2: memref<200x2048xbf16, #tpu.memory_space<vmem>>, %arg3: memref<2048x128xbf16, #tpu.memory_space<vmem>>, %arg4: memref<1x128xf32, #tpu.memory_space<vmem>>, %arg5: memref<200x128xbf16, #tpu.memory_space<vmem>>) attributes {dimension_semantics = [#tpu.dimension_semantics<parallel>, #tpu.dimension_semantics<parallel>], iteration_bounds = array<i64: 1, 2>, scalar_prefetch = 0 : i64, scratch_operands = 0 : i64, tpu.core_type = #tpu.core_type<tc>, window_params = [{transform_indices = @transform_0, window_bounds = array<i64: 200, 2048>}, {transform_indices = @transform_1, window_bounds = array<i64: 2048, 128>}, {transform_indices = @transform_2, window_bounds = array<i64: 1, 128>}, {transform_indices = @transform_3, window_bounds = array<i64: 200, 128>}]} {
    %c0 = arith.constant 0 : index
    %c0_0 = arith.constant 0 : index
    %0 = vector.load %arg2[%c0, %c0_0] : memref<200x2048xbf16, #tpu.memory_space<vmem>>, vector<200x2048xbf16>
    %c0_1 = arith.constant 0 : index
    %c0_2 = arith.constant 0 : index
    %1 = vector.load %arg3[%c0_1, %c0_2] : memref<2048x128xbf16, #tpu.memory_space<vmem>>, vector<2048x128xbf16>
    %cst = arith.constant dense<0.000000e+00> : vector<200x128xf32>
    %2 = tpu.matmul %0, %1, %cst {dimension_numbers = #tpu.dot_dimension_numbers<[1], [0], [0], [1], [0, 0, 1, 1], [], []>} : vector<200x2048xbf16>, vector<2048x128xbf16>, vector<200x128xf32> -> vector<200x128xf32>
    %c0_3 = arith.constant 0 : index
    %c0_4 = arith.constant 0 : index
    %3 = vector.load %arg4[%c0_3, %c0_4] : memref<1x128xf32, #tpu.memory_space<vmem>>, vector<1x128xf32>
    %4 = vector.broadcast %3 : vector<1x128xf32> to vector<200x128xf32>
    %5 = arith.addf %2, %4 : vector<200x128xf32>
    %cst_5 = arith.constant 0.000000e+00 : f32
    %6 = vector.broadcast %cst_5 : f32 to vector<200x128xf32>
    %7 = arith.maximumf %5, %6 : vector<200x128xf32>
    %8 = arith.truncf %7 : vector<200x128xf32> to vector<200x128xbf16>
    %c0_6 = arith.constant 0 : index
    %c0_7 = arith.constant 0 : index
    %9 = vector.load %arg5[%c0_6, %c0_7] : memref<200x128xbf16, #tpu.memory_space<vmem>>, vector<200x128xbf16>
    tpu.vector_store %arg5[%c0_6, %c0_7], %8 {strides = array<i32>} : memref<200x128xbf16, #tpu.memory_space<vmem>>, vector<200x128xbf16>,
    return
  }
  func.func @transform_0(%arg0: i32, %arg1: i32) -> (i32, i32) {
    %c0_i32 = arith.constant 0 : i32
    %c0_i32_0 = arith.constant 0 : i32
    return %arg0, %c0_i32 : i32, i32
  }
  func.func @transform_1(%arg0: i32, %arg1: i32) -> (i32, i32) {
    %c0_i32 = arith.constant 0 : i32
    %c0_i32_0 = arith.constant 0 : i32
    return %c0_i32, %arg1 : i32, i32
  }
  func.func @transform_2(%arg0: i32, %arg1: i32) -> (i32, i32) {
    %c0_i32 = arith.constant 0 : i32
    %c0_i32_0 = arith.constant 0 : i32
    return %c0_i32, %arg1 : i32, i32
  }
  func.func @transform_3(%arg0: i32, %arg1: i32) -> (i32, i32) {
    %c0_i32 = arith.constant 0 : i32
    return %arg0, %arg1 : i32, i32
  }
}

module attributes {stable_mosaic.version = 11 : i64} {
  func.func @_maxpool_kernel(%arg0: i32, %arg1: memref<5x2x5x512xbf16, #tpu.memory_space<vmem>>, %arg2: memref<5x5x256xbf16, #tpu.memory_space<vmem>>) attributes {dimension_semantics = [#tpu.dimension_semantics<parallel>], iteration_bounds = array<i64: 2>, scalar_prefetch = 0 : i64, scratch_operands = 0 : i64, tpu.core_type = #tpu.core_type<tc>, window_params = [{transform_indices = @transform_0, window_bounds = array<i64: 5, 2, 5, 512>}, {transform_indices = @transform_1, window_bounds = array<i64: 5, 5, 256>}]} {
    %c0 = arith.constant 0 : index
    %c0_0 = arith.constant 0 : index
    %c0_1 = arith.constant 0 : index
    %c0_2 = arith.constant 0 : index
    %0 = vector.load %arg1[%c0, %c0_0, %c0_1, %c0_2] : memref<5x2x5x512xbf16, #tpu.memory_space<vmem>>, vector<5x2x5x512xbf16>
    %1 = vector.extract_strided_slice %0 {offsets = [0, 0, 0, 0], sizes = [5, 1, 5, 512], strides = [1, 1, 1, 1]} : vector<5x2x5x512xbf16> to vector<5x1x5x512xbf16>
    %2 = vector.shape_cast %1 : vector<5x1x5x512xbf16> to vector<5x5x512xbf16>
    %3 = vector.extract_strided_slice %0 {offsets = [0, 1, 0, 0], sizes = [5, 1, 5, 512], strides = [1, 1, 1, 1]} : vector<5x2x5x512xbf16> to vector<5x1x5x512xbf16>
    %4 = vector.shape_cast %3 : vector<5x1x5x512xbf16> to vector<5x5x512xbf16>
    %5 = arith.maximumf %2, %4 : vector<5x5x512xbf16>
    %6 = vector.extract_strided_slice %5 {offsets = [0, 0, 0], sizes = [5, 5, 256], strides = [1, 1, 1]} : vector<5x5x512xbf16> to vector<5x5x256xbf16>
    %7 = vector.extract_strided_slice %5 {offsets = [0, 0, 256], sizes = [5, 5, 256], strides = [1, 1, 1]} : vector<5x5x512xbf16> to vector<5x5x256xbf16>
    %8 = arith.maximumf %6, %7 : vector<5x5x256xbf16>
    %c0_3 = arith.constant 0 : index
    %c0_4 = arith.constant 0 : index
    %c0_5 = arith.constant 0 : index
    %9 = vector.load %arg2[%c0_3, %c0_4, %c0_5] : memref<5x5x256xbf16, #tpu.memory_space<vmem>>, vector<5x5x256xbf16>
    tpu.vector_store %arg2[%c0_3, %c0_4, %c0_5], %8 {strides = array<i32>} : memref<5x5x256xbf16, #tpu.memory_space<vmem>>, vector<5x5x256xbf16>,
    return
  }
  func.func @transform_0(%arg0: i32) -> (i32, i32, i32, i32) {
    %c0_i32 = arith.constant 0 : i32
    %c0_i32_0 = arith.constant 0 : i32
    %c0_i32_1 = arith.constant 0 : i32
    %c0_i32_2 = arith.constant 0 : i32
    return %arg0, %c0_i32, %c0_i32_0, %c0_i32_1 : i32, i32, i32, i32
  }
  func.func @transform_1(%arg0: i32) -> (i32, i32, i32) {
    %c0_i32 = arith.constant 0 : i32
    %c0_i32_0 = arith.constant 0 : i32
    %c0_i32_1 = arith.constant 0 : i32
    return %arg0, %c0_i32, %c0_i32_0 : i32, i32, i32
  }
}

module attributes {stable_mosaic.version = 11 : i64} {
  func.func @_matmul_bias_act_kernel(%arg0: i32, %arg1: i32, %arg2: memref<8x4096xbf16, #tpu.memory_space<vmem>>, %arg3: memref<4096x128xbf16, #tpu.memory_space<vmem>>, %arg4: memref<1x128xf32, #tpu.memory_space<vmem>>, %arg5: memref<8x128xbf16, #tpu.memory_space<vmem>>) attributes {dimension_semantics = [#tpu.dimension_semantics<parallel>, #tpu.dimension_semantics<parallel>], iteration_bounds = array<i64: 1, 1>, scalar_prefetch = 0 : i64, scratch_operands = 0 : i64, tpu.core_type = #tpu.core_type<tc>, window_params = [{transform_indices = @transform_0, window_bounds = array<i64: 8, 4096>}, {transform_indices = @transform_1, window_bounds = array<i64: 4096, 128>}, {transform_indices = @transform_2, window_bounds = array<i64: 1, 128>}, {transform_indices = @transform_3, window_bounds = array<i64: 8, 128>}]} {
    %c0 = arith.constant 0 : index
    %c0_0 = arith.constant 0 : index
    %0 = vector.load %arg2[%c0, %c0_0] : memref<8x4096xbf16, #tpu.memory_space<vmem>>, vector<8x4096xbf16>
    %c0_1 = arith.constant 0 : index
    %c0_2 = arith.constant 0 : index
    %1 = vector.load %arg3[%c0_1, %c0_2] : memref<4096x128xbf16, #tpu.memory_space<vmem>>, vector<4096x128xbf16>
    %cst = arith.constant dense<0.000000e+00> : vector<8x128xf32>
    %2 = tpu.matmul %0, %1, %cst {dimension_numbers = #tpu.dot_dimension_numbers<[1], [0], [0], [1], [0, 0, 1, 1], [], []>} : vector<8x4096xbf16>, vector<4096x128xbf16>, vector<8x128xf32> -> vector<8x128xf32>
    %c0_3 = arith.constant 0 : index
    %c0_4 = arith.constant 0 : index
    %3 = vector.load %arg4[%c0_3, %c0_4] : memref<1x128xf32, #tpu.memory_space<vmem>>, vector<1x128xf32>
    %4 = vector.broadcast %3 : vector<1x128xf32> to vector<8x128xf32>
    %5 = arith.addf %2, %4 : vector<8x128xf32>
    %cst_5 = arith.constant 0.000000e+00 : f32
    %6 = vector.broadcast %cst_5 : f32 to vector<8x128xf32>
    %7 = arith.maximumf %5, %6 : vector<8x128xf32>
    %8 = arith.truncf %7 : vector<8x128xf32> to vector<8x128xbf16>
    %c0_6 = arith.constant 0 : index
    %c0_7 = arith.constant 0 : index
    %9 = vector.load %arg5[%c0_6, %c0_7] : memref<8x128xbf16, #tpu.memory_space<vmem>>, vector<8x128xbf16>
    tpu.vector_store %arg5[%c0_6, %c0_7], %8 {strides = array<i32>} : memref<8x128xbf16, #tpu.memory_space<vmem>>, vector<8x128xbf16>,
    return
  }
  func.func @transform_0(%arg0: i32, %arg1: i32) -> (i32, i32) {
    %c0_i32 = arith.constant 0 : i32
    %c0_i32_0 = arith.constant 0 : i32
    return %arg0, %c0_i32 : i32, i32
  }
  func.func @transform_1(%arg0: i32, %arg1: i32) -> (i32, i32) {
    %c0_i32 = arith.constant 0 : i32
    %c0_i32_0 = arith.constant 0 : i32
    return %c0_i32, %arg1 : i32, i32
  }
  func.func @transform_2(%arg0: i32, %arg1: i32) -> (i32, i32) {
    %c0_i32 = arith.constant 0 : i32
    %c0_i32_0 = arith.constant 0 : i32
    return %c0_i32, %arg1 : i32, i32
  }
  func.func @transform_3(%arg0: i32, %arg1: i32) -> (i32, i32) {
    %c0_i32 = arith.constant 0 : i32
    return %arg0, %arg1 : i32, i32
  }
}

module attributes {stable_mosaic.version = 11 : i64} {
  func.func @_maxpool_kernel(%arg0: i32, %arg1: memref<1x2x1x256xbf16, #tpu.memory_space<vmem>>, %arg2: memref<1x1x128xbf16, #tpu.memory_space<vmem>>) attributes {dimension_semantics = [#tpu.dimension_semantics<parallel>], iteration_bounds = array<i64: 2>, scalar_prefetch = 0 : i64, scratch_operands = 0 : i64, tpu.core_type = #tpu.core_type<tc>, window_params = [{transform_indices = @transform_0, window_bounds = array<i64: 1, 2, 1, 256>}, {transform_indices = @transform_1, window_bounds = array<i64: 1, 1, 128>}]} {
    %c0 = arith.constant 0 : index
    %c0_0 = arith.constant 0 : index
    %c0_1 = arith.constant 0 : index
    %c0_2 = arith.constant 0 : index
    %0 = vector.load %arg1[%c0, %c0_0, %c0_1, %c0_2] : memref<1x2x1x256xbf16, #tpu.memory_space<vmem>>, vector<1x2x1x256xbf16>
    %1 = vector.extract_strided_slice %0 {offsets = [0, 0, 0, 0], sizes = [1, 1, 1, 256], strides = [1, 1, 1, 1]} : vector<1x2x1x256xbf16> to vector<1x1x1x256xbf16>
    %2 = vector.shape_cast %1 : vector<1x1x1x256xbf16> to vector<1x1x256xbf16>
    %3 = vector.extract_strided_slice %0 {offsets = [0, 1, 0, 0], sizes = [1, 1, 1, 256], strides = [1, 1, 1, 1]} : vector<1x2x1x256xbf16> to vector<1x1x1x256xbf16>
    %4 = vector.shape_cast %3 : vector<1x1x1x256xbf16> to vector<1x1x256xbf16>
    %5 = arith.maximumf %2, %4 : vector<1x1x256xbf16>
    %6 = vector.extract_strided_slice %5 {offsets = [0, 0, 0], sizes = [1, 1, 128], strides = [1, 1, 1]} : vector<1x1x256xbf16> to vector<1x1x128xbf16>
    %7 = vector.extract_strided_slice %5 {offsets = [0, 0, 128], sizes = [1, 1, 128], strides = [1, 1, 1]} : vector<1x1x256xbf16> to vector<1x1x128xbf16>
    %8 = arith.maximumf %6, %7 : vector<1x1x128xbf16>
    %c0_3 = arith.constant 0 : index
    %c0_4 = arith.constant 0 : index
    %c0_5 = arith.constant 0 : index
    %9 = vector.load %arg2[%c0_3, %c0_4, %c0_5] : memref<1x1x128xbf16, #tpu.memory_space<vmem>>, vector<1x1x128xbf16>
    tpu.vector_store %arg2[%c0_3, %c0_4, %c0_5], %8 {strides = array<i32>} : memref<1x1x128xbf16, #tpu.memory_space<vmem>>, vector<1x1x128xbf16>,
    return
  }
  func.func @transform_0(%arg0: i32) -> (i32, i32, i32, i32) {
    %c0_i32 = arith.constant 0 : i32
    %c0_i32_0 = arith.constant 0 : i32
    %c0_i32_1 = arith.constant 0 : i32
    %c0_i32_2 = arith.constant 0 : i32
    return %arg0, %c0_i32, %c0_i32_0, %c0_i32_1 : i32, i32, i32, i32
  }
  func.func @transform_1(%arg0: i32) -> (i32, i32, i32) {
    %c0_i32 = arith.constant 0 : i32
    %c0_i32_0 = arith.constant 0 : i32
    %c0_i32_1 = arith.constant 0 : i32
    return %arg0, %c0_i32, %c0_i32_0 : i32, i32, i32
  }
}

module attributes {stable_mosaic.version = 11 : i64} {
  func.func @_fc_head_kernel(%arg0: memref<2x128xbf16, #tpu.memory_space<vmem>>, %arg1: memref<128x64xf32, #tpu.memory_space<vmem>>, %arg2: memref<1x64xf32, #tpu.memory_space<vmem>>, %arg3: memref<64x32xf32, #tpu.memory_space<vmem>>, %arg4: memref<1x32xf32, #tpu.memory_space<vmem>>, %arg5: memref<32x16xf32, #tpu.memory_space<vmem>>, %arg6: memref<1x16xf32, #tpu.memory_space<vmem>>, %arg7: memref<16x2xf32, #tpu.memory_space<vmem>>, %arg8: memref<1x2xf32, #tpu.memory_space<vmem>>, %arg9: memref<2x2xf32, #tpu.memory_space<vmem>>) attributes {dimension_semantics = [], scalar_prefetch = 0 : i64, scratch_operands = 0 : i64, tpu.core_type = #tpu.core_type<tc>} {
    %c0 = arith.constant 0 : index
    %c0_0 = arith.constant 0 : index
    %0 = vector.load %arg0[%c0, %c0_0] : memref<2x128xbf16, #tpu.memory_space<vmem>>, vector<2x128xbf16>
    %1 = arith.extf %0 : vector<2x128xbf16> to vector<2x128xf32>
    %c0_1 = arith.constant 0 : index
    %c0_2 = arith.constant 0 : index
    %2 = vector.load %arg1[%c0_1, %c0_2] : memref<128x64xf32, #tpu.memory_space<vmem>>, vector<128x64xf32>
    %cst = arith.constant dense<0.000000e+00> : vector<2x64xf32>
    %3 = tpu.matmul %1, %2, %cst {dimension_numbers = #tpu.dot_dimension_numbers<[1], [0], [0], [1], [0, 0, 1, 1], [], []>} : vector<2x128xf32>, vector<128x64xf32>, vector<2x64xf32> -> vector<2x64xf32>
    %c0_3 = arith.constant 0 : index
    %c0_4 = arith.constant 0 : index
    %4 = vector.load %arg2[%c0_3, %c0_4] : memref<1x64xf32, #tpu.memory_space<vmem>>, vector<1x64xf32>
    %5 = vector.broadcast %4 : vector<1x64xf32> to vector<2x64xf32>
    %6 = arith.addf %3, %5 : vector<2x64xf32>
    %cst_5 = arith.constant 0.000000e+00 : f32
    %7 = vector.broadcast %cst_5 : f32 to vector<2x64xf32>
    %8 = arith.maximumf %6, %7 : vector<2x64xf32>
    %c0_6 = arith.constant 0 : index
    %c0_7 = arith.constant 0 : index
    %9 = vector.load %arg3[%c0_6, %c0_7] : memref<64x32xf32, #tpu.memory_space<vmem>>, vector<64x32xf32>
    %cst_8 = arith.constant dense<0.000000e+00> : vector<2x32xf32>
    %10 = tpu.matmul %8, %9, %cst_8 {dimension_numbers = #tpu.dot_dimension_numbers<[1], [0], [0], [1], [0, 0, 1, 1], [], []>} : vector<2x64xf32>, vector<64x32xf32>, vector<2x32xf32> -> vector<2x32xf32>
    %c0_9 = arith.constant 0 : index
    %c0_10 = arith.constant 0 : index
    %11 = vector.load %arg4[%c0_9, %c0_10] : memref<1x32xf32, #tpu.memory_space<vmem>>, vector<1x32xf32>
    %12 = vector.broadcast %11 : vector<1x32xf32> to vector<2x32xf32>
    %13 = arith.addf %10, %12 : vector<2x32xf32>
    %cst_11 = arith.constant 0.000000e+00 : f32
    %14 = vector.broadcast %cst_11 : f32 to vector<2x32xf32>
    %15 = arith.maximumf %13, %14 : vector<2x32xf32>
    %c0_12 = arith.constant 0 : index
    %c0_13 = arith.constant 0 : index
    %16 = vector.load %arg5[%c0_12, %c0_13] : memref<32x16xf32, #tpu.memory_space<vmem>>, vector<32x16xf32>
    %cst_14 = arith.constant dense<0.000000e+00> : vector<2x16xf32>
    %17 = tpu.matmul %15, %16, %cst_14 {dimension_numbers = #tpu.dot_dimension_numbers<[1], [0], [0], [1], [0, 0, 1, 1], [], []>} : vector<2x32xf32>, vector<32x16xf32>, vector<2x16xf32> -> vector<2x16xf32>
    %c0_15 = arith.constant 0 : index
    %c0_16 = arith.constant 0 : index
    %18 = vector.load %arg6[%c0_15, %c0_16] : memref<1x16xf32, #tpu.memory_space<vmem>>, vector<1x16xf32>
    %19 = vector.broadcast %18 : vector<1x16xf32> to vector<2x16xf32>
    %20 = arith.addf %17, %19 : vector<2x16xf32>
    %cst_17 = arith.constant 0.000000e+00 : f32
    %21 = vector.broadcast %cst_17 : f32 to vector<2x16xf32>
    %22 = arith.maximumf %20, %21 : vector<2x16xf32>
    %c0_18 = arith.constant 0 : index
    %c0_19 = arith.constant 0 : index
    %23 = vector.load %arg7[%c0_18, %c0_19] : memref<16x2xf32, #tpu.memory_space<vmem>>, vector<16x2xf32>
    %cst_20 = arith.constant dense<0.000000e+00> : vector<2x2xf32>
    %24 = tpu.matmul %22, %23, %cst_20 {dimension_numbers = #tpu.dot_dimension_numbers<[1], [0], [0], [1], [0, 0, 1, 1], [], []>} : vector<2x16xf32>, vector<16x2xf32>, vector<2x2xf32> -> vector<2x2xf32>
    %c0_21 = arith.constant 0 : index
    %c0_22 = arith.constant 0 : index
    %25 = vector.load %arg8[%c0_21, %c0_22] : memref<1x2xf32, #tpu.memory_space<vmem>>, vector<1x2xf32>
    %26 = vector.broadcast %25 : vector<1x2xf32> to vector<2x2xf32>
    %27 = arith.addf %24, %26 : vector<2x2xf32>
    %cst_23 = arith.constant dense<0xFF800000> : vector<2xf32>
    %28 = vector.multi_reduction <maximumf>, %27, %cst_23 [1] : vector<2x2xf32> to vector<2xf32>
    %29 = vector.shape_cast %28 : vector<2xf32> to vector<2x1xf32>
    %30 = vector.broadcast %29 : vector<2x1xf32> to vector<2x2xf32>
    %31 = arith.subf %27, %30 : vector<2x2xf32>
    %32 = math.exp %31 : vector<2x2xf32>
    %cst_24 = arith.constant dense<0.000000e+00> : vector<2xf32>
    %33 = vector.multi_reduction <add>, %32, %cst_24 [1] : vector<2x2xf32> to vector<2xf32>
    %34 = vector.shape_cast %33 : vector<2xf32> to vector<2x1xf32>
    %35 = vector.broadcast %34 : vector<2x1xf32> to vector<2x2xf32>
    %36 = arith.divf %32, %35 : vector<2x2xf32>
    %c0_25 = arith.constant 0 : index
    %c0_26 = arith.constant 0 : index
    %37 = vector.load %arg9[%c0_25, %c0_26] : memref<2x2xf32, #tpu.memory_space<vmem>>, vector<2x2xf32>
    tpu.vector_store %arg9[%c0_25, %c0_26], %36 {strides = array<i32>} : memref<2x2xf32, #tpu.memory_space<vmem>>, vector<2x2xf32>,
    return
  }
}

</mosaic_0001>

<bundles_post_ra>
// kernel: cnn_forward.9
= control target key start
LH: loop header
LB: loop body
LE: loop exit
PB: predicated region body
PF: predicated region fallthrough
CT: control target
= control target key end

     0   :  { %s2538_s12 = smov 0   ;;  %s2540_s13 = smov 0   ;;  %s2955_s0 = inlined_call_operand.vmem [shape: bf16[6728,128], index: 0, kind: input, shape index: {}]   ;;  %s2956_s1 = inlined_call_operand.vmem [shape: bf16[128,128], index: 1, kind: input, shape index: {}]   ;;  %s2957_s2 = inlined_call_operand.vmem [shape: f32[1,128], index: 2, kind: input, shape index: {}]   ;;  %s2958_s3 = inlined_call_operand.vmem [shape: bf16[6728,128], index: 3, kind: output, shape index: {}]  }
   0x1   :  { %s2542_s14 = smov 0   ;;  %s2544_s15 = smov 0  }
   0x2   :  { %s2546_s16 = smov 0  }
   0x3 LB: > { %s1744_s17 = sadd.s32 4294967295, %s2484_s16   ;;  %s25_s18 = sadd.s32 1, %s2480_s15  ;;  %s2484_s16 = sphi %s2546_s16, %s13_s16   ;;  %s2480_s15 = sphi %s2544_s15, %s2966_s15   ;;  %s2476_s14 = sphi %s2542_s14, %s2965_s14   ;;  %s2472_s13 = sphi %s2540_s13, %s2964_s13   ;;  %s2468_s12 = sphi %s2538_s12, %s2963_s12  }
   0x4   : > { %p27_p0 = scmp.ge.s32.totalorder %s25_s18, 14  ;;  %s112_s19 = sadd.s32 1, %s2472_s13 }
   0x5   : > { %p122_p1 = scmp.ne.s32.totalorder %s2472_s13, %s2468_s12  ;;  %p123_p2 = scmp.eq.s32.totalorder %s1744_s17, 13 }
   0x6   : > { %s2968_s18 = smov (%p27_p0, %s25_s18), 0  ;;  %p1750_p4 = scmp.ge.s32.totalorder %s2484_s16, 1 }
   0x7   : > { %p2570_p3 = por %p123_p2, %p122_p1  ;;  %s107_s21 = ssub.s32 %s2480_s15, %s2968_s18 }
   0x8   : > { %p177_p5 = scmp.lt.s32.totalorder %s2484_s16, 15  ;;  %p110_p6 = scmp.eq.s32.totalorder %s107_s21, 0 }
   0xa   : > { %p178_p7 = pnand %p1750_p4, %p177_p5 }
   0xb   : > { %s2579_s22 = scalar_select %p110_p6, %s2472_s13, %s112_s19  }
   0xc   : > { %181 = sbr.rel (%p178_p7) target bundleno = 393 (0x189), region = 32  ;;  %s2585_s25 = sshll.u32 (!%p178_p7), %s2476_s14, 6 }
   0xd   : > { %p216_p8 = scmp.lt.s32.totalorder (!%p178_p7), %s2585_s25, 840  ;;  %s208_s29 = sand.u32 (!%p178_p7), 1, %s2468_s12  }
   0xe   : > { %s1751_s30 = sshll.u32 (!%p178_p7), %s208_s29, 8 }
   0xf   : > { %s2663_s12 = scalar_lea.vmem (!%p178_p7), [#allocation2], %s1751_s30  }
  0x11   : > { %v2374_v0 = vld [vmem:[%s2956_s1 + $0x38] sm:$0xff]   ;;  %v2375_v1 = vld [vmem:[%s2956_s1 + $0x30] sm:$0xff]   ;;  %s217_s28 = scalar_select %p216_p8, %s2585_s25, 840  ;;  %v2376_v2 = vld [vmem:[%s2956_s1 + $0x28] sm:$0xff]  }
  0x12   : > { %2174 = vmatprep.subr.bf16.mxu0 %v2374_v0  ;;  %2254 = vmatprep.subr.bf16.mxu1 %v2374_v0  ;;  %v2377_v3 = vld [vmem:[%s2956_s1 + $0x20] sm:$0xff]   ;;  %v2378_v6 = vld [vmem:[%s2956_s1 + $0x18] sm:$0xff]   ;;  %v2379_v7 = vld [vmem:[%s2956_s1 + $0x10] sm:$0xff]   ;;  %s1940_s5 = sshll.u32 (%p2570_p3), %s2476_s14, 8 }
  0x13   : > { %2175 = vmatpush3.bf16.msra.mxu0 %v2374_v0  ;;  %2262 = vmatpush3.bf16.msra.mxu1 %v2374_v0  ;;  %s1753_s4 = sshll.u32 %s217_s28, 2  ;;  %v2380_v8 = vld [vmem:[%s2956_s1 + $0x8] sm:$0xff]   ;;  %v2381_v9 = vld [vmem:[%s2956_s1] sm:$0xff]   ;;  %s2758_s8 = scalar_lea.vmem (%p2570_p3), %s2958_s3, %s1940_s5  }
  0x14   : > { %2176 = vmatprep.subr.bf16.mxu0 %v2375_v1  ;;  %2255 = vmatprep.subr.bf16.mxu1 %v2375_v1  ;;  %s2598_s7 = scalar_lea.vmem %s2955_s0, %s1753_s4  ;;  %v2650_v40 = vld [vmem:[%s2957_s2] ss:$0 sm:$0xff]  ;;  %s1246_s4 = ssub.s32 (%p2570_p3), 841, %s2585_s25 }
  0x15   : > { %v2382_v4 = vld [vmem:[%s2598_s7] sm:$0xff]   ;;  %v2384_v10 = vld [vmem:[%s2598_s7 + $0x8] sm:$0xff]   ;;  %v2386_v12 = vld [vmem:[%s2598_s7 + $0x10] sm:$0xff]   ;;  %p1247_p9 = scmp.lt.s32.totalorder (%p2570_p3), %s1246_s4, 64 }
  0x16   : > { %v2383_v5 = vld [vmem:[%s2598_s7 + $0x80] sm:$0xff]   ;;  %2190 = vmatprep.mubr.bf16.mxu0 %v2382_v4  ;;  %v2385_v11 = vld [vmem:[%s2598_s7 + $0x88] sm:$0xff]   ;;  %v2387_v13 = vld [vmem:[%s2598_s7 + $0x90] sm:$0xff]  }
  0x17   : > { %2177 = vmatpush3.bf16.msra.mxu0 %v2375_v1  ;;  %2263 = vmatpush3.bf16.msra.mxu1 %v2375_v1  ;;  %v2388_v14 = vld [vmem:[%s2598_s7 + $0x18] sm:$0xff]   ;;  %v2390_v16 = vld [vmem:[%s2598_s7 + $0x20] sm:$0xff]   ;;  %v2392_v18 = vld [vmem:[%s2598_s7 + $0x28] sm:$0xff]  }
  0x18   : > { %2178 = vmatprep.subr.bf16.mxu0 %v2376_v2  ;;  %2256 = vmatprep.subr.bf16.mxu1 %v2376_v2  ;;  %v2389_v15 = vld [vmem:[%s2598_s7 + $0x98] sm:$0xff]   ;;  %v2391_v17 = vld [vmem:[%s2598_s7 + $0xa0] sm:$0xff]   ;;  %v2393_v19 = vld [vmem:[%s2598_s7 + $0xa8] sm:$0xff]  }
  0x19   : > { %2222 = vmatprep.mubr.bf16.mxu1 %v2383_v5  ;;  %v2394_v20 = vld [vmem:[%s2598_s7 + $0x30] sm:$0xff]   ;;  %v2396_v22 = vld [vmem:[%s2598_s7 + $0x38] sm:$0xff]   ;;  %v2398_v24 = vld [vmem:[%s2598_s7 + $0x40] sm:$0xff]  }
  0x1a   : > { %v2395_v21 = vld [vmem:[%s2598_s7 + $0xb0] sm:$0xff]   ;;  %v2397_v23 = vld [vmem:[%s2598_s7 + $0xb8] sm:$0xff]   ;;  %v2399_v25 = vld [vmem:[%s2598_s7 + $0xc0] sm:$0xff]  }
  0x1b   : > { %2179 = vmatpush3.bf16.msra.mxu0 %v2376_v2  ;;  %2264 = vmatpush3.bf16.msra.mxu1 %v2376_v2  ;;  %v2400_v26 = vld [vmem:[%s2598_s7 + $0x48] sm:$0xff]   ;;  %v2402_v28 = vld [vmem:[%s2598_s7 + $0x50] sm:$0xff]   ;;  %v2404_v30 = vld [vmem:[%s2598_s7 + $0x58] sm:$0xff]  }
  0x1c   : > { %2180 = vmatprep.subr.bf16.mxu0 %v2377_v3  ;;  %2257 = vmatprep.subr.bf16.mxu1 %v2377_v3  ;;  %v2401_v27 = vld [vmem:[%s2598_s7 + $0xc8] sm:$0xff]   ;;  %v2403_v29 = vld [vmem:[%s2598_s7 + $0xd0] sm:$0xff]   ;;  %v2405_v31 = vld [vmem:[%s2598_s7 + $0xd8] sm:$0xff]  }
  0x1d   : > { %v2406_v32 = vld [vmem:[%s2598_s7 + $0x60] sm:$0xff]   ;;  %v2408_v34 = vld [vmem:[%s2598_s7 + $0x68] sm:$0xff]   ;;  %v2410_v36 = vld [vmem:[%s2598_s7 + $0x70] sm:$0xff]  }
  0x1e   : > { %v2407_v33 = vld [vmem:[%s2598_s7 + $0xe0] sm:$0xff]   ;;  %v2409_v35 = vld [vmem:[%s2598_s7 + $0xe8] sm:$0xff]   ;;  %v2411_v37 = vld [vmem:[%s2598_s7 + $0xf0] sm:$0xff]  }
  0x1f   : > { %2181 = vmatpush3.bf16.msra.mxu0 %v2377_v3  ;;  %2265 = vmatpush3.bf16.msra.mxu1 %v2377_v3  ;;  %v2412_v38 = vld [vmem:[%s2598_s7 + $0x78] sm:$0xff]  }
  0x20   : > { %2182 = vmatprep.subr.bf16.mxu0 %v2378_v6  ;;  %2258 = vmatprep.subr.bf16.mxu1 %v2378_v6  ;;  %v2413_v39 = vld [vmem:[%s2598_s7 + $0xf8] sm:$0xff]  }
  0x23   : > { %2183 = vmatpush3.bf16.msra.mxu0 %v2378_v6  ;;  %2266 = vmatpush3.bf16.msra.mxu1 %v2378_v6 }
  0x24   : > { %2184 = vmatprep.subr.bf16.mxu0 %v2379_v7  ;;  %2259 = vmatprep.subr.bf16.mxu1 %v2379_v7 }
  0x27   : > { %2185 = vmatpush3.bf16.msra.mxu0 %v2379_v7  ;;  %2267 = vmatpush3.bf16.msra.mxu1 %v2379_v7 }
  0x28   : > { %2186 = vmatprep.subr.bf16.mxu0 %v2380_v8  ;;  %2260 = vmatprep.subr.bf16.mxu1 %v2380_v8 }
  0x2b   : > { %2187 = vmatpush3.bf16.msra.mxu0 %v2380_v8  ;;  %2268 = vmatpush3.bf16.msra.mxu1 %v2380_v8 }
  0x2c   : > { %2188 = vmatprep.subr.bf16.mxu0 %v2381_v9  ;;  %2261 = vmatprep.subr.bf16.mxu1 %v2381_v9 }
  0x2f   : > { %2189 = vmatpush3.bf16.msra.mxu0 %v2381_v9  ;;  %2269 = vmatpush3.bf16.msra.mxu1 %v2381_v9 }
  0x32   : > { %2191 = vmatmul.mubr.bf16.vlgmr.msra.gmra.mxu0 %v2384_v10  ;;  %2223 = vmatmul.mubr.bf16.vlgmr.msra.gmra.mxu1 %v2385_v11 }
  0x33   : > { %2194 = vmatprep.mubr.bf16.mxu0 %v2386_v12  ;;  %2226 = vmatprep.mubr.bf16.mxu1 %v2387_v13 }
  0x3a   : > { %2195 = vmatmul.mubr.bf16.gmra.mxu0 %v2388_v14  ;;  %2227 = vmatmul.mubr.bf16.gmra.mxu1 %v2389_v15 }
  0x3b   : > { %2198 = vmatprep.mubr.bf16.mxu0 %v2390_v16  ;;  %2230 = vmatprep.mubr.bf16.mxu1 %v2391_v17 }
  0x42   : > { %2199 = vmatmul.mubr.bf16.gmra.mxu0 %v2392_v18  ;;  %2231 = vmatmul.mubr.bf16.gmra.mxu1 %v2393_v19 }
  0x43   : > { %2202 = vmatprep.mubr.bf16.mxu0 %v2394_v20  ;;  %2234 = vmatprep.mubr.bf16.mxu1 %v2395_v21 }
  0x4a   : > { %2203 = vmatmul.mubr.bf16.gmra.mxu0 %v2396_v22  ;;  %2235 = vmatmul.mubr.bf16.gmra.mxu1 %v2397_v23 }
  0x4b   : > { %2206 = vmatprep.mubr.bf16.mxu0 %v2398_v24  ;;  %2238 = vmatprep.mubr.bf16.mxu1 %v2399_v25 }
  0x52   : > { %2207 = vmatmul.mubr.bf16.gmra.mxu0 %v2400_v26  ;;  %2239 = vmatmul.mubr.bf16.gmra.mxu1 %v2401_v27 }
  0x53   : > { %2210 = vmatprep.mubr.bf16.mxu0 %v2402_v28  ;;  %2242 = vmatprep.mubr.bf16.mxu1 %v2403_v29 }
  0x5a   : > { %2211 = vmatmul.mubr.bf16.gmra.mxu0 %v2404_v30  ;;  %2243 = vmatmul.mubr.bf16.gmra.mxu1 %v2405_v31 }
  0x5b   : > { %2214 = vmatprep.mubr.bf16.mxu0 %v2406_v32  ;;  %2246 = vmatprep.mubr.bf16.mxu1 %v2407_v33 }
  0x62   : > { %2215 = vmatmul.mubr.bf16.gmra.mxu0 %v2408_v34  ;;  %2247 = vmatmul.mubr.bf16.gmra.mxu1 %v2409_v35 }
  0x63   : > { %2218 = vmatprep.mubr.bf16.mxu0 %v2410_v36  ;;  %2250 = vmatprep.mubr.bf16.mxu1 %v2411_v37 }
  0x6a   : > { %2219 = vmatmul.mubr.bf16.gmra.mxu0 %v2412_v38  ;;  %2251 = vmatmul.mubr.bf16.gmra.mxu1 %v2413_v39 }
  0xf2   : > { %v2192_v41 = vpop.f32.mrf.mxu0  ;;  %v2224_v42 = vpop.f32.mrf.mxu1 }
  0xf3   : > { %v608_v43 = vadd.f32 %v2192_v41, %v2650_v40  ;;  %v736_v44 = vadd.f32 %v2224_v42, %v2650_v40 }
  0xf4   : > { %v599_v45 = vpop.f32.mrf.mxu0  ;;  %v727_v46 = vpop.f32.mrf.mxu1 }
  0xf5   : > { %v600_v47 = vadd.f32 %v2650_v40, %v599_v45  ;;  %v728_v48 = vadd.f32 %v2650_v40, %v727_v46  ;;  %v856_v53 = vmax.f32 %v608_v43, 0.0  ;;  %v888_v54 = vmax.f32 %v736_v44, 0.0 }
  0xf6   : > { %v2193_v49 = vpop.f32.mrf.mxu0  ;;  %v2225_v50 = vpop.f32.mrf.mxu1 }
  0xf7   : > { %v611_v51 = vadd.f32 %v2193_v49, %v2650_v40  ;;  %v739_v52 = vadd.f32 %v2225_v50, %v2650_v40  ;;  %v854_v61 = vmax.f32 %v600_v47, 0.0  ;;  %v886_v62 = vmax.f32 %v728_v48, 0.0 }
  0xf8   : > { %v602_v55 = vpop.f32.mrf.mxu0  ;;  %v730_v56 = vpop.f32.mrf.mxu1 }
  0xf9   : > { %v857_v57 = vmax.f32 %v611_v51, 0.0  ;;  %v889_v58 = vmax.f32 %v739_v52, 0.0  ;;  %v603_v59 = vadd.f32 %v2650_v40, %v602_v55  ;;  %v731_v60 = vadd.f32 %v2650_v40, %v730_v56 }
  0xfa   : > { %v2196_v63 = vpop.f32.mrf.mxu0  ;;  %v2228_v0 = vpop.f32.mrf.mxu1 }
  0xfb   : > { %v1951_v1 = vpack.c.bf16 %v857_v57, %v856_v53  ;;  %v2031_v2 = vpack.c.bf16 %v889_v58, %v888_v54  ;;  %v855_v3 = vmax.f32 %v603_v59, 0.0  ;;  %v887_v4 = vmax.f32 %v731_v60, 0.0 }
  0xfc   : > { %v624_v5 = vadd.f32 %v2196_v63, %v2650_v40  ;;  %v752_v6 = vadd.f32 %v2228_v0, %v2650_v40  ;;  %v615_v7 = vpop.f32.mrf.mxu0  ;;  %v743_v8 = vpop.f32.mrf.mxu1 }
  0xfd   : > { %2103 = vst [vmem:[%s2663_s12 + $0x8] sm:$0xff] %v1951_v1   ;;  %2119 = vst [vmem:[%s2663_s12 + $0x88] sm:$0xff] %v2031_v2   ;;  %v1946_v9 = vpack.c.bf16 %v855_v3, %v854_v61  ;;  %v2026_v10 = vpack.c.bf16 %v887_v4, %v886_v62  ;;  %v616_v11 = vadd.f32 %v2650_v40, %v615_v7 }
  0xfe   : > { %v744_v12 = vadd.f32 %v2650_v40, %v743_v8  ;;  %v2197_v13 = vpop.f32.mrf.mxu0  ;;  %v2229_v14 = vpop.f32.mrf.mxu1  ;;  %v860_v17 = vmax.f32 %v624_v5, 0.0  ;;  %v892_v18 = vmax.f32 %v752_v6, 0.0 }
  0xff   : > { %1947 = vst [vmem:[%s2663_s12] sm:$0xff] %v1946_v9   ;;  %2118 = vst [vmem:[%s2663_s12 + $0x80] sm:$0xff] %v2026_v10   ;;  %v627_v15 = vadd.f32 %v2197_v13, %v2650_v40  ;;  %v755_v16 = vadd.f32 %v2229_v14, %v2650_v40  ;;  %v858_v25 = vmax.f32 %v616_v11, 0.0 }
 0x100   : > { %v618_v19 = vpop.f32.mrf.mxu0  ;;  %v746_v20 = vpop.f32.mrf.mxu1  ;;  %v890_v26 = vmax.f32 %v744_v12, 0.0 }
 0x101   : > { %v861_v21 = vmax.f32 %v627_v15, 0.0  ;;  %v893_v22 = vmax.f32 %v755_v16, 0.0  ;;  %v619_v23 = vadd.f32 %v2650_v40, %v618_v19  ;;  %v747_v24 = vadd.f32 %v2650_v40, %v746_v20 }
 0x102   : > { %v2200_v27 = vpop.f32.mrf.mxu0  ;;  %v2232_v28 = vpop.f32.mrf.mxu1 }
 0x103   : > { %v1961_v29 = vpack.c.bf16 %v861_v21, %v860_v17  ;;  %v2041_v30 = vpack.c.bf16 %v893_v22, %v892_v18  ;;  %v859_v31 = vmax.f32 %v619_v23, 0.0  ;;  %v891_v32 = vmax.f32 %v747_v24, 0.0 }
 0x104   : > { %v640_v33 = vadd.f32 %v2200_v27, %v2650_v40  ;;  %v768_v34 = vadd.f32 %v2232_v28, %v2650_v40  ;;  %v631_v35 = vpop.f32.mrf.mxu0  ;;  %v759_v36 = vpop.f32.mrf.mxu1 }
 0x105   : > { %2105 = vst [vmem:[%s2663_s12 + $0x18] sm:$0xff] %v1961_v29   ;;  %2121 = vst [vmem:[%s2663_s12 + $0x98] sm:$0xff] %v2041_v30   ;;  %v1956_v37 = vpack.c.bf16 %v859_v31, %v858_v25  ;;  %v2036_v38 = vpack.c.bf16 %v891_v32, %v890_v26  ;;  %v632_v39 = vadd.f32 %v2650_v40, %v631_v35 }
 0x106   : > { %v760_v41 = vadd.f32 %v2650_v40, %v759_v36  ;;  %v2201_v42 = vpop.f32.mrf.mxu0  ;;  %v2233_v43 = vpop.f32.mrf.mxu1  ;;  %v864_v46 = vmax.f32 %v640_v33, 0.0  ;;  %v896_v47 = vmax.f32 %v768_v34, 0.0 }
 0x107   : > { %2104 = vst [vmem:[%s2663_s12 + $0x10] sm:$0xff] %v1956_v37   ;;  %2120 = vst [vmem:[%s2663_s12 + $0x90] sm:$0xff] %v2036_v38   ;;  %v643_v44 = vadd.f32 %v2201_v42, %v2650_v40  ;;  %v771_v45 = vadd.f32 %v2233_v43, %v2650_v40  ;;  %v862_v54 = vmax.f32 %v632_v39, 0.0 }
 0x108   : > { %v634_v48 = vpop.f32.mrf.mxu0  ;;  %v762_v49 = vpop.f32.mrf.mxu1  ;;  %v894_v55 = vmax.f32 %v760_v41, 0.0 }
 0x109   : > { %v865_v50 = vmax.f32 %v643_v44, 0.0  ;;  %v897_v51 = vmax.f32 %v771_v45, 0.0  ;;  %v635_v52 = vadd.f32 %v2650_v40, %v634_v48  ;;  %v763_v53 = vadd.f32 %v2650_v40, %v762_v49 }
 0x10a   : > { %v2204_v56 = vpop.f32.mrf.mxu0  ;;  %v2236_v57 = vpop.f32.mrf.mxu1 }
 0x10b   : > { %v1971_v58 = vpack.c.bf16 %v865_v50, %v864_v46  ;;  %v2051_v59 = vpack.c.bf16 %v897_v51, %v896_v47  ;;  %v863_v60 = vmax.f32 %v635_v52, 0.0  ;;  %v895_v61 = vmax.f32 %v763_v53, 0.0 }
 0x10c   : > { %v656_v62 = vadd.f32 %v2204_v56, %v2650_v40  ;;  %v784_v63 = vadd.f32 %v2236_v57, %v2650_v40  ;;  %v647_v0 = vpop.f32.mrf.mxu0  ;;  %v775_v1 = vpop.f32.mrf.mxu1 }
 0x10d   : > { %2107 = vst [vmem:[%s2663_s12 + $0x28] sm:$0xff] %v1971_v58   ;;  %2123 = vst [vmem:[%s2663_s12 + $0xa8] sm:$0xff] %v2051_v59   ;;  %v1966_v2 = vpack.c.bf16 %v863_v60, %v862_v54  ;;  %v2046_v3 = vpack.c.bf16 %v895_v61, %v894_v55  ;;  %v648_v4 = vadd.f32 %v2650_v40, %v647_v0 }
 0x10e   : > { %v776_v5 = vadd.f32 %v2650_v40, %v775_v1  ;;  %v2205_v6 = vpop.f32.mrf.mxu0  ;;  %v2237_v7 = vpop.f32.mrf.mxu1  ;;  %v868_v10 = vmax.f32 %v656_v62, 0.0  ;;  %v900_v11 = vmax.f32 %v784_v63, 0.0 }
 0x10f   : > { %2106 = vst [vmem:[%s2663_s12 + $0x20] sm:$0xff] %v1966_v2   ;;  %2122 = vst [vmem:[%s2663_s12 + $0xa0] sm:$0xff] %v2046_v3   ;;  %v659_v8 = vadd.f32 %v2205_v6, %v2650_v40  ;;  %v787_v9 = vadd.f32 %v2237_v7, %v2650_v40  ;;  %v866_v18 = vmax.f32 %v648_v4, 0.0 }
 0x110   : > { %v650_v12 = vpop.f32.mrf.mxu0  ;;  %v778_v13 = vpop.f32.mrf.mxu1  ;;  %v898_v19 = vmax.f32 %v776_v5, 0.0 }
 0x111   : > { %v869_v14 = vmax.f32 %v659_v8, 0.0  ;;  %v901_v15 = vmax.f32 %v787_v9, 0.0  ;;  %v651_v16 = vadd.f32 %v2650_v40, %v650_v12  ;;  %v779_v17 = vadd.f32 %v2650_v40, %v778_v13 }
 0x112   : > { %v2208_v20 = vpop.f32.mrf.mxu0  ;;  %v2240_v21 = vpop.f32.mrf.mxu1 }
 0x113   : > { %v1981_v22 = vpack.c.bf16 %v869_v14, %v868_v10  ;;  %v2061_v23 = vpack.c.bf16 %v901_v15, %v900_v11  ;;  %v867_v24 = vmax.f32 %v651_v16, 0.0  ;;  %v899_v25 = vmax.f32 %v779_v17, 0.0 }
 0x114   : > { %v672_v26 = vadd.f32 %v2208_v20, %v2650_v40  ;;  %v800_v27 = vadd.f32 %v2240_v21, %v2650_v40  ;;  %v663_v28 = vpop.f32.mrf.mxu0  ;;  %v791_v29 = vpop.f32.mrf.mxu1 }
 0x115   : > { %2109 = vst [vmem:[%s2663_s12 + $0x38] sm:$0xff] %v1981_v22   ;;  %2125 = vst [vmem:[%s2663_s12 + $0xb8] sm:$0xff] %v2061_v23   ;;  %v1976_v30 = vpack.c.bf16 %v867_v24, %v866_v18  ;;  %v2056_v31 = vpack.c.bf16 %v899_v25, %v898_v19  ;;  %v664_v32 = vadd.f32 %v2650_v40, %v663_v28 }
 0x116   : > { %v792_v33 = vadd.f32 %v2650_v40, %v791_v29  ;;  %v2209_v34 = vpop.f32.mrf.mxu0  ;;  %v2241_v35 = vpop.f32.mrf.mxu1  ;;  %v872_v38 = vmax.f32 %v672_v26, 0.0  ;;  %v904_v39 = vmax.f32 %v800_v27, 0.0 }
 0x117   : > { %2108 = vst [vmem:[%s2663_s12 + $0x30] sm:$0xff] %v1976_v30   ;;  %2124 = vst [vmem:[%s2663_s12 + $0xb0] sm:$0xff] %v2056_v31   ;;  %v675_v36 = vadd.f32 %v2209_v34, %v2650_v40  ;;  %v803_v37 = vadd.f32 %v2241_v35, %v2650_v40  ;;  %v870_v47 = vmax.f32 %v664_v32, 0.0 }
 0x118   : > { %v666_v41 = vpop.f32.mrf.mxu0  ;;  %v794_v42 = vpop.f32.mrf.mxu1  ;;  %v902_v48 = vmax.f32 %v792_v33, 0.0 }
 0x119   : > { %v873_v43 = vmax.f32 %v675_v36, 0.0  ;;  %v905_v44 = vmax.f32 %v803_v37, 0.0  ;;  %v667_v45 = vadd.f32 %v2650_v40, %v666_v41  ;;  %v795_v46 = vadd.f32 %v2650_v40, %v794_v42 }
 0x11a   : > { %v2212_v49 = vpop.f32.mrf.mxu0  ;;  %v2244_v50 = vpop.f32.mrf.mxu1 }
 0x11b   : > { %v1991_v51 = vpack.c.bf16 %v873_v43, %v872_v38  ;;  %v2071_v52 = vpack.c.bf16 %v905_v44, %v904_v39  ;;  %v871_v53 = vmax.f32 %v667_v45, 0.0  ;;  %v903_v54 = vmax.f32 %v795_v46, 0.0 }
 0x11c   : > { %v688_v55 = vadd.f32 %v2212_v49, %v2650_v40  ;;  %v816_v56 = vadd.f32 %v2244_v50, %v2650_v40  ;;  %v679_v57 = vpop.f32.mrf.mxu0  ;;  %v807_v58 = vpop.f32.mrf.mxu1 }
 0x11d   : > { %2111 = vst [vmem:[%s2663_s12 + $0x48] sm:$0xff] %v1991_v51   ;;  %2127 = vst [vmem:[%s2663_s12 + $0xc8] sm:$0xff] %v2071_v52   ;;  %v1986_v59 = vpack.c.bf16 %v871_v53, %v870_v47  ;;  %v2066_v60 = vpack.c.bf16 %v903_v54, %v902_v48  ;;  %v680_v61 = vadd.f32 %v2650_v40, %v679_v57 }
 0x11e   : > { %v808_v62 = vadd.f32 %v2650_v40, %v807_v58  ;;  %v2213_v63 = vpop.f32.mrf.mxu0  ;;  %v2245_v0 = vpop.f32.mrf.mxu1  ;;  %v876_v3 = vmax.f32 %v688_v55, 0.0  ;;  %v908_v4 = vmax.f32 %v816_v56, 0.0 }
 0x11f   : > { %2110 = vst [vmem:[%s2663_s12 + $0x40] sm:$0xff] %v1986_v59   ;;  %2126 = vst [vmem:[%s2663_s12 + $0xc0] sm:$0xff] %v2066_v60   ;;  %v691_v1 = vadd.f32 %v2213_v63, %v2650_v40  ;;  %v819_v2 = vadd.f32 %v2245_v0, %v2650_v40  ;;  %v874_v11 = vmax.f32 %v680_v61, 0.0 }
 0x120   : > { %v682_v5 = vpop.f32.mrf.mxu0  ;;  %v810_v6 = vpop.f32.mrf.mxu1  ;;  %v906_v12 = vmax.f32 %v808_v62, 0.0 }
 0x121   : > { %v877_v7 = vmax.f32 %v691_v1, 0.0  ;;  %v909_v8 = vmax.f32 %v819_v2, 0.0  ;;  %v683_v9 = vadd.f32 %v2650_v40, %v682_v5  ;;  %v811_v10 = vadd.f32 %v2650_v40, %v810_v6 }
 0x122   : > { %v2216_v13 = vpop.f32.mrf.mxu0  ;;  %v2248_v14 = vpop.f32.mrf.mxu1 }
 0x123   : > { %v2001_v15 = vpack.c.bf16 %v877_v7, %v876_v3  ;;  %v2081_v16 = vpack.c.bf16 %v909_v8, %v908_v4  ;;  %v875_v17 = vmax.f32 %v683_v9, 0.0  ;;  %v907_v18 = vmax.f32 %v811_v10, 0.0 }
 0x124   : > { %v704_v19 = vadd.f32 %v2216_v13, %v2650_v40  ;;  %v832_v20 = vadd.f32 %v2248_v14, %v2650_v40  ;;  %v695_v21 = vpop.f32.mrf.mxu0  ;;  %v823_v22 = vpop.f32.mrf.mxu1 }
 0x125   : > { %2113 = vst [vmem:[%s2663_s12 + $0x58] sm:$0xff] %v2001_v15   ;;  %2129 = vst [vmem:[%s2663_s12 + $0xd8] sm:$0xff] %v2081_v16   ;;  %v1996_v23 = vpack.c.bf16 %v875_v17, %v874_v11  ;;  %v2076_v24 = vpack.c.bf16 %v907_v18, %v906_v12  ;;  %v696_v25 = vadd.f32 %v2650_v40, %v695_v21 }
 0x126   : > { %v824_v26 = vadd.f32 %v2650_v40, %v823_v22  ;;  %v2217_v27 = vpop.f32.mrf.mxu0  ;;  %v2249_v28 = vpop.f32.mrf.mxu1  ;;  %v880_v31 = vmax.f32 %v704_v19, 0.0  ;;  %v912_v32 = vmax.f32 %v832_v20, 0.0 }
 0x127   : > { %2112 = vst [vmem:[%s2663_s12 + $0x50] sm:$0xff] %v1996_v23   ;;  %2128 = vst [vmem:[%s2663_s12 + $0xd0] sm:$0xff] %v2076_v24   ;;  %v707_v29 = vadd.f32 %v2217_v27, %v2650_v40  ;;  %v835_v30 = vadd.f32 %v2249_v28, %v2650_v40  ;;  %v878_v39 = vmax.f32 %v696_v25, 0.0 }
 0x128   : > { %v698_v33 = vpop.f32.mrf.mxu0  ;;  %v826_v34 = vpop.f32.mrf.mxu1  ;;  %v910_v41 = vmax.f32 %v824_v26, 0.0 }
 0x129   : > { %v881_v35 = vmax.f32 %v707_v29, 0.0  ;;  %v913_v36 = vmax.f32 %v835_v30, 0.0  ;;  %v699_v37 = vadd.f32 %v2650_v40, %v698_v33  ;;  %v827_v38 = vadd.f32 %v2650_v40, %v826_v34 }
 0x12a   : > { %v2220_v42 = vpop.f32.mrf.mxu0  ;;  %v2252_v43 = vpop.f32.mrf.mxu1 }
 0x12b   : > { %v2011_v44 = vpack.c.bf16 %v881_v35, %v880_v31  ;;  %v2091_v45 = vpack.c.bf16 %v913_v36, %v912_v32  ;;  %v879_v46 = vmax.f32 %v699_v37, 0.0  ;;  %v911_v47 = vmax.f32 %v827_v38, 0.0 }
 0x12c   : > { %v720_v48 = vadd.f32 %v2220_v42, %v2650_v40  ;;  %v848_v49 = vadd.f32 %v2252_v43, %v2650_v40  ;;  %v711_v50 = vpop.f32.mrf.mxu0  ;;  %v839_v51 = vpop.f32.mrf.mxu1 }
 0x12d   : > { %2115 = vst [vmem:[%s2663_s12 + $0x68] sm:$0xff] %v2011_v44   ;;  %2131 = vst [vmem:[%s2663_s12 + $0xe8] sm:$0xff] %v2091_v45   ;;  %v2006_v52 = vpack.c.bf16 %v879_v46, %v878_v39  ;;  %v2086_v53 = vpack.c.bf16 %v911_v47, %v910_v41  ;;  %v712_v54 = vadd.f32 %v2650_v40, %v711_v50 }
 0x12e   : > { %v840_v55 = vadd.f32 %v2650_v40, %v839_v51  ;;  %v2221_v56 = vpop.f32.mrf.mxu0  ;;  %v2253_v57 = vpop.f32.mrf.mxu1  ;;  %v884_v60 = vmax.f32 %v720_v48, 0.0  ;;  %v916_v61 = vmax.f32 %v848_v49, 0.0 }
 0x12f   : > { %2114 = vst [vmem:[%s2663_s12 + $0x60] sm:$0xff] %v2006_v52   ;;  %2130 = vst [vmem:[%s2663_s12 + $0xe0] sm:$0xff] %v2086_v53   ;;  %v723_v58 = vadd.f32 %v2221_v56, %v2650_v40  ;;  %v851_v59 = vadd.f32 %v2253_v57, %v2650_v40  ;;  %v882_v4 = vmax.f32 %v712_v54, 0.0 }
 0x130   : > { %v714_v62 = vpop.f32.mrf.mxu0  ;;  %v842_v63 = vpop.f32.mrf.mxu1  ;;  %v914_v5 = vmax.f32 %v840_v55, 0.0 }
 0x131   : > { %v885_v0 = vmax.f32 %v723_v58, 0.0  ;;  %v917_v1 = vmax.f32 %v851_v59, 0.0  ;;  %v715_v2 = vadd.f32 %v2650_v40, %v714_v62  ;;  %v843_v3 = vadd.f32 %v2650_v40, %v842_v63 }
 0x133   : > { %v2021_v6 = vpack.c.bf16 %v885_v0, %v884_v60  ;;  %v2101_v7 = vpack.c.bf16 %v917_v1, %v916_v61  ;;  %v883_v8 = vmax.f32 %v715_v2, 0.0  ;;  %v915_v9 = vmax.f32 %v843_v3, 0.0  ;;  %1244 = sbr.rel (!%p2570_p3) target bundleno = 393 (0x189), region = 36 }
 0x135   : > { %2117 = vst [vmem:[%s2663_s12 + $0x78] sm:$0xff] %v2021_v6   ;;  %2133 = vst [vmem:[%s2663_s12 + $0xf8] sm:$0xff] %v2101_v7   ;;  %v2016_v10 = vpack.c.bf16 %v883_v8, %v882_v4  ;;  %v2096_v11 = vpack.c.bf16 %v915_v9, %v914_v5 }
 0x137   : > { %2116 = vst [vmem:[%s2663_s12 + $0x70] sm:$0xff] %v2016_v10   ;;  %2132 = vst [vmem:[%s2663_s12 + $0xf0] sm:$0xff] %v2096_v11  }
 0x138   : > { %s2970_s4 = smov (!%p1247_p9, %s1246_s4), 64 }
 0x139   : > { %s1861_s9 = sshll.u32 %s2970_s4, 6 }
 0x13a   : > { %p1864_p10 = scmp.eq.s32.totalorder %s1861_s9, 0 }
 0x13b   : > { %s2764_s10 = sshrl.u32 (!%p1864_p10), %s2970_s4, 6 }
 0x13c   : > { %1256 = sbr.rel (%p1864_p10) target bundleno = 393 (0x189), region = 40  ;;  %p1865_p11 = scmp.le.s32.totalorder (!%p1864_p10), %s2764_s10, 0 }
 0x141   : > { %1674 = sbr.rel (%p1865_p11) target bundleno = 376 (0x178), region = 118  ;;  %s2960_s14 = smov (!%p1865_p11), %s2758_s8 }
 0x142   : > { %s2961_s20 = smov (!%p1865_p11), %s2663_s12  ;;  %s2773_s25 = smov (!%p1865_p11), 0  }
 0x143   : > { %s2775_s11 = smov (!%p1865_p11), 0  }
 0x146 LB: >> { %v1273_v40 = vld [vmem:[%s2492_s20] sm:$0xf]  ;;  %v1275_v12 = vld [vmem:[%s2492_s20 + $0x4] sm:$0xf]  ;;  %v1277_v13 = vld [vmem:[%s2492_s20 + $0x8] sm:$0xf]  ;;  %s2500_s11 = sphi %s2775_s11, %s1267_s11   ;;  %s2496_s25 = sphi %s2773_s25, %s2962_s25   ;;  %s2492_s20 = sphi %s2961_s20, %s1406_s20   ;;  %s2488_s14 = sphi %s2960_s14, %s1407_s14  }
 0x147   : >> { %1274 = vst [vmem:[%s2488_s14] sm:$0xf] %v1273_v40  ;;  %1276 = vst [vmem:[%s2488_s14 + $0x4] sm:$0xf] %v1275_v12  ;;  %v1279_v14 = vld [vmem:[%s2492_s20 + $0xc] sm:$0xf]  ;;  %s1401_s17 = sadd.s32 1, %s2496_s25 }
 0x148   : >> { %1278 = vst [vmem:[%s2488_s14 + $0x8] sm:$0xf] %v1277_v13  ;;  %v1281_v15 = vld [vmem:[%s2492_s20 + $0x10] sm:$0xf]  ;;  %v1283_v16 = vld [vmem:[%s2492_s20 + $0x14] sm:$0xf]  ;;  %p1402_p12 = scmp.ge.s32.totalorder %s1401_s17, %s2764_s10 }
 0x149   : >> { %1280 = vst [vmem:[%s2488_s14 + $0xc] sm:$0xf] %v1279_v14  ;;  %1282 = vst [vmem:[%s2488_s14 + $0x10] sm:$0xf] %v1281_v15  ;;  %v1285_v17 = vld [vmem:[%s2492_s20 + $0x18] sm:$0xf] }
 0x14a   : >> { %1284 = vst [vmem:[%s2488_s14 + $0x14] sm:$0xf] %v1283_v16  ;;  %v1287_v18 = vld [vmem:[%s2492_s20 + $0x1c] sm:$0xf]  ;;  %v1289_v19 = vld [vmem:[%s2492_s20 + $0x20] sm:$0xf] }
 0x14b   : >> { %1286 = vst [vmem:[%s2488_s14 + $0x18] sm:$0xf] %v1285_v17  ;;  %1288 = vst [vmem:[%s2488_s14 + $0x1c] sm:$0xf] %v1287_v18  ;;  %v1291_v20 = vld [vmem:[%s2492_s20 + $0x24] sm:$0xf] }
 0x14c   : >> { %1290 = vst [vmem:[%s2488_s14 + $0x20] sm:$0xf] %v1289_v19  ;;  %v1293_v21 = vld [vmem:[%s2492_s20 + $0x28] sm:$0xf]  ;;  %v1295_v22 = vld [vmem:[%s2492_s20 + $0x2c] sm:$0xf] }
 0x14d   : >> { %1292 = vst [vmem:[%s2488_s14 + $0x24] sm:$0xf] %v1291_v20  ;;  %1294 = vst [vmem:[%s2488_s14 + $0x28] sm:$0xf] %v1293_v21  ;;  %v1297_v23 = vld [vmem:[%s2492_s20 + $0x30] sm:$0xf] }
 0x14e   : >> { %1296 = vst [vmem:[%s2488_s14 + $0x2c] sm:$0xf] %v1295_v22  ;;  %v1299_v24 = vld [vmem:[%s2492_s20 + $0x34] sm:$0xf]  ;;  %v1301_v25 = vld [vmem:[%s2492_s20 + $0x38] sm:$0xf] }
 0x14f   : >> { %1298 = vst [vmem:[%s2488_s14 + $0x30] sm:$0xf] %v1297_v23  ;;  %1300 = vst [vmem:[%s2488_s14 + $0x34] sm:$0xf] %v1299_v24  ;;  %v1303_v26 = vld [vmem:[%s2492_s20 + $0x3c] sm:$0xf] }
 0x150   : >> { %1302 = vst [vmem:[%s2488_s14 + $0x38] sm:$0xf] %v1301_v25  ;;  %v1305_v27 = vld [vmem:[%s2492_s20 + $0x40] sm:$0xf]  ;;  %v1307_v28 = vld [vmem:[%s2492_s20 + $0x44] sm:$0xf] }
 0x151   : >> { %1304 = vst [vmem:[%s2488_s14 + $0x3c] sm:$0xf] %v1303_v26  ;;  %1306 = vst [vmem:[%s2488_s14 + $0x40] sm:$0xf] %v1305_v27  ;;  %v1309_v29 = vld [vmem:[%s2492_s20 + $0x48] sm:$0xf] }
 0x152   : >> { %1308 = vst [vmem:[%s2488_s14 + $0x44] sm:$0xf] %v1307_v28  ;;  %v1311_v30 = vld [vmem:[%s2492_s20 + $0x4c] sm:$0xf]  ;;  %v1313_v31 = vld [vmem:[%s2492_s20 + $0x50] sm:$0xf] }
 0x153   : >> { %1310 = vst [vmem:[%s2488_s14 + $0x48] sm:$0xf] %v1309_v29  ;;  %1312 = vst [vmem:[%s2488_s14 + $0x4c] sm:$0xf] %v1311_v30  ;;  %v1315_v32 = vld [vmem:[%s2492_s20 + $0x54] sm:$0xf] }
 0x154   : >> { %1314 = vst [vmem:[%s2488_s14 + $0x50] sm:$0xf] %v1313_v31  ;;  %v1317_v33 = vld [vmem:[%s2492_s20 + $0x58] sm:$0xf]  ;;  %v1319_v34 = vld [vmem:[%s2492_s20 + $0x5c] sm:$0xf] }
 0x155   : >> { %1316 = vst [vmem:[%s2488_s14 + $0x54] sm:$0xf] %v1315_v32  ;;  %1318 = vst [vmem:[%s2488_s14 + $0x58] sm:$0xf] %v1317_v33  ;;  %v1321_v35 = vld [vmem:[%s2492_s20 + $0x60] sm:$0xf] }
 0x156   : >> { %1320 = vst [vmem:[%s2488_s14 + $0x5c] sm:$0xf] %v1319_v34  ;;  %v1323_v36 = vld [vmem:[%s2492_s20 + $0x64] sm:$0xf]  ;;  %v1325_v37 = vld [vmem:[%s2492_s20 + $0x68] sm:$0xf] }
 0x157   : >> { %1322 = vst [vmem:[%s2488_s14 + $0x60] sm:$0xf] %v1321_v35  ;;  %1324 = vst [vmem:[%s2488_s14 + $0x64] sm:$0xf] %v1323_v36  ;;  %v1327_v38 = vld [vmem:[%s2492_s20 + $0x6c] sm:$0xf] }
 0x158   : >> { %1326 = vst [vmem:[%s2488_s14 + $0x68] sm:$0xf] %v1325_v37  ;;  %v1329_v39 = vld [vmem:[%s2492_s20 + $0x70] sm:$0xf]  ;;  %v1331_v41 = vld [vmem:[%s2492_s20 + $0x74] sm:$0xf] }
 0x159   : >> { %1328 = vst [vmem:[%s2488_s14 + $0x6c] sm:$0xf] %v1327_v38  ;;  %1330 = vst [vmem:[%s2488_s14 + $0x70] sm:$0xf] %v1329_v39  ;;  %v1333_v42 = vld [vmem:[%s2492_s20 + $0x78] sm:$0xf] }
 0x15a   : >> { %1332 = vst [vmem:[%s2488_s14 + $0x74] sm:$0xf] %v1331_v41  ;;  %v1335_v43 = vld [vmem:[%s2492_s20 + $0x7c] sm:$0xf]  ;;  %v1337_v44 = vld [vmem:[%s2492_s20 + $0x80] sm:$0xf] }
 0x15b   : >> { %1334 = vst [vmem:[%s2488_s14 + $0x78] sm:$0xf] %v1333_v42  ;;  %1336 = vst [vmem:[%s2488_s14 + $0x7c] sm:$0xf] %v1335_v43  ;;  %v1339_v45 = vld [vmem:[%s2492_s20 + $0x84] sm:$0xf] }
 0x15c   : >> { %1338 = vst [vmem:[%s2488_s14 + $0x80] sm:$0xf] %v1337_v44  ;;  %v1341_v46 = vld [vmem:[%s2492_s20 + $0x88] sm:$0xf]  ;;  %v1343_v47 = vld [vmem:[%s2492_s20 + $0x8c] sm:$0xf] }
 0x15d   : >> { %1340 = vst [vmem:[%s2488_s14 + $0x84] sm:$0xf] %v1339_v45  ;;  %1342 = vst [vmem:[%s2488_s14 + $0x88] sm:$0xf] %v1341_v46  ;;  %v1345_v48 = vld [vmem:[%s2492_s20 + $0x90] sm:$0xf] }
 0x15e   : >> { %1344 = vst [vmem:[%s2488_s14 + $0x8c] sm:$0xf] %v1343_v47  ;;  %v1347_v49 = vld [vmem:[%s2492_s20 + $0x94] sm:$0xf]  ;;  %v1349_v50 = vld [vmem:[%s2492_s20 + $0x98] sm:$0xf] }
 0x15f   : >> { %1346 = vst [vmem:[%s2488_s14 + $0x90] sm:$0xf] %v1345_v48  ;;  %1348 = vst [vmem:[%s2488_s14 + $0x94] sm:$0xf] %v1347_v49  ;;  %v1351_v51 = vld [vmem:[%s2492_s20 + $0x9c] sm:$0xf] }
 0x160   : >> { %1350 = vst [vmem:[%s2488_s14 + $0x98] sm:$0xf] %v1349_v50  ;;  %v1353_v52 = vld [vmem:[%s2492_s20 + $0xa0] sm:$0xf]  ;;  %v1355_v53 = vld [vmem:[%s2492_s20 + $0xa4] sm:$0xf] }
 0x161   : >> { %1352 = vst [vmem:[%s2488_s14 + $0x9c] sm:$0xf] %v1351_v51  ;;  %1354 = vst [vmem:[%s2488_s14 + $0xa0] sm:$0xf] %v1353_v52  ;;  %v1357_v54 = vld [vmem:[%s2492_s20 + $0xa8] sm:$0xf] }
 0x162   : >> { %1356 = vst [vmem:[%s2488_s14 + $0xa4] sm:$0xf] %v1355_v53  ;;  %v1359_v55 = vld [vmem:[%s2492_s20 + $0xac] sm:$0xf]  ;;  %v1361_v56 = vld [vmem:[%s2492_s20 + $0xb0] sm:$0xf] }
 0x163   : >> { %1358 = vst [vmem:[%s2488_s14 + $0xa8] sm:$0xf] %v1357_v54  ;;  %1360 = vst [vmem:[%s2488_s14 + $0xac] sm:$0xf] %v1359_v55  ;;  %v1363_v57 = vld [vmem:[%s2492_s20 + $0xb4] sm:$0xf] }
 0x164   : >> { %1362 = vst [vmem:[%s2488_s14 + $0xb0] sm:$0xf] %v1361_v56  ;;  %v1365_v58 = vld [vmem:[%s2492_s20 + $0xb8] sm:$0xf]  ;;  %v1367_v59 = vld [vmem:[%s2492_s20 + $0xbc] sm:$0xf] }
 0x165   : >> { %1364 = vst [vmem:[%s2488_s14 + $0xb4] sm:$0xf] %v1363_v57  ;;  %1366 = vst [vmem:[%s2488_s14 + $0xb8] sm:$0xf] %v1365_v58  ;;  %v1369_v60 = vld [vmem:[%s2492_s20 + $0xc0] sm:$0xf] }
 0x166   : >> { %1368 = vst [vmem:[%s2488_s14 + $0xbc] sm:$0xf] %v1367_v59  ;;  %v1371_v61 = vld [vmem:[%s2492_s20 + $0xc4] sm:$0xf]  ;;  %v1373_v62 = vld [vmem:[%s2492_s20 + $0xc8] sm:$0xf] }
 0x167   : >> { %1370 = vst [vmem:[%s2488_s14 + $0xc0] sm:$0xf] %v1369_v60  ;;  %1372 = vst [vmem:[%s2488_s14 + $0xc4] sm:$0xf] %v1371_v61  ;;  %v1375_v63 = vld [vmem:[%s2492_s20 + $0xcc] sm:$0xf] }
 0x168   : >> { %1374 = vst [vmem:[%s2488_s14 + $0xc8] sm:$0xf] %v1373_v62  ;;  %v1377_v0 = vld [vmem:[%s2492_s20 + $0xd0] sm:$0xf]  ;;  %v1379_v1 = vld [vmem:[%s2492_s20 + $0xd4] sm:$0xf] }
 0x169   : >> { %1376 = vst [vmem:[%s2488_s14 + $0xcc] sm:$0xf] %v1375_v63  ;;  %1378 = vst [vmem:[%s2488_s14 + $0xd0] sm:$0xf] %v1377_v0  ;;  %v1381_v2 = vld [vmem:[%s2492_s20 + $0xd8] sm:$0xf] }
 0x16a   : >> { %1380 = vst [vmem:[%s2488_s14 + $0xd4] sm:$0xf] %v1379_v1  ;;  %v1383_v3 = vld [vmem:[%s2492_s20 + $0xdc] sm:$0xf]  ;;  %v1385_v4 = vld [vmem:[%s2492_s20 + $0xe0] sm:$0xf] }
 0x16b   : >> { %1382 = vst [vmem:[%s2488_s14 + $0xd8] sm:$0xf] %v1381_v2  ;;  %1384 = vst [vmem:[%s2488_s14 + $0xdc] sm:$0xf] %v1383_v3  ;;  %v1387_v5 = vld [vmem:[%s2492_s20 + $0xe4] sm:$0xf] }
 0x16c   : >> { %1386 = vst [vmem:[%s2488_s14 + $0xe0] sm:$0xf] %v1385_v4  ;;  %v1389_v6 = vld [vmem:[%s2492_s20 + $0xe8] sm:$0xf]  ;;  %v1391_v7 = vld [vmem:[%s2492_s20 + $0xec] sm:$0xf] }
 0x16d   : >> { %1388 = vst [vmem:[%s2488_s14 + $0xe4] sm:$0xf] %v1387_v5  ;;  %1390 = vst [vmem:[%s2488_s14 + $0xe8] sm:$0xf] %v1389_v6  ;;  %v1393_v8 = vld [vmem:[%s2492_s20 + $0xf0] sm:$0xf] }
 0x16e   : >> { %1392 = vst [vmem:[%s2488_s14 + $0xec] sm:$0xf] %v1391_v7  ;;  %v1395_v9 = vld [vmem:[%s2492_s20 + $0xf4] sm:$0xf]  ;;  %v1397_v10 = vld [vmem:[%s2492_s20 + $0xf8] sm:$0xf] }
 0x16f   : >> { %1394 = vst [vmem:[%s2488_s14 + $0xf0] sm:$0xf] %v1393_v8  ;;  %1396 = vst [vmem:[%s2488_s14 + $0xf4] sm:$0xf] %v1395_v9  ;;  %v1399_v11 = vld [vmem:[%s2492_s20 + $0xfc] sm:$0xf] }
 0x170   : >> { %1398 = vst [vmem:[%s2488_s14 + $0xf8] sm:$0xf] %v1397_v10  ;;  %1400 = vst [vmem:[%s2488_s14 + $0xfc] sm:$0xf] %v1399_v11  ;;  %s2972_s17 = smov (%p1402_p12, %s1401_s17), 0  ;;  %s1267_s11 = sadd.s32 1, %s2500_s11  }
 0x171   : >> { %s1866_s19 = sshll.u32 %s2972_s17, 8  ;;  %p1266_p13 = scmp.ge.s32.totalorder %s1267_s11, %s2764_s10 }
 0x172   : >> { %s1406_s20 = scalar_lea.vmem %s2663_s12, %s1866_s19 [#allocation2]   ;;  %s1407_s14 = scalar_lea.vmem %s2758_s8, %s1866_s19  }
 0x173   : >> { %s2962_s25 = smov %s2972_s17  ;;  %1269 = sbr.rel (!%p1266_p13) target bundleno = 326 (0x146), region = 124 }
 0x178 PF: > { %s2932_s21 = sand.u32 63, %s2970_s4   ;;  %s1941_s23 = sshll.u32 %s2764_s10, 8 }
 0x179   : > { %s1412_s24 = scalar_lea.vmem %s2663_s12, %s1941_s23 [#allocation2]   ;;  %s1414_s26 = scalar_lea.vmem %s2758_s8, %s1941_s23  }
 0x17a   : > { %p1871_p0 = scmp.le.s32.totalorder %s2932_s21, 0 }
 0x17b   : > { %s2502_s27 = smov (!%p1871_p0), %s1414_s26   ;;  %s2506_s28 = smov (!%p1871_p0), %s1412_s24  }
 0x17c   : > { %1688 = sbr.rel (%p1871_p0) target bundleno = 393 (0x189), region = 129  ;;  %s2510_s29 = smov (!%p1871_p0), 0  }
 0x17d   : > { %s2514_s30 = smov (!%p1871_p0), 0  }
 0x181 LB: >> { %v1424_v40 = vld [vmem:[%s2508_s28] sm:$0xf]  ;;  %s1426_s4 = sadd.s32 1, %s2512_s29  ;;  %s1418_s30 = sadd.s32 1, %s2516_s30   ;;  %s2516_s30 = sphi %s2514_s30, %s1418_s30   ;;  %s2512_s29 = sphi %s2510_s29, %s2511_s29   ;;  %s2508_s28 = sphi %s2506_s28, %s1431_s28   ;;  %s2504_s27 = sphi %s2502_s27, %s1432_s27  }
 0x182   : >> { %1425 = vst [vmem:[%s2504_s27] sm:$0xf] %v1424_v40  ;;  %p1427_p1 = scmp.ge.s32.totalorder %s1426_s4, %s2932_s21  ;;  %p1417_p2 = scmp.ge.s32.totalorder %s1418_s30, %s2932_s21 }
 0x184   : >> { %s2974_s4 = smov (%p1427_p1, %s1426_s4), 0  ;;  %1420 = sbr.rel (!%p1417_p2) target bundleno = 385 (0x181), region = 135 }
 0x185   : >> { %s1872_s12 = sshll.u32 %s2974_s4, 2  ;;  %s2511_s29 = smov %s2974_s4  }
 0x186   : >> { %s1431_s28 = scalar_lea.vmem %s1412_s24, %s1872_s12 [#allocation2]   ;;  %s1432_s27 = scalar_lea.vmem %s1414_s26, %s1872_s12  }
 0x189 PF: > { %s13_s16 = sadd.s32 1, %s2484_s16   ;;  %s2963_s12 = smov %s2472_s13 }
 0x18a   : > { %p10_p3 = scmp.ge.s32.totalorder %s13_s16, 16   ;;  %s2964_s13 = smov %s2579_s22 }
 0x18b   : > { %s2965_s14 = smov %s2480_s15  ;;  %s2966_s15 = smov %s2968_s18 }
 0x18c   :  { %12 = sbr.rel (!%p10_p3) target bundleno = 3 (0x3), region = 146 }

// kernel: cnn_forward.10
= control target key start
LH: loop header
LB: loop body
LE: loop exit
PB: predicated region body
PF: predicated region fallthrough
CT: control target
= control target key end

     0   :  { %s1413_s6 = smov 0   ;;  %s1844_s0 = inlined_call_operand.vmem [shape: bf16[58,2,29,256], index: 0, kind: input, shape index: {}]   ;;  %s1845_s1 = inlined_call_operand.vmem [shape: bf16[58,29,128], index: 1, kind: output, shape index: {}]  }
   0x1 LB: > { %s1172_s7 = sadd.s32 4294967295, %s1401_s6   ;;  %p1176_p0 = scmp.ge.s32.totalorder %s1401_s6, 1  ;;  %s1401_s6 = sphi %s1413_s6, %s11_s6  }
   0x2   : > { %p89_p1 = scmp.lt.s32.totalorder %s1401_s6, 3 }
   0x4   : > { %p90_p2 = pnand %p1176_p0, %p89_p1 }
   0x5   : > { %s111_s8 = smul.u32 (!%p90_p2), 29, %s1172_s7 }
   0x6   : > { %93 = sbr.rel (%p90_p2) target bundleno = 126 (0x7e), region = 24 }
   0x7   : > { %p112_p3 = scmp.lt.s32.totalorder (!%p90_p2), %s111_s8, 57 }
   0xb   : > { %s1849_s8 = smov (!%p112_p3, %s111_s8), 57  ;;  %vm940_vm0 = vcmask 1042432   ;;  %vm941_vm1 = vsmask.f32 2304 }
   0xc   : > { %s1183_s9 = sshll.u32 %s1849_s8, 6  ;;  %s1184_s13 = sshll.u32 %s1849_s8, 4  ;;  %vm1434_vm2 = vmand %vm940_vm0, %vm941_vm1 }
   0xd   : > { %s1424_s12 = scalar_lea.vmem %s1844_s0, %s1183_s9  ;;  %s1441_s16 = scalar_lea.vmem %s1845_s1, %s1184_s13 }
   0xe   : > { %v125_v0 = vld [vmem:[%s1424_s12] sm:$0xff]  ;;  %v126_v1 = vld [vmem:[%s1424_s12 + $0x8] sm:$0xff]  ;;  %v127_v5 = vld [vmem:[%s1424_s12 + $0x10] sm:$0xff] }
   0xf   : > { %v129_v2 = vld [vmem:[%s1424_s12 + $0x20] sm:$0xff]  ;;  %v130_v3 = vld [vmem:[%s1424_s12 + $0x28] sm:$0xff]  ;;  %v131_v6 = vld [vmem:[%s1424_s12 + $0x30] sm:$0xff] }
  0x10   : > { %v357_v4 = vmax.bf16 %v129_v2, %v125_v0  ;;  %v358_v7 = vmax.bf16 %v130_v3, %v126_v1  ;;  %v359_v8 = vmax.bf16 %v131_v6, %v127_v5  ;;  %v128_v9 = vld [vmem:[%s1424_s12 + $0x18] sm:$0x77]  ;;  %v133_v14 = vld [vmem:[%s1424_s12 + $0x40] sm:$0xff]  ;;  %v134_v15 = vld [vmem:[%s1424_s12 + $0x48] sm:$0xff] }
  0x11   : > { %v132_v10 = vld [vmem:[%s1424_s12 + $0x38] sm:$0x77]  ;;  %v137_v16 = vld [vmem:[%s1424_s12 + $0x60] sm:$0xff]  ;;  %v138_v19 = vld [vmem:[%s1424_s12 + $0x68] sm:$0xff] }
  0x12   : > { %v589_v12 = vrot.slane %v357_v4, 4  ;;  %v360_v13 = vmax.bf16 %v132_v10, %v128_v9  ;;  %v590_v17 = vrot.slane %v358_v7, 4  ;;  %v591_v18 = vrot.slane %v359_v8, 4  ;;  %v135_v21 = vld [vmem:[%s1424_s12 + $0x50] sm:$0xff]  ;;  %v136_v27 = vld [vmem:[%s1424_s12 + $0x58] sm:$0x77] }
  0x13   : > { %v361_v20 = vmax.bf16 %v137_v16, %v133_v14  ;;  %v139_v22 = vld [vmem:[%s1424_s12 + $0x70] sm:$0xff]  ;;  %v362_v25 = vmax.bf16 %v138_v19, %v134_v15  ;;  %v140_v28 = vld [vmem:[%s1424_s12 + $0x78] sm:$0x77]  ;;  %v141_v29 = vld [vmem:[%s1424_s12 + $0x80] sm:$0xff] }
  0x14   : > { %v821_v23 = vmax.bf16 %v589_v12, %v357_v4  ;;  %v592_v24 = vrot.slane %v360_v13, 4  ;;  %v363_v26 = vmax.bf16 %v139_v22, %v135_v21  ;;  %v822_v30 = vmax.bf16 %v590_v17, %v358_v7  ;;  %v943_v32 = vld [vmem:[%s1441_s16 + $0xc] sm:$0x7]  ;;  %v145_v36 = vld [vmem:[%s1424_s12 + $0xa0] sm:$0xff]  ;;  %v143_v42 = vld [vmem:[%s1424_s12 + $0x90] sm:$0xff] }
  0x15   : > { %v823_v31 = vmax.bf16 %v591_v18, %v359_v8  ;;  %v593_v33 = vrot.slane %v361_v20, 4  ;;  %v364_v34 = vmax.bf16 %v140_v28, %v136_v27  ;;  %v142_v35 = vld [vmem:[%s1424_s12 + $0x88] sm:$0xff]  ;;  %v594_v38 = vrot.slane %v362_v25, 4  ;;  %v147_v43 = vld [vmem:[%s1424_s12 + $0xb0] sm:$0xff]  ;;  %v144_v48 = vld [vmem:[%s1424_s12 + $0x98] sm:$0x77] }
  0x16   : > { %v824_v37 = vmax.bf16 %v592_v24, %v360_v13  ;;  %v595_v39 = vrot.slane %v363_v26, 4  ;;  %v146_v40 = vld [vmem:[%s1424_s12 + $0xa8] sm:$0xff]  ;;  %v365_v41 = vmax.bf16 %v145_v36, %v141_v29  ;;  %v1330_v44 = vcombine.low %v821_v23, %v822_v30  ;;  %v148_v49 = vld [vmem:[%s1424_s12 + $0xb8] sm:$0x77]  ;;  %v149_v50 = vld [vmem:[%s1424_s12 + $0xc0] sm:$0xff] }
  0x17   : > { %939 = vst [vmem:[%s1441_s16 + $0x8] sm:$0xf] %v823_v31  ;;  %v825_v45 = vmax.bf16 %v593_v33, %v361_v20  ;;  %v596_v46 = vrot.slane %v364_v34, 4  ;;  %v366_v47 = vmax.bf16 %v146_v40, %v142_v35  ;;  %v826_v52 = vmax.bf16 %v594_v38, %v362_v25  ;;  %v949_v54 = vld [vmem:[%s1441_s16 + $0x1c] sm:$0x7]  ;;  %v150_v56 = vld [vmem:[%s1424_s12 + $0xc8] sm:$0xff] }
  0x18   : > { %v944_v51 = vsel %vm1434_vm2, %v824_v37, %v943_v32  ;;  %v827_v53 = vmax.bf16 %v595_v39, %v363_v26  ;;  %v597_v55 = vrot.slane %v365_v41, 4  ;;  %v153_v57 = vld [vmem:[%s1424_s12 + $0xe0] sm:$0xff]  ;;  %1189 = vst [vmem:[%s1441_s16] sm:$0xff] %v1330_v44   ;;  %v367_v60 = vmax.bf16 %v147_v43, %v143_v42  ;;  %v154_v62 = vld [vmem:[%s1424_s12 + $0xe8] sm:$0xff]  ;;  %v151_v63 = vld [vmem:[%s1424_s12 + $0xd0] sm:$0xff] }
  0x19   : > { %945 = vst [vmem:[%s1441_s16 + $0xc] sm:$0x7] %v944_v51  ;;  %v828_v58 = vmax.bf16 %v596_v46, %v364_v34  ;;  %v598_v59 = vrot.slane %v366_v47, 4  ;;  %v368_v61 = vmax.bf16 %v148_v49, %v144_v48  ;;  %v155_v0 = vld [vmem:[%s1424_s12 + $0xf0] sm:$0xff]  ;;  %v1331_v1 = vcombine.low %v825_v45, %v826_v52  ;;  %v955_v3 = vld [vmem:[%s1441_s16 + $0x2c] sm:$0x7] }
  0x1a   : > { %948 = vst [vmem:[%s1441_s16 + $0x18] sm:$0xf] %v827_v53  ;;  %v829_v2 = vmax.bf16 %v597_v55, %v365_v41  ;;  %v369_v4 = vmax.bf16 %v153_v57, %v149_v50  ;;  %v370_v5 = vmax.bf16 %v154_v62, %v150_v56  ;;  %v152_v6 = vld [vmem:[%s1424_s12 + $0xd8] sm:$0x77]  ;;  %v599_v10 = vrot.slane %v367_v60, 4  ;;  %v157_v13 = vld [vmem:[%s1424_s12 + $0x100] sm:$0xff] }
  0x1b   : > { %v156_v7 = vld [vmem:[%s1424_s12 + $0xf8] sm:$0x77]  ;;  %v950_v8 = vsel %vm1434_vm2, %v828_v58, %v949_v54  ;;  %v830_v9 = vmax.bf16 %v598_v59, %v366_v47  ;;  %v600_v12 = vrot.slane %v368_v61, 4  ;;  %v158_v14 = vld [vmem:[%s1424_s12 + $0x108] sm:$0xff]  ;;  %v161_v15 = vld [vmem:[%s1424_s12 + $0x120] sm:$0xff]  ;;  %1332 = vst [vmem:[%s1441_s16 + $0x10] sm:$0xff] %v1331_v1   ;;  %v371_v18 = vmax.bf16 %v155_v0, %v151_v63 }
  0x1c   : > { %951 = vst [vmem:[%s1441_s16 + $0x1c] sm:$0x7] %v950_v8  ;;  %v601_v16 = vrot.slane %v369_v4, 4  ;;  %v602_v17 = vrot.slane %v370_v5, 4  ;;  %v372_v19 = vmax.bf16 %v156_v7, %v152_v6  ;;  %v162_v20 = vld [vmem:[%s1424_s12 + $0x128] sm:$0xff]  ;;  %v159_v21 = vld [vmem:[%s1424_s12 + $0x110] sm:$0xff]  ;;  %v831_v24 = vmax.bf16 %v599_v10, %v367_v60 }
  0x1d   : > { %v163_v22 = vld [vmem:[%s1424_s12 + $0x130] sm:$0xff]  ;;  %v1333_v23 = vcombine.low %v829_v2, %v830_v9  ;;  %v832_v25 = vmax.bf16 %v600_v12, %v368_v61  ;;  %v961_v26 = vld [vmem:[%s1441_s16 + $0x3c] sm:$0x7]  ;;  %v373_v27 = vmax.bf16 %v161_v15, %v157_v13  ;;  %v603_v32 = vrot.slane %v371_v18, 4  ;;  %v165_v34 = vld [vmem:[%s1424_s12 + $0x140] sm:$0xff] }
  0x1e   : > { %v160_v28 = vld [vmem:[%s1424_s12 + $0x118] sm:$0x77]  ;;  %v833_v30 = vmax.bf16 %v601_v16, %v369_v4  ;;  %v834_v31 = vmax.bf16 %v602_v17, %v370_v5  ;;  %v604_v33 = vrot.slane %v372_v19, 4  ;;  %v166_v35 = vld [vmem:[%s1424_s12 + $0x148] sm:$0xff]  ;;  %v169_v36 = vld [vmem:[%s1424_s12 + $0x160] sm:$0xff]  ;;  %v374_v38 = vmax.bf16 %v162_v20, %v158_v14 }
  0x1f   : > { %v164_v29 = vld [vmem:[%s1424_s12 + $0x138] sm:$0x77]  ;;  %1334 = vst [vmem:[%s1441_s16 + $0x20] sm:$0xff] %v1333_v23   ;;  %954 = vst [vmem:[%s1441_s16 + $0x28] sm:$0xf] %v831_v24  ;;  %v956_v37 = vsel %vm1434_vm2, %v832_v25, %v955_v3  ;;  %v605_v39 = vrot.slane %v373_v27, 4  ;;  %v375_v40 = vmax.bf16 %v163_v22, %v159_v21  ;;  %v835_v45 = vmax.bf16 %v603_v32, %v371_v18 }
  0x20   : > { %v170_v41 = vld [vmem:[%s1424_s12 + $0x168] sm:$0xff]  ;;  %v167_v42 = vld [vmem:[%s1424_s12 + $0x150] sm:$0xff]  ;;  %957 = vst [vmem:[%s1441_s16 + $0x2c] sm:$0x7] %v956_v37  ;;  %v1335_v44 = vcombine.low %v833_v30, %v834_v31  ;;  %v836_v46 = vmax.bf16 %v604_v33, %v372_v19  ;;  %v376_v47 = vmax.bf16 %v164_v29, %v160_v28  ;;  %v168_v48 = vld [vmem:[%s1424_s12 + $0x158] sm:$0x77]  ;;  %v377_v53 = vmax.bf16 %v169_v36, %v165_v34 }
  0x21   : > { %v171_v43 = vld [vmem:[%s1424_s12 + $0x170] sm:$0xff]  ;;  %v172_v49 = vld [vmem:[%s1424_s12 + $0x178] sm:$0x77]  ;;  %v606_v50 = vrot.slane %v374_v38, 4  ;;  %v837_v51 = vmax.bf16 %v605_v39, %v373_v27  ;;  %v607_v52 = vrot.slane %v375_v40, 4  ;;  %v173_v54 = vld [vmem:[%s1424_s12 + $0x180] sm:$0xff]  ;;  %v378_v58 = vmax.bf16 %v170_v41, %v166_v35 }
  0x22   : > { %v177_v55 = vld [vmem:[%s1424_s12 + $0x1a0] sm:$0xff]  ;;  %1336 = vst [vmem:[%s1441_s16 + $0x30] sm:$0xff] %v1335_v44   ;;  %960 = vst [vmem:[%s1441_s16 + $0x38] sm:$0xf] %v835_v45  ;;  %v962_v56 = vsel %vm1434_vm2, %v836_v46, %v961_v26  ;;  %v608_v57 = vrot.slane %v376_v47, 4  ;;  %v379_v59 = vmax.bf16 %v171_v43, %v167_v42  ;;  %v174_v60 = vld [vmem:[%s1424_s12 + $0x188] sm:$0xff]  ;;  %v380_v2 = vmax.bf16 %v172_v49, %v168_v48 }
  0x23   : > { %v178_v61 = vld [vmem:[%s1424_s12 + $0x1a8] sm:$0xff]  ;;  %963 = vst [vmem:[%s1441_s16 + $0x3c] sm:$0x7] %v962_v56  ;;  %v838_v62 = vmax.bf16 %v606_v50, %v374_v38  ;;  %v839_v63 = vmax.bf16 %v607_v52, %v375_v40  ;;  %v609_v1 = vrot.slane %v377_v53, 4  ;;  %v175_v3 = vld [vmem:[%s1424_s12 + $0x190] sm:$0xff]  ;;  %v610_v6 = vrot.slane %v378_v58, 4 }
  0x24   : > { %v967_v0 = vld [vmem:[%s1441_s16 + $0x4c] sm:$0x7]  ;;  %v176_v4 = vld [vmem:[%s1424_s12 + $0x198] sm:$0x77]  ;;  %v840_v5 = vmax.bf16 %v608_v57, %v376_v47  ;;  %v611_v7 = vrot.slane %v379_v59, 4  ;;  %v381_v8 = vmax.bf16 %v177_v55, %v173_v54  ;;  %v179_v9 = vld [vmem:[%s1424_s12 + $0x1b0] sm:$0xff]  ;;  %v382_v16 = vmax.bf16 %v178_v61, %v174_v60 }
  0x25   : > { %v180_v10 = vld [vmem:[%s1424_s12 + $0x1b8] sm:$0x77]  ;;  %v181_v12 = vld [vmem:[%s1424_s12 + $0x1c0] sm:$0xff]  ;;  %v1337_v13 = vcombine.low %v837_v51, %v838_v62  ;;  %966 = vst [vmem:[%s1441_s16 + $0x48] sm:$0xf] %v839_v63  ;;  %v841_v14 = vmax.bf16 %v609_v1, %v377_v53  ;;  %v612_v15 = vrot.slane %v380_v2, 4  ;;  %v842_v21 = vmax.bf16 %v610_v6, %v378_v58 }
  0x26   : > { %v182_v17 = vld [vmem:[%s1424_s12 + $0x1c8] sm:$0xff]  ;;  %v185_v18 = vld [vmem:[%s1424_s12 + $0x1e0] sm:$0xff]  ;;  %v968_v20 = vsel %vm1434_vm2, %v840_v5, %v967_v0  ;;  %v843_v22 = vmax.bf16 %v611_v7, %v379_v59  ;;  %v973_v23 = vld [vmem:[%s1441_s16 + $0x5c] sm:$0x7]  ;;  %v613_v24 = vrot.slane %v381_v8, 4  ;;  %v614_v27 = vrot.slane %v382_v16, 4 }
  0x27   : > { %v186_v19 = vld [vmem:[%s1424_s12 + $0x1e8] sm:$0xff]  ;;  %v183_v25 = vld [vmem:[%s1424_s12 + $0x1d0] sm:$0xff]  ;;  %1338 = vst [vmem:[%s1441_s16 + $0x40] sm:$0xff] %v1337_v13   ;;  %969 = vst [vmem:[%s1441_s16 + $0x4c] sm:$0x7] %v968_v20  ;;  %v844_v26 = vmax.bf16 %v612_v15, %v380_v2  ;;  %v383_v28 = vmax.bf16 %v179_v9, %v175_v3  ;;  %v384_v29 = vmax.bf16 %v180_v10, %v176_v4 }
  0x28   : > { %v187_v30 = vld [vmem:[%s1424_s12 + $0x1f0] sm:$0xff]  ;;  %v184_v31 = vld [vmem:[%s1424_s12 + $0x1d8] sm:$0x77]  ;;  %v1339_v33 = vcombine.low %v841_v14, %v842_v21  ;;  %972 = vst [vmem:[%s1441_s16 + $0x58] sm:$0xf] %v843_v22  ;;  %v845_v34 = vmax.bf16 %v613_v24, %v381_v8  ;;  %v385_v35 = vmax.bf16 %v185_v18, %v181_v12  ;;  %v386_v36 = vmax.bf16 %v186_v19, %v182_v17  ;;  %v189_v37 = vld [vmem:[%s1424_s12 + $0x200] sm:$0xff] }
  0x29   : > { %v188_v32 = vld [vmem:[%s1424_s12 + $0x1f8] sm:$0x77]  ;;  %v193_v38 = vld [vmem:[%s1424_s12 + $0x220] sm:$0xff]  ;;  %v974_v39 = vsel %vm1434_vm2, %v844_v26, %v973_v23  ;;  %v846_v40 = vmax.bf16 %v614_v27, %v382_v16  ;;  %v615_v41 = vrot.slane %v383_v28, 4  ;;  %v616_v42 = vrot.slane %v384_v29, 4  ;;  %v190_v44 = vld [vmem:[%s1424_s12 + $0x208] sm:$0xff] }
  0x2a   : > { %v979_v43 = vld [vmem:[%s1441_s16 + $0x6c] sm:$0x7]  ;;  %1340 = vst [vmem:[%s1441_s16 + $0x50] sm:$0xff] %v1339_v33   ;;  %975 = vst [vmem:[%s1441_s16 + $0x5c] sm:$0x7] %v974_v39  ;;  %v617_v45 = vrot.slane %v385_v35, 4  ;;  %v387_v47 = vmax.bf16 %v187_v30, %v183_v25  ;;  %v388_v48 = vmax.bf16 %v188_v32, %v184_v31  ;;  %v389_v56 = vmax.bf16 %v193_v38, %v189_v37 }
  0x2b   : > { %v618_v46 = vrot.slane %v386_v36, 4  ;;  %v194_v49 = vld [vmem:[%s1424_s12 + $0x228] sm:$0xff]  ;;  %v191_v50 = vld [vmem:[%s1424_s12 + $0x210] sm:$0xff]  ;;  %v1341_v52 = vcombine.low %v845_v34, %v846_v40  ;;  %v847_v53 = vmax.bf16 %v615_v41, %v383_v28  ;;  %v848_v54 = vmax.bf16 %v616_v42, %v384_v29  ;;  %v985_v55 = vld [vmem:[%s1441_s16 + $0x7c] sm:$0x7] }
  0x2c   : > { %v195_v51 = vld [vmem:[%s1424_s12 + $0x230] sm:$0xff]  ;;  %v192_v57 = vld [vmem:[%s1424_s12 + $0x218] sm:$0x77]  ;;  %v849_v59 = vmax.bf16 %v617_v45, %v385_v35  ;;  %v619_v61 = vrot.slane %v387_v47, 4  ;;  %v620_v62 = vrot.slane %v388_v48, 4  ;;  %v197_v63 = vld [vmem:[%s1424_s12 + $0x240] sm:$0xff]  ;;  %v390_v3 = vmax.bf16 %v194_v49, %v190_v44 }
  0x2d   : > { %v196_v58 = vld [vmem:[%s1424_s12 + $0x238] sm:$0x77]  ;;  %v850_v60 = vmax.bf16 %v618_v46, %v386_v36  ;;  %v198_v0 = vld [vmem:[%s1424_s12 + $0x248] sm:$0xff]  ;;  %v201_v1 = vld [vmem:[%s1424_s12 + $0x260] sm:$0xff]  ;;  %1342 = vst [vmem:[%s1441_s16 + $0x60] sm:$0xff] %v1341_v52   ;;  %v980_v2 = vsel %vm1434_vm2, %v848_v54, %v979_v43  ;;  %v621_v4 = vrot.slane %v389_v56, 4  ;;  %v391_v5 = vmax.bf16 %v195_v51, %v191_v50 }
  0x2e   : > { %978 = vst [vmem:[%s1441_s16 + $0x68] sm:$0xf] %v847_v53  ;;  %v202_v6 = vld [vmem:[%s1424_s12 + $0x268] sm:$0xff]  ;;  %v199_v7 = vld [vmem:[%s1424_s12 + $0x250] sm:$0xff]  ;;  %981 = vst [vmem:[%s1441_s16 + $0x6c] sm:$0x7] %v980_v2  ;;  %v851_v10 = vmax.bf16 %v619_v61, %v387_v47  ;;  %v852_v12 = vmax.bf16 %v620_v62, %v388_v48  ;;  %v392_v13 = vmax.bf16 %v196_v58, %v192_v57 }
  0x2f   : > { %v203_v8 = vld [vmem:[%s1424_s12 + $0x270] sm:$0xff]  ;;  %v1343_v9 = vcombine.low %v849_v59, %v850_v60  ;;  %v200_v14 = vld [vmem:[%s1424_s12 + $0x258] sm:$0x77]  ;;  %v622_v16 = vrot.slane %v390_v3, 4  ;;  %v853_v17 = vmax.bf16 %v621_v4, %v389_v56  ;;  %v623_v18 = vrot.slane %v391_v5, 4  ;;  %v205_v20 = vld [vmem:[%s1424_s12 + $0x280] sm:$0xff] }
  0x30   : > { %v204_v15 = vld [vmem:[%s1424_s12 + $0x278] sm:$0x77]  ;;  %v393_v19 = vmax.bf16 %v201_v1, %v197_v63  ;;  %v209_v21 = vld [vmem:[%s1424_s12 + $0x2a0] sm:$0xff]  ;;  %984 = vst [vmem:[%s1441_s16 + $0x78] sm:$0xf] %v851_v10  ;;  %v986_v22 = vsel %vm1434_vm2, %v852_v12, %v985_v55  ;;  %v624_v23 = vrot.slane %v392_v13, 4  ;;  %v394_v24 = vmax.bf16 %v202_v6, %v198_v0 }
  0x31   : > { %1344 = vst [vmem:[%s1441_s16 + $0x70] sm:$0xff] %v1343_v9   ;;  %v395_v25 = vmax.bf16 %v203_v8, %v199_v7  ;;  %v206_v26 = vld [vmem:[%s1424_s12 + $0x288] sm:$0xff]  ;;  %987 = vst [vmem:[%s1441_s16 + $0x7c] sm:$0x7] %v986_v22  ;;  %v854_v28 = vmax.bf16 %v622_v16, %v390_v3  ;;  %v855_v29 = vmax.bf16 %v623_v18, %v391_v5  ;;  %v207_v33 = vld [vmem:[%s1424_s12 + $0x290] sm:$0xff] }
  0x32   : > { %v210_v27 = vld [vmem:[%s1424_s12 + $0x2a8] sm:$0xff]  ;;  %v625_v31 = vrot.slane %v393_v19, 4  ;;  %v396_v32 = vmax.bf16 %v204_v15, %v200_v14  ;;  %v208_v34 = vld [vmem:[%s1424_s12 + $0x298] sm:$0x77]  ;;  %v856_v35 = vmax.bf16 %v624_v23, %v392_v13  ;;  %v626_v36 = vrot.slane %v394_v24, 4  ;;  %v211_v39 = vld [vmem:[%s1424_s12 + $0x2b0] sm:$0xff] }
  0x33   : > { %v991_v30 = vld [vmem:[%s1441_s16 + $0x8c] sm:$0x7]  ;;  %v627_v37 = vrot.slane %v395_v25, 4  ;;  %v397_v38 = vmax.bf16 %v209_v21, %v205_v20  ;;  %v212_v40 = vld [vmem:[%s1424_s12 + $0x2b8] sm:$0x77]  ;;  %v213_v41 = vld [vmem:[%s1424_s12 + $0x2c0] sm:$0xff]  ;;  %v1345_v42 = vcombine.low %v853_v17, %v854_v28  ;;  %v398_v45 = vmax.bf16 %v210_v27, %v206_v26 }
  0x34   : > { %990 = vst [vmem:[%s1441_s16 + $0x88] sm:$0xf] %v855_v29  ;;  %v857_v43 = vmax.bf16 %v625_v31, %v393_v19  ;;  %v628_v44 = vrot.slane %v396_v32, 4  ;;  %v214_v46 = vld [vmem:[%s1424_s12 + $0x2c8] sm:$0xff]  ;;  %v217_v47 = vld [vmem:[%s1424_s12 + $0x2e0] sm:$0xff]  ;;  %v992_v49 = vsel %vm1434_vm2, %v856_v35, %v991_v30  ;;  %v858_v50 = vmax.bf16 %v626_v36, %v394_v24  ;;  %v215_v54 = vld [vmem:[%s1424_s12 + $0x2d0] sm:$0xff] }
  0x35   : > { %v218_v48 = vld [vmem:[%s1424_s12 + $0x2e8] sm:$0xff]  ;;  %v859_v51 = vmax.bf16 %v627_v37, %v395_v25  ;;  %v997_v52 = vld [vmem:[%s1441_s16 + $0x9c] sm:$0x7]  ;;  %v629_v53 = vrot.slane %v397_v38, 4  ;;  %1346 = vst [vmem:[%s1441_s16 + $0x80] sm:$0xff] %v1345_v42   ;;  %v630_v56 = vrot.slane %v398_v45, 4  ;;  %v399_v57 = vmax.bf16 %v211_v39, %v207_v33 }
  0x36   : > { %993 = vst [vmem:[%s1441_s16 + $0x8c] sm:$0x7] %v992_v49  ;;  %v860_v55 = vmax.bf16 %v628_v44, %v396_v32  ;;  %v400_v58 = vmax.bf16 %v212_v40, %v208_v34  ;;  %v219_v59 = vld [vmem:[%s1424_s12 + $0x2f0] sm:$0xff]  ;;  %v216_v60 = vld [vmem:[%s1424_s12 + $0x2d8] sm:$0x77]  ;;  %v1347_v62 = vcombine.low %v857_v43, %v858_v50  ;;  %v401_v0 = vmax.bf16 %v217_v47, %v213_v41  ;;  %v221_v2 = vld [vmem:[%s1424_s12 + $0x300] sm:$0xff] }
  0x37   : > { %v220_v61 = vld [vmem:[%s1424_s12 + $0x2f8] sm:$0x77]  ;;  %996 = vst [vmem:[%s1441_s16 + $0x98] sm:$0xf] %v859_v51  ;;  %v861_v63 = vmax.bf16 %v629_v53, %v397_v38  ;;  %v402_v1 = vmax.bf16 %v218_v48, %v214_v46  ;;  %v225_v3 = vld [vmem:[%s1424_s12 + $0x320] sm:$0xff]  ;;  %v862_v5 = vmax.bf16 %v630_v56, %v398_v45  ;;  %v631_v6 = vrot.slane %v399_v57, 4 }
  0x38   : > { %v998_v4 = vsel %vm1434_vm2, %v860_v55, %v997_v52  ;;  %v632_v7 = vrot.slane %v400_v58, 4  ;;  %v1003_v8 = vld [vmem:[%s1441_s16 + $0xac] sm:$0x7]  ;;  %1348 = vst [vmem:[%s1441_s16 + $0x90] sm:$0xff] %v1347_v62   ;;  %v633_v10 = vrot.slane %v401_v0, 4  ;;  %v403_v13 = vmax.bf16 %v219_v59, %v215_v54  ;;  %v223_v16 = vld [vmem:[%s1424_s12 + $0x310] sm:$0xff] }
  0x39   : > { %v222_v9 = vld [vmem:[%s1424_s12 + $0x308] sm:$0xff]  ;;  %999 = vst [vmem:[%s1441_s16 + $0x9c] sm:$0x7] %v998_v4  ;;  %v634_v12 = vrot.slane %v402_v1, 4  ;;  %v404_v14 = vmax.bf16 %v220_v61, %v216_v60  ;;  %v227_v17 = vld [vmem:[%s1424_s12 + $0x330] sm:$0xff]  ;;  %v1349_v18 = vcombine.low %v861_v63, %v862_v5  ;;  %v863_v19 = vmax.bf16 %v631_v6, %v399_v57  ;;  %v229_v29 = vld [vmem:[%s1424_s12 + $0x340] sm:$0xff] }
  0x3a   : > { %v226_v15 = vld [vmem:[%s1424_s12 + $0x328] sm:$0xff]  ;;  %v864_v20 = vmax.bf16 %v632_v7, %v400_v58  ;;  %v1009_v21 = vld [vmem:[%s1441_s16 + $0xbc] sm:$0x7]  ;;  %v405_v22 = vmax.bf16 %v225_v3, %v221_v2  ;;  %v865_v25 = vmax.bf16 %v633_v10, %v401_v0  ;;  %v635_v27 = vrot.slane %v403_v13, 4  ;;  %v233_v31 = vld [vmem:[%s1424_s12 + $0x360] sm:$0xff] }
  0x3b   : > { %v224_v23 = vld [vmem:[%s1424_s12 + $0x318] sm:$0x77]  ;;  %v866_v26 = vmax.bf16 %v634_v12, %v402_v1  ;;  %v636_v28 = vrot.slane %v404_v14, 4  ;;  %v230_v30 = vld [vmem:[%s1424_s12 + $0x348] sm:$0xff]  ;;  %1350 = vst [vmem:[%s1441_s16 + $0xa0] sm:$0xff] %v1349_v18   ;;  %v406_v33 = vmax.bf16 %v226_v15, %v222_v9  ;;  %v407_v35 = vmax.bf16 %v227_v17, %v223_v16  ;;  %v231_v37 = vld [vmem:[%s1424_s12 + $0x350] sm:$0xff] }
  0x3c   : > { %v228_v24 = vld [vmem:[%s1424_s12 + $0x338] sm:$0x77]  ;;  %1002 = vst [vmem:[%s1441_s16 + $0xa8] sm:$0xf] %v863_v19  ;;  %v1004_v32 = vsel %vm1434_vm2, %v864_v20, %v1003_v8  ;;  %v637_v34 = vrot.slane %v405_v22, 4  ;;  %v234_v36 = vld [vmem:[%s1424_s12 + $0x368] sm:$0xff]  ;;  %v867_v40 = vmax.bf16 %v635_v27, %v403_v13  ;;  %v409_v48 = vmax.bf16 %v233_v31, %v229_v29 }
  0x3d   : > { %v235_v38 = vld [vmem:[%s1424_s12 + $0x370] sm:$0xff]  ;;  %1005 = vst [vmem:[%s1441_s16 + $0xac] sm:$0x7] %v1004_v32  ;;  %v1351_v39 = vcombine.low %v865_v25, %v866_v26  ;;  %v868_v41 = vmax.bf16 %v636_v28, %v404_v14  ;;  %v408_v42 = vmax.bf16 %v228_v24, %v224_v23  ;;  %v232_v43 = vld [vmem:[%s1424_s12 + $0x358] sm:$0x77]  ;;  %v638_v45 = vrot.slane %v406_v33, 4 }
  0x3e   : > { %v236_v44 = vld [vmem:[%s1424_s12 + $0x378] sm:$0x77]  ;;  %v869_v46 = vmax.bf16 %v637_v34, %v405_v22  ;;  %v639_v47 = vrot.slane %v407_v35, 4  ;;  %v237_v49 = vld [vmem:[%s1424_s12 + $0x380] sm:$0xff]  ;;  %1008 = vst [vmem:[%s1441_s16 + $0xb8] sm:$0xf] %v867_v40  ;;  %v410_v53 = vmax.bf16 %v234_v36, %v230_v30  ;;  %v411_v54 = vmax.bf16 %v235_v38, %v231_v37 }
  0x3f   : > { %v241_v50 = vld [vmem:[%s1424_s12 + $0x3a0] sm:$0xff]  ;;  %1352 = vst [vmem:[%s1441_s16 + $0xb0] sm:$0xff] %v1351_v39   ;;  %v1010_v51 = vsel %vm1434_vm2, %v868_v41, %v1009_v21  ;;  %v640_v52 = vrot.slane %v408_v42, 4  ;;  %v238_v55 = vld [vmem:[%s1424_s12 + $0x388] sm:$0xff]  ;;  %v870_v57 = vmax.bf16 %v638_v45, %v406_v33  ;;  %v641_v60 = vrot.slane %v409_v48, 4  ;;  %v239_v62 = vld [vmem:[%s1424_s12 + $0x390] sm:$0xff] }
  0x40   : > { %v242_v56 = vld [vmem:[%s1424_s12 + $0x3a8] sm:$0xff]  ;;  %1011 = vst [vmem:[%s1441_s16 + $0xbc] sm:$0x7] %v1010_v51  ;;  %v871_v58 = vmax.bf16 %v639_v47, %v407_v35  ;;  %v412_v61 = vmax.bf16 %v236_v44, %v232_v43  ;;  %v240_v63 = vld [vmem:[%s1424_s12 + $0x398] sm:$0x77]  ;;  %v642_v1 = vrot.slane %v410_v53, 4  ;;  %v413_v3 = vmax.bf16 %v241_v50, %v237_v49 }
  0x41   : > { %v1015_v59 = vld [vmem:[%s1441_s16 + $0xcc] sm:$0x7]  ;;  %v872_v0 = vmax.bf16 %v640_v52, %v408_v42  ;;  %v643_v2 = vrot.slane %v411_v54, 4  ;;  %v243_v4 = vld [vmem:[%s1424_s12 + $0x3b0] sm:$0xff]  ;;  %v244_v5 = vld [vmem:[%s1424_s12 + $0x3b8] sm:$0x77]  ;;  %v1353_v7 = vcombine.low %v869_v46, %v870_v57  ;;  %v873_v8 = vmax.bf16 %v641_v60, %v409_v48 }
  0x42   : > { %v245_v6 = vld [vmem:[%s1424_s12 + $0x3c0] sm:$0xff]  ;;  %1014 = vst [vmem:[%s1441_s16 + $0xc8] sm:$0xf] %v871_v58  ;;  %v644_v9 = vrot.slane %v412_v61, 4  ;;  %v414_v10 = vmax.bf16 %v242_v56, %v238_v55  ;;  %v246_v12 = vld [vmem:[%s1424_s12 + $0x3c8] sm:$0xff]  ;;  %v874_v16 = vmax.bf16 %v642_v1, %v410_v53  ;;  %v645_v19 = vrot.slane %v413_v3, 4 }
  0x43   : > { %v249_v13 = vld [vmem:[%s1424_s12 + $0x3e0] sm:$0xff]  ;;  %v250_v14 = vld [vmem:[%s1424_s12 + $0x3e8] sm:$0xff]  ;;  %v1016_v15 = vsel %vm1434_vm2, %v872_v0, %v1015_v59  ;;  %v875_v17 = vmax.bf16 %v643_v2, %v411_v54  ;;  %v1021_v18 = vld [vmem:[%s1441_s16 + $0xdc] sm:$0x7]  ;;  %1354 = vst [vmem:[%s1441_s16 + $0xc0] sm:$0xff] %v1353_v7   ;;  %v415_v23 = vmax.bf16 %v243_v4, %v239_v62  ;;  %v416_v24 = vmax.bf16 %v244_v5, %v240_v63 }
  0x44   : > { %v247_v20 = vld [vmem:[%s1424_s12 + $0x3d0] sm:$0xff]  ;;  %1017 = vst [vmem:[%s1441_s16 + $0xcc] sm:$0x7] %v1016_v15  ;;  %v876_v21 = vmax.bf16 %v644_v9, %v412_v61  ;;  %v646_v22 = vrot.slane %v414_v10, 4  ;;  %v248_v26 = vld [vmem:[%s1424_s12 + $0x3d8] sm:$0x77]  ;;  %v1355_v28 = vcombine.low %v873_v8, %v874_v16  ;;  %v877_v29 = vmax.bf16 %v645_v19, %v413_v3 }
  0x45   : > { %v251_v25 = vld [vmem:[%s1424_s12 + $0x3f0] sm:$0xff]  ;;  %v252_v27 = vld [vmem:[%s1424_s12 + $0x3f8] sm:$0x77]  ;;  %1020 = vst [vmem:[%s1441_s16 + $0xd8] sm:$0xf] %v875_v17  ;;  %v417_v30 = vmax.bf16 %v249_v13, %v245_v6  ;;  %v418_v31 = vmax.bf16 %v250_v14, %v246_v12  ;;  %v253_v32 = vld [vmem:[%s1424_s12 + $0x400] sm:$0xff] }
  0x46   : > { %v257_v33 = vld [vmem:[%s1424_s12 + $0x420] sm:$0xff]  ;;  %v1022_v34 = vsel %vm1434_vm2, %v876_v21, %v1021_v18  ;;  %v878_v35 = vmax.bf16 %v646_v22, %v414_v10  ;;  %v647_v36 = vrot.slane %v415_v23, 4  ;;  %v648_v37 = vrot.slane %v416_v24, 4  ;;  %v1027_v38 = vld [vmem:[%s1441_s16 + $0xec] sm:$0x7]  ;;  %1356 = vst [vmem:[%s1441_s16 + $0xd0] sm:$0xff] %v1355_v28  }
  0x47   : > { %v254_v39 = vld [vmem:[%s1424_s12 + $0x408] sm:$0xff]  ;;  %1023 = vst [vmem:[%s1441_s16 + $0xdc] sm:$0x7] %v1022_v34  ;;  %v649_v40 = vrot.slane %v417_v30, 4  ;;  %v650_v41 = vrot.slane %v418_v31, 4  ;;  %v419_v42 = vmax.bf16 %v251_v25, %v247_v20  ;;  %v420_v43 = vmax.bf16 %v252_v27, %v248_v26  ;;  %v255_v45 = vld [vmem:[%s1424_s12 + $0x410] sm:$0xff] }
  0x48   : > { %v258_v44 = vld [vmem:[%s1424_s12 + $0x428] sm:$0xff]  ;;  %v259_v46 = vld [vmem:[%s1424_s12 + $0x430] sm:$0xff]  ;;  %v1357_v47 = vcombine.low %v877_v29, %v878_v35  ;;  %v879_v48 = vmax.bf16 %v647_v36, %v415_v23  ;;  %v880_v49 = vmax.bf16 %v648_v37, %v416_v24  ;;  %v1033_v50 = vld [vmem:[%s1441_s16 + $0xfc] sm:$0x7]  ;;  %v421_v51 = vmax.bf16 %v257_v33, %v253_v32 }
  0x49   : > { %v256_v52 = vld [vmem:[%s1424_s12 + $0x418] sm:$0x77]  ;;  %v881_v54 = vmax.bf16 %v649_v40, %v417_v30  ;;  %v882_v55 = vmax.bf16 %v650_v41, %v418_v31  ;;  %v651_v56 = vrot.slane %v419_v42, 4  ;;  %v652_v57 = vrot.slane %v420_v43, 4  ;;  %v261_v58 = vld [vmem:[%s1424_s12 + $0x440] sm:$0xff]  ;;  %v262_v59 = vld [vmem:[%s1424_s12 + $0x448] sm:$0xff] }
  0x4a   : > { %v260_v53 = vld [vmem:[%s1424_s12 + $0x438] sm:$0x77]  ;;  %v265_v60 = vld [vmem:[%s1424_s12 + $0x460] sm:$0xff]  ;;  %1358 = vst [vmem:[%s1441_s16 + $0xe0] sm:$0xff] %v1357_v47   ;;  %1026 = vst [vmem:[%s1441_s16 + $0xe8] sm:$0xf] %v879_v48  ;;  %v1028_v61 = vsel %vm1434_vm2, %v880_v49, %v1027_v38  ;;  %v422_v62 = vmax.bf16 %v258_v44, %v254_v39  ;;  %v423_v0 = vmax.bf16 %v259_v46, %v255_v45 }
  0x4b   : > { %v653_v63 = vrot.slane %v421_v51, 4  ;;  %v266_v1 = vld [vmem:[%s1424_s12 + $0x468] sm:$0xff]  ;;  %v263_v2 = vld [vmem:[%s1424_s12 + $0x450] sm:$0xff]  ;;  %1029 = vst [vmem:[%s1441_s16 + $0xec] sm:$0x7] %v1028_v61  ;;  %v1359_v4 = vcombine.low %v881_v54, %v882_v55  ;;  %v883_v5 = vmax.bf16 %v651_v56, %v419_v42  ;;  %v884_v6 = vmax.bf16 %v652_v57, %v420_v43  ;;  %v269_v15 = vld [vmem:[%s1424_s12 + $0x480] sm:$0xff] }
  0x4c   : > { %v267_v3 = vld [vmem:[%s1424_s12 + $0x470] sm:$0xff]  ;;  %v424_v7 = vmax.bf16 %v260_v53, %v256_v52  ;;  %v264_v8 = vld [vmem:[%s1424_s12 + $0x458] sm:$0x77]  ;;  %v654_v10 = vrot.slane %v422_v62, 4  ;;  %v655_v13 = vrot.slane %v423_v0, 4  ;;  %v425_v14 = vmax.bf16 %v265_v60, %v261_v58  ;;  %v273_v16 = vld [vmem:[%s1424_s12 + $0x4a0] sm:$0xff] }
  0x4d   : > { %v268_v9 = vld [vmem:[%s1424_s12 + $0x478] sm:$0x77]  ;;  %v885_v12 = vmax.bf16 %v653_v63, %v421_v51  ;;  %1360 = vst [vmem:[%s1441_s16 + $0xf0] sm:$0xff] %v1359_v4   ;;  %1032 = vst [vmem:[%s1441_s16 + $0xf8] sm:$0xf] %v883_v5  ;;  %v1034_v17 = vsel %vm1434_vm2, %v884_v6, %v1033_v50  ;;  %v426_v19 = vmax.bf16 %v266_v1, %v262_v59  ;;  %v270_v21 = vld [vmem:[%s1424_s12 + $0x488] sm:$0xff] }
  0x4e   : > { %v656_v18 = vrot.slane %v424_v7, 4  ;;  %v427_v20 = vmax.bf16 %v267_v3, %v263_v2  ;;  %v274_v22 = vld [vmem:[%s1424_s12 + $0x4a8] sm:$0xff]  ;;  %1035 = vst [vmem:[%s1441_s16 + $0xfc] sm:$0x7] %v1034_v17  ;;  %v886_v23 = vmax.bf16 %v654_v10, %v422_v62  ;;  %v887_v24 = vmax.bf16 %v655_v13, %v423_v0  ;;  %v271_v28 = vld [vmem:[%s1424_s12 + $0x490] sm:$0xff]  ;;  %v277_v36 = vld [vmem:[%s1424_s12 + $0x4c0] sm:$0xff] }
  0x4f   : > { %v1039_v25 = vld [vmem:[%s1441_s16 + $0x10c] sm:$0x7]  ;;  %v657_v26 = vrot.slane %v425_v14, 4  ;;  %v428_v27 = vmax.bf16 %v268_v9, %v264_v8  ;;  %v272_v29 = vld [vmem:[%s1424_s12 + $0x498] sm:$0x77]  ;;  %v658_v31 = vrot.slane %v426_v19, 4  ;;  %v429_v33 = vmax.bf16 %v273_v16, %v269_v15 }
  0x50   : > { %v888_v30 = vmax.bf16 %v656_v18, %v424_v7  ;;  %v659_v32 = vrot.slane %v427_v20, 4  ;;  %v275_v34 = vld [vmem:[%s1424_s12 + $0x4b0] sm:$0xff]  ;;  %v276_v35 = vld [vmem:[%s1424_s12 + $0x4b8] sm:$0x77]  ;;  %v1361_v37 = vcombine.low %v885_v12, %v886_v23  ;;  %1038 = vst [vmem:[%s1441_s16 + $0x108] sm:$0xf] %v887_v24  ;;  %v430_v40 = vmax.bf16 %v274_v22, %v270_v21 }
  0x51   : > { %v889_v38 = vmax.bf16 %v657_v26, %v425_v14  ;;  %v660_v39 = vrot.slane %v428_v27, 4  ;;  %v278_v41 = vld [vmem:[%s1424_s12 + $0x4c8] sm:$0xff]  ;;  %v281_v42 = vld [vmem:[%s1424_s12 + $0x4e0] sm:$0xff]  ;;  %v890_v45 = vmax.bf16 %v658_v31, %v426_v19  ;;  %v1045_v47 = vld [vmem:[%s1441_s16 + $0x11c] sm:$0x7]  ;;  %v661_v48 = vrot.slane %v429_v33, 4 }
  0x52   : > { %v282_v43 = vld [vmem:[%s1424_s12 + $0x4e8] sm:$0xff]  ;;  %v1040_v44 = vsel %vm1434_vm2, %v888_v30, %v1039_v25  ;;  %v891_v46 = vmax.bf16 %v659_v32, %v427_v20  ;;  %v279_v49 = vld [vmem:[%s1424_s12 + $0x4d0] sm:$0xff]  ;;  %1362 = vst [vmem:[%s1441_s16 + $0x100] sm:$0xff] %v1361_v37   ;;  %v662_v51 = vrot.slane %v430_v40, 4  ;;  %v431_v52 = vmax.bf16 %v275_v34, %v271_v28  ;;  %v280_v55 = vld [vmem:[%s1424_s12 + $0x4d8] sm:$0x77] }
  0x53   : > { %1041 = vst [vmem:[%s1441_s16 + $0x10c] sm:$0x7] %v1040_v44  ;;  %v892_v50 = vmax.bf16 %v660_v39, %v428_v27  ;;  %v432_v53 = vmax.bf16 %v276_v35, %v272_v29  ;;  %v283_v54 = vld [vmem:[%s1424_s12 + $0x4f0] sm:$0xff]  ;;  %v284_v56 = vld [vmem:[%s1424_s12 + $0x4f8] sm:$0x77]  ;;  %v1363_v57 = vcombine.low %v889_v38, %v890_v45  ;;  %v893_v58 = vmax.bf16 %v661_v48, %v429_v33  ;;  %v285_v61 = vld [vmem:[%s1424_s12 + $0x500] sm:$0xff] }
  0x54   : > { %1044 = vst [vmem:[%s1441_s16 + $0x118] sm:$0xf] %v891_v46  ;;  %v433_v59 = vmax.bf16 %v281_v42, %v277_v36  ;;  %v434_v60 = vmax.bf16 %v282_v43, %v278_v41  ;;  %v289_v62 = vld [vmem:[%s1424_s12 + $0x520] sm:$0xff]  ;;  %v894_v0 = vmax.bf16 %v662_v51, %v430_v40  ;;  %v663_v1 = vrot.slane %v431_v52, 4  ;;  %v1051_v3 = vld [vmem:[%s1441_s16 + $0x12c] sm:$0x7] }
  0x55   : > { %v1046_v63 = vsel %vm1434_vm2, %v892_v50, %v1045_v47  ;;  %v664_v2 = vrot.slane %v432_v53, 4  ;;  %v286_v4 = vld [vmem:[%s1424_s12 + $0x508] sm:$0xff]  ;;  %1364 = vst [vmem:[%s1441_s16 + $0x110] sm:$0xff] %v1363_v57   ;;  %v435_v7 = vmax.bf16 %v283_v54, %v279_v49  ;;  %v436_v8 = vmax.bf16 %v284_v56, %v280_v55  ;;  %v287_v10 = vld [vmem:[%s1424_s12 + $0x510] sm:$0xff]  ;;  %v1057_v16 = vld [vmem:[%s1441_s16 + $0x13c] sm:$0x7] }
  0x56   : > { %1047 = vst [vmem:[%s1441_s16 + $0x11c] sm:$0x7] %v1046_v63  ;;  %v665_v5 = vrot.slane %v433_v59, 4  ;;  %v666_v6 = vrot.slane %v434_v60, 4  ;;  %v290_v9 = vld [vmem:[%s1424_s12 + $0x528] sm:$0xff]  ;;  %v291_v12 = vld [vmem:[%s1424_s12 + $0x530] sm:$0xff]  ;;  %v1365_v13 = vcombine.low %v893_v58, %v894_v0  ;;  %v895_v14 = vmax.bf16 %v663_v1, %v431_v52 }
  0x57   : > { %v896_v15 = vmax.bf16 %v664_v2, %v432_v53  ;;  %v437_v17 = vmax.bf16 %v289_v62, %v285_v61  ;;  %v288_v18 = vld [vmem:[%s1424_s12 + $0x518] sm:$0x77]  ;;  %v667_v22 = vrot.slane %v435_v7, 4  ;;  %v668_v23 = vrot.slane %v436_v8, 4  ;;  %v293_v24 = vld [vmem:[%s1424_s12 + $0x540] sm:$0xff]  ;;  %v294_v25 = vld [vmem:[%s1424_s12 + $0x548] sm:$0xff] }
  0x58   : > { %v292_v19 = vld [vmem:[%s1424_s12 + $0x538] sm:$0x77]  ;;  %v897_v20 = vmax.bf16 %v665_v5, %v433_v59  ;;  %v898_v21 = vmax.bf16 %v666_v6, %v434_v60  ;;  %v297_v26 = vld [vmem:[%s1424_s12 + $0x560] sm:$0xff]  ;;  %1366 = vst [vmem:[%s1441_s16 + $0x120] sm:$0xff] %v1365_v13   ;;  %1050 = vst [vmem:[%s1441_s16 + $0x128] sm:$0xf] %v895_v14  ;;  %v438_v28 = vmax.bf16 %v290_v9, %v286_v4 }
  0x59   : > { %v1052_v27 = vsel %vm1434_vm2, %v896_v15, %v1051_v3  ;;  %v669_v29 = vrot.slane %v437_v17, 4  ;;  %v439_v30 = vmax.bf16 %v291_v12, %v287_v10  ;;  %v298_v31 = vld [vmem:[%s1424_s12 + $0x568] sm:$0xff]  ;;  %v295_v32 = vld [vmem:[%s1424_s12 + $0x550] sm:$0xff]  ;;  %v899_v35 = vmax.bf16 %v667_v22, %v435_v7  ;;  %v296_v38 = vld [vmem:[%s1424_s12 + $0x558] sm:$0x77] }
  0x5a   : > { %v299_v33 = vld [vmem:[%s1424_s12 + $0x570] sm:$0xff]  ;;  %1053 = vst [vmem:[%s1441_s16 + $0x12c] sm:$0x7] %v1052_v27  ;;  %v1367_v34 = vcombine.low %v897_v20, %v898_v21  ;;  %v900_v36 = vmax.bf16 %v668_v23, %v436_v8  ;;  %v440_v37 = vmax.bf16 %v292_v19, %v288_v18  ;;  %v300_v39 = vld [vmem:[%s1424_s12 + $0x578] sm:$0x77]  ;;  %v670_v40 = vrot.slane %v438_v28, 4 }
  0x5b   : > { %v901_v41 = vmax.bf16 %v669_v29, %v437_v17  ;;  %v671_v42 = vrot.slane %v439_v30, 4  ;;  %v441_v43 = vmax.bf16 %v297_v26, %v293_v24  ;;  %v301_v44 = vld [vmem:[%s1424_s12 + $0x580] sm:$0xff]  ;;  %1056 = vst [vmem:[%s1441_s16 + $0x138] sm:$0xf] %v899_v35  ;;  %v442_v48 = vmax.bf16 %v298_v31, %v294_v25  ;;  %v302_v50 = vld [vmem:[%s1424_s12 + $0x588] sm:$0xff]  ;;  %v303_v57 = vld [vmem:[%s1424_s12 + $0x590] sm:$0xff] }
  0x5c   : > { %v305_v45 = vld [vmem:[%s1424_s12 + $0x5a0] sm:$0xff]  ;;  %1368 = vst [vmem:[%s1441_s16 + $0x130] sm:$0xff] %v1367_v34   ;;  %v1058_v46 = vsel %vm1434_vm2, %v900_v36, %v1057_v16  ;;  %v672_v47 = vrot.slane %v440_v37, 4  ;;  %v443_v49 = vmax.bf16 %v299_v33, %v295_v32  ;;  %v306_v51 = vld [vmem:[%s1424_s12 + $0x5a8] sm:$0xff]  ;;  %v902_v52 = vmax.bf16 %v670_v40, %v438_v28  ;;  %v304_v58 = vld [vmem:[%s1424_s12 + $0x598] sm:$0x77] }
  0x5d   : > { %1059 = vst [vmem:[%s1441_s16 + $0x13c] sm:$0x7] %v1058_v46  ;;  %v903_v53 = vmax.bf16 %v671_v42, %v439_v30  ;;  %v1063_v54 = vld [vmem:[%s1441_s16 + $0x14c] sm:$0x7]  ;;  %v673_v55 = vrot.slane %v441_v43, 4  ;;  %v444_v56 = vmax.bf16 %v300_v39, %v296_v38  ;;  %v674_v60 = vrot.slane %v442_v48, 4 }
  0x5e   : > { %v904_v59 = vmax.bf16 %v672_v47, %v440_v37  ;;  %v675_v61 = vrot.slane %v443_v49, 4  ;;  %v445_v62 = vmax.bf16 %v305_v45, %v301_v44  ;;  %v307_v63 = vld [vmem:[%s1424_s12 + $0x5b0] sm:$0xff]  ;;  %v308_v0 = vld [vmem:[%s1424_s12 + $0x5b8] sm:$0x77]  ;;  %v309_v1 = vld [vmem:[%s1424_s12 + $0x5c0] sm:$0xff]  ;;  %v1369_v2 = vcombine.low %v901_v41, %v902_v52 }
  0x5f   : > { %1062 = vst [vmem:[%s1441_s16 + $0x148] sm:$0xf] %v903_v53  ;;  %v905_v3 = vmax.bf16 %v673_v55, %v441_v43  ;;  %v676_v4 = vrot.slane %v444_v56, 4  ;;  %v446_v5 = vmax.bf16 %v306_v51, %v302_v50  ;;  %v310_v6 = vld [vmem:[%s1424_s12 + $0x5c8] sm:$0xff]  ;;  %v313_v7 = vld [vmem:[%s1424_s12 + $0x5e0] sm:$0xff]  ;;  %v906_v10 = vmax.bf16 %v674_v60, %v442_v48  ;;  %v311_v15 = vld [vmem:[%s1424_s12 + $0x5d0] sm:$0xff] }
  0x60   : > { %v314_v8 = vld [vmem:[%s1424_s12 + $0x5e8] sm:$0xff]  ;;  %v1064_v9 = vsel %vm1434_vm2, %v904_v59, %v1063_v54  ;;  %v907_v12 = vmax.bf16 %v675_v61, %v443_v49  ;;  %v1069_v13 = vld [vmem:[%s1441_s16 + $0x15c] sm:$0x7]  ;;  %v677_v14 = vrot.slane %v445_v62, 4  ;;  %1370 = vst [vmem:[%s1441_s16 + $0x140] sm:$0xff] %v1369_v2   ;;  %v447_v18 = vmax.bf16 %v307_v63, %v303_v57  ;;  %v315_v20 = vld [vmem:[%s1424_s12 + $0x5f0] sm:$0xff] }
  0x61   : > { %1065 = vst [vmem:[%s1441_s16 + $0x14c] sm:$0x7] %v1064_v9  ;;  %v908_v16 = vmax.bf16 %v676_v4, %v444_v56  ;;  %v678_v17 = vrot.slane %v446_v5, 4  ;;  %v448_v19 = vmax.bf16 %v308_v0, %v304_v58  ;;  %v312_v21 = vld [vmem:[%s1424_s12 + $0x5d8] sm:$0x77]  ;;  %v1371_v23 = vcombine.low %v905_v3, %v906_v10  ;;  %v317_v27 = vld [vmem:[%s1424_s12 + $0x600] sm:$0xff] }
  0x62   : > { %v316_v22 = vld [vmem:[%s1424_s12 + $0x5f8] sm:$0x77]  ;;  %1068 = vst [vmem:[%s1441_s16 + $0x158] sm:$0xf] %v907_v12  ;;  %v909_v24 = vmax.bf16 %v677_v14, %v445_v62  ;;  %v449_v25 = vmax.bf16 %v313_v7, %v309_v1  ;;  %v450_v26 = vmax.bf16 %v314_v8, %v310_v6  ;;  %v321_v28 = vld [vmem:[%s1424_s12 + $0x620] sm:$0xff]  ;;  %v679_v31 = vrot.slane %v447_v18, 4 }
  0x63   : > { %v1070_v29 = vsel %vm1434_vm2, %v908_v16, %v1069_v13  ;;  %v910_v30 = vmax.bf16 %v678_v17, %v446_v5  ;;  %v680_v32 = vrot.slane %v448_v19, 4  ;;  %v1075_v33 = vld [vmem:[%s1441_s16 + $0x16c] sm:$0x7]  ;;  %1372 = vst [vmem:[%s1441_s16 + $0x150] sm:$0xff] %v1371_v23   ;;  %v451_v37 = vmax.bf16 %v315_v20, %v311_v15  ;;  %v319_v40 = vld [vmem:[%s1424_s12 + $0x610] sm:$0xff]  ;;  %v325_v53 = vld [vmem:[%s1424_s12 + $0x640] sm:$0xff] }
  0x64   : > { %v318_v34 = vld [vmem:[%s1424_s12 + $0x608] sm:$0xff]  ;;  %1071 = vst [vmem:[%s1441_s16 + $0x15c] sm:$0x7] %v1070_v29  ;;  %v681_v35 = vrot.slane %v449_v25, 4  ;;  %v682_v36 = vrot.slane %v450_v26, 4  ;;  %v452_v38 = vmax.bf16 %v316_v22, %v312_v21  ;;  %v323_v41 = vld [vmem:[%s1424_s12 + $0x630] sm:$0xff]  ;;  %v911_v43 = vmax.bf16 %v679_v31, %v447_v18 }
  0x65   : > { %v322_v39 = vld [vmem:[%s1424_s12 + $0x628] sm:$0xff]  ;;  %v1373_v42 = vcombine.low %v909_v24, %v910_v30  ;;  %v912_v44 = vmax.bf16 %v680_v32, %v448_v19  ;;  %v1081_v45 = vld [vmem:[%s1441_s16 + $0x17c] sm:$0x7]  ;;  %v453_v46 = vmax.bf16 %v321_v28, %v317_v27  ;;  %v683_v51 = vrot.slane %v451_v37, 4  ;;  %v329_v55 = vld [vmem:[%s1424_s12 + $0x660] sm:$0xff] }
  0x66   : > { %v320_v47 = vld [vmem:[%s1424_s12 + $0x618] sm:$0x77]  ;;  %v913_v49 = vmax.bf16 %v681_v35, %v449_v25  ;;  %v914_v50 = vmax.bf16 %v682_v36, %v450_v26  ;;  %v684_v52 = vrot.slane %v452_v38, 4  ;;  %v326_v54 = vld [vmem:[%s1424_s12 + $0x648] sm:$0xff]  ;;  %1074 = vst [vmem:[%s1441_s16 + $0x168] sm:$0xf] %v911_v43  ;;  %v454_v57 = vmax.bf16 %v322_v39, %v318_v34 }
  0x67   : > { %v324_v48 = vld [vmem:[%s1424_s12 + $0x638] sm:$0x77]  ;;  %1374 = vst [vmem:[%s1441_s16 + $0x160] sm:$0xff] %v1373_v42   ;;  %v1076_v56 = vsel %vm1434_vm2, %v912_v44, %v1075_v33  ;;  %v685_v58 = vrot.slane %v453_v46, 4  ;;  %v455_v59 = vmax.bf16 %v323_v41, %v319_v40  ;;  %v330_v60 = vld [vmem:[%s1424_s12 + $0x668] sm:$0xff]  ;;  %v327_v61 = vld [vmem:[%s1424_s12 + $0x650] sm:$0xff]  ;;  %v915_v0 = vmax.bf16 %v683_v51, %v451_v37 }
  0x68   : > { %v331_v62 = vld [vmem:[%s1424_s12 + $0x670] sm:$0xff]  ;;  %1077 = vst [vmem:[%s1441_s16 + $0x16c] sm:$0x7] %v1076_v56  ;;  %v1375_v63 = vcombine.low %v913_v49, %v914_v50  ;;  %v916_v1 = vmax.bf16 %v684_v52, %v452_v38  ;;  %v456_v2 = vmax.bf16 %v324_v48, %v320_v47  ;;  %v328_v3 = vld [vmem:[%s1424_s12 + $0x658] sm:$0x77]  ;;  %v686_v5 = vrot.slane %v454_v57, 4 }
  0x69   : > { %v332_v4 = vld [vmem:[%s1424_s12 + $0x678] sm:$0x77]  ;;  %v917_v6 = vmax.bf16 %v685_v58, %v453_v46  ;;  %v687_v7 = vrot.slane %v455_v59, 4  ;;  %v457_v8 = vmax.bf16 %v329_v55, %v325_v53  ;;  %v333_v9 = vld [vmem:[%s1424_s12 + $0x680] sm:$0xff]  ;;  %1080 = vst [vmem:[%s1441_s16 + $0x178] sm:$0xf] %v915_v0  ;;  %v458_v14 = vmax.bf16 %v330_v60, %v326_v54 }
  0x6a   : > { %v337_v10 = vld [vmem:[%s1424_s12 + $0x6a0] sm:$0xff]  ;;  %1376 = vst [vmem:[%s1441_s16 + $0x170] sm:$0xff] %v1375_v63   ;;  %v1082_v12 = vsel %vm1434_vm2, %v916_v1, %v1081_v45  ;;  %v688_v13 = vrot.slane %v456_v2, 4  ;;  %v459_v15 = vmax.bf16 %v331_v62, %v327_v61  ;;  %v334_v16 = vld [vmem:[%s1424_s12 + $0x688] sm:$0xff]  ;;  %v918_v18 = vmax.bf16 %v686_v5, %v454_v57  ;;  %v335_v23 = vld [vmem:[%s1424_s12 + $0x690] sm:$0xff] }
  0x6b   : > { %v338_v17 = vld [vmem:[%s1424_s12 + $0x6a8] sm:$0xff]  ;;  %1083 = vst [vmem:[%s1441_s16 + $0x17c] sm:$0x7] %v1082_v12  ;;  %v919_v19 = vmax.bf16 %v687_v7, %v455_v59  ;;  %v689_v21 = vrot.slane %v457_v8, 4  ;;  %v460_v22 = vmax.bf16 %v332_v4, %v328_v3  ;;  %v336_v24 = vld [vmem:[%s1424_s12 + $0x698] sm:$0x77]  ;;  %v461_v28 = vmax.bf16 %v337_v10, %v333_v9 }
  0x6c   : > { %v1087_v20 = vld [vmem:[%s1441_s16 + $0x18c] sm:$0x7]  ;;  %v920_v25 = vmax.bf16 %v688_v13, %v456_v2  ;;  %v690_v26 = vrot.slane %v458_v14, 4  ;;  %v691_v27 = vrot.slane %v459_v15, 4  ;;  %v339_v29 = vld [vmem:[%s1424_s12 + $0x6b0] sm:$0xff]  ;;  %v341_v31 = vld [vmem:[%s1424_s12 + $0x6c0] sm:$0xff]  ;;  %v1377_v32 = vcombine.low %v917_v6, %v918_v18 }
  0x6d   : > { %v340_v30 = vld [vmem:[%s1424_s12 + $0x6b8] sm:$0x77]  ;;  %1086 = vst [vmem:[%s1441_s16 + $0x188] sm:$0xf] %v919_v19  ;;  %v921_v33 = vmax.bf16 %v689_v21, %v457_v8  ;;  %v692_v34 = vrot.slane %v460_v22, 4  ;;  %v462_v35 = vmax.bf16 %v338_v17, %v334_v16  ;;  %v342_v36 = vld [vmem:[%s1424_s12 + $0x6c8] sm:$0xff]  ;;  %v463_v47 = vmax.bf16 %v339_v29, %v335_v23 }
  0x6e   : > { %v345_v37 = vld [vmem:[%s1424_s12 + $0x6e0] sm:$0xff]  ;;  %v346_v38 = vld [vmem:[%s1424_s12 + $0x6e8] sm:$0xff]  ;;  %v1088_v39 = vsel %vm1434_vm2, %v920_v25, %v1087_v20  ;;  %v922_v40 = vmax.bf16 %v690_v26, %v458_v14  ;;  %v923_v41 = vmax.bf16 %v691_v27, %v459_v15  ;;  %v1093_v42 = vld [vmem:[%s1441_s16 + $0x19c] sm:$0x7]  ;;  %v693_v43 = vrot.slane %v461_v28, 4  ;;  %1378 = vst [vmem:[%s1441_s16 + $0x180] sm:$0xff] %v1377_v32  }
  0x6f   : > { %v343_v44 = vld [vmem:[%s1424_s12 + $0x6d0] sm:$0xff]  ;;  %1089 = vst [vmem:[%s1441_s16 + $0x18c] sm:$0x7] %v1088_v39  ;;  %v924_v45 = vmax.bf16 %v692_v34, %v460_v22  ;;  %v694_v46 = vrot.slane %v462_v35, 4  ;;  %v464_v48 = vmax.bf16 %v340_v30, %v336_v24  ;;  %v344_v50 = vld [vmem:[%s1424_s12 + $0x6d8] sm:$0x77]  ;;  %v465_v54 = vmax.bf16 %v345_v37, %v341_v31 }
  0x70   : > { %v347_v49 = vld [vmem:[%s1424_s12 + $0x6f0] sm:$0xff]  ;;  %v348_v51 = vld [vmem:[%s1424_s12 + $0x6f8] sm:$0x77]  ;;  %v1379_v52 = vcombine.low %v921_v33, %v922_v40  ;;  %1092 = vst [vmem:[%s1441_s16 + $0x198] sm:$0xf] %v923_v41  ;;  %v925_v53 = vmax.bf16 %v693_v43, %v461_v28  ;;  %v466_v55 = vmax.bf16 %v346_v38, %v342_v36  ;;  %v349_v56 = vld [vmem:[%s1424_s12 + $0x700] sm:$0xff] }
  0x71   : > { %v353_v57 = vld [vmem:[%s1424_s12 + $0x720] sm:$0xff]  ;;  %v1094_v58 = vsel %vm1434_vm2, %v924_v45, %v1093_v42  ;;  %v926_v59 = vmax.bf16 %v694_v46, %v462_v35  ;;  %v695_v60 = vrot.slane %v463_v47, 4  ;;  %v696_v61 = vrot.slane %v464_v48, 4  ;;  %v1099_v62 = vld [vmem:[%s1441_s16 + $0x1ac] sm:$0x7]  ;;  %v351_v5 = vld [vmem:[%s1424_s12 + $0x710] sm:$0xff] }
  0x72   : > { %v350_v63 = vld [vmem:[%s1424_s12 + $0x708] sm:$0xff]  ;;  %1380 = vst [vmem:[%s1441_s16 + $0x190] sm:$0xff] %v1379_v52   ;;  %1095 = vst [vmem:[%s1441_s16 + $0x19c] sm:$0x7] %v1094_v58  ;;  %v697_v0 = vrot.slane %v465_v54, 4  ;;  %v698_v1 = vrot.slane %v466_v55, 4  ;;  %v467_v2 = vmax.bf16 %v347_v49, %v343_v44  ;;  %v468_v3 = vmax.bf16 %v348_v51, %v344_v50 }
  0x73   : > { %v354_v4 = vld [vmem:[%s1424_s12 + $0x728] sm:$0xff]  ;;  %v355_v6 = vld [vmem:[%s1424_s12 + $0x730] sm:$0xff]  ;;  %v1381_v7 = vcombine.low %v925_v53, %v926_v59  ;;  %v927_v8 = vmax.bf16 %v695_v60, %v463_v47  ;;  %v928_v9 = vmax.bf16 %v696_v61, %v464_v48  ;;  %v469_v10 = vmax.bf16 %v353_v57, %v349_v56  ;;  %v352_v12 = vld [vmem:[%s1424_s12 + $0x718] sm:$0x77] }
  0x74   : > { %v356_v13 = vld [vmem:[%s1424_s12 + $0x738] sm:$0x77]  ;;  %v929_v14 = vmax.bf16 %v697_v0, %v465_v54  ;;  %v930_v15 = vmax.bf16 %v698_v1, %v466_v55  ;;  %v699_v16 = vrot.slane %v467_v2, 4  ;;  %v700_v17 = vrot.slane %v468_v3, 4  ;;  %v1111_v34 = vld [vmem:[%s1441_s16 + $0x1cc] sm:$0x7] }
  0x75   : > { %1382 = vst [vmem:[%s1441_s16 + $0x1a0] sm:$0xff] %v1381_v7   ;;  %1098 = vst [vmem:[%s1441_s16 + $0x1a8] sm:$0xf] %v927_v8  ;;  %v1100_v18 = vsel %vm1434_vm2, %v928_v9, %v1099_v62  ;;  %v1105_v19 = vld [vmem:[%s1441_s16 + $0x1bc] sm:$0x7]  ;;  %v470_v20 = vmax.bf16 %v354_v4, %v350_v63  ;;  %v701_v21 = vrot.slane %v469_v10, 4  ;;  %v471_v22 = vmax.bf16 %v355_v6, %v351_v5 }
  0x76   : > { %1101 = vst [vmem:[%s1441_s16 + $0x1ac] sm:$0x7] %v1100_v18  ;;  %v1383_v23 = vcombine.low %v929_v14, %v930_v15  ;;  %v931_v24 = vmax.bf16 %v699_v16, %v467_v2  ;;  %v932_v25 = vmax.bf16 %v700_v17, %v468_v3  ;;  %v472_v26 = vmax.bf16 %v356_v13, %v352_v12 }
  0x77   : > { %v702_v27 = vrot.slane %v470_v20, 4  ;;  %v933_v28 = vmax.bf16 %v701_v21, %v469_v10  ;;  %v703_v29 = vrot.slane %v471_v22, 4 }
  0x78   : > { %1384 = vst [vmem:[%s1441_s16 + $0x1b0] sm:$0xff] %v1383_v23   ;;  %1104 = vst [vmem:[%s1441_s16 + $0x1b8] sm:$0xf] %v931_v24  ;;  %v1106_v30 = vsel %vm1434_vm2, %v932_v25, %v1105_v19  ;;  %v704_v31 = vrot.slane %v472_v26, 4 }
  0x79   : > { %1107 = vst [vmem:[%s1441_s16 + $0x1bc] sm:$0x7] %v1106_v30  ;;  %v934_v32 = vmax.bf16 %v702_v27, %v470_v20  ;;  %v935_v33 = vmax.bf16 %v703_v29, %v471_v22 }
  0x7a   : > { %v936_v35 = vmax.bf16 %v704_v31, %v472_v26 }
  0x7b   : > { %v1385_v36 = vcombine.low %v933_v28, %v934_v32  ;;  %1110 = vst [vmem:[%s1441_s16 + $0x1c8] sm:$0xf] %v935_v33 }
  0x7c   : > { %v1112_v37 = vsel %vm1434_vm2, %v936_v35, %v1111_v34 }
  0x7d   : > { %1386 = vst [vmem:[%s1441_s16 + $0x1c0] sm:$0xff] %v1385_v36   ;;  %1113 = vst [vmem:[%s1441_s16 + $0x1cc] sm:$0x7] %v1112_v37 }
  0x7e PF: > { %s11_s6 = sadd.s32 1, %s1401_s6  }
  0x7f   : > { %p8_p4 = scmp.ge.s32.totalorder %s11_s6, 4  }
  0x81   :  { %10 = sbr.rel (!%p8_p4) target bundleno = 1 (0x1), region = 54 }

// kernel: cnn_forward.11
= control target key start
LH: loop header
LB: loop body
LE: loop exit
PB: predicated region body
PF: predicated region fallthrough
CT: control target
= control target key end

     0   :  { %s5314_s12 = smov 0   ;;  %s5316_s13 = smov 0   ;;  %s6400_s0 = inlined_call_operand.vmem [shape: bf16[1352,1024], index: 0, kind: input, shape index: {}]   ;;  %s6401_s1 = inlined_call_operand.vmem [shape: bf16[1024,128], index: 1, kind: input, shape index: {}]   ;;  %s6402_s2 = inlined_call_operand.vmem [shape: f32[1,128], index: 2, kind: input, shape index: {}]   ;;  %s6403_s3 = inlined_call_operand.vmem [shape: bf16[1352,128], index: 3, kind: output, shape index: {}]  }
   0x1   :  { %s5318_s14 = smov 0   ;;  %s5320_s15 = smov 0  }
   0x2   :  { %s5322_s16 = smov 0  }
   0x3 LB: > { %s4347_s17 = sadd.s32 4294967295, %s5259_s16   ;;  %s25_s18 = sadd.s32 1, %s5255_s15  ;;  %s5259_s16 = sphi %s5322_s16, %s13_s16   ;;  %s5255_s15 = sphi %s5320_s15, %s6457_s15   ;;  %s5251_s14 = sphi %s5318_s14, %s6456_s14   ;;  %s5247_s13 = sphi %s5316_s13, %s6455_s13   ;;  %s5243_s12 = sphi %s5314_s12, %s6454_s12  }
   0x4   : > { %p27_p0 = scmp.ge.s32.totalorder %s25_s18, 3  ;;  %s112_s19 = sadd.s32 1, %s5247_s13 }
   0x5   : > { %p122_p1 = scmp.ne.s32.totalorder %s5247_s13, %s5243_s12  ;;  %p123_p2 = scmp.eq.s32.totalorder %s4347_s17, 2 }
   0x6   : > { %s6459_s18 = smov (%p27_p0, %s25_s18), 0  ;;  %p4353_p4 = scmp.ge.s32.totalorder %s5259_s16, 1 }
   0x7   : > { %p5346_p3 = por %p123_p2, %p122_p1  ;;  %s107_s21 = ssub.s32 %s5255_s15, %s6459_s18 }
   0x8   : > { %p180_p5 = scmp.lt.s32.totalorder %s5259_s16, 4  ;;  %p110_p6 = scmp.eq.s32.totalorder %s107_s21, 0 }
   0xa   : > { %p181_p7 = pnand %p4353_p4, %p180_p5 }
   0xb   : > { %s5355_s22 = scalar_select %p110_p6, %s5247_s13, %s112_s19  }
   0xc   : > { %184 = sbr.rel (%p181_p7) target bundleno = 873 (0x369), region = 32 }
  0x11   : > { %v5124_v0 = vld [vmem:[%s6401_s1 + $0x38] sm:$0xff]   ;;  %v5293_v1 = vmov 0   ;;  %v5126_v3 = vld [vmem:[%s6401_s1 + $0x30] sm:$0xff]   ;;  %v5128_v5 = vld [vmem:[%s6401_s1 + $0x28] sm:$0xff]   ;;  %s5397_s24 = sshll.u32 %s5251_s14, 6  ;;  %s213_s17 = sand.u32 1, %s5243_s12  }
  0x12   : > { %2301 = vmatprep.subr.bf16.mxu0 %v5293_v1  ;;  %2590 = vmatprep.subr.bf16.mxu1 %v5293_v1  ;;  %v5125_v2 = vld [vmem:[%s6401_s1 + $0xb8] sm:$0xff]   ;;  %v5127_v4 = vld [vmem:[%s6401_s1 + $0xb0] sm:$0xff]   ;;  %v5129_v6 = vld [vmem:[%s6401_s1 + $0xa8] sm:$0xff]   ;;  %p222_p8 = scmp.lt.s32.totalorder %s5397_s24, 168  ;;  %s4354_s19 = sshll.u32 %s213_s17, 8 }
  0x13   : > { %2302 = vmatpush1.bf16.msra.mxu0 %v5124_v0  ;;  %2591 = vmatpush1.bf16.msra.mxu1 %v5125_v2  ;;  %v5130_v7 = vld [vmem:[%s6401_s1 + $0x20] sm:$0xff]   ;;  %v5132_v9 = vld [vmem:[%s6401_s1 + $0x18] sm:$0xff]   ;;  %v5134_v11 = vld [vmem:[%s6401_s1 + $0x10] sm:$0xff]   ;;  %s6085_s12 = scalar_lea.vmem [#allocation2], %s4354_s19   ;;  %s4825_s23 = sshll.u32 (%p5346_p3), %s5251_s14, 8 }
  0x14   : > { %2303 = vmatprep.subr.bf16.mxu0 %v5293_v1  ;;  %2592 = vmatprep.subr.bf16.mxu1 %v5293_v1  ;;  %v5131_v8 = vld [vmem:[%s6401_s1 + $0xa0] sm:$0xff]   ;;  %v5133_v10 = vld [vmem:[%s6401_s1 + $0x98] sm:$0xff]   ;;  %v5135_v12 = vld [vmem:[%s6401_s1 + $0x90] sm:$0xff]   ;;  %s223_s4 = scalar_select %p222_p8, %s5397_s24, 168 }
  0x15   : > { %v5136_v13 = vld [vmem:[%s6401_s1 + $0x8] sm:$0xff]   ;;  %v5138_v15 = vld [vmem:[%s6401_s1] sm:$0xff]   ;;  %v5140_v17 = vld [vmem:[%s6401_s1 + $0x78] sm:$0xff]   ;;  %s6203_s27 = scalar_lea.vmem (%p5346_p3), %s6403_s3, %s4825_s23  }
  0x16   : > { %v5137_v14 = vld [vmem:[%s6401_s1 + $0x88] sm:$0xff]   ;;  %s4760_s9 = sshll.u32 %s223_s4, 5  ;;  %v5139_v16 = vld [vmem:[%s6401_s1 + $0x80] sm:$0xff]   ;;  %v5141_v18 = vld [vmem:[%s6401_s1 + $0xf8] sm:$0xff]  }
  0x17   : > { %2304 = vmatpush1.bf16.msra.mxu0 %v5126_v3  ;;  %2593 = vmatpush1.bf16.msra.mxu1 %v5127_v4  ;;  %s5429_s21 = scalar_lea.vmem %s6400_s0, %s4760_s9  ;;  %v5142_v24 = vld [vmem:[%s6401_s1 + $0x70] sm:$0xff]   ;;  %v5144_v27 = vld [vmem:[%s6401_s1 + $0x68] sm:$0xff]   ;;  %v5146_v29 = vld [vmem:[%s6401_s1 + $0x60] sm:$0xff]  }
  0x18   : > { %2305 = vmatprep.subr.bf16.mxu0 %v5293_v1  ;;  %2594 = vmatprep.subr.bf16.mxu1 %v5293_v1  ;;  %v5440_v19 = vld [vmem:[%s5429_s21] sm:$0xff]  ;;  %v5446_v21 = vld [vmem:[%s5429_s21 + $0x8] sm:$0xff]  ;;  %v5143_v26 = vld [vmem:[%s6401_s1 + $0xf0] sm:$0xff]  }
  0x19   : > { %v5443_v20 = vld [vmem:[%s5429_s21 + $0x20] sm:$0xff]  ;;  %v5451_v23 = vld [vmem:[%s5429_s21 + $0x28] sm:$0xff]  ;;  %v5148_v31 = vld [vmem:[%s6401_s1 + $0x58] sm:$0xff]  }
  0x1a   : > { %v4360_v22 = vcombine.high %v5440_v19, %v5443_v20  ;;  %v4362_v25 = vcombine.high %v5446_v21, %v5451_v23  ;;  %v5145_v28 = vld [vmem:[%s6401_s1 + $0xe8] sm:$0xff]   ;;  %v5147_v30 = vld [vmem:[%s6401_s1 + $0xe0] sm:$0xff]   ;;  %v5149_v32 = vld [vmem:[%s6401_s1 + $0xd8] sm:$0xff]   ;;  %v4359_v42 = vcombine.low %v5440_v19, %v5443_v20  ;;  %v4361_v44 = vcombine.low %v5446_v21, %v5451_v23 }
  0x1b   : > { %2306 = vmatpush1.bf16.msra.mxu0 %v5128_v5  ;;  %2595 = vmatpush1.bf16.msra.mxu1 %v5129_v6  ;;  %v5150_v33 = vld [vmem:[%s6401_s1 + $0x50] sm:$0xff]   ;;  %v5152_v35 = vld [vmem:[%s6401_s1 + $0x48] sm:$0xff]   ;;  %v5154_v37 = vld [vmem:[%s6401_s1 + $0x40] sm:$0xff]  }
  0x1c   : > { %2307 = vmatprep.subr.bf16.mxu0 %v5293_v1  ;;  %2596 = vmatprep.subr.bf16.mxu1 %v5293_v1  ;;  %v5151_v34 = vld [vmem:[%s6401_s1 + $0xd0] sm:$0xff]   ;;  %v5153_v36 = vld [vmem:[%s6401_s1 + $0xc8] sm:$0xff]   ;;  %v5155_v38 = vld [vmem:[%s6401_s1 + $0xc0] sm:$0xff]  }
  0x1d   : > { %2333 = vmatprep.mubr.bf16.mxu0 %v4360_v22  ;;  %2622 = vmatprep.mubr.bf16.mxu1 %v4362_v25  ;;  %v254_v39 = vld [vmem:[%s5429_s21 + $0x40] sm:$0xff]  ;;  %v255_v41 = vld [vmem:[%s5429_s21 + $0x48] sm:$0xff]  ;;  %v5156_v45 = vld [vmem:[%s6401_s1 + $0x138] sm:$0xff]  }
  0x1e   : > { %v258_v40 = vld [vmem:[%s5429_s21 + $0x60] sm:$0xff]  ;;  %v259_v43 = vld [vmem:[%s5429_s21 + $0x68] sm:$0xff]  ;;  %v5157_v46 = vld [vmem:[%s6401_s1 + $0x1b8] sm:$0xff]  }
  0x1f   : > { %2308 = vmatpush1.bf16.msra.mxu0 %v5130_v7  ;;  %2597 = vmatpush1.bf16.msra.mxu1 %v5131_v8  ;;  %v4368_v47 = vcombine.high %v254_v39, %v258_v40  ;;  %v4370_v48 = vcombine.high %v255_v41, %v259_v43  ;;  %v262_v49 = vld [vmem:[%s5429_s21 + $0x80] sm:$0xff]  ;;  %v5158_v51 = vld [vmem:[%s6401_s1 + $0x130] sm:$0xff]   ;;  %v263_v53 = vld [vmem:[%s5429_s21 + $0x88] sm:$0xff]  ;;  %v4367_v55 = vcombine.low %v254_v39, %v258_v40 }
  0x20   : > { %2309 = vmatprep.subr.bf16.mxu0 %v5293_v1  ;;  %2598 = vmatprep.subr.bf16.mxu1 %v5293_v1  ;;  %v266_v50 = vld [vmem:[%s5429_s21 + $0xa0] sm:$0xff]  ;;  %v5159_v52 = vld [vmem:[%s6401_s1 + $0x1b0] sm:$0xff]   ;;  %v267_v54 = vld [vmem:[%s5429_s21 + $0xa8] sm:$0xff]  ;;  %v4369_v56 = vcombine.low %v255_v41, %v259_v43 }
  0x21   : > { %v4376_v57 = vcombine.high %v262_v49, %v266_v50  ;;  %v4378_v58 = vcombine.high %v263_v53, %v267_v54  ;;  %v5160_v59 = vld [vmem:[%s6401_s1 + $0x128] sm:$0xff]   ;;  %v270_v61 = vld [vmem:[%s5429_s21 + $0xc0] sm:$0xff]  ;;  %v4375_v4 = vcombine.low %v262_v49, %v266_v50  ;;  %v5164_v5 = vld [vmem:[%s6401_s1 + $0x118] sm:$0xff]   ;;  %v4377_v6 = vcombine.low %v263_v53, %v267_v54 }
  0x22   : > { %v5161_v60 = vld [vmem:[%s6401_s1 + $0x1a8] sm:$0xff]   ;;  %v274_v62 = vld [vmem:[%s5429_s21 + $0xe0] sm:$0xff]  ;;  %v5165_v8 = vld [vmem:[%s6401_s1 + $0x198] sm:$0xff]  }
  0x23   : > { %2310 = vmatpush1.bf16.msra.mxu0 %v5132_v9  ;;  %2599 = vmatpush1.bf16.msra.mxu1 %v5133_v10  ;;  %v271_v63 = vld [vmem:[%s5429_s21 + $0xc8] sm:$0xff]  ;;  %v5162_v2 = vld [vmem:[%s6401_s1 + $0x120] sm:$0xff]   ;;  %v4384_v7 = vcombine.high %v270_v61, %v274_v62  ;;  %v5175_v39 = vld [vmem:[%s6401_s1 + $0x1f0] sm:$0xff]  }
  0x24   : > { %2311 = vmatprep.subr.bf16.mxu0 %v5293_v1  ;;  %2600 = vmatprep.subr.bf16.mxu1 %v5293_v1  ;;  %v275_v0 = vld [vmem:[%s5429_s21 + $0xe8] sm:$0xff]  ;;  %v5163_v3 = vld [vmem:[%s6401_s1 + $0x1a0] sm:$0xff]  }
  0x25   : > { %v4386_v9 = vcombine.high %v271_v63, %v275_v0  ;;  %v278_v10 = vld [vmem:[%s5429_s21 + $0x100] sm:$0xff]  ;;  %v5168_v20 = vld [vmem:[%s6401_s1 + $0x108] sm:$0xff]  }
  0x26   : > { %v5169_v21 = vld [vmem:[%s6401_s1 + $0x188] sm:$0xff]   ;;  %v286_v22 = vld [vmem:[%s5429_s21 + $0x140] sm:$0xff] }
  0x27   : > { %2312 = vmatpush1.bf16.msra.mxu0 %v5134_v11  ;;  %2601 = vmatpush1.bf16.msra.mxu1 %v5135_v12  ;;  %v282_v11 = vld [vmem:[%s5429_s21 + $0x120] sm:$0xff]  ;;  %v279_v12 = vld [vmem:[%s5429_s21 + $0x108] sm:$0xff] }
  0x28   : > { %2313 = vmatprep.subr.bf16.mxu0 %v5293_v1  ;;  %2602 = vmatprep.subr.bf16.mxu1 %v5293_v1  ;;  %v290_v23 = vld [vmem:[%s5429_s21 + $0x160] sm:$0xff]  ;;  %v287_v25 = vld [vmem:[%s5429_s21 + $0x148] sm:$0xff] }
  0x29   : > { %v4399_v40 = vcombine.low %v286_v22, %v290_v23  ;;  %v307_v49 = vld [vmem:[%s5429_s21 + $0x1e8] sm:$0xff]  ;;  %v5178_v54 = vld [vmem:[%s6401_s1 + $0x160] sm:$0xff]  }
  0x2b   : > { %2314 = vmatpush1.bf16.msra.mxu0 %v5136_v13  ;;  %2603 = vmatpush1.bf16.msra.mxu1 %v5137_v14  ;;  %v283_v13 = vld [vmem:[%s5429_s21 + $0x128] sm:$0xff]  ;;  %v5166_v14 = vld [vmem:[%s6401_s1 + $0x110] sm:$0xff]  }
  0x2c   : > { %2315 = vmatprep.subr.bf16.mxu0 %v5293_v1  ;;  %2604 = vmatprep.subr.bf16.mxu1 %v5293_v1  ;;  %v4394_v19 = vcombine.high %v279_v12, %v283_v13 }
  0x2f   : > { %2316 = vmatpush1.bf16.msra.mxu0 %v5138_v15  ;;  %2605 = vmatpush1.bf16.msra.mxu1 %v5139_v16  ;;  %v5167_v15 = vld [vmem:[%s6401_s1 + $0x190] sm:$0xff]   ;;  %v4383_v16 = vcombine.low %v270_v61, %v274_v62 }
  0x30   : > { %2317 = vmatprep.subr.bf16.mxu0 %v5293_v1  ;;  %2606 = vmatprep.subr.bf16.mxu1 %v5293_v1 }
  0x33   : > { %2318 = vmatpush2.bf16.msra.mxu0 %v5140_v17  ;;  %2607 = vmatpush2.bf16.msra.mxu1 %v5141_v18  ;;  %v4385_v17 = vcombine.low %v271_v63, %v275_v0  ;;  %v4392_v18 = vcombine.high %v278_v10, %v282_v11  ;;  %v318_v0 = vld [vmem:[%s5429_s21 + $0x240] sm:$0xff] }
  0x34   : > { %2319 = vmatprep.subr.bf16.mxu0 %v5293_v1  ;;  %2608 = vmatprep.subr.bf16.mxu1 %v5293_v1 }
  0x37   : > { %2320 = vmatpush2.bf16.msra.mxu0 %v5142_v24  ;;  %2609 = vmatpush2.bf16.msra.mxu1 %v5143_v26  ;;  %v5170_v24 = vld [vmem:[%s6401_s1 + $0x100] sm:$0xff]   ;;  %v291_v26 = vld [vmem:[%s5429_s21 + $0x168] sm:$0xff] }
  0x38   : > { %2321 = vmatprep.subr.bf16.mxu0 %v5293_v1  ;;  %2610 = vmatprep.subr.bf16.mxu1 %v5293_v1  ;;  %v4401_v41 = vcombine.low %v287_v25, %v291_v26 }
  0x3b   : > { %2322 = vmatpush2.bf16.msra.mxu0 %v5144_v27  ;;  %2611 = vmatpush2.bf16.msra.mxu1 %v5145_v28  ;;  %v5171_v27 = vld [vmem:[%s6401_s1 + $0x180] sm:$0xff]   ;;  %v4391_v28 = vcombine.low %v278_v10, %v282_v11  ;;  %v327_v11 = vld [vmem:[%s5429_s21 + $0x288] sm:$0xff] }
  0x3c   : > { %2323 = vmatprep.subr.bf16.mxu0 %v5293_v1  ;;  %2612 = vmatprep.subr.bf16.mxu1 %v5293_v1  ;;  %v330_v10 = vld [vmem:[%s5429_s21 + $0x2a0] sm:$0xff] }
  0x3f   : > { %2324 = vmatpush2.bf16.msra.mxu0 %v5146_v29  ;;  %2613 = vmatpush2.bf16.msra.mxu1 %v5147_v30  ;;  %v4393_v29 = vcombine.low %v279_v12, %v283_v13  ;;  %v4400_v30 = vcombine.high %v286_v22, %v290_v23  ;;  %v331_v12 = vld [vmem:[%s5429_s21 + $0x2a8] sm:$0xff]  ;;  %v5180_v13 = vld [vmem:[%s6401_s1 + $0x158] sm:$0xff]  }
  0x40   : > { %2325 = vmatprep.subr.bf16.mxu0 %v5293_v1  ;;  %2614 = vmatprep.subr.bf16.mxu1 %v5293_v1  ;;  %v339_v22 = vld [vmem:[%s5429_s21 + $0x2e8] sm:$0xff] }
  0x43   : > { %2326 = vmatpush2.bf16.msra.mxu0 %v5148_v31  ;;  %2615 = vmatpush2.bf16.msra.mxu1 %v5149_v32  ;;  %v4402_v31 = vcombine.high %v287_v25, %v291_v26  ;;  %v5172_v32 = vld [vmem:[%s6401_s1 + $0x178] sm:$0xff]  }
  0x44   : > { %2327 = vmatprep.subr.bf16.mxu0 %v5293_v1  ;;  %2616 = vmatprep.subr.bf16.mxu1 %v5293_v1 }
  0x47   : > { %2328 = vmatpush2.bf16.msra.mxu0 %v5150_v33  ;;  %2617 = vmatpush2.bf16.msra.mxu1 %v5151_v34  ;;  %v5173_v33 = vld [vmem:[%s6401_s1 + $0x1f8] sm:$0xff]   ;;  %v294_v34 = vld [vmem:[%s5429_s21 + $0x180] sm:$0xff] }
  0x48   : > { %2329 = vmatprep.subr.bf16.mxu0 %v5293_v1  ;;  %2618 = vmatprep.subr.bf16.mxu1 %v5293_v1 }
  0x4b   : > { %2330 = vmatpush2.bf16.msra.mxu0 %v5152_v35  ;;  %2619 = vmatpush2.bf16.msra.mxu1 %v5153_v36  ;;  %v298_v35 = vld [vmem:[%s5429_s21 + $0x1a0] sm:$0xff]  ;;  %v5174_v36 = vld [vmem:[%s6401_s1 + $0x170] sm:$0xff]  }
  0x4c   : > { %2331 = vmatprep.subr.bf16.mxu0 %v5293_v1  ;;  %2620 = vmatprep.subr.bf16.mxu1 %v5293_v1  ;;  %v4407_v50 = vcombine.low %v294_v34, %v298_v35 }
  0x4f   : > { %2332 = vmatpush2.bf16.msra.mxu0 %v5154_v37  ;;  %2621 = vmatpush2.bf16.msra.mxu1 %v5155_v38  ;;  %v295_v37 = vld [vmem:[%s5429_s21 + $0x188] sm:$0xff] }
  0x50   : > { %2879 = vmatprep.subr.bf16.mxu0 %v5293_v1  ;;  %3168 = vmatprep.subr.bf16.mxu1 %v5293_v1  ;;  %v299_v38 = vld [vmem:[%s5429_s21 + $0x1a8] sm:$0xff] }
  0x51   : > { %v4410_v43 = vcombine.high %v295_v37, %v299_v38 }
  0x52   : > { %2334 = vmatmul.mubr.bf16.vlgmr.msra.gmra.mxu0 %v4359_v42  ;;  %2623 = vmatmul.mubr.bf16.vlgmr.msra.gmra.mxu1 %v4361_v44  ;;  %v4408_v42 = vcombine.high %v294_v34, %v298_v35  ;;  %v5176_v44 = vld [vmem:[%s6401_s1 + $0x168] sm:$0xff]  }
  0x53   : > { %2880 = vmatpush1.bf16.msra.mxu0 %v5156_v45  ;;  %3169 = vmatpush1.bf16.msra.mxu1 %v5157_v46  ;;  %v5177_v45 = vld [vmem:[%s6401_s1 + $0x1e8] sm:$0xff]   ;;  %v302_v46 = vld [vmem:[%s5429_s21 + $0x1c0] sm:$0xff] }
  0x54   : > { %2341 = vmatprep.mubr.bf16.mxu0 %v4368_v47  ;;  %2630 = vmatprep.mubr.bf16.mxu1 %v4370_v48  ;;  %v306_v47 = vld [vmem:[%s5429_s21 + $0x1e0] sm:$0xff]  ;;  %v303_v48 = vld [vmem:[%s5429_s21 + $0x1c8] sm:$0xff] }
  0x55   : > { %2881 = vmatprep.subr.bf16.mxu0 %v5293_v1  ;;  %3170 = vmatprep.subr.bf16.mxu1 %v5293_v1  ;;  %v4418_v53 = vcombine.high %v303_v48, %v307_v49  ;;  %v4417_v61 = vcombine.low %v303_v48, %v307_v49  ;;  %v363_v48 = vld [vmem:[%s5429_s21 + $0x3a8] sm:$0xff] }
  0x56   : > { %v5184_v49 = vld [vmem:[%s6401_s1 + $0x148] sm:$0xff]  }
  0x57   : > { %2882 = vmatpush1.bf16.msra.mxu0 %v5158_v51  ;;  %3171 = vmatpush1.bf16.msra.mxu1 %v5159_v52  ;;  %v4409_v51 = vcombine.low %v295_v37, %v299_v38  ;;  %v4416_v52 = vcombine.high %v302_v46, %v306_v47  ;;  %v350_v37 = vld [vmem:[%s5429_s21 + $0x340] sm:$0xff] }
  0x58   : > { %2883 = vmatprep.subr.bf16.mxu0 %v5293_v1  ;;  %3172 = vmatprep.subr.bf16.mxu1 %v5293_v1  ;;  %v354_v38 = vld [vmem:[%s5429_s21 + $0x360] sm:$0xff] }
  0x5a   : > { %2342 = vmatmul.mubr.bf16.gmra.mxu0 %v4367_v55  ;;  %2631 = vmatmul.mubr.bf16.gmra.mxu1 %v4369_v56  ;;  %v5179_v55 = vld [vmem:[%s6401_s1 + $0x1e0] sm:$0xff]  }
  0x5b   : > { %2349 = vmatprep.mubr.bf16.mxu0 %v4376_v57  ;;  %2638 = vmatprep.mubr.bf16.mxu1 %v4378_v58  ;;  %v310_v56 = vld [vmem:[%s5429_s21 + $0x200] sm:$0xff]  ;;  %v311_v58 = vld [vmem:[%s5429_s21 + $0x208] sm:$0xff] }
  0x5c   : > { %2884 = vmatpush1.bf16.msra.mxu0 %v5160_v59  ;;  %3173 = vmatpush1.bf16.msra.mxu1 %v5161_v60  ;;  %v314_v57 = vld [vmem:[%s5429_s21 + $0x220] sm:$0xff]  ;;  %v315_v59 = vld [vmem:[%s5429_s21 + $0x228] sm:$0xff]  ;;  %v4415_v60 = vcombine.low %v302_v46, %v306_v47 }
  0x5d   : > { %2885 = vmatprep.subr.bf16.mxu0 %v5293_v1  ;;  %3174 = vmatprep.subr.bf16.mxu1 %v5293_v1  ;;  %v4424_v62 = vcombine.high %v310_v56, %v314_v57  ;;  %v4426_v63 = vcombine.high %v311_v58, %v315_v59  ;;  %v362_v46 = vld [vmem:[%s5429_s21 + $0x3a0] sm:$0xff]  ;;  %v359_v47 = vld [vmem:[%s5429_s21 + $0x388] sm:$0xff] }
  0x60   : > { %2886 = vmatpush1.bf16.msra.mxu0 %v5162_v2  ;;  %3175 = vmatpush1.bf16.msra.mxu1 %v5163_v3  ;;  %v322_v2 = vld [vmem:[%s5429_s21 + $0x260] sm:$0xff]  ;;  %v319_v3 = vld [vmem:[%s5429_s21 + $0x248] sm:$0xff] }
  0x61   : > { %2887 = vmatprep.subr.bf16.mxu0 %v5293_v1  ;;  %3176 = vmatprep.subr.bf16.mxu1 %v5293_v1 }
  0x62   : > { %2350 = vmatmul.mubr.bf16.gmra.mxu0 %v4375_v4  ;;  %2639 = vmatmul.mubr.bf16.gmra.mxu1 %v4377_v6  ;;  %v323_v4 = vld [vmem:[%s5429_s21 + $0x268] sm:$0xff]  ;;  %v4425_v6 = vcombine.low %v311_v58, %v315_v59 }
  0x63   : > { %2357 = vmatprep.mubr.bf16.mxu0 %v4384_v7  ;;  %2646 = vmatprep.mubr.bf16.mxu1 %v4386_v9  ;;  %v4432_v7 = vcombine.high %v318_v0, %v322_v2  ;;  %v326_v9 = vld [vmem:[%s5429_s21 + $0x280] sm:$0xff]  ;;  %v371_v58 = vld [vmem:[%s5429_s21 + $0x3e8] sm:$0xff] }
  0x64   : > { %2888 = vmatpush1.bf16.msra.mxu0 %v5164_v5  ;;  %3177 = vmatpush1.bf16.msra.mxu1 %v5165_v8  ;;  %v4423_v5 = vcombine.low %v310_v56, %v314_v57  ;;  %v4434_v8 = vcombine.high %v319_v3, %v323_v4  ;;  %v4439_v23 = vcombine.low %v326_v9, %v330_v10  ;;  %v370_v56 = vld [vmem:[%s5429_s21 + $0x3e0] sm:$0xff]  ;;  %v367_v57 = vld [vmem:[%s5429_s21 + $0x3c8] sm:$0xff] }
  0x65   : > { %2889 = vmatprep.subr.bf16.mxu0 %v5293_v1  ;;  %3178 = vmatprep.subr.bf16.mxu1 %v5293_v1 }
  0x68   : > { %2890 = vmatpush1.bf16.msra.mxu0 %v5166_v14  ;;  %3179 = vmatpush1.bf16.msra.mxu1 %v5167_v15  ;;  %v5181_v14 = vld [vmem:[%s6401_s1 + $0x1d8] sm:$0xff]   ;;  %v4431_v15 = vcombine.low %v318_v0, %v322_v2  ;;  %v375_v0 = vld [vmem:[%s5429_s21 + $0x408] sm:$0xff] }
  0x69   : > { %2891 = vmatprep.subr.bf16.mxu0 %v5293_v1  ;;  %3180 = vmatprep.subr.bf16.mxu1 %v5293_v1  ;;  %v379_v2 = vld [vmem:[%s5429_s21 + $0x428] sm:$0xff] }
  0x6a   : > { %2358 = vmatmul.mubr.bf16.gmra.mxu0 %v4383_v16  ;;  %2647 = vmatmul.mubr.bf16.gmra.mxu1 %v4385_v17  ;;  %v4433_v16 = vcombine.low %v319_v3, %v323_v4  ;;  %v4440_v17 = vcombine.high %v326_v9, %v330_v10  ;;  %v5186_v3 = vld [vmem:[%s6401_s1 + $0x140] sm:$0xff]  }
  0x6b   : > { %2365 = vmatprep.mubr.bf16.mxu0 %v4392_v18  ;;  %2654 = vmatprep.mubr.bf16.mxu1 %v4394_v19  ;;  %v4442_v18 = vcombine.high %v327_v11, %v331_v12  ;;  %v334_v19 = vld [vmem:[%s5429_s21 + $0x2c0] sm:$0xff] }
  0x6c   : > { %2892 = vmatpush1.bf16.msra.mxu0 %v5168_v20  ;;  %3181 = vmatpush1.bf16.msra.mxu1 %v5169_v21  ;;  %v338_v20 = vld [vmem:[%s5429_s21 + $0x2e0] sm:$0xff]  ;;  %v335_v21 = vld [vmem:[%s5429_s21 + $0x2c8] sm:$0xff] }
  0x6d   : > { %2893 = vmatprep.subr.bf16.mxu0 %v5293_v1  ;;  %3182 = vmatprep.subr.bf16.mxu1 %v5293_v1  ;;  %v4448_v25 = vcombine.high %v334_v19, %v338_v20  ;;  %v4450_v26 = vcombine.high %v335_v21, %v339_v22  ;;  %v4449_v34 = vcombine.low %v335_v21, %v339_v22  ;;  %v5187_v4 = vld [vmem:[%s6401_s1 + $0x1c0] sm:$0xff]  }
  0x6e   : > { %v382_v9 = vld [vmem:[%s5429_s21 + $0x440] sm:$0xff] }
  0x6f   : > { %v386_v10 = vld [vmem:[%s5429_s21 + $0x460] sm:$0xff] }
  0x70   : > { %2894 = vmatpush1.bf16.msra.mxu0 %v5170_v24  ;;  %3183 = vmatpush1.bf16.msra.mxu1 %v5171_v27  ;;  %v4441_v24 = vcombine.low %v327_v11, %v331_v12  ;;  %v342_v27 = vld [vmem:[%s5429_s21 + $0x300] sm:$0xff]  ;;  %v383_v11 = vld [vmem:[%s5429_s21 + $0x448] sm:$0xff]  ;;  %v4495_v21 = vcombine.low %v382_v9, %v386_v10 }
  0x71   : > { %2895 = vmatprep.subr.bf16.mxu0 %v5293_v1  ;;  %3184 = vmatprep.subr.bf16.mxu1 %v5293_v1  ;;  %v387_v12 = vld [vmem:[%s5429_s21 + $0x468] sm:$0xff] }
  0x72   : > { %2366 = vmatmul.mubr.bf16.gmra.mxu0 %v4391_v28  ;;  %2655 = vmatmul.mubr.bf16.gmra.mxu1 %v4393_v29  ;;  %v346_v28 = vld [vmem:[%s5429_s21 + $0x320] sm:$0xff]  ;;  %v343_v29 = vld [vmem:[%s5429_s21 + $0x308] sm:$0xff]  ;;  %v4497_v22 = vcombine.low %v383_v11, %v387_v12 }
  0x73   : > { %2373 = vmatprep.mubr.bf16.mxu0 %v4400_v30  ;;  %2662 = vmatprep.mubr.bf16.mxu1 %v4402_v31  ;;  %v347_v30 = vld [vmem:[%s5429_s21 + $0x328] sm:$0xff]  ;;  %v5182_v31 = vld [vmem:[%s6401_s1 + $0x150] sm:$0xff]   ;;  %v4456_v35 = vcombine.high %v342_v27, %v346_v28 }
  0x74   : > { %2896 = vmatpush2.bf16.msra.mxu0 %v5172_v32  ;;  %3185 = vmatpush2.bf16.msra.mxu1 %v5173_v33  ;;  %v5183_v32 = vld [vmem:[%s6401_s1 + $0x1d0] sm:$0xff]   ;;  %v4447_v33 = vcombine.low %v334_v19, %v338_v20  ;;  %v391_v19 = vld [vmem:[%s5429_s21 + $0x488] sm:$0xff] }
  0x75   : > { %2897 = vmatprep.subr.bf16.mxu0 %v5293_v1  ;;  %3186 = vmatprep.subr.bf16.mxu1 %v5293_v1  ;;  %v395_v20 = vld [vmem:[%s5429_s21 + $0x4a8] sm:$0xff] }
  0x78   : > { %2898 = vmatpush2.bf16.msra.mxu0 %v5174_v36  ;;  %3187 = vmatpush2.bf16.msra.mxu1 %v5175_v39  ;;  %v4458_v36 = vcombine.high %v343_v29, %v347_v30  ;;  %v351_v39 = vld [vmem:[%s5429_s21 + $0x348] sm:$0xff] }
  0x79   : > { %2899 = vmatprep.subr.bf16.mxu0 %v5293_v1  ;;  %3188 = vmatprep.subr.bf16.mxu1 %v5293_v1 }
  0x7a   : > { %2374 = vmatmul.mubr.bf16.gmra.mxu0 %v4399_v40  ;;  %2663 = vmatmul.mubr.bf16.gmra.mxu1 %v4401_v41  ;;  %v355_v40 = vld [vmem:[%s5429_s21 + $0x368] sm:$0xff]  ;;  %v4455_v41 = vcombine.low %v342_v27, %v346_v28 }
  0x7b   : > { %2381 = vmatprep.mubr.bf16.mxu0 %v4408_v42  ;;  %2670 = vmatprep.mubr.bf16.mxu1 %v4410_v43  ;;  %v4457_v42 = vcombine.low %v343_v29, %v347_v30  ;;  %v4464_v43 = vcombine.high %v350_v37, %v354_v38  ;;  %v399_v27 = vld [vmem:[%s5429_s21 + $0x4c8] sm:$0xff]  ;;  %v4505_v30 = vcombine.low %v391_v19, %v395_v20 }
  0x7c   : > { %2900 = vmatpush2.bf16.msra.mxu0 %v5176_v44  ;;  %3189 = vmatpush2.bf16.msra.mxu1 %v5177_v45  ;;  %v4466_v44 = vcombine.high %v351_v39, %v355_v40  ;;  %v358_v45 = vld [vmem:[%s5429_s21 + $0x380] sm:$0xff]  ;;  %v403_v28 = vld [vmem:[%s5429_s21 + $0x4e8] sm:$0xff] }
  0x7d   : > { %2901 = vmatprep.subr.bf16.mxu0 %v5293_v1  ;;  %3190 = vmatprep.subr.bf16.mxu1 %v5293_v1  ;;  %v4471_v59 = vcombine.low %v358_v45, %v362_v46 }
  0x80   : > { %2902 = vmatpush2.bf16.msra.mxu0 %v5178_v54  ;;  %3191 = vmatpush2.bf16.msra.mxu1 %v5179_v55  ;;  %v4474_v54 = vcombine.high %v359_v47, %v363_v48  ;;  %v366_v55 = vld [vmem:[%s5429_s21 + $0x3c0] sm:$0xff] }
  0x81   : > { %2903 = vmatprep.subr.bf16.mxu0 %v5293_v1  ;;  %3192 = vmatprep.subr.bf16.mxu1 %v5293_v1 }
  0x82   : > { %2382 = vmatmul.mubr.bf16.gmra.mxu0 %v4407_v50  ;;  %2671 = vmatmul.mubr.bf16.gmra.mxu1 %v4409_v51  ;;  %v5185_v50 = vld [vmem:[%s6401_s1 + $0x1c8] sm:$0xff]   ;;  %v4463_v51 = vcombine.low %v350_v37, %v354_v38  ;;  %v4513_v38 = vcombine.low %v399_v27, %v403_v28 }
  0x83   : > { %2389 = vmatprep.mubr.bf16.mxu0 %v4416_v52  ;;  %2678 = vmatprep.mubr.bf16.mxu1 %v4418_v53  ;;  %v4465_v52 = vcombine.low %v351_v39, %v355_v40  ;;  %v4472_v53 = vcombine.high %v358_v45, %v362_v46 }
  0x84   : > { %2904 = vmatpush2.bf16.msra.mxu0 %v5180_v13  ;;  %3193 = vmatpush2.bf16.msra.mxu1 %v5181_v14  ;;  %v4489_v14 = vcombine.low %v375_v0, %v379_v2 }
  0x85   : > { %2905 = vmatprep.subr.bf16.mxu0 %v5293_v1  ;;  %3194 = vmatprep.subr.bf16.mxu1 %v5293_v1 }
  0x88   : > { %2906 = vmatpush2.bf16.msra.mxu0 %v5182_v31  ;;  %3195 = vmatpush2.bf16.msra.mxu1 %v5183_v32  ;;  %v4514_v32 = vcombine.high %v399_v27, %v403_v28  ;;  %v459_v27 = vld [vmem:[%s5429_s21 + $0x6a8] sm:$0xff] }
  0x89   : > { %2907 = vmatprep.subr.bf16.mxu0 %v5293_v1  ;;  %3196 = vmatprep.subr.bf16.mxu1 %v5293_v1 }
  0x8a   : > { %2390 = vmatmul.mubr.bf16.gmra.mxu0 %v4415_v60  ;;  %2679 = vmatmul.mubr.bf16.gmra.mxu1 %v4417_v61  ;;  %v4473_v60 = vcombine.low %v359_v47, %v363_v48  ;;  %v4480_v61 = vcombine.high %v366_v55, %v370_v56 }
  0x8b   : > { %2397 = vmatprep.mubr.bf16.mxu0 %v4424_v62  ;;  %2686 = vmatprep.mubr.bf16.mxu1 %v4426_v63  ;;  %v4482_v62 = vcombine.high %v367_v57, %v371_v58  ;;  %v378_v63 = vld [vmem:[%s5429_s21 + $0x420] sm:$0xff] }
  0x8c   : > { %2908 = vmatpush2.bf16.msra.mxu0 %v5184_v49  ;;  %3197 = vmatpush2.bf16.msra.mxu1 %v5185_v50  ;;  %v422_v49 = vld [vmem:[%s5429_s21 + $0x580] sm:$0xff] }
  0x8d   : > { %2909 = vmatprep.subr.bf16.mxu0 %v5293_v1  ;;  %3198 = vmatprep.subr.bf16.mxu1 %v5293_v1  ;;  %v374_v1 = vld [vmem:[%s5429_s21 + $0x400] sm:$0xff] }
  0x8e   : > { %v4487_v13 = vcombine.low %v374_v1, %v378_v63  ;;  %v426_v50 = vld [vmem:[%s5429_s21 + $0x5a0] sm:$0xff] }
  0x90   : > { %2910 = vmatpush2.bf16.msra.mxu0 %v5186_v3  ;;  %3199 = vmatpush2.bf16.msra.mxu1 %v5187_v4  ;;  %v439_v3 = vld [vmem:[%s5429_s21 + $0x608] sm:$0xff] }
  0x91   : > { %v443_v4 = vld [vmem:[%s5429_s21 + $0x628] sm:$0xff] }
  0x92   : > { %2398 = vmatmul.mubr.bf16.gmra.mxu0 %v4423_v5  ;;  %2687 = vmatmul.mubr.bf16.gmra.mxu1 %v4425_v6  ;;  %v4479_v5 = vcombine.low %v366_v55, %v370_v56  ;;  %v4481_v6 = vcombine.low %v367_v57, %v371_v58  ;;  %v4536_v55 = vcombine.high %v422_v49, %v426_v50  ;;  %v430_v57 = vld [vmem:[%s5429_s21 + $0x5c0] sm:$0xff] }
  0x93   : > { %2405 = vmatprep.mubr.bf16.mxu0 %v4432_v7  ;;  %2694 = vmatprep.mubr.bf16.mxu1 %v4434_v8  ;;  %v4488_v7 = vcombine.high %v374_v1, %v378_v63  ;;  %v4490_v8 = vcombine.high %v375_v0, %v379_v2  ;;  %v434_v58 = vld [vmem:[%s5429_s21 + $0x5e0] sm:$0xff] }
  0x94   : > { %v4544_v1 = vcombine.high %v430_v57, %v434_v58  ;;  %v438_v0 = vld [vmem:[%s5429_s21 + $0x600] sm:$0xff] }
  0x95   : > { %v442_v2 = vld [vmem:[%s5429_s21 + $0x620] sm:$0xff] }
  0x9a   : > { %2406 = vmatmul.mubr.bf16.gmra.mxu0 %v4431_v15  ;;  %2695 = vmatmul.mubr.bf16.gmra.mxu1 %v4433_v16  ;;  %v4496_v15 = vcombine.high %v382_v9, %v386_v10  ;;  %v4498_v16 = vcombine.high %v383_v11, %v387_v12  ;;  %v446_v9 = vld [vmem:[%s5429_s21 + $0x640] sm:$0xff]  ;;  %v447_v11 = vld [vmem:[%s5429_s21 + $0x648] sm:$0xff] }
  0x9b   : > { %2413 = vmatprep.mubr.bf16.mxu0 %v4440_v17  ;;  %2702 = vmatprep.mubr.bf16.mxu1 %v4442_v18  ;;  %v390_v17 = vld [vmem:[%s5429_s21 + $0x480] sm:$0xff]  ;;  %v451_v12 = vld [vmem:[%s5429_s21 + $0x668] sm:$0xff] }
  0x9c   : > { %v394_v18 = vld [vmem:[%s5429_s21 + $0x4a0] sm:$0xff] }
  0x9d   : > { %v4503_v29 = vcombine.low %v390_v17, %v394_v18  ;;  %v450_v10 = vld [vmem:[%s5429_s21 + $0x660] sm:$0xff] }
  0xa2   : > { %2414 = vmatmul.mubr.bf16.gmra.mxu0 %v4439_v23  ;;  %2703 = vmatmul.mubr.bf16.gmra.mxu1 %v4441_v24  ;;  %v4504_v23 = vcombine.high %v390_v17, %v394_v18  ;;  %v4506_v24 = vcombine.high %v391_v19, %v395_v20  ;;  %v4562_v17 = vcombine.high %v447_v11, %v451_v12 }
  0xa3   : > { %2421 = vmatprep.mubr.bf16.mxu0 %v4448_v25  ;;  %2710 = vmatprep.mubr.bf16.mxu1 %v4450_v26  ;;  %v398_v25 = vld [vmem:[%s5429_s21 + $0x4c0] sm:$0xff] }
  0xa4   : > { %v402_v26 = vld [vmem:[%s5429_s21 + $0x4e0] sm:$0xff] }
  0xa5   : > { %v4512_v31 = vcombine.high %v398_v25, %v402_v26  ;;  %v4511_v37 = vcombine.low %v398_v25, %v402_v26  ;;  %v455_v26 = vld [vmem:[%s5429_s21 + $0x688] sm:$0xff] }
  0xaa   : > { %2422 = vmatmul.mubr.bf16.gmra.mxu0 %v4447_v33  ;;  %2711 = vmatmul.mubr.bf16.gmra.mxu1 %v4449_v34  ;;  %v406_v33 = vld [vmem:[%s5429_s21 + $0x500] sm:$0xff] }
  0xab   : > { %2429 = vmatprep.mubr.bf16.mxu0 %v4456_v35  ;;  %2718 = vmatprep.mubr.bf16.mxu1 %v4458_v36  ;;  %v410_v34 = vld [vmem:[%s5429_s21 + $0x520] sm:$0xff]  ;;  %v407_v35 = vld [vmem:[%s5429_s21 + $0x508] sm:$0xff] }
  0xac   : > { %v411_v36 = vld [vmem:[%s5429_s21 + $0x528] sm:$0xff]  ;;  %v4520_v39 = vcombine.high %v406_v33, %v410_v34  ;;  %v4519_v45 = vcombine.low %v406_v33, %v410_v34 }
  0xad   : > { %v4522_v40 = vcombine.high %v407_v35, %v411_v36  ;;  %v4521_v46 = vcombine.low %v407_v35, %v411_v36  ;;  %v4570_v35 = vcombine.high %v455_v26, %v459_v27 }
  0xb2   : > { %2430 = vmatmul.mubr.bf16.gmra.mxu0 %v4455_v41  ;;  %2719 = vmatmul.mubr.bf16.gmra.mxu1 %v4457_v42  ;;  %v414_v41 = vld [vmem:[%s5429_s21 + $0x540] sm:$0xff] }
  0xb3   : > { %2437 = vmatprep.mubr.bf16.mxu0 %v4464_v43  ;;  %2726 = vmatprep.mubr.bf16.mxu1 %v4466_v44  ;;  %v418_v42 = vld [vmem:[%s5429_s21 + $0x560] sm:$0xff]  ;;  %v415_v43 = vld [vmem:[%s5429_s21 + $0x548] sm:$0xff] }
  0xb4   : > { %v419_v44 = vld [vmem:[%s5429_s21 + $0x568] sm:$0xff]  ;;  %v4528_v47 = vcombine.high %v414_v41, %v418_v42 }
  0xb5   : > { %v4530_v48 = vcombine.high %v415_v43, %v419_v44 }
  0xba   : > { %2438 = vmatmul.mubr.bf16.gmra.mxu0 %v4463_v51  ;;  %2727 = vmatmul.mubr.bf16.gmra.mxu1 %v4465_v52  ;;  %v423_v51 = vld [vmem:[%s5429_s21 + $0x588] sm:$0xff] }
  0xbb   : > { %2445 = vmatprep.mubr.bf16.mxu0 %v4472_v53  ;;  %2734 = vmatprep.mubr.bf16.mxu1 %v4474_v54  ;;  %v427_v52 = vld [vmem:[%s5429_s21 + $0x5a8] sm:$0xff]  ;;  %v4527_v53 = vcombine.low %v414_v41, %v418_v42  ;;  %v4529_v54 = vcombine.low %v415_v43, %v419_v44  ;;  %v462_v42 = vld [vmem:[%s5429_s21 + $0x6c0] sm:$0xff] }
  0xbc   : > { %v4538_v56 = vcombine.high %v423_v51, %v427_v52  ;;  %v466_v43 = vld [vmem:[%s5429_s21 + $0x6e0] sm:$0xff] }
  0xc2   : > { %2446 = vmatmul.mubr.bf16.gmra.mxu0 %v4471_v59  ;;  %2735 = vmatmul.mubr.bf16.gmra.mxu1 %v4473_v60  ;;  %v431_v59 = vld [vmem:[%s5429_s21 + $0x5c8] sm:$0xff] }
  0xc3   : > { %2453 = vmatprep.mubr.bf16.mxu0 %v4480_v61  ;;  %2742 = vmatprep.mubr.bf16.mxu1 %v4482_v62  ;;  %v435_v60 = vld [vmem:[%s5429_s21 + $0x5e8] sm:$0xff]  ;;  %v4535_v61 = vcombine.low %v422_v49, %v426_v50  ;;  %v4537_v62 = vcombine.low %v423_v51, %v427_v52  ;;  %v4569_v52 = vcombine.low %v455_v26, %v459_v27 }
  0xc4   : > { %v4546_v63 = vcombine.high %v431_v59, %v435_v60 }
  0xca   : > { %2454 = vmatmul.mubr.bf16.gmra.mxu0 %v4479_v5  ;;  %2743 = vmatmul.mubr.bf16.gmra.mxu1 %v4481_v6  ;;  %v4543_v5 = vcombine.low %v430_v57, %v434_v58  ;;  %v4545_v6 = vcombine.low %v431_v59, %v435_v60 }
  0xcb   : > { %2461 = vmatprep.mubr.bf16.mxu0 %v4488_v7  ;;  %2750 = vmatprep.mubr.bf16.mxu1 %v4490_v8  ;;  %v4552_v7 = vcombine.high %v438_v0, %v442_v2  ;;  %v4554_v8 = vcombine.high %v439_v3, %v443_v4 }
  0xd2   : > { %2462 = vmatmul.mubr.bf16.gmra.mxu0 %v4487_v13  ;;  %2751 = vmatmul.mubr.bf16.gmra.mxu1 %v4489_v14  ;;  %v4551_v13 = vcombine.low %v438_v0, %v442_v2  ;;  %v4553_v14 = vcombine.low %v439_v3, %v443_v4  ;;  %v471_v2 = vld [vmem:[%s5429_s21 + $0x708] sm:$0xff] }
  0xd3   : > { %2469 = vmatprep.mubr.bf16.mxu0 %v4496_v15  ;;  %2758 = vmatprep.mubr.bf16.mxu1 %v4498_v16  ;;  %v4560_v15 = vcombine.high %v446_v9, %v450_v10  ;;  %v5746_v16 = vld [vmem:[%s6402_s2] ss:$0 sm:$0xff]  ;;  %v475_v3 = vld [vmem:[%s5429_s21 + $0x728] sm:$0xff] }
  0xda   : > { %2470 = vmatmul.mubr.bf16.gmra.mxu0 %v4495_v21  ;;  %2759 = vmatmul.mubr.bf16.gmra.mxu1 %v4497_v22  ;;  %v454_v22 = vld [vmem:[%s5429_s21 + $0x680] sm:$0xff] }
  0xdb   : > { %2477 = vmatprep.mubr.bf16.mxu0 %v4504_v23  ;;  %2766 = vmatprep.mubr.bf16.mxu1 %v4506_v24  ;;  %v458_v23 = vld [vmem:[%s5429_s21 + $0x6a0] sm:$0xff] }
  0xdc   : > { %v4568_v33 = vcombine.high %v454_v22, %v458_v23  ;;  %v4567_v49 = vcombine.low %v454_v22, %v458_v23  ;;  %v479_v23 = vld [vmem:[%s5429_s21 + $0x748] sm:$0xff] }
  0xe2   : > { %2478 = vmatmul.mubr.bf16.gmra.mxu0 %v4503_v29  ;;  %2767 = vmatmul.mubr.bf16.gmra.mxu1 %v4505_v30  ;;  %v4559_v29 = vcombine.low %v446_v9, %v450_v10 }
  0xe3   : > { %2485 = vmatprep.mubr.bf16.mxu0 %v4512_v31  ;;  %2774 = vmatprep.mubr.bf16.mxu1 %v4514_v32  ;;  %v4561_v32 = vcombine.low %v447_v11, %v451_v12  ;;  %v4586_v11 = vcombine.high %v471_v2, %v475_v3 }
  0xea   : > { %2486 = vmatmul.mubr.bf16.gmra.mxu0 %v4511_v37  ;;  %2775 = vmatmul.mubr.bf16.gmra.mxu1 %v4513_v38 }
  0xeb   : > { %2493 = vmatprep.mubr.bf16.mxu0 %v4520_v39  ;;  %2782 = vmatprep.mubr.bf16.mxu1 %v4522_v40 }
  0xf2   : > { %2494 = vmatmul.mubr.bf16.gmra.mxu0 %v4519_v45  ;;  %2783 = vmatmul.mubr.bf16.gmra.mxu1 %v4521_v46  ;;  %v463_v46 = vld [vmem:[%s5429_s21 + $0x6c8] sm:$0xff] }
  0xf3   : > { %2501 = vmatprep.mubr.bf16.mxu0 %v4528_v47  ;;  %2790 = vmatprep.mubr.bf16.mxu1 %v4530_v48  ;;  %v467_v47 = vld [vmem:[%s5429_s21 + $0x6e8] sm:$0xff] }
  0xfa   : > { %2502 = vmatmul.mubr.bf16.gmra.mxu0 %v4527_v53  ;;  %2791 = vmatmul.mubr.bf16.gmra.mxu1 %v4529_v54  ;;  %v4576_v53 = vcombine.high %v462_v42, %v466_v43 }
  0xfb   : > { %2509 = vmatprep.mubr.bf16.mxu0 %v4536_v55  ;;  %2798 = vmatprep.mubr.bf16.mxu1 %v4538_v56  ;;  %v4578_v55 = vcombine.high %v463_v46, %v467_v47 }
 0x102   : > { %2510 = vmatmul.mubr.bf16.gmra.mxu0 %v4535_v61  ;;  %2799 = vmatmul.mubr.bf16.gmra.mxu1 %v4537_v62  ;;  %v470_v62 = vld [vmem:[%s5429_s21 + $0x700] sm:$0xff] }
 0x103   : > { %2517 = vmatprep.mubr.bf16.mxu0 %v4544_v1  ;;  %2806 = vmatprep.mubr.bf16.mxu1 %v4546_v63  ;;  %v474_v1 = vld [vmem:[%s5429_s21 + $0x720] sm:$0xff] }
 0x104   : > { %v4584_v9 = vcombine.high %v470_v62, %v474_v1  ;;  %v4583_v27 = vcombine.low %v470_v62, %v474_v1  ;;  %v494_v1 = vld [vmem:[%s5429_s21 + $0x7c0] sm:$0xff] }
 0x10a   : > { %2518 = vmatmul.mubr.bf16.gmra.mxu0 %v4543_v5  ;;  %2807 = vmatmul.mubr.bf16.gmra.mxu1 %v4545_v6  ;;  %v4575_v5 = vcombine.low %v462_v42, %v466_v43  ;;  %v490_v42 = vld [vmem:[%s5429_s21 + $0x7a0] sm:$0xff] }
 0x10b   : > { %2525 = vmatprep.mubr.bf16.mxu0 %v4552_v7  ;;  %2814 = vmatprep.mubr.bf16.mxu1 %v4554_v8  ;;  %v4577_v8 = vcombine.low %v463_v46, %v467_v47  ;;  %v487_v46 = vld [vmem:[%s5429_s21 + $0x788] sm:$0xff] }
 0x10c   : > { %v491_v47 = vld [vmem:[%s5429_s21 + $0x7a8] sm:$0xff] }
 0x112   : > { %v2335_v18 = vpop.f32.mrf.mxu0  ;;  %2526 = vmatmul.mubr.bf16.gmra.mxu0 %v4551_v13  ;;  %v2624_v20 = vpop.f32.mrf.mxu1  ;;  %2815 = vmatmul.mubr.bf16.gmra.mxu1 %v4553_v14 }
 0x113   : > { %v2336_v19 = vadd.f32 %v5746_v16, %v2335_v18  ;;  %2533 = vmatprep.mubr.bf16.mxu0 %v4560_v15  ;;  %2822 = vmatprep.mubr.bf16.mxu1 %v4562_v17 }
 0x114   : > { %v2337_v21 = vpop.f32.mrf.mxu0  ;;  %v2626_v25 = vpop.f32.mrf.mxu1 }
 0x115   : > { %v5751_v24 = vadd.f32 %v2624_v20, %v2336_v19  ;;  %v478_v19 = vld [vmem:[%s5429_s21 + $0x740] sm:$0xff]  ;;  %v483_v25 = vld [vmem:[%s5429_s21 + $0x768] sm:$0xff] }
 0x116   : > { %v2338_v28 = vpop.f32.mrf.mxu0  ;;  %v2627_v31 = vpop.f32.mrf.mxu1  ;;  %v482_v20 = vld [vmem:[%s5429_s21 + $0x760] sm:$0xff] }
 0x117   : > { %v2339_v30 = vadd.f32 %v5746_v16, %v2338_v28 }
 0x118   : > { %v2340_v34 = vpop.f32.mrf.mxu0  ;;  %v2629_v37 = vpop.f32.mrf.mxu1 }
 0x119   : > { %v5756_v36 = vadd.f32 %v2627_v31, %v2339_v30  ;;  %v4585_v30 = vcombine.low %v471_v2, %v475_v3  ;;  %v4592_v31 = vcombine.high %v478_v19, %v482_v20 }
 0x11a   : > { %v2343_v38 = vpop.f32.mrf.mxu0  ;;  %2534 = vmatmul.mubr.bf16.gmra.mxu0 %v4559_v29  ;;  %v2632_v40 = vpop.f32.mrf.mxu1  ;;  %2823 = vmatmul.mubr.bf16.gmra.mxu1 %v4561_v32 }
 0x11b   : > { %v2344_v39 = vadd.f32 %v5746_v16, %v2343_v38  ;;  %2541 = vmatprep.mubr.bf16.mxu0 %v4568_v33  ;;  %2830 = vmatprep.mubr.bf16.mxu1 %v4570_v35  ;;  %v4594_v33 = vcombine.high %v479_v23, %v483_v25 }
 0x11c   : > { %v2345_v41 = vpop.f32.mrf.mxu0  ;;  %v2634_v45 = vpop.f32.mrf.mxu1 }
 0x11d   : > { %v5761_v44 = vadd.f32 %v2632_v40, %v2344_v39  ;;  %v486_v41 = vld [vmem:[%s5429_s21 + $0x780] sm:$0xff] }
 0x11e   : > { %v2346_v48 = vpop.f32.mrf.mxu0  ;;  %v2635_v51 = vpop.f32.mrf.mxu1 }
 0x11f   : > { %v2347_v50 = vadd.f32 %v5746_v16, %v2346_v48 }
 0x120   : > { %v2348_v54 = vpop.f32.mrf.mxu0  ;;  %v2637_v57 = vpop.f32.mrf.mxu1 }
 0x121   : > { %v5766_v56 = vadd.f32 %v2635_v51, %v2347_v50 }
 0x122   : > { %v2351_v58 = vpop.f32.mrf.mxu0  ;;  %2542 = vmatmul.mubr.bf16.gmra.mxu0 %v4567_v49  ;;  %v2640_v60 = vpop.f32.mrf.mxu1  ;;  %2831 = vmatmul.mubr.bf16.gmra.mxu1 %v4569_v52  ;;  %v4591_v49 = vcombine.low %v478_v19, %v482_v20  ;;  %v4593_v52 = vcombine.low %v479_v23, %v483_v25  ;;  %v248_v23 = vld [vmem:[%s5429_s21 + $0x10] sm:$0xff] }
 0x123   : > { %v2352_v59 = vadd.f32 %v5746_v16, %v2351_v58  ;;  %2549 = vmatprep.mubr.bf16.mxu0 %v4576_v53  ;;  %2838 = vmatprep.mubr.bf16.mxu1 %v4578_v55  ;;  %v4600_v53 = vcombine.high %v486_v41, %v490_v42  ;;  %v4602_v55 = vcombine.high %v487_v46, %v491_v47  ;;  %v252_v25 = vld [vmem:[%s5429_s21 + $0x30] sm:$0xff] }
 0x124   : > { %v2353_v61 = vpop.f32.mrf.mxu0  ;;  %v2642_v0 = vpop.f32.mrf.mxu1 }
 0x125   : > { %v5771_v63 = vadd.f32 %v2640_v60, %v2352_v59  ;;  %v498_v0 = vld [vmem:[%s5429_s21 + $0x7e0] sm:$0xff] }
 0x126   : > { %v2354_v4 = vpop.f32.mrf.mxu0  ;;  %v2643_v7 = vpop.f32.mrf.mxu1 }
 0x127   : > { %v2355_v6 = vadd.f32 %v5746_v16, %v2354_v4  ;;  %v495_v4 = vld [vmem:[%s5429_s21 + $0x7c8] sm:$0xff] }
 0x128   : > { %v2356_v10 = vpop.f32.mrf.mxu0  ;;  %v2645_v13 = vpop.f32.mrf.mxu1 }
 0x129   : > { %v5776_v12 = vadd.f32 %v2643_v7, %v2355_v6  ;;  %v4599_v7 = vcombine.low %v486_v41, %v490_v42  ;;  %v4601_v10 = vcombine.low %v487_v46, %v491_v47 }
 0x12a   : > { %v2359_v14 = vpop.f32.mrf.mxu0  ;;  %2550 = vmatmul.mubr.bf16.gmra.mxu0 %v4575_v5  ;;  %v2648_v17 = vpop.f32.mrf.mxu1  ;;  %2839 = vmatmul.mubr.bf16.gmra.mxu1 %v4577_v8  ;;  %v499_v5 = vld [vmem:[%s5429_s21 + $0x7e8] sm:$0xff] }
 0x12b   : > { %v2360_v15 = vadd.f32 %v5746_v16, %v2359_v14  ;;  %2557 = vmatprep.mubr.bf16.mxu0 %v4584_v9  ;;  %2846 = vmatprep.mubr.bf16.mxu1 %v4586_v11  ;;  %v4608_v11 = vcombine.high %v494_v1, %v498_v0  ;;  %v4610_v14 = vcombine.high %v495_v4, %v499_v5 }
 0x12c   : > { %v2361_v18 = vpop.f32.mrf.mxu0  ;;  %v2650_v22 = vpop.f32.mrf.mxu1 }
 0x12d   : > { %v5781_v21 = vadd.f32 %v2648_v17, %v2360_v15 }
 0x12e   : > { %v2362_v26 = vpop.f32.mrf.mxu0  ;;  %v2651_v29 = vpop.f32.mrf.mxu1 }
 0x12f   : > { %v2363_v28 = vadd.f32 %v5746_v16, %v2362_v26 }
 0x130   : > { %v2364_v32 = vpop.f32.mrf.mxu0  ;;  %v2653_v35 = vpop.f32.mrf.mxu1 }
 0x131   : > { %v5786_v34 = vadd.f32 %v2651_v29, %v2363_v28  ;;  %v249_v28 = vld [vmem:[%s5429_s21 + $0x18] sm:$0xff]  ;;  %v4609_v35 = vcombine.low %v495_v4, %v499_v5 }
 0x132   : > { %v2367_v37 = vpop.f32.mrf.mxu0  ;;  %2558 = vmatmul.mubr.bf16.gmra.mxu0 %v4583_v27  ;;  %v2656_v39 = vpop.f32.mrf.mxu1  ;;  %2847 = vmatmul.mubr.bf16.gmra.mxu1 %v4585_v30  ;;  %v253_v29 = vld [vmem:[%s5429_s21 + $0x38] sm:$0xff] }
 0x133   : > { %v2368_v38 = vadd.f32 %v5746_v16, %v2367_v37  ;;  %2565 = vmatprep.mubr.bf16.mxu0 %v4592_v31  ;;  %2854 = vmatprep.mubr.bf16.mxu1 %v4594_v33  ;;  %v4607_v31 = vcombine.low %v494_v1, %v498_v0  ;;  %v4364_v37 = vcombine.high %v248_v23, %v252_v25 }
 0x134   : > { %v2369_v40 = vpop.f32.mrf.mxu0  ;;  %v2658_v45 = vpop.f32.mrf.mxu1 }
 0x135   : > { %v5791_v43 = vadd.f32 %v2656_v39, %v2368_v38  ;;  %v4366_v39 = vcombine.high %v249_v28, %v253_v29 }
 0x136   : > { %v2370_v48 = vpop.f32.mrf.mxu0  ;;  %v2659_v51 = vpop.f32.mrf.mxu1 }
 0x137   : > { %v2371_v50 = vadd.f32 %v5746_v16, %v2370_v48  ;;  %v256_v48 = vld [vmem:[%s5429_s21 + $0x50] sm:$0xff] }
 0x138   : > { %v2372_v54 = vpop.f32.mrf.mxu0  ;;  %v2661_v58 = vpop.f32.mrf.mxu1 }
 0x139   : > { %v5796_v57 = vadd.f32 %v2659_v51, %v2371_v50 }
 0x13a   : > { %v2375_v59 = vpop.f32.mrf.mxu0  ;;  %2566 = vmatmul.mubr.bf16.gmra.mxu0 %v4591_v49  ;;  %v2664_v61 = vpop.f32.mrf.mxu1  ;;  %2855 = vmatmul.mubr.bf16.gmra.mxu1 %v4593_v52  ;;  %v260_v49 = vld [vmem:[%s5429_s21 + $0x70] sm:$0xff]  ;;  %v257_v52 = vld [vmem:[%s5429_s21 + $0x58] sm:$0xff] }
 0x13b   : > { %v2376_v60 = vadd.f32 %v5746_v16, %v2375_v59  ;;  %2573 = vmatprep.mubr.bf16.mxu0 %v4600_v53  ;;  %2862 = vmatprep.mubr.bf16.mxu1 %v4602_v55  ;;  %v261_v53 = vld [vmem:[%s5429_s21 + $0x78] sm:$0xff]  ;;  %v4363_v55 = vcombine.low %v248_v23, %v252_v25 }
 0x13c   : > { %v2377_v62 = vpop.f32.mrf.mxu0  ;;  %v2666_v3 = vpop.f32.mrf.mxu1  ;;  %v4374_v1 = vcombine.high %v257_v52, %v261_v53 }
 0x13d   : > { %v5801_v2 = vadd.f32 %v2664_v61, %v2376_v60  ;;  %v4365_v60 = vcombine.low %v249_v28, %v253_v29  ;;  %v4372_v61 = vcombine.high %v256_v48, %v260_v49 }
 0x13e   : > { %v2378_v6 = vpop.f32.mrf.mxu0  ;;  %v2667_v9 = vpop.f32.mrf.mxu1 }
 0x13f   : > { %v2379_v8 = vadd.f32 %v5746_v16, %v2378_v6 }
 0x140   : > { %v2380_v13 = vpop.f32.mrf.mxu0  ;;  %v2669_v17 = vpop.f32.mrf.mxu1 }
 0x141   : > { %v5806_v15 = vadd.f32 %v2667_v9, %v2379_v8  ;;  %v264_v8 = vld [vmem:[%s5429_s21 + $0x90] sm:$0xff]  ;;  %v265_v13 = vld [vmem:[%s5429_s21 + $0x98] sm:$0xff] }
 0x142   : > { %v2383_v18 = vpop.f32.mrf.mxu0  ;;  %2574 = vmatmul.mubr.bf16.gmra.mxu0 %v4599_v7  ;;  %v2672_v20 = vpop.f32.mrf.mxu1  ;;  %2863 = vmatmul.mubr.bf16.gmra.mxu1 %v4601_v10  ;;  %v268_v9 = vld [vmem:[%s5429_s21 + $0xb0] sm:$0xff] }
 0x143   : > { %v2384_v19 = vadd.f32 %v5746_v16, %v2383_v18  ;;  %2581 = vmatprep.mubr.bf16.mxu0 %v4608_v11  ;;  %2870 = vmatprep.mubr.bf16.mxu1 %v4610_v14  ;;  %v269_v14 = vld [vmem:[%s5429_s21 + $0xb8] sm:$0xff]  ;;  %v4371_v18 = vcombine.low %v256_v48, %v260_v49  ;;  %v4380_v23 = vcombine.high %v264_v8, %v268_v9 }
 0x144   : > { %v2385_v22 = vpop.f32.mrf.mxu0  ;;  %v2674_v27 = vpop.f32.mrf.mxu1  ;;  %v4381_v49 = vcombine.low %v265_v13, %v269_v14 }
 0x145   : > { %v5811_v26 = vadd.f32 %v2672_v20, %v2384_v19  ;;  %v4373_v22 = vcombine.low %v257_v52, %v261_v53  ;;  %v4382_v27 = vcombine.high %v265_v13, %v269_v14 }
 0x146   : > { %v2386_v30 = vpop.f32.mrf.mxu0  ;;  %v2675_v33 = vpop.f32.mrf.mxu1 }
 0x147   : > { %v2387_v32 = vadd.f32 %v5746_v16, %v2386_v30 }
 0x148   : > { %v2388_v38 = vpop.f32.mrf.mxu0  ;;  %v2677_v41 = vpop.f32.mrf.mxu1 }
 0x149   : > { %v5816_v40 = vadd.f32 %v2675_v33, %v2387_v32  ;;  %v273_v41 = vld [vmem:[%s5429_s21 + $0xd8] sm:$0xff] }
 0x14a   : > { %v2391_v42 = vpop.f32.mrf.mxu0  ;;  %2582 = vmatmul.mubr.bf16.gmra.mxu0 %v4607_v31  ;;  %v2680_v46 = vpop.f32.mrf.mxu1  ;;  %2871 = vmatmul.mubr.bf16.gmra.mxu1 %v4609_v35  ;;  %v272_v35 = vld [vmem:[%s5429_s21 + $0xd0] sm:$0xff] }
 0x14b   : > { %v2392_v45 = vadd.f32 %v5746_v16, %v2391_v42  ;;  %2911 = vmatprep.mubr.bf16.mxu0 %v4364_v37  ;;  %3200 = vmatprep.mubr.bf16.mxu1 %v4366_v39  ;;  %v276_v37 = vld [vmem:[%s5429_s21 + $0xf0] sm:$0xff]  ;;  %v277_v42 = vld [vmem:[%s5429_s21 + $0xf8] sm:$0xff] }
 0x14c   : > { %v2393_v47 = vpop.f32.mrf.mxu0  ;;  %v2682_v51 = vpop.f32.mrf.mxu1  ;;  %v4390_v53 = vcombine.high %v273_v41, %v277_v42  ;;  %v4389_v13 = vcombine.low %v273_v41, %v277_v42 }
 0x14d   : > { %v5821_v50 = vadd.f32 %v2680_v46, %v2392_v45  ;;  %v4379_v46 = vcombine.low %v264_v8, %v268_v9  ;;  %v4388_v51 = vcombine.high %v272_v35, %v276_v37  ;;  %v4387_v8 = vcombine.low %v272_v35, %v276_v37  ;;  %v293_v35 = vld [vmem:[%s5429_s21 + $0x178] sm:$0xff] }
 0x14e   : > { %v2394_v54 = vpop.f32.mrf.mxu0  ;;  %v2683_v59 = vpop.f32.mrf.mxu1 }
 0x14f   : > { %v2395_v58 = vadd.f32 %v5746_v16, %v2394_v54 }
 0x150   : > { %v2396_v62 = vpop.f32.mrf.mxu0  ;;  %v2685_v3 = vpop.f32.mrf.mxu1 }
 0x151   : > { %v5826_v0 = vadd.f32 %v2683_v59, %v2395_v58  ;;  %v280_v62 = vld [vmem:[%s5429_s21 + $0x110] sm:$0xff] }
 0x152   : > { %v2399_v4 = vpop.f32.mrf.mxu0  ;;  %2912 = vmatmul.mubr.bf16.vlgmr.msra.gmra.mxu0 %v4363_v55  ;;  %v2688_v6 = vpop.f32.mrf.mxu1  ;;  %3201 = vmatmul.mubr.bf16.vlgmr.msra.gmra.mxu1 %v4365_v60 }
 0x153   : > { %v2400_v5 = vadd.f32 %v5746_v16, %v2399_v4  ;;  %2919 = vmatprep.mubr.bf16.mxu0 %v4372_v61  ;;  %3208 = vmatprep.mubr.bf16.mxu1 %v4374_v1  ;;  %v284_v1 = vld [vmem:[%s5429_s21 + $0x130] sm:$0xff] }
 0x154   : > { %v2401_v7 = vpop.f32.mrf.mxu0  ;;  %v2690_v11 = vpop.f32.mrf.mxu1  ;;  %v4396_v14 = vcombine.high %v280_v62, %v284_v1 }
 0x155   : > { %v5831_v10 = vadd.f32 %v2688_v6, %v2400_v5  ;;  %v281_v5 = vld [vmem:[%s5429_s21 + $0x118] sm:$0xff] }
 0x156   : > { %v2402_v17 = vpop.f32.mrf.mxu0  ;;  %v2691_v20 = vpop.f32.mrf.mxu1  ;;  %v285_v6 = vld [vmem:[%s5429_s21 + $0x138] sm:$0xff] }
 0x157   : > { %v2403_v19 = vadd.f32 %v5746_v16, %v2402_v17 }
 0x158   : > { %v2404_v25 = vpop.f32.mrf.mxu0  ;;  %v2693_v29 = vpop.f32.mrf.mxu1 }
 0x159   : > { %v5836_v28 = vadd.f32 %v2691_v20, %v2403_v19  ;;  %v288_v29 = vld [vmem:[%s5429_s21 + $0x150] sm:$0xff] }
 0x15a   : > { %v2407_v30 = vpop.f32.mrf.mxu0  ;;  %2920 = vmatmul.mubr.bf16.gmra.mxu0 %v4371_v18  ;;  %v2696_v32 = vpop.f32.mrf.mxu1  ;;  %3209 = vmatmul.mubr.bf16.gmra.mxu1 %v4373_v22  ;;  %v4398_v18 = vcombine.high %v281_v5, %v285_v6 }
 0x15b   : > { %v2408_v31 = vadd.f32 %v5746_v16, %v2407_v30  ;;  %2927 = vmatprep.mubr.bf16.mxu0 %v4380_v23  ;;  %3216 = vmatprep.mubr.bf16.mxu1 %v4382_v27  ;;  %v292_v30 = vld [vmem:[%s5429_s21 + $0x170] sm:$0xff] }
 0x15c   : > { %v2409_v33 = vpop.f32.mrf.mxu0  ;;  %v2698_v39 = vpop.f32.mrf.mxu1 }
 0x15d   : > { %v5841_v38 = vadd.f32 %v2696_v32, %v2408_v31  ;;  %v289_v33 = vld [vmem:[%s5429_s21 + $0x158] sm:$0xff]  ;;  %v4395_v39 = vcombine.low %v280_v62, %v284_v1 }
 0x15e   : > { %v2410_v45 = vpop.f32.mrf.mxu0  ;;  %v2699_v48 = vpop.f32.mrf.mxu1  ;;  %v297_v1 = vld [vmem:[%s5429_s21 + $0x198] sm:$0xff] }
 0x15f   : > { %v2411_v47 = vadd.f32 %v5746_v16, %v2410_v45  ;;  %v4397_v45 = vcombine.low %v281_v5, %v285_v6  ;;  %v4403_v6 = vcombine.low %v288_v29, %v292_v30 }
 0x160   : > { %v2412_v52 = vpop.f32.mrf.mxu0  ;;  %v2701_v55 = vpop.f32.mrf.mxu1 }
 0x161   : > { %v5846_v54 = vadd.f32 %v2699_v48, %v2411_v47  ;;  %v4406_v48 = vcombine.high %v289_v33, %v293_v35 }
 0x162   : > { %v2415_v58 = vpop.f32.mrf.mxu0  ;;  %2928 = vmatmul.mubr.bf16.gmra.mxu0 %v4379_v46  ;;  %v2704_v60 = vpop.f32.mrf.mxu1  ;;  %3217 = vmatmul.mubr.bf16.gmra.mxu1 %v4381_v49  ;;  %v4404_v46 = vcombine.high %v288_v29, %v292_v30  ;;  %v308_v29 = vld [vmem:[%s5429_s21 + $0x1f0] sm:$0xff] }
 0x163   : > { %v2416_v59 = vadd.f32 %v5746_v16, %v2415_v58  ;;  %2935 = vmatprep.mubr.bf16.mxu0 %v4388_v51  ;;  %3224 = vmatprep.mubr.bf16.mxu1 %v4390_v53 }
 0x164   : > { %v2417_v61 = vpop.f32.mrf.mxu0  ;;  %v2706_v4 = vpop.f32.mrf.mxu1 }
 0x165   : > { %v5851_v3 = vadd.f32 %v2704_v60, %v2416_v59  ;;  %v296_v59 = vld [vmem:[%s5429_s21 + $0x190] sm:$0xff]  ;;  %v301_v4 = vld [vmem:[%s5429_s21 + $0x1b8] sm:$0xff] }
 0x166   : > { %v2418_v7 = vpop.f32.mrf.mxu0  ;;  %v2707_v11 = vpop.f32.mrf.mxu1  ;;  %v300_v60 = vld [vmem:[%s5429_s21 + $0x1b0] sm:$0xff] }
 0x167   : > { %v2419_v9 = vadd.f32 %v5746_v16, %v2418_v7 }
 0x168   : > { %v2420_v17 = vpop.f32.mrf.mxu0  ;;  %v2709_v20 = vpop.f32.mrf.mxu1 }
 0x169   : > { %v5856_v19 = vadd.f32 %v2707_v11, %v2419_v9  ;;  %v4405_v9 = vcombine.low %v289_v33, %v293_v35  ;;  %v4412_v11 = vcombine.high %v296_v59, %v300_v60  ;;  %v305_v33 = vld [vmem:[%s5429_s21 + $0x1d8] sm:$0xff] }
 0x16a   : > { %v2423_v22 = vpop.f32.mrf.mxu0  ;;  %2936 = vmatmul.mubr.bf16.gmra.mxu0 %v4387_v8  ;;  %v2712_v25 = vpop.f32.mrf.mxu1  ;;  %3225 = vmatmul.mubr.bf16.gmra.mxu1 %v4389_v13  ;;  %v309_v35 = vld [vmem:[%s5429_s21 + $0x1f8] sm:$0xff] }
 0x16b   : > { %v2424_v23 = vadd.f32 %v5746_v16, %v2423_v22  ;;  %2943 = vmatprep.mubr.bf16.mxu0 %v4396_v14  ;;  %3232 = vmatprep.mubr.bf16.mxu1 %v4398_v18  ;;  %v4414_v14 = vcombine.high %v297_v1, %v301_v4 }
 0x16c   : > { %v2425_v27 = vpop.f32.mrf.mxu0  ;;  %v2714_v32 = vpop.f32.mrf.mxu1 }
 0x16d   : > { %v5861_v31 = vadd.f32 %v2712_v25, %v2424_v23  ;;  %v304_v27 = vld [vmem:[%s5429_s21 + $0x1d0] sm:$0xff] }
 0x16e   : > { %v2426_v37 = vpop.f32.mrf.mxu0  ;;  %v2715_v42 = vpop.f32.mrf.mxu1 }
 0x16f   : > { %v2427_v41 = vadd.f32 %v5746_v16, %v2426_v37 }
 0x170   : > { %v2428_v47 = vpop.f32.mrf.mxu0  ;;  %v2717_v51 = vpop.f32.mrf.mxu1 }
 0x171   : > { %v5866_v49 = vadd.f32 %v2715_v42, %v2427_v41 }
 0x172   : > { %v2431_v52 = vpop.f32.mrf.mxu0  ;;  %2944 = vmatmul.mubr.bf16.gmra.mxu0 %v4395_v39  ;;  %v2720_v55 = vpop.f32.mrf.mxu1  ;;  %3233 = vmatmul.mubr.bf16.gmra.mxu1 %v4397_v45  ;;  %v4411_v39 = vcombine.low %v296_v59, %v300_v60  ;;  %v4413_v45 = vcombine.low %v297_v1, %v301_v4  ;;  %v312_v60 = vld [vmem:[%s5429_s21 + $0x210] sm:$0xff] }
 0x173   : > { %v2432_v53 = vadd.f32 %v5746_v16, %v2431_v52  ;;  %2951 = vmatprep.mubr.bf16.mxu0 %v4404_v46  ;;  %3240 = vmatprep.mubr.bf16.mxu1 %v4406_v48  ;;  %v4420_v46 = vcombine.high %v304_v27, %v308_v29  ;;  %v4422_v48 = vcombine.high %v305_v33, %v309_v35 }
 0x174   : > { %v2433_v58 = vpop.f32.mrf.mxu0  ;;  %v2722_v62 = vpop.f32.mrf.mxu1 }
 0x175   : > { %v5871_v61 = vadd.f32 %v2720_v55, %v2432_v53  ;;  %v316_v62 = vld [vmem:[%s5429_s21 + $0x230] sm:$0xff] }
 0x176   : > { %v2434_v5 = vpop.f32.mrf.mxu0  ;;  %v2723_v8 = vpop.f32.mrf.mxu1 }
 0x177   : > { %v2435_v7 = vadd.f32 %v5746_v16, %v2434_v5  ;;  %v313_v5 = vld [vmem:[%s5429_s21 + $0x218] sm:$0xff] }
 0x178   : > { %v2436_v13 = vpop.f32.mrf.mxu0  ;;  %v2725_v18 = vpop.f32.mrf.mxu1 }
 0x179   : > { %v5876_v17 = vadd.f32 %v2723_v8, %v2435_v7  ;;  %v4419_v8 = vcombine.low %v304_v27, %v308_v29  ;;  %v4421_v13 = vcombine.low %v305_v33, %v309_v35  ;;  %v320_v29 = vld [vmem:[%s5429_s21 + $0x250] sm:$0xff] }
 0x17a   : > { %v2439_v20 = vpop.f32.mrf.mxu0  ;;  %2952 = vmatmul.mubr.bf16.gmra.mxu0 %v4403_v6  ;;  %v2728_v23 = vpop.f32.mrf.mxu1  ;;  %3241 = vmatmul.mubr.bf16.gmra.mxu1 %v4405_v9  ;;  %v317_v6 = vld [vmem:[%s5429_s21 + $0x238] sm:$0xff] }
 0x17b   : > { %v2440_v22 = vadd.f32 %v5746_v16, %v2439_v20  ;;  %2959 = vmatprep.mubr.bf16.mxu0 %v4412_v11  ;;  %3248 = vmatprep.mubr.bf16.mxu1 %v4414_v14  ;;  %v4428_v14 = vcombine.high %v312_v60, %v316_v62  ;;  %v4430_v20 = vcombine.high %v313_v5, %v317_v6 }
 0x17c   : > { %v2441_v25 = vpop.f32.mrf.mxu0  ;;  %v2730_v32 = vpop.f32.mrf.mxu1 }
 0x17d   : > { %v5881_v30 = vadd.f32 %v2728_v23, %v2440_v22 }
 0x17e   : > { %v2442_v37 = vpop.f32.mrf.mxu0  ;;  %v2731_v42 = vpop.f32.mrf.mxu1 }
 0x17f   : > { %v2443_v41 = vadd.f32 %v5746_v16, %v2442_v37 }
 0x180   : > { %v2444_v47 = vpop.f32.mrf.mxu0  ;;  %v2733_v52 = vpop.f32.mrf.mxu1 }
 0x181   : > { %v5886_v51 = vadd.f32 %v2731_v42, %v2443_v41  ;;  %v321_v41 = vld [vmem:[%s5429_s21 + $0x258] sm:$0xff]  ;;  %v4429_v52 = vcombine.low %v313_v5, %v317_v6 }
 0x182   : > { %v2447_v53 = vpop.f32.mrf.mxu0  ;;  %2960 = vmatmul.mubr.bf16.gmra.mxu0 %v4411_v39  ;;  %v2736_v58 = vpop.f32.mrf.mxu1  ;;  %3249 = vmatmul.mubr.bf16.gmra.mxu1 %v4413_v45  ;;  %v324_v39 = vld [vmem:[%s5429_s21 + $0x270] sm:$0xff]  ;;  %v325_v42 = vld [vmem:[%s5429_s21 + $0x278] sm:$0xff] }
 0x183   : > { %v2448_v55 = vadd.f32 %v5746_v16, %v2447_v53  ;;  %2967 = vmatprep.mubr.bf16.mxu0 %v4420_v46  ;;  %3256 = vmatprep.mubr.bf16.mxu1 %v4422_v48  ;;  %v4427_v46 = vcombine.low %v312_v60, %v316_v62  ;;  %v4436_v53 = vcombine.high %v320_v29, %v324_v39  ;;  %v328_v62 = vld [vmem:[%s5429_s21 + $0x290] sm:$0xff] }
 0x184   : > { %v2449_v59 = vpop.f32.mrf.mxu0  ;;  %v2738_v4 = vpop.f32.mrf.mxu1 }
 0x185   : > { %v5891_v1 = vadd.f32 %v2736_v58, %v2448_v55  ;;  %v4438_v58 = vcombine.high %v321_v41, %v325_v42 }
 0x186   : > { %v2450_v7 = vpop.f32.mrf.mxu0  ;;  %v2739_v11 = vpop.f32.mrf.mxu1 }
 0x187   : > { %v2451_v9 = vadd.f32 %v5746_v16, %v2450_v7 }
 0x188   : > { %v2452_v18 = vpop.f32.mrf.mxu0  ;;  %v2741_v23 = vpop.f32.mrf.mxu1 }
 0x189   : > { %v5896_v22 = vadd.f32 %v2739_v11, %v2451_v9  ;;  %v332_v11 = vld [vmem:[%s5429_s21 + $0x2b0] sm:$0xff] }
 0x18a   : > { %v2455_v25 = vpop.f32.mrf.mxu0  ;;  %2968 = vmatmul.mubr.bf16.gmra.mxu0 %v4419_v8  ;;  %v2744_v37 = vpop.f32.mrf.mxu1  ;;  %3257 = vmatmul.mubr.bf16.gmra.mxu1 %v4421_v13  ;;  %v329_v13 = vld [vmem:[%s5429_s21 + $0x298] sm:$0xff] }
 0x18b   : > { %v2456_v32 = vadd.f32 %v5746_v16, %v2455_v25  ;;  %2975 = vmatprep.mubr.bf16.mxu0 %v4428_v14  ;;  %3264 = vmatprep.mubr.bf16.mxu1 %v4430_v20  ;;  %v333_v14 = vld [vmem:[%s5429_s21 + $0x2b8] sm:$0xff]  ;;  %v4435_v20 = vcombine.low %v320_v29, %v324_v39  ;;  %v336_v39 = vld [vmem:[%s5429_s21 + $0x2d0] sm:$0xff] }
 0x18c   : > { %v2457_v27 = vpop.f32.mrf.mxu0  ;;  %v2746_v35 = vpop.f32.mrf.mxu1 }
 0x18d   : > { %v5901_v33 = vadd.f32 %v2744_v37, %v2456_v32  ;;  %v4437_v32 = vcombine.low %v321_v41, %v325_v42  ;;  %v4444_v37 = vcombine.high %v328_v62, %v332_v11  ;;  %v4446_v35 = vcombine.high %v329_v13, %v333_v14 }
 0x18e   : > { %v2458_v45 = vpop.f32.mrf.mxu0  ;;  %v2747_v48 = vpop.f32.mrf.mxu1 }
 0x18f   : > { %v2459_v47 = vadd.f32 %v5746_v16, %v2458_v45 }
 0x190   : > { %v2460_v55 = vpop.f32.mrf.mxu0  ;;  %v2749_v4 = vpop.f32.mrf.mxu1 }
 0x191   : > { %v5906_v59 = vadd.f32 %v2747_v48, %v2459_v47  ;;  %v337_v55 = vld [vmem:[%s5429_s21 + $0x2d8] sm:$0xff] }
 0x192   : > { %v2463_v7 = vpop.f32.mrf.mxu0  ;;  %2976 = vmatmul.mubr.bf16.gmra.mxu0 %v4427_v46  ;;  %v2752_v9 = vpop.f32.mrf.mxu1  ;;  %3265 = vmatmul.mubr.bf16.gmra.mxu1 %v4429_v52 }
 0x193   : > { %v2464_v8 = vadd.f32 %v5746_v16, %v2463_v7  ;;  %2983 = vmatprep.mubr.bf16.mxu0 %v4436_v53  ;;  %3272 = vmatprep.mubr.bf16.mxu1 %v4438_v58  ;;  %v340_v53 = vld [vmem:[%s5429_s21 + $0x2f0] sm:$0xff]  ;;  %v341_v58 = vld [vmem:[%s5429_s21 + $0x2f8] sm:$0xff]  ;;  %v4443_v7 = vcombine.low %v328_v62, %v332_v11 }
 0x194   : > { %v2465_v60 = vpop.f32.mrf.mxu0  ;;  %v2754_v6 = vpop.f32.mrf.mxu1  ;;  %v344_v11 = vld [vmem:[%s5429_s21 + $0x310] sm:$0xff] }
 0x195   : > { %v5911_v5 = vadd.f32 %v2752_v9, %v2464_v8  ;;  %v4445_v60 = vcombine.low %v329_v13, %v333_v14  ;;  %v4452_v6 = vcombine.high %v336_v39, %v340_v53 }
 0x196   : > { %v2466_v18 = vpop.f32.mrf.mxu0  ;;  %v2755_v25 = vpop.f32.mrf.mxu1 }
 0x197   : > { %v2467_v23 = vadd.f32 %v5746_v16, %v2466_v18 }
 0x198   : > { %v2468_v27 = vpop.f32.mrf.mxu0  ;;  %v2757_v46 = vpop.f32.mrf.mxu1 }
 0x199   : > { %v5916_v45 = vadd.f32 %v2755_v25, %v2467_v23  ;;  %v345_v46 = vld [vmem:[%s5429_s21 + $0x318] sm:$0xff] }
 0x19a   : > { %v2471_v47 = vpop.f32.mrf.mxu0  ;;  %2984 = vmatmul.mubr.bf16.gmra.mxu0 %v4435_v20  ;;  %v2760_v52 = vpop.f32.mrf.mxu1  ;;  %3273 = vmatmul.mubr.bf16.gmra.mxu1 %v4437_v32  ;;  %v4454_v20 = vcombine.high %v337_v55, %v341_v58 }
 0x19b   : > { %v2472_v48 = vadd.f32 %v5746_v16, %v2471_v47  ;;  %2991 = vmatprep.mubr.bf16.mxu0 %v4444_v37  ;;  %3280 = vmatprep.mubr.bf16.mxu1 %v4446_v35  ;;  %v348_v35 = vld [vmem:[%s5429_s21 + $0x330] sm:$0xff]  ;;  %v349_v47 = vld [vmem:[%s5429_s21 + $0x338] sm:$0xff] }
 0x19c   : > { %v2473_v29 = vpop.f32.mrf.mxu0  ;;  %v2762_v42 = vpop.f32.mrf.mxu1 }
 0x19d   : > { %v5921_v41 = vadd.f32 %v2760_v52, %v2472_v48  ;;  %v4451_v52 = vcombine.low %v336_v39, %v340_v53  ;;  %v352_v53 = vld [vmem:[%s5429_s21 + $0x350] sm:$0xff] }
 0x19e   : > { %v2474_v4 = vpop.f32.mrf.mxu0  ;;  %v2763_v9 = vpop.f32.mrf.mxu1 }
 0x19f   : > { %v2475_v8 = vadd.f32 %v5746_v16, %v2474_v4  ;;  %v4453_v4 = vcombine.low %v337_v55, %v341_v58 }
 0x1a0   : > { %v2476_v18 = vpop.f32.mrf.mxu0  ;;  %v2765_v25 = vpop.f32.mrf.mxu1 }
 0x1a1   : > { %v5926_v23 = vadd.f32 %v2763_v9, %v2475_v8  ;;  %v4462_v9 = vcombine.high %v345_v46, %v349_v47 }
 0x1a2   : > { %v2479_v32 = vpop.f32.mrf.mxu0  ;;  %2992 = vmatmul.mubr.bf16.gmra.mxu0 %v4443_v7  ;;  %v2768_v27 = vpop.f32.mrf.mxu1  ;;  %3281 = vmatmul.mubr.bf16.gmra.mxu1 %v4445_v60  ;;  %v4460_v7 = vcombine.high %v344_v11, %v348_v35 }
 0x1a3   : > { %v2480_v37 = vadd.f32 %v5746_v16, %v2479_v32  ;;  %2999 = vmatprep.mubr.bf16.mxu0 %v4452_v6  ;;  %3288 = vmatprep.mubr.bf16.mxu1 %v4454_v20  ;;  %v356_v32 = vld [vmem:[%s5429_s21 + $0x370] sm:$0xff] }
 0x1a4   : > { %v2481_v62 = vpop.f32.mrf.mxu0  ;;  %v2770_v14 = vpop.f32.mrf.mxu1 }
 0x1a5   : > { %v5931_v13 = vadd.f32 %v2768_v27, %v2480_v37  ;;  %v353_v37 = vld [vmem:[%s5429_s21 + $0x358] sm:$0xff]  ;;  %v4459_v14 = vcombine.low %v344_v11, %v348_v35  ;;  %v360_v35 = vld [vmem:[%s5429_s21 + $0x390] sm:$0xff] }
 0x1a6   : > { %v2482_v48 = vpop.f32.mrf.mxu0  ;;  %v2771_v42 = vpop.f32.mrf.mxu1  ;;  %v357_v27 = vld [vmem:[%s5429_s21 + $0x378] sm:$0xff] }
 0x1a7   : > { %v2483_v29 = vadd.f32 %v5746_v16, %v2482_v48 }
 0x1a8   : > { %v2484_v8 = vpop.f32.mrf.mxu0  ;;  %v2773_v6 = vpop.f32.mrf.mxu1 }
 0x1a9   : > { %v5936_v60 = vadd.f32 %v2771_v42, %v2483_v29  ;;  %v4461_v29 = vcombine.low %v345_v46, %v349_v47  ;;  %v4468_v42 = vcombine.high %v352_v53, %v356_v32 }
 0x1aa   : > { %v2487_v18 = vpop.f32.mrf.mxu0  ;;  %3000 = vmatmul.mubr.bf16.gmra.mxu0 %v4451_v52  ;;  %v2776_v25 = vpop.f32.mrf.mxu1  ;;  %3289 = vmatmul.mubr.bf16.gmra.mxu1 %v4453_v4 }
 0x1ab   : > { %v2488_v20 = vadd.f32 %v5746_v16, %v2487_v18  ;;  %3007 = vmatprep.mubr.bf16.mxu0 %v4460_v7  ;;  %3296 = vmatprep.mubr.bf16.mxu1 %v4462_v9  ;;  %v4470_v7 = vcombine.high %v353_v37, %v357_v27 }
 0x1ac   : > { %v2489_v39 = vpop.f32.mrf.mxu0  ;;  %v2778_v58 = vpop.f32.mrf.mxu1 }
 0x1ad   : > { %v5941_v55 = vadd.f32 %v2776_v25, %v2488_v20  ;;  %v364_v25 = vld [vmem:[%s5429_s21 + $0x3b0] sm:$0xff]  ;;  %v361_v39 = vld [vmem:[%s5429_s21 + $0x398] sm:$0xff] }
 0x1ae   : > { %v2490_v62 = vpop.f32.mrf.mxu0  ;;  %v2779_v52 = vpop.f32.mrf.mxu1  ;;  %v365_v58 = vld [vmem:[%s5429_s21 + $0x3b8] sm:$0xff] }
 0x1af   : > { %v2491_v48 = vadd.f32 %v5746_v16, %v2490_v62 }
 0x1b0   : > { %v2492_v4 = vpop.f32.mrf.mxu0  ;;  %v2781_v9 = vpop.f32.mrf.mxu1 }
 0x1b1   : > { %v5946_v8 = vadd.f32 %v2779_v52, %v2491_v48  ;;  %v4467_v48 = vcombine.low %v352_v53, %v356_v32  ;;  %v4469_v4 = vcombine.low %v353_v37, %v357_v27  ;;  %v4476_v9 = vcombine.high %v360_v35, %v364_v25  ;;  %v368_v32 = vld [vmem:[%s5429_s21 + $0x3d0] sm:$0xff] }
 0x1b2   : > { %v2495_v6 = vpop.f32.mrf.mxu0  ;;  %3008 = vmatmul.mubr.bf16.gmra.mxu0 %v4459_v14  ;;  %v2784_v20 = vpop.f32.mrf.mxu1  ;;  %3297 = vmatmul.mubr.bf16.gmra.mxu1 %v4461_v29 }
 0x1b3   : > { %v2496_v18 = vadd.f32 %v5746_v16, %v2495_v6  ;;  %3015 = vmatprep.mubr.bf16.mxu0 %v4468_v42  ;;  %3304 = vmatprep.mubr.bf16.mxu1 %v4470_v7  ;;  %v4478_v42 = vcombine.high %v361_v39, %v365_v58 }
 0x1b4   : > { %v2497_v11 = vpop.f32.mrf.mxu0  ;;  %v2786_v47 = vpop.f32.mrf.mxu1 }
 0x1b5   : > { %v5951_v46 = vadd.f32 %v2784_v20, %v2496_v18  ;;  %v372_v47 = vld [vmem:[%s5429_s21 + $0x3f0] sm:$0xff] }
 0x1b6   : > { %v2498_v62 = vpop.f32.mrf.mxu0  ;;  %v2787_v14 = vpop.f32.mrf.mxu1 }
 0x1b7   : > { %6405 = vst [vmem:[#allocation3_spill] sm:$0xff] %v5951_v46  ;;  %v2499_v52 = vadd.f32 %v5746_v16, %v2498_v62  ;;  %v369_v62 = vld [vmem:[%s5429_s21 + $0x3d8] sm:$0xff] }
 0x1b8   : > { %v2500_v29 = vpop.f32.mrf.mxu0  ;;  %v2789_v6 = vpop.f32.mrf.mxu1 }
 0x1b9   : > { %v5956_v7 = vadd.f32 %v2787_v14, %v2499_v52  ;;  %v373_v29 = vld [vmem:[%s5429_s21 + $0x3f8] sm:$0xff]  ;;  %v4475_v52 = vcombine.low %v360_v35, %v364_v25 }
 0x1ba   : > { %v2503_v18 = vpop.f32.mrf.mxu0  ;;  %3016 = vmatmul.mubr.bf16.gmra.mxu0 %v4467_v48  ;;  %v2792_v11 = vpop.f32.mrf.mxu1  ;;  %3305 = vmatmul.mubr.bf16.gmra.mxu1 %v4469_v4  ;;  %v5968_v48 = vld [vmem:[%s6402_s2] ss:$0 sm:$0xff]  ;;  %v4477_v4 = vcombine.low %v361_v39, %v365_v58  ;;  %v4486_v6 = vcombine.high %v369_v62, %v373_v29 }
 0x1bb   : > { %6406 = vst [vmem:[#allocation4_spill] sm:$0xff] %v5956_v7  ;;  %v2504_v20 = vadd.f32 %v5746_v16, %v2503_v18  ;;  %3023 = vmatprep.mubr.bf16.mxu0 %v4476_v9  ;;  %3312 = vmatprep.mubr.bf16.mxu1 %v4478_v42  ;;  %v4484_v9 = vcombine.high %v368_v32, %v372_v47 }
 0x1bc   : > { %v2505_v53 = vpop.f32.mrf.mxu0  ;;  %v2794_v27 = vpop.f32.mrf.mxu1 }
 0x1bd   : > { %v5961_v37 = vadd.f32 %v2792_v11, %v2504_v20  ;;  %v376_v53 = vld [vmem:[%s5429_s21 + $0x410] sm:$0xff] }
 0x1be   : > { %v2506_v46 = vpop.f32.mrf.mxu0  ;;  %v2795_v14 = vpop.f32.mrf.mxu1  ;;  %v380_v27 = vld [vmem:[%s5429_s21 + $0x430] sm:$0xff] }
 0x1bf   : > { %6407 = vst [vmem:[#allocation5_spill] sm:$0xff] %v5961_v37  ;;  %v2507_v16 = vadd.f32 %v5968_v48, %v2506_v46  ;;  %v381_v37 = vld [vmem:[%s5429_s21 + $0x438] sm:$0xff] }
 0x1c0   : > { %v2508_v42 = vpop.f32.mrf.mxu0  ;;  %v2797_v20 = vpop.f32.mrf.mxu1 }
 0x1c1   : > { %v5971_v18 = vadd.f32 %v2795_v14, %v2507_v16  ;;  %v377_v42 = vld [vmem:[%s5429_s21 + $0x418] sm:$0xff]  ;;  %v4483_v16 = vcombine.low %v368_v32, %v372_v47  ;;  %v4485_v20 = vcombine.low %v369_v62, %v373_v29  ;;  %v384_v32 = vld [vmem:[%s5429_s21 + $0x450] sm:$0xff] }
 0x1c2   : > { %v2511_v35 = vpop.f32.mrf.mxu0  ;;  %3024 = vmatmul.mubr.bf16.gmra.mxu0 %v4475_v52  ;;  %v2800_v11 = vpop.f32.mrf.mxu1  ;;  %3313 = vmatmul.mubr.bf16.gmra.mxu1 %v4477_v4  ;;  %v388_v47 = vld [vmem:[%s5429_s21 + $0x470] sm:$0xff] }
 0x1c3   : > { %6408 = vst [vmem:[#allocation6_spill] sm:$0xff] %v5971_v18  ;;  %v2512_v25 = vadd.f32 %v5968_v48, %v2511_v35  ;;  %3031 = vmatprep.mubr.bf16.mxu0 %v4484_v9  ;;  %3320 = vmatprep.mubr.bf16.mxu1 %v4486_v6  ;;  %v4492_v35 = vcombine.high %v376_v53, %v380_v27 }
 0x1c4   : > { %v2513_v46 = vpop.f32.mrf.mxu0  ;;  %v2802_v58 = vpop.f32.mrf.mxu1  ;;  %v4494_v9 = vcombine.high %v377_v42, %v381_v37 }
 0x1c5   : > { %v5976_v39 = vadd.f32 %v2800_v11, %v2512_v25 }
 0x1c6   : > { %v2514_v7 = vpop.f32.mrf.mxu0  ;;  %v2803_v52 = vpop.f32.mrf.mxu1 }
 0x1c7   : > { %6409 = vst [vmem:[#allocation7_spill] sm:$0xff] %v5976_v39  ;;  %v2515_v14 = vadd.f32 %v5968_v48, %v2514_v7  ;;  %v389_v39 = vld [vmem:[%s5429_s21 + $0x478] sm:$0xff] }
 0x1c8   : > { %v2516_v4 = vpop.f32.mrf.mxu0  ;;  %v2805_v25 = vpop.f32.mrf.mxu1 }
 0x1c9   : > { %v5981_v6 = vadd.f32 %v2803_v52, %v2515_v14  ;;  %v385_v4 = vld [vmem:[%s5429_s21 + $0x458] sm:$0xff]  ;;  %v4491_v14 = vcombine.low %v376_v53, %v380_v27  ;;  %v4493_v25 = vcombine.low %v377_v42, %v381_v37  ;;  %v392_v53 = vld [vmem:[%s5429_s21 + $0x490] sm:$0xff] }
 0x1ca   : > { %v2519_v11 = vpop.f32.mrf.mxu0  ;;  %3032 = vmatmul.mubr.bf16.gmra.mxu0 %v4483_v16  ;;  %v2808_v58 = vpop.f32.mrf.mxu1  ;;  %3321 = vmatmul.mubr.bf16.gmra.mxu1 %v4485_v20  ;;  %v396_v27 = vld [vmem:[%s5429_s21 + $0x4b0] sm:$0xff] }
 0x1cb   : > { %6410 = vst [vmem:[#allocation8_spill] sm:$0xff] %v5981_v6  ;;  %v2520_v46 = vadd.f32 %v5968_v48, %v2519_v11  ;;  %3039 = vmatprep.mubr.bf16.mxu0 %v4492_v35  ;;  %3328 = vmatprep.mubr.bf16.mxu1 %v4494_v9  ;;  %v4500_v11 = vcombine.high %v384_v32, %v388_v47 }
 0x1cc   : > { %v2521_v7 = vpop.f32.mrf.mxu0  ;;  %v2810_v29 = vpop.f32.mrf.mxu1  ;;  %v4502_v35 = vcombine.high %v385_v4, %v389_v39 }
 0x1cd   : > { %v5986_v62 = vadd.f32 %v2808_v58, %v2520_v46 }
 0x1ce   : > { %v2522_v18 = vpop.f32.mrf.mxu0  ;;  %v2811_v16 = vpop.f32.mrf.mxu1 }
 0x1cf   : > { %6411 = vst [vmem:[#allocation9_spill] sm:$0xff] %v5986_v62  ;;  %v2523_v52 = vadd.f32 %v5968_v48, %v2522_v18  ;;  %v397_v62 = vld [vmem:[%s5429_s21 + $0x4b8] sm:$0xff] }
 0x1d0   : > { %v2524_v20 = vpop.f32.mrf.mxu0  ;;  %v2813_v46 = vpop.f32.mrf.mxu1 }
 0x1d1   : > { %v5991_v9 = vadd.f32 %v2811_v16, %v2523_v52  ;;  %v393_v20 = vld [vmem:[%s5429_s21 + $0x498] sm:$0xff]  ;;  %v4499_v52 = vcombine.low %v384_v32, %v388_v47  ;;  %v4501_v46 = vcombine.low %v385_v4, %v389_v39  ;;  %v400_v32 = vld [vmem:[%s5429_s21 + $0x4d0] sm:$0xff] }
 0x1d2   : > { %v2527_v58 = vpop.f32.mrf.mxu0  ;;  %3040 = vmatmul.mubr.bf16.gmra.mxu0 %v4491_v14  ;;  %v2816_v29 = vpop.f32.mrf.mxu1  ;;  %3329 = vmatmul.mubr.bf16.gmra.mxu1 %v4493_v25  ;;  %v404_v47 = vld [vmem:[%s5429_s21 + $0x4f0] sm:$0xff] }
 0x1d3   : > { %6412 = vst [vmem:[#allocation10_spill] sm:$0xff] %v5991_v9  ;;  %v2528_v7 = vadd.f32 %v5968_v48, %v2527_v58  ;;  %3047 = vmatprep.mubr.bf16.mxu0 %v4500_v11  ;;  %3336 = vmatprep.mubr.bf16.mxu1 %v4502_v35  ;;  %v4508_v58 = vcombine.high %v392_v53, %v396_v27 }
 0x1d4   : > { %v2529_v18 = vpop.f32.mrf.mxu0  ;;  %v2818_v42 = vpop.f32.mrf.mxu1  ;;  %v4510_v11 = vcombine.high %v393_v20, %v397_v62 }
 0x1d5   : > { %v5996_v37 = vadd.f32 %v2816_v29, %v2528_v7 }
 0x1d6   : > { %v2530_v6 = vpop.f32.mrf.mxu0  ;;  %v2819_v14 = vpop.f32.mrf.mxu1 }
 0x1d7   : > { %6413 = vst [vmem:[#allocation11_spill] sm:$0xff] %v5996_v37  ;;  %v2531_v16 = vadd.f32 %v5968_v48, %v2530_v6  ;;  %v405_v37 = vld [vmem:[%s5429_s21 + $0x4f8] sm:$0xff] }
 0x1d8   : > { %v2532_v25 = vpop.f32.mrf.mxu0  ;;  %v2821_v7 = vpop.f32.mrf.mxu1 }
 0x1d9   : > { %v6001_v35 = vadd.f32 %v2819_v14, %v2531_v16  ;;  %v401_v25 = vld [vmem:[%s5429_s21 + $0x4d8] sm:$0xff]  ;;  %v4507_v16 = vcombine.low %v392_v53, %v396_v27  ;;  %v4509_v7 = vcombine.low %v393_v20, %v397_v62  ;;  %v408_v53 = vld [vmem:[%s5429_s21 + $0x510] sm:$0xff] }
 0x1da   : > { %v2535_v29 = vpop.f32.mrf.mxu0  ;;  %3048 = vmatmul.mubr.bf16.gmra.mxu0 %v4499_v52  ;;  %v2824_v42 = vpop.f32.mrf.mxu1  ;;  %3337 = vmatmul.mubr.bf16.gmra.mxu1 %v4501_v46  ;;  %v412_v27 = vld [vmem:[%s5429_s21 + $0x530] sm:$0xff] }
 0x1db   : > { %6414 = vst [vmem:[#allocation12_spill] sm:$0xff] %v6001_v35  ;;  %v2536_v18 = vadd.f32 %v5968_v48, %v2535_v29  ;;  %3055 = vmatprep.mubr.bf16.mxu0 %v4508_v58  ;;  %3344 = vmatprep.mubr.bf16.mxu1 %v4510_v11  ;;  %v4516_v29 = vcombine.high %v400_v32, %v404_v47 }
 0x1dc   : > { %v2537_v6 = vpop.f32.mrf.mxu0  ;;  %v2826_v4 = vpop.f32.mrf.mxu1  ;;  %v4518_v58 = vcombine.high %v401_v25, %v405_v37 }
 0x1dd   : > { %v6006_v39 = vadd.f32 %v2824_v42, %v2536_v18 }
 0x1de   : > { %v2538_v9 = vpop.f32.mrf.mxu0  ;;  %v2827_v52 = vpop.f32.mrf.mxu1 }
 0x1df   : > { %6415 = vst [vmem:[#allocation13_spill] sm:$0xff] %v6006_v39  ;;  %v2539_v14 = vadd.f32 %v5968_v48, %v2538_v9  ;;  %v413_v39 = vld [vmem:[%s5429_s21 + $0x538] sm:$0xff] }
 0x1e0   : > { %v2540_v46 = vpop.f32.mrf.mxu0  ;;  %v2829_v18 = vpop.f32.mrf.mxu1 }
 0x1e1   : > { %v6011_v11 = vadd.f32 %v2827_v52, %v2539_v14  ;;  %v409_v46 = vld [vmem:[%s5429_s21 + $0x518] sm:$0xff]  ;;  %v4515_v14 = vcombine.low %v400_v32, %v404_v47  ;;  %v4517_v18 = vcombine.low %v401_v25, %v405_v37  ;;  %v416_v32 = vld [vmem:[%s5429_s21 + $0x550] sm:$0xff] }
 0x1e2   : > { %v2543_v42 = vpop.f32.mrf.mxu0  ;;  %3056 = vmatmul.mubr.bf16.gmra.mxu0 %v4507_v16  ;;  %v2832_v4 = vpop.f32.mrf.mxu1  ;;  %3345 = vmatmul.mubr.bf16.gmra.mxu1 %v4509_v7  ;;  %v420_v47 = vld [vmem:[%s5429_s21 + $0x570] sm:$0xff] }
 0x1e3   : > { %6416 = vst [vmem:[#allocation14_spill] sm:$0xff] %v6011_v11  ;;  %v2544_v6 = vadd.f32 %v5968_v48, %v2543_v42  ;;  %3063 = vmatprep.mubr.bf16.mxu0 %v4516_v29  ;;  %3352 = vmatprep.mubr.bf16.mxu1 %v4518_v58  ;;  %v4524_v42 = vcombine.high %v408_v53, %v412_v27 }
 0x1e4   : > { %v2545_v9 = vpop.f32.mrf.mxu0  ;;  %v2834_v20 = vpop.f32.mrf.mxu1  ;;  %v4526_v29 = vcombine.high %v409_v46, %v413_v39 }
 0x1e5   : > { %v6016_v62 = vadd.f32 %v2832_v4, %v2544_v6 }
 0x1e6   : > { %v2546_v35 = vpop.f32.mrf.mxu0  ;;  %v2835_v16 = vpop.f32.mrf.mxu1 }
 0x1e7   : > { %6417 = vst [vmem:[#allocation15_spill] sm:$0xff] %v6016_v62  ;;  %v2547_v52 = vadd.f32 %v5968_v48, %v2546_v35  ;;  %v421_v62 = vld [vmem:[%s5429_s21 + $0x578] sm:$0xff] }
 0x1e8   : > { %v2548_v7 = vpop.f32.mrf.mxu0  ;;  %v2837_v6 = vpop.f32.mrf.mxu1 }
 0x1e9   : > { %v6021_v58 = vadd.f32 %v2835_v16, %v2547_v52  ;;  %v417_v7 = vld [vmem:[%s5429_s21 + $0x558] sm:$0xff]  ;;  %v4523_v52 = vcombine.low %v408_v53, %v412_v27  ;;  %v4525_v6 = vcombine.low %v409_v46, %v413_v39  ;;  %v424_v53 = vld [vmem:[%s5429_s21 + $0x590] sm:$0xff] }
 0x1ea   : > { %v2551_v4 = vpop.f32.mrf.mxu0  ;;  %3064 = vmatmul.mubr.bf16.gmra.mxu0 %v4515_v14  ;;  %v2840_v20 = vpop.f32.mrf.mxu1  ;;  %3353 = vmatmul.mubr.bf16.gmra.mxu1 %v4517_v18  ;;  %v428_v27 = vld [vmem:[%s5429_s21 + $0x5b0] sm:$0xff] }
 0x1eb   : > { %6418 = vst [vmem:[#allocation16_spill] sm:$0xff] %v6021_v58  ;;  %v2552_v9 = vadd.f32 %v5968_v48, %v2551_v4  ;;  %3071 = vmatprep.mubr.bf16.mxu0 %v4524_v42  ;;  %3360 = vmatprep.mubr.bf16.mxu1 %v4526_v29  ;;  %v4532_v4 = vcombine.high %v416_v32, %v420_v47 }
 0x1ec   : > { %v2553_v35 = vpop.f32.mrf.mxu0  ;;  %v2842_v25 = vpop.f32.mrf.mxu1  ;;  %v4534_v42 = vcombine.high %v417_v7, %v421_v62 }
 0x1ed   : > { %v6026_v37 = vadd.f32 %v2840_v20, %v2552_v9 }
 0x1ee   : > { %v2554_v11 = vpop.f32.mrf.mxu0  ;;  %v2843_v14 = vpop.f32.mrf.mxu1 }
 0x1ef   : > { %6419 = vst [vmem:[#allocation17_spill] sm:$0xff] %v6026_v37  ;;  %v2555_v16 = vadd.f32 %v5968_v48, %v2554_v11  ;;  %v429_v37 = vld [vmem:[%s5429_s21 + $0x5b8] sm:$0xff] }
 0x1f0   : > { %v2556_v18 = vpop.f32.mrf.mxu0  ;;  %v2845_v9 = vpop.f32.mrf.mxu1 }
 0x1f1   : > { %v6031_v29 = vadd.f32 %v2843_v14, %v2555_v16  ;;  %v425_v18 = vld [vmem:[%s5429_s21 + $0x598] sm:$0xff]  ;;  %v4531_v16 = vcombine.low %v416_v32, %v420_v47  ;;  %v4533_v9 = vcombine.low %v417_v7, %v421_v62  ;;  %v432_v32 = vld [vmem:[%s5429_s21 + $0x5d0] sm:$0xff] }
 0x1f2   : > { %v2559_v20 = vpop.f32.mrf.mxu0  ;;  %3072 = vmatmul.mubr.bf16.gmra.mxu0 %v4523_v52  ;;  %v2848_v25 = vpop.f32.mrf.mxu1  ;;  %3361 = vmatmul.mubr.bf16.gmra.mxu1 %v4525_v6  ;;  %v436_v47 = vld [vmem:[%s5429_s21 + $0x5f0] sm:$0xff] }
 0x1f3   : > { %6420 = vst [vmem:[#allocation18_spill] sm:$0xff] %v6031_v29  ;;  %v2560_v35 = vadd.f32 %v5968_v48, %v2559_v20  ;;  %3079 = vmatprep.mubr.bf16.mxu0 %v4532_v4  ;;  %3368 = vmatprep.mubr.bf16.mxu1 %v4534_v42  ;;  %v4540_v20 = vcombine.high %v424_v53, %v428_v27 }
 0x1f4   : > { %v2561_v11 = vpop.f32.mrf.mxu0  ;;  %v2850_v46 = vpop.f32.mrf.mxu1  ;;  %v4542_v4 = vcombine.high %v425_v18, %v429_v37 }
 0x1f5   : > { %v6036_v39 = vadd.f32 %v2848_v25, %v2560_v35 }
 0x1f6   : > { %v2562_v58 = vpop.f32.mrf.mxu0  ;;  %v2851_v52 = vpop.f32.mrf.mxu1 }
 0x1f7   : > { %6421 = vst [vmem:[#allocation19_spill] sm:$0xff] %v6036_v39  ;;  %v2563_v14 = vadd.f32 %v5968_v48, %v2562_v58  ;;  %v437_v39 = vld [vmem:[%s5429_s21 + $0x5f8] sm:$0xff] }
 0x1f8   : > { %v2564_v6 = vpop.f32.mrf.mxu0  ;;  %v2853_v35 = vpop.f32.mrf.mxu1 }
 0x1f9   : > { %v6041_v42 = vadd.f32 %v2851_v52, %v2563_v14  ;;  %v433_v6 = vld [vmem:[%s5429_s21 + $0x5d8] sm:$0xff]  ;;  %v4539_v14 = vcombine.low %v424_v53, %v428_v27  ;;  %v4541_v35 = vcombine.low %v425_v18, %v429_v37  ;;  %v440_v53 = vld [vmem:[%s5429_s21 + $0x610] sm:$0xff] }
 0x1fa   : > { %v2567_v25 = vpop.f32.mrf.mxu0  ;;  %3080 = vmatmul.mubr.bf16.gmra.mxu0 %v4531_v16  ;;  %v2856_v46 = vpop.f32.mrf.mxu1  ;;  %3369 = vmatmul.mubr.bf16.gmra.mxu1 %v4533_v9  ;;  %v444_v27 = vld [vmem:[%s5429_s21 + $0x630] sm:$0xff] }
 0x1fb   : > { %6422 = vst [vmem:[#allocation20_spill] sm:$0xff] %v6041_v42  ;;  %v2568_v11 = vadd.f32 %v5968_v48, %v2567_v25  ;;  %3087 = vmatprep.mubr.bf16.mxu0 %v4540_v20  ;;  %3376 = vmatprep.mubr.bf16.mxu1 %v4542_v4  ;;  %v4548_v25 = vcombine.high %v432_v32, %v436_v47 }
 0x1fc   : > { %v2569_v58 = vpop.f32.mrf.mxu0  ;;  %v2858_v7 = vpop.f32.mrf.mxu1  ;;  %v4550_v20 = vcombine.high %v433_v6, %v437_v39 }
 0x1fd   : > { %v6046_v62 = vadd.f32 %v2856_v46, %v2568_v11 }
 0x1fe   : > { %v2570_v29 = vpop.f32.mrf.mxu0  ;;  %v2859_v16 = vpop.f32.mrf.mxu1 }
 0x1ff   : > { %6423 = vst [vmem:[#allocation21_spill] sm:$0xff] %v6046_v62  ;;  %v2571_v52 = vadd.f32 %v5968_v48, %v2570_v29  ;;  %v445_v62 = vld [vmem:[%s5429_s21 + $0x638] sm:$0xff] }
 0x200   : > { %v2572_v9 = vpop.f32.mrf.mxu0  ;;  %v2861_v11 = vpop.f32.mrf.mxu1 }
 0x201   : > { %v6051_v4 = vadd.f32 %v2859_v16, %v2571_v52  ;;  %v441_v9 = vld [vmem:[%s5429_s21 + $0x618] sm:$0xff]  ;;  %v4547_v52 = vcombine.low %v432_v32, %v436_v47  ;;  %v4549_v11 = vcombine.low %v433_v6, %v437_v39  ;;  %v448_v32 = vld [vmem:[%s5429_s21 + $0x650] sm:$0xff] }
 0x202   : > { %v2575_v46 = vpop.f32.mrf.mxu0  ;;  %3088 = vmatmul.mubr.bf16.gmra.mxu0 %v4539_v14  ;;  %v2864_v7 = vpop.f32.mrf.mxu1  ;;  %3377 = vmatmul.mubr.bf16.gmra.mxu1 %v4541_v35  ;;  %v452_v47 = vld [vmem:[%s5429_s21 + $0x670] sm:$0xff] }
 0x203   : > { %6424 = vst [vmem:[#allocation22_spill] sm:$0xff] %v6051_v4  ;;  %v2576_v58 = vadd.f32 %v5968_v48, %v2575_v46  ;;  %3095 = vmatprep.mubr.bf16.mxu0 %v4548_v25  ;;  %3384 = vmatprep.mubr.bf16.mxu1 %v4550_v20  ;;  %v4556_v46 = vcombine.high %v440_v53, %v444_v27 }
 0x204   : > { %v2577_v29 = vpop.f32.mrf.mxu0  ;;  %v2866_v18 = vpop.f32.mrf.mxu1  ;;  %v4558_v25 = vcombine.high %v441_v9, %v445_v62 }
 0x205   : > { %v6056_v37 = vadd.f32 %v2864_v7, %v2576_v58 }
 0x206   : > { %v2578_v42 = vpop.f32.mrf.mxu0  ;;  %v2867_v14 = vpop.f32.mrf.mxu1 }
 0x207   : > { %6425 = vst [vmem:[#allocation23_spill] sm:$0xff] %v6056_v37  ;;  %v2579_v16 = vadd.f32 %v5968_v48, %v2578_v42  ;;  %v453_v37 = vld [vmem:[%s5429_s21 + $0x678] sm:$0xff] }
 0x208   : > { %v2580_v35 = vpop.f32.mrf.mxu0  ;;  %v2869_v58 = vpop.f32.mrf.mxu1 }
 0x209   : > { %v6061_v20 = vadd.f32 %v2867_v14, %v2579_v16  ;;  %v449_v35 = vld [vmem:[%s5429_s21 + $0x658] sm:$0xff]  ;;  %v4555_v16 = vcombine.low %v440_v53, %v444_v27  ;;  %v4557_v58 = vcombine.low %v441_v9, %v445_v62  ;;  %v460_v62 = vld [vmem:[%s5429_s21 + $0x6b0] sm:$0xff] }
 0x20a   : > { %v2583_v7 = vpop.f32.mrf.mxu0  ;;  %3096 = vmatmul.mubr.bf16.gmra.mxu0 %v4547_v52  ;;  %v2872_v18 = vpop.f32.mrf.mxu1  ;;  %3385 = vmatmul.mubr.bf16.gmra.mxu1 %v4549_v11  ;;  %v457_v9 = vld [vmem:[%s5429_s21 + $0x698] sm:$0xff] }
 0x20b   : > { %v2584_v29 = vadd.f32 %v5968_v48, %v2583_v7  ;;  %3103 = vmatprep.mubr.bf16.mxu0 %v4556_v46  ;;  %3392 = vmatprep.mubr.bf16.mxu1 %v4558_v25  ;;  %v4564_v7 = vcombine.high %v448_v32, %v452_v47  ;;  %v4566_v46 = vcombine.high %v449_v35, %v453_v37 }
 0x20c   : > { %v2585_v42 = vpop.f32.mrf.mxu0  ;;  %v2874_v6 = vpop.f32.mrf.mxu1 }
 0x20d   : > { %v6066_v39 = vadd.f32 %v2872_v18, %v2584_v29  ;;  %v461_v6 = vld [vmem:[%s5429_s21 + $0x6b8] sm:$0xff] }
 0x20e   : > { %v2586_v4 = vpop.f32.mrf.mxu0  ;;  %v2875_v52 = vpop.f32.mrf.mxu1 }
 0x20f   : > { %6426 = vst [vmem:[#allocation24_spill] sm:$0xff] %v6066_v39  ;;  %v2587_v14 = vadd.f32 %v5968_v48, %v2586_v4  ;;  %v456_v4 = vld [vmem:[%s5429_s21 + $0x690] sm:$0xff] }
 0x210   : > { %v2588_v11 = vpop.f32.mrf.mxu0  ;;  %v2877_v29 = vpop.f32.mrf.mxu1  ;;  %v4572_v39 = vcombine.high %v456_v4, %v460_v62 }
 0x211   : > { %v6071_v25 = vadd.f32 %v2875_v52, %v2587_v14  ;;  %v4563_v14 = vcombine.low %v448_v32, %v452_v47 }
 0x212   : > { %v2913_v18 = vpop.f32.mrf.mxu0  ;;  %3104 = vmatmul.mubr.bf16.gmra.mxu0 %v4555_v16  ;;  %v3202_v53 = vpop.f32.mrf.mxu1  ;;  %3393 = vmatmul.mubr.bf16.gmra.mxu1 %v4557_v58  ;;  %v4565_v16 = vcombine.low %v449_v35, %v453_v37  ;;  %v4574_v58 = vcombine.high %v457_v9, %v461_v6  ;;  %v464_v37 = vld [vmem:[%s5429_s21 + $0x6d0] sm:$0xff] }
 0x213   : > { %6427 = vst [vmem:[#allocation25_spill] sm:$0xff] %v6071_v25  ;;  %v2914_v42 = vadd.f32 %v2913_v18, %v5751_v24  ;;  %3111 = vmatprep.mubr.bf16.mxu0 %v4564_v7  ;;  %3400 = vmatprep.mubr.bf16.mxu1 %v4566_v46  ;;  %v468_v35 = vld [vmem:[%s5429_s21 + $0x6f0] sm:$0xff] }
 0x214   : > { %v2915_v48 = vpop.f32.mrf.mxu0  ;;  %v3204_v27 = vpop.f32.mrf.mxu1 }
 0x215   : > { %v3203_v52 = vadd.f32 %v3202_v53, %v2914_v42 }
 0x216   : > { %v2916_v11 = vpop.f32.mrf.mxu0  ;;  %v3205_v25 = vpop.f32.mrf.mxu1 }
 0x217   : > { %v2917_v29 = vadd.f32 %v2916_v11, %v5756_v36  ;;  %v3457_v48 = vmax.f32 %v3203_v52, 0.0  ;;  %v465_v11 = vld [vmem:[%s5429_s21 + $0x6d8] sm:$0xff] }
 0x218   : > { %v2918_v24 = vpop.f32.mrf.mxu0  ;;  %v3207_v46 = vpop.f32.mrf.mxu1 }
 0x219   : > { %v3206_v7 = vadd.f32 %v3205_v25, %v2917_v29  ;;  %v469_v25 = vld [vmem:[%s5429_s21 + $0x6f8] sm:$0xff]  ;;  %v4571_v24 = vcombine.low %v456_v4, %v460_v62 }
 0x21a   : > { %v2921_v18 = vpop.f32.mrf.mxu0  ;;  %3112 = vmatmul.mubr.bf16.gmra.mxu0 %v4563_v14  ;;  %v3210_v47 = vpop.f32.mrf.mxu1  ;;  %3401 = vmatmul.mubr.bf16.gmra.mxu1 %v4565_v16  ;;  %v4573_v16 = vcombine.low %v457_v9, %v461_v6  ;;  %v472_v9 = vld [vmem:[%s5429_s21 + $0x710] sm:$0xff] }
 0x21b   : > { %v3458_v27 = vmax.f32 %v3206_v7, 0.0  ;;  %v2922_v32 = vadd.f32 %v2921_v18, %v5761_v44  ;;  %3119 = vmatprep.mubr.bf16.mxu0 %v4572_v39  ;;  %3408 = vmatprep.mubr.bf16.mxu1 %v4574_v58  ;;  %v4580_v39 = vcombine.high %v464_v37, %v468_v35  ;;  %v4582_v7 = vcombine.high %v465_v11, %v469_v25  ;;  %v476_v6 = vld [vmem:[%s5429_s21 + $0x730] sm:$0xff] }
 0x21c   : > { %v2923_v36 = vpop.f32.mrf.mxu0  ;;  %v3212_v53 = vpop.f32.mrf.mxu1 }
 0x21d   : > { %v4831_v42 = vpack.c.bf16 %v3458_v27, %v3457_v48  ;;  %v3211_v14 = vadd.f32 %v3210_v47, %v2922_v32  ;;  %v477_v53 = vld [vmem:[%s5429_s21 + $0x738] sm:$0xff] }
 0x21e   : > { %v2924_v29 = vpop.f32.mrf.mxu0  ;;  %v3213_v52 = vpop.f32.mrf.mxu1 }
 0x21f   : > { %4832 = vst [vmem:[%s6085_s12] sm:$0xff] %v4831_v42   ;;  %v2925_v44 = vadd.f32 %v2924_v29, %v5766_v56  ;;  %v3459_v4 = vmax.f32 %v3211_v14, 0.0  ;;  %v473_v42 = vld [vmem:[%s5429_s21 + $0x718] sm:$0xff] }
 0x220   : > { %v2926_v58 = vpop.f32.mrf.mxu0  ;;  %v3215_v18 = vpop.f32.mrf.mxu1 }
 0x221   : > { %v3214_v46 = vadd.f32 %v3213_v52, %v2925_v44  ;;  %v4579_v44 = vcombine.low %v464_v37, %v468_v35  ;;  %v4581_v58 = vcombine.low %v465_v11, %v469_v25  ;;  %v480_v11 = vld [vmem:[%s5429_s21 + $0x750] sm:$0xff] }
 0x222   : > { %v2929_v48 = vpop.f32.mrf.mxu0  ;;  %3120 = vmatmul.mubr.bf16.gmra.mxu0 %v4571_v24  ;;  %v3218_v32 = vpop.f32.mrf.mxu1  ;;  %3409 = vmatmul.mubr.bf16.gmra.mxu1 %v4573_v16  ;;  %v484_v25 = vld [vmem:[%s5429_s21 + $0x770] sm:$0xff] }
 0x223   : > { %v3460_v62 = vmax.f32 %v3214_v46, 0.0  ;;  %v2930_v27 = vadd.f32 %v2929_v48, %v5771_v63  ;;  %3127 = vmatprep.mubr.bf16.mxu0 %v4580_v39  ;;  %3416 = vmatprep.mubr.bf16.mxu1 %v4582_v7  ;;  %v4588_v63 = vcombine.high %v472_v9, %v476_v6  ;;  %v4590_v39 = vcombine.high %v473_v42, %v477_v53 }
 0x224   : > { %v2931_v56 = vpop.f32.mrf.mxu0  ;;  %v3220_v36 = vpop.f32.mrf.mxu1 }
 0x225   : > { %v4836_v47 = vpack.c.bf16 %v3460_v62, %v3459_v4  ;;  %v3219_v24 = vadd.f32 %v3218_v32, %v2930_v27  ;;  %v481_v32 = vld [vmem:[%s5429_s21 + $0x758] sm:$0xff]  ;;  %v4587_v36 = vcombine.low %v472_v9, %v476_v6 }
 0x226   : > { %v2932_v29 = vpop.f32.mrf.mxu0  ;;  %v3221_v52 = vpop.f32.mrf.mxu1  ;;  %v485_v56 = vld [vmem:[%s5429_s21 + $0x778] sm:$0xff] }
 0x227   : > { %4988 = vst [vmem:[%s6085_s12 + $0x8] sm:$0xff] %v4836_v47   ;;  %v2933_v14 = vadd.f32 %v2932_v29, %v5776_v12  ;;  %v3461_v48 = vmax.f32 %v3219_v24, 0.0 }
 0x228   : > { %v2934_v16 = vpop.f32.mrf.mxu0  ;;  %v3223_v46 = vpop.f32.mrf.mxu1 }
 0x229   : > { %v3222_v7 = vadd.f32 %v3221_v52, %v2933_v14  ;;  %v4589_v14 = vcombine.low %v473_v42, %v477_v53  ;;  %v488_v42 = vld [vmem:[%s5429_s21 + $0x790] sm:$0xff] }
 0x22a   : > { %v2937_v18 = vpop.f32.mrf.mxu0  ;;  %3128 = vmatmul.mubr.bf16.gmra.mxu0 %v4579_v44  ;;  %v3226_v4 = vpop.f32.mrf.mxu1  ;;  %3417 = vmatmul.mubr.bf16.gmra.mxu1 %v4581_v58  ;;  %v4598_v58 = vcombine.high %v481_v32, %v485_v56  ;;  %v492_v53 = vld [vmem:[%s5429_s21 + $0x7b0] sm:$0xff] }
 0x22b   : > { %v3462_v37 = vmax.f32 %v3222_v7, 0.0  ;;  %v2938_v35 = vadd.f32 %v2937_v18, %v5781_v21  ;;  %3135 = vmatprep.mubr.bf16.mxu0 %v4588_v63  ;;  %3424 = vmatprep.mubr.bf16.mxu1 %v4590_v39  ;;  %v4596_v21 = vcombine.high %v480_v11, %v484_v25 }
 0x22c   : > { %v2939_v12 = vpop.f32.mrf.mxu0  ;;  %v3228_v27 = vpop.f32.mrf.mxu1 }
 0x22d   : > { %v4841_v62 = vpack.c.bf16 %v3462_v37, %v3461_v48  ;;  %v3227_v29 = vadd.f32 %v3226_v4, %v2938_v35  ;;  %v489_v37 = vld [vmem:[%s5429_s21 + $0x798] sm:$0xff]  ;;  %v4595_v12 = vcombine.low %v480_v11, %v484_v25 }
 0x22e   : > { %v2940_v47 = vpop.f32.mrf.mxu0  ;;  %v3229_v24 = vpop.f32.mrf.mxu1  ;;  %v493_v35 = vld [vmem:[%s5429_s21 + $0x7b8] sm:$0xff] }
 0x22f   : > { %4989 = vst [vmem:[%s6085_s12 + $0x10] sm:$0xff] %v4841_v62   ;;  %v2941_v44 = vadd.f32 %v2940_v47, %v5786_v34  ;;  %v3463_v7 = vmax.f32 %v3227_v29, 0.0 }
 0x230   : > { %v2942_v52 = vpop.f32.mrf.mxu0  ;;  %v3231_v16 = vpop.f32.mrf.mxu1 }
 0x231   : > { %v3230_v63 = vadd.f32 %v3229_v24, %v2941_v44  ;;  %v4606_v44 = vcombine.high %v489_v37, %v493_v35 }
 0x232   : > { %v2945_v39 = vpop.f32.mrf.mxu0  ;;  %3136 = vmatmul.mubr.bf16.gmra.mxu0 %v4587_v36  ;;  %v3234_v46 = vpop.f32.mrf.mxu1  ;;  %3425 = vmatmul.mubr.bf16.gmra.mxu1 %v4589_v14  ;;  %v4597_v36 = vcombine.low %v481_v32, %v485_v56  ;;  %v496_v32 = vld [vmem:[%s5429_s21 + $0x7d0] sm:$0xff] }
 0x233   : > { %v3464_v9 = vmax.f32 %v3230_v63, 0.0  ;;  %v2946_v6 = vadd.f32 %v2945_v39, %v5791_v43  ;;  %3143 = vmatprep.mubr.bf16.mxu0 %v4596_v21  ;;  %3432 = vmatprep.mubr.bf16.mxu1 %v4598_v58  ;;  %v4604_v43 = vcombine.high %v488_v42, %v492_v53  ;;  %v500_v56 = vld [vmem:[%s5429_s21 + $0x7f0] sm:$0xff]  ;;  %v497_v39 = vld [vmem:[%s5429_s21 + $0x7d8] sm:$0xff] }
 0x234   : > { %v2947_v34 = vpop.f32.mrf.mxu0  ;;  %v3236_v48 = vpop.f32.mrf.mxu1 }
 0x235   : > { %v4846_v18 = vpack.c.bf16 %v3464_v9, %v3463_v7  ;;  %v3235_v62 = vadd.f32 %v3234_v46, %v2946_v6  ;;  %v501_v7 = vld [vmem:[%s5429_s21 + $0x7f8] sm:$0xff]  ;;  %v4603_v6 = vcombine.low %v488_v42, %v492_v53  ;;  %v4605_v48 = vcombine.low %v489_v37, %v493_v35  ;;  %s3849_s21 = ssub.s32 (%p5346_p3), 169, %s5397_s24 }
 0x236   : > { %v2948_v4 = vpop.f32.mrf.mxu0  ;;  %v3237_v47 = vpop.f32.mrf.mxu1  ;;  %v4611_v35 = vcombine.low %v496_v32, %v500_v56  ;;  %p3850_p9 = scmp.lt.s32.totalorder (%p5346_p3), %s3849_s21, 64 }
 0x237   : > { %4990 = vst [vmem:[%s6085_s12 + $0x18] sm:$0xff] %v4846_v18   ;;  %v2949_v27 = vadd.f32 %v2948_v4, %v5796_v57  ;;  %v3465_v52 = vmax.f32 %v3235_v62, 0.0 }
 0x238   : > { %v2950_v29 = vpop.f32.mrf.mxu0  ;;  %v3239_v14 = vpop.f32.mrf.mxu1 }
 0x239   : > { %v3238_v24 = vadd.f32 %v3237_v47, %v2949_v27 }
 0x23a   : > { %v2953_v21 = vpop.f32.mrf.mxu0  ;;  %3144 = vmatmul.mubr.bf16.gmra.mxu0 %v4595_v12  ;;  %v3242_v58 = vpop.f32.mrf.mxu1  ;;  %3433 = vmatmul.mubr.bf16.gmra.mxu1 %v4597_v36  ;;  %v4614_v12 = vcombine.high %v497_v39, %v501_v7 }
 0x23b   : > { %v3466_v11 = vmax.f32 %v3238_v24, 0.0  ;;  %v2954_v25 = vadd.f32 %v2953_v21, %v5801_v2  ;;  %3151 = vmatprep.mubr.bf16.mxu0 %v4604_v43  ;;  %3440 = vmatprep.mubr.bf16.mxu1 %v4606_v44  ;;  %v4612_v2 = vcombine.high %v496_v32, %v500_v56 }
 0x23c   : > { %v2955_v57 = vpop.f32.mrf.mxu0  ;;  %v3244_v16 = vpop.f32.mrf.mxu1 }
 0x23d   : > { %v4851_v63 = vpack.c.bf16 %v3466_v11, %v3465_v52  ;;  %v3243_v46 = vadd.f32 %v3242_v58, %v2954_v25  ;;  %v4613_v52 = vcombine.low %v497_v39, %v501_v7 }
 0x23e   : > { %v2956_v9 = vpop.f32.mrf.mxu0  ;;  %v3245_v18 = vpop.f32.mrf.mxu1 }
 0x23f   : > { %4991 = vst [vmem:[%s6085_s12 + $0x20] sm:$0xff] %v4851_v63   ;;  %v2957_v34 = vadd.f32 %v2956_v9, %v5806_v15  ;;  %v3467_v36 = vmax.f32 %v3243_v46, 0.0 }
 0x240   : > { %v2958_v4 = vpop.f32.mrf.mxu0  ;;  %v3247_v27 = vpop.f32.mrf.mxu1 }
 0x241   : > { %v3246_v62 = vadd.f32 %v3245_v18, %v2957_v34 }
 0x242   : > { %v2961_v47 = vpop.f32.mrf.mxu0  ;;  %3152 = vmatmul.mubr.bf16.gmra.mxu0 %v4603_v6  ;;  %v3250_v44 = vpop.f32.mrf.mxu1  ;;  %3441 = vmatmul.mubr.bf16.gmra.mxu1 %v4605_v48 }
 0x243   : > { %v3468_v43 = vmax.f32 %v3246_v62, 0.0  ;;  %v2962_v29 = vadd.f32 %v2961_v47, %v5811_v26  ;;  %3159 = vmatprep.mubr.bf16.mxu0 %v4612_v2  ;;  %3448 = vmatprep.mubr.bf16.mxu1 %v4614_v12 }
 0x244   : > { %v2963_v42 = vpop.f32.mrf.mxu0  ;;  %v3252_v53 = vpop.f32.mrf.mxu1 }
 0x245   : > { %v4856_v15 = vpack.c.bf16 %v3468_v43, %v3467_v36  ;;  %v3251_v24 = vadd.f32 %v3250_v44, %v2962_v29 }
 0x246   : > { %v2964_v37 = vpop.f32.mrf.mxu0  ;;  %v3253_v21 = vpop.f32.mrf.mxu1 }
 0x247   : > { %4992 = vst [vmem:[%s6085_s12 + $0x28] sm:$0xff] %v4856_v15   ;;  %v2965_v14 = vadd.f32 %v2964_v37, %v5816_v40  ;;  %v3469_v57 = vmax.f32 %v3251_v24, 0.0 }
 0x248   : > { %v2966_v11 = vpop.f32.mrf.mxu0  ;;  %v3255_v58 = vpop.f32.mrf.mxu1 }
 0x249   : > { %v3254_v25 = vadd.f32 %v3253_v21, %v2965_v14 }
 0x24a   : > { %v2969_v26 = vpop.f32.mrf.mxu0  ;;  %3160 = vmatmul.mubr.bf16.gmra.mxu0 %v4611_v35  ;;  %v3258_v9 = vpop.f32.mrf.mxu1  ;;  %3449 = vmatmul.mubr.bf16.gmra.mxu1 %v4613_v52 }
 0x24b   : > { %v3470_v63 = vmax.f32 %v3254_v25, 0.0  ;;  %v2970_v16 = vadd.f32 %v2969_v26, %v5821_v50 }
 0x24c   : > { %v2971_v6 = vpop.f32.mrf.mxu0  ;;  %v3260_v56 = vpop.f32.mrf.mxu1 }
 0x24d   : > { %v4861_v32 = vpack.c.bf16 %v3470_v63, %v3469_v57  ;;  %v3259_v40 = vadd.f32 %v3258_v9, %v2970_v16 }
 0x24e   : > { %v2972_v46 = vpop.f32.mrf.mxu0  ;;  %v3261_v7 = vpop.f32.mrf.mxu1 }
 0x24f   : > { %4993 = vst [vmem:[%s6085_s12 + $0x30] sm:$0xff] %v4861_v32   ;;  %v2973_v39 = vadd.f32 %v2972_v46, %v5826_v0  ;;  %v3471_v4 = vmax.f32 %v3259_v40, 0.0 }
 0x250   : > { %v2974_v34 = vpop.f32.mrf.mxu0  ;;  %v3263_v48 = vpop.f32.mrf.mxu1 }
 0x251   : > { %v3262_v18 = vadd.f32 %v3261_v7, %v2973_v39 }
 0x252   : > { %v2977_v2 = vpop.f32.mrf.mxu0  ;;  %v3266_v62 = vpop.f32.mrf.mxu1 }
 0x253   : > { %v3472_v12 = vmax.f32 %v3262_v18, 0.0  ;;  %v2978_v50 = vadd.f32 %v2977_v2, %v5831_v10 }
 0x254   : > { %v2979_v27 = vpop.f32.mrf.mxu0  ;;  %v3268_v36 = vpop.f32.mrf.mxu1 }
 0x255   : > { %v4866_v47 = vpack.c.bf16 %v3472_v12, %v3471_v4  ;;  %v3267_v29 = vadd.f32 %v3266_v62, %v2978_v50 }
 0x256   : > { %v2980_v43 = vpop.f32.mrf.mxu0  ;;  %v3269_v0 = vpop.f32.mrf.mxu1 }
 0x257   : > { %4994 = vst [vmem:[%s6085_s12 + $0x38] sm:$0xff] %v4866_v47   ;;  %v2981_v44 = vadd.f32 %v2980_v43, %v5836_v28  ;;  %v3473_v35 = vmax.f32 %v3267_v29, 0.0 }
 0x258   : > { %v2982_v42 = vpop.f32.mrf.mxu0  ;;  %v3271_v53 = vpop.f32.mrf.mxu1 }
 0x259   : > { %v3270_v15 = vadd.f32 %v3269_v0, %v2981_v44 }
 0x25a   : > { %v2985_v37 = vpop.f32.mrf.mxu0  ;;  %v3274_v10 = vpop.f32.mrf.mxu1 }
 0x25b   : > { %v3474_v24 = vmax.f32 %v3270_v15, 0.0  ;;  %v2986_v14 = vadd.f32 %v2985_v37, %v5841_v38 }
 0x25c   : > { %v2987_v21 = vpop.f32.mrf.mxu0  ;;  %v3276_v11 = vpop.f32.mrf.mxu1 }
 0x25d   : > { %v4871_v52 = vpack.c.bf16 %v3474_v24, %v3473_v35  ;;  %v3275_v58 = vadd.f32 %v3274_v10, %v2986_v14 }
 0x25e   : > { %v2988_v25 = vpop.f32.mrf.mxu0  ;;  %v3277_v28 = vpop.f32.mrf.mxu1 }
 0x25f   : > { %4995 = vst [vmem:[%s6085_s12 + $0x40] sm:$0xff] %v4871_v52   ;;  %v2989_v26 = vadd.f32 %v2988_v25, %v5846_v54  ;;  %v3475_v6 = vmax.f32 %v3275_v58, 0.0 }
 0x260   : > { %v2990_v57 = vpop.f32.mrf.mxu0  ;;  %v3279_v16 = vpop.f32.mrf.mxu1 }
 0x261   : > { %v3278_v63 = vadd.f32 %v3277_v28, %v2989_v26 }
 0x262   : > { %v2993_v9 = vpop.f32.mrf.mxu0  ;;  %v3282_v38 = vpop.f32.mrf.mxu1 }
 0x263   : > { %v3476_v32 = vmax.f32 %v3278_v63, 0.0  ;;  %v2994_v56 = vadd.f32 %v2993_v9, %v5851_v3 }
 0x264   : > { %v2995_v46 = vpop.f32.mrf.mxu0  ;;  %v3284_v39 = vpop.f32.mrf.mxu1 }
 0x265   : > { %v4876_v40 = vpack.c.bf16 %v3476_v32, %v3475_v6  ;;  %v3283_v34 = vadd.f32 %v3282_v38, %v2994_v56 }
 0x266   : > { %v2996_v7 = vpop.f32.mrf.mxu0  ;;  %v3285_v54 = vpop.f32.mrf.mxu1 }
 0x267   : > { %4996 = vst [vmem:[%s6085_s12 + $0x48] sm:$0xff] %v4876_v40   ;;  %v2997_v18 = vadd.f32 %v2996_v7, %v5856_v19  ;;  %v3477_v50 = vmax.f32 %v3283_v34, 0.0 }
 0x268   : > { %v2998_v48 = vpop.f32.mrf.mxu0  ;;  %v3287_v4 = vpop.f32.mrf.mxu1 }
 0x269   : > { %v3286_v2 = vadd.f32 %v3285_v54, %v2997_v18 }
 0x26a   : > { %v3001_v12 = vpop.f32.mrf.mxu0  ;;  %v3290_v3 = vpop.f32.mrf.mxu1 }
 0x26b   : > { %v3478_v62 = vmax.f32 %v3286_v2, 0.0  ;;  %v3002_v27 = vadd.f32 %v3001_v12, %v5861_v31 }
 0x26c   : > { %v3003_v47 = vpop.f32.mrf.mxu0  ;;  %v3292_v43 = vpop.f32.mrf.mxu1 }
 0x26d   : > { %v4881_v36 = vpack.c.bf16 %v3478_v62, %v3477_v50  ;;  %v3291_v44 = vadd.f32 %v3290_v3, %v3002_v27 }
 0x26e   : > { %v3004_v29 = vpop.f32.mrf.mxu0  ;;  %v3293_v19 = vpop.f32.mrf.mxu1 }
 0x26f   : > { %4997 = vst [vmem:[%s6085_s12 + $0x50] sm:$0xff] %v4881_v36   ;;  %v3005_v0 = vadd.f32 %v3004_v29, %v5866_v49  ;;  %v3479_v35 = vmax.f32 %v3291_v44, 0.0 }
 0x270   : > { %v3006_v42 = vpop.f32.mrf.mxu0  ;;  %v3295_v53 = vpop.f32.mrf.mxu1 }
 0x271   : > { %v3294_v15 = vadd.f32 %v3293_v19, %v3005_v0 }
 0x272   : > { %v3009_v37 = vpop.f32.mrf.mxu0  ;;  %v3298_v31 = vpop.f32.mrf.mxu1 }
 0x273   : > { %v3480_v24 = vmax.f32 %v3294_v15, 0.0  ;;  %v3010_v14 = vadd.f32 %v3009_v37, %v5871_v61 }
 0x274   : > { %v3011_v10 = vpop.f32.mrf.mxu0  ;;  %v3300_v52 = vpop.f32.mrf.mxu1 }
 0x275   : > { %v4886_v21 = vpack.c.bf16 %v3480_v24, %v3479_v35  ;;  %v3299_v25 = vadd.f32 %v3298_v31, %v3010_v14 }
 0x276   : > { %v3012_v11 = vpop.f32.mrf.mxu0  ;;  %v3301_v49 = vpop.f32.mrf.mxu1 }
 0x277   : > { %4998 = vst [vmem:[%s6085_s12 + $0x58] sm:$0xff] %v4886_v21   ;;  %v3013_v58 = vadd.f32 %v3012_v11, %v5876_v17  ;;  %v3481_v16 = vmax.f32 %v3299_v25, 0.0 }
 0x278   : > { %v3014_v26 = vpop.f32.mrf.mxu0  ;;  %v3303_v57 = vpop.f32.mrf.mxu1 }
 0x279   : > { %v3302_v28 = vadd.f32 %v3301_v49, %v3013_v58 }
 0x27a   : > { %v3017_v63 = vpop.f32.mrf.mxu0  ;;  %v3306_v61 = vpop.f32.mrf.mxu1 }
 0x27b   : > { %v3482_v9 = vmax.f32 %v3302_v28, 0.0  ;;  %v3018_v6 = vadd.f32 %v3017_v63, %v5881_v30 }
 0x27c   : > { %v3019_v32 = vpop.f32.mrf.mxu0  ;;  %v3308_v38 = vpop.f32.mrf.mxu1 }
 0x27d   : > { %v4891_v56 = vpack.c.bf16 %v3482_v9, %v3481_v16  ;;  %v3307_v40 = vadd.f32 %v3306_v61, %v3018_v6 }
 0x27e   : > { %v3020_v46 = vpop.f32.mrf.mxu0  ;;  %v3309_v17 = vpop.f32.mrf.mxu1 }
 0x27f   : > { %4999 = vst [vmem:[%s6085_s12 + $0x60] sm:$0xff] %v4891_v56   ;;  %v3021_v39 = vadd.f32 %v3020_v46, %v5886_v51  ;;  %v3483_v48 = vmax.f32 %v3307_v40, 0.0 }
 0x280   : > { %v3022_v7 = vpop.f32.mrf.mxu0  ;;  %v3311_v18 = vpop.f32.mrf.mxu1 }
 0x281   : > { %v3310_v34 = vadd.f32 %v3309_v17, %v3021_v39 }
 0x282   : > { %v3025_v54 = vpop.f32.mrf.mxu0  ;;  %v3314_v30 = vpop.f32.mrf.mxu1 }
 0x283   : > { %v3484_v2 = vmax.f32 %v3310_v34, 0.0  ;;  %v3026_v4 = vadd.f32 %v3025_v54, %v5891_v1 }
 0x284   : > { %v3027_v12 = vpop.f32.mrf.mxu0  ;;  %v3316_v62 = vpop.f32.mrf.mxu1 }
 0x285   : > { %v4896_v50 = vpack.c.bf16 %v3484_v2, %v3483_v48  ;;  %v3315_v3 = vadd.f32 %v3314_v30, %v3026_v4 }
 0x286   : > { %v3028_v27 = vpop.f32.mrf.mxu0  ;;  %v3317_v51 = vpop.f32.mrf.mxu1 }
 0x287   : > { %5000 = vst [vmem:[%s6085_s12 + $0x68] sm:$0xff] %v4896_v50   ;;  %v3029_v47 = vadd.f32 %v3028_v27, %v5896_v22  ;;  %v3485_v0 = vmax.f32 %v3315_v3, 0.0 }
 0x288   : > { %v3030_v36 = vpop.f32.mrf.mxu0  ;;  %v3319_v29 = vpop.f32.mrf.mxu1 }
 0x289   : > { %v3318_v43 = vadd.f32 %v3317_v51, %v3029_v47 }
 0x28a   : > { %v3033_v44 = vpop.f32.mrf.mxu0  ;;  %v3322_v1 = vpop.f32.mrf.mxu1 }
 0x28b   : > { %v3486_v19 = vmax.f32 %v3318_v43, 0.0  ;;  %v3034_v42 = vadd.f32 %v3033_v44, %v5901_v33 }
 0x28c   : > { %v3035_v15 = vpop.f32.mrf.mxu0  ;;  %v3324_v37 = vpop.f32.mrf.mxu1 }
 0x28d   : > { %v4901_v53 = vpack.c.bf16 %v3486_v19, %v3485_v0  ;;  %v3323_v24 = vadd.f32 %v3322_v1, %v3034_v42 }
 0x28e   : > { %v3036_v35 = vpop.f32.mrf.mxu0  ;;  %v3325_v22 = vpop.f32.mrf.mxu1 }
 0x28f   : > { %5001 = vst [vmem:[%s6085_s12 + $0x70] sm:$0xff] %v4901_v53   ;;  %v3037_v14 = vadd.f32 %v3036_v35, %v5906_v59  ;;  %v3487_v11 = vmax.f32 %v3323_v24, 0.0 }
 0x290   : > { %v3038_v31 = vpop.f32.mrf.mxu0  ;;  %v3327_v21 = vpop.f32.mrf.mxu1 }
 0x291   : > { %v3326_v10 = vadd.f32 %v3325_v22, %v3037_v14 }
 0x292   : > { %v3041_v52 = vpop.f32.mrf.mxu0  ;;  %v3330_v33 = vpop.f32.mrf.mxu1 }
 0x293   : > { %v3488_v25 = vmax.f32 %v3326_v10, 0.0  ;;  %v3042_v58 = vadd.f32 %v3041_v52, %v5911_v5 }
 0x294   : > { %v3043_v49 = vpop.f32.mrf.mxu0  ;;  %v3332_v28 = vpop.f32.mrf.mxu1 }
 0x295   : > { %v4906_v26 = vpack.c.bf16 %v3488_v25, %v3487_v11  ;;  %v3331_v63 = vadd.f32 %v3330_v33, %v3042_v58  ;;  %v6428_v25 = vld [vmem:[#allocation3_spill] sm:$0xff] }
 0x296   : > { %v3044_v57 = vpop.f32.mrf.mxu0  ;;  %v3333_v59 = vpop.f32.mrf.mxu1 }
 0x297   : > { %5002 = vst [vmem:[%s6085_s12 + $0x78] sm:$0xff] %v4906_v26   ;;  %v3045_v16 = vadd.f32 %v3044_v57, %v5916_v45  ;;  %v3489_v56 = vmax.f32 %v3331_v63, 0.0  ;;  %v6429_v63 = vld [vmem:[#allocation4_spill] sm:$0xff] }
 0x298   : > { %v3046_v9 = vpop.f32.mrf.mxu0  ;;  %v3335_v61 = vpop.f32.mrf.mxu1 }
 0x299   : > { %v3334_v6 = vadd.f32 %v3333_v59, %v3045_v16 }
 0x29a   : > { %v3049_v32 = vpop.f32.mrf.mxu0  ;;  %v3338_v5 = vpop.f32.mrf.mxu1 }
 0x29b   : > { %v3490_v38 = vmax.f32 %v3334_v6, 0.0  ;;  %v3050_v46 = vadd.f32 %v3049_v32, %v5921_v41 }
 0x29c   : > { %v3051_v40 = vpop.f32.mrf.mxu0  ;;  %v3340_v17 = vpop.f32.mrf.mxu1 }
 0x29d   : > { %v4911_v39 = vpack.c.bf16 %v3490_v38, %v3489_v56  ;;  %v3339_v34 = vadd.f32 %v3338_v5, %v3050_v46  ;;  %v6430_v38 = vld [vmem:[#allocation5_spill] sm:$0xff] }
 0x29e   : > { %v3052_v7 = vpop.f32.mrf.mxu0  ;;  %v3341_v45 = vpop.f32.mrf.mxu1 }
 0x29f   : > { %5003 = vst [vmem:[%s6085_s12 + $0x80] sm:$0xff] %v4911_v39   ;;  %v3053_v18 = vadd.f32 %v3052_v7, %v5926_v23  ;;  %v3491_v30 = vmax.f32 %v3339_v34, 0.0 }
 0x2a0   : > { %v3054_v54 = vpop.f32.mrf.mxu0  ;;  %v3343_v2 = vpop.f32.mrf.mxu1 }
 0x2a1   : > { %v3342_v48 = vadd.f32 %v3341_v45, %v3053_v18  ;;  %v6431_v18 = vld [vmem:[#allocation6_spill] sm:$0xff] }
 0x2a2   : > { %v3057_v4 = vpop.f32.mrf.mxu0  ;;  %v3346_v41 = vpop.f32.mrf.mxu1 }
 0x2a3   : > { %v3492_v12 = vmax.f32 %v3342_v48, 0.0  ;;  %v3058_v50 = vadd.f32 %v3057_v4, %v5931_v13 }
 0x2a4   : > { %v3059_v62 = vpop.f32.mrf.mxu0  ;;  %v3348_v3 = vpop.f32.mrf.mxu1 }
 0x2a5   : > { %v4916_v27 = vpack.c.bf16 %v3492_v12, %v3491_v30  ;;  %v3347_v51 = vadd.f32 %v3346_v41, %v3058_v50  ;;  %v6432_v41 = vld [vmem:[#allocation7_spill] sm:$0xff] }
 0x2a6   : > { %v3060_v47 = vpop.f32.mrf.mxu0  ;;  %v3349_v23 = vpop.f32.mrf.mxu1 }
 0x2a7   : > { %5004 = vst [vmem:[%s6085_s12 + $0x88] sm:$0xff] %v4916_v27   ;;  %v3061_v36 = vadd.f32 %v3060_v47, %v5936_v60  ;;  %v3493_v19 = vmax.f32 %v3347_v51, 0.0 }
 0x2a8   : > { %v3062_v43 = vpop.f32.mrf.mxu0  ;;  %v3351_v44 = vpop.f32.mrf.mxu1 }
 0x2a9   : > { %v3350_v29 = vadd.f32 %v3349_v23, %v3061_v36  ;;  %v6433_v43 = vld [vmem:[#allocation8_spill] sm:$0xff] }
 0x2aa   : > { %v3065_v0 = vpop.f32.mrf.mxu0  ;;  %v3354_v13 = vpop.f32.mrf.mxu1 }
 0x2ab   : > { %v3494_v42 = vmax.f32 %v3350_v29, 0.0  ;;  %v3066_v1 = vadd.f32 %v3065_v0, %v5941_v55 }
 0x2ac   : > { %v3067_v15 = vpop.f32.mrf.mxu0  ;;  %v3356_v37 = vpop.f32.mrf.mxu1 }
 0x2ad   : > { %v4921_v53 = vpack.c.bf16 %v3494_v42, %v3493_v19  ;;  %v3355_v24 = vadd.f32 %v3354_v13, %v3066_v1 }
 0x2ae   : > { %v3068_v35 = vpop.f32.mrf.mxu0  ;;  %v3357_v60 = vpop.f32.mrf.mxu1 }
 0x2af   : > { %5005 = vst [vmem:[%s6085_s12 + $0x90] sm:$0xff] %v4921_v53   ;;  %v3069_v14 = vadd.f32 %v3068_v35, %v5946_v8  ;;  %v3495_v52 = vmax.f32 %v3355_v24, 0.0  ;;  %v6434_v53 = vld [vmem:[#allocation9_spill] sm:$0xff] }
 0x2b0   : > { %v3070_v22 = vpop.f32.mrf.mxu0  ;;  %v3359_v10 = vpop.f32.mrf.mxu1 }
 0x2b1   : > { %v3358_v31 = vadd.f32 %v3357_v60, %v3069_v14  ;;  %v6435_v10 = vld [vmem:[#allocation10_spill] sm:$0xff] }
 0x2b2   : > { %v3073_v21 = vpop.f32.mrf.mxu0  ;;  %v3362_v55 = vpop.f32.mrf.mxu1 }
 0x2b3   : > { %v3496_v11 = vmax.f32 %v3358_v31, 0.0  ;;  %v3074_v58 = vadd.f32 %v3073_v21, %v6428_v25 }
 0x2b4   : > { %v3075_v33 = vpop.f32.mrf.mxu0  ;;  %v3364_v26 = vpop.f32.mrf.mxu1 }
 0x2b5   : > { %v4926_v49 = vpack.c.bf16 %v3496_v11, %v3495_v52  ;;  %v3363_v57 = vadd.f32 %v3362_v55, %v3074_v58  ;;  %v6436_v26 = vld [vmem:[#allocation11_spill] sm:$0xff] }
 0x2b6   : > { %v3076_v28 = vpop.f32.mrf.mxu0  ;;  %v3365_v8 = vpop.f32.mrf.mxu1 }
 0x2b7   : > { %5006 = vst [vmem:[%s6085_s12 + $0x98] sm:$0xff] %v4926_v49   ;;  %v3077_v16 = vadd.f32 %v3076_v28, %v6429_v63  ;;  %v3497_v32 = vmax.f32 %v3363_v57, 0.0 }
 0x2b8   : > { %v3078_v59 = vpop.f32.mrf.mxu0  ;;  %v3367_v6 = vpop.f32.mrf.mxu1 }
 0x2b9   : > { %v3366_v9 = vadd.f32 %v3365_v8, %v3077_v16  ;;  %v6437_v6 = vld [vmem:[#allocation12_spill] sm:$0xff] }
 0x2ba   : > { %v3081_v61 = vpop.f32.mrf.mxu0  ;;  %v3370_v5 = vpop.f32.mrf.mxu1 }
 0x2bb   : > { %v3498_v56 = vmax.f32 %v3366_v9, 0.0  ;;  %v3082_v46 = vadd.f32 %v3081_v61, %v6430_v38 }
 0x2bc   : > { %v3083_v40 = vpop.f32.mrf.mxu0  ;;  %v3372_v17 = vpop.f32.mrf.mxu1 }
 0x2bd   : > { %v4931_v39 = vpack.c.bf16 %v3498_v56, %v3497_v32  ;;  %v3371_v34 = vadd.f32 %v3370_v5, %v3082_v46  ;;  %v6438_v17 = vld [vmem:[#allocation13_spill] sm:$0xff] }
 0x2be   : > { %v3084_v7 = vpop.f32.mrf.mxu0  ;;  %v3373_v54 = vpop.f32.mrf.mxu1 }
 0x2bf   : > { %5007 = vst [vmem:[%s6085_s12 + $0xa0] sm:$0xff] %v4931_v39   ;;  %v3085_v45 = vadd.f32 %v3084_v7, %v6431_v18  ;;  %v3499_v12 = vmax.f32 %v3371_v34, 0.0 }
 0x2c0   : > { %v3086_v48 = vpop.f32.mrf.mxu0  ;;  %v3375_v4 = vpop.f32.mrf.mxu1 }
 0x2c1   : > { %v3374_v2 = vadd.f32 %v3373_v54, %v3085_v45  ;;  %v6439_v4 = vld [vmem:[#allocation14_spill] sm:$0xff] }
 0x2c2   : > { %v3089_v30 = vpop.f32.mrf.mxu0  ;;  %v3378_v27 = vpop.f32.mrf.mxu1 }
 0x2c3   : > { %v3500_v50 = vmax.f32 %v3374_v2, 0.0  ;;  %v3090_v62 = vadd.f32 %v3089_v30, %v6432_v41 }
 0x2c4   : > { %v3091_v3 = vpop.f32.mrf.mxu0  ;;  %v3380_v51 = vpop.f32.mrf.mxu1 }
 0x2c5   : > { %v4936_v47 = vpack.c.bf16 %v3500_v50, %v3499_v12  ;;  %v3379_v23 = vadd.f32 %v3378_v27, %v3090_v62  ;;  %v6440_v51 = vld [vmem:[#allocation15_spill] sm:$0xff] }
 0x2c6   : > { %v3092_v36 = vpop.f32.mrf.mxu0  ;;  %v3381_v44 = vpop.f32.mrf.mxu1 }
 0x2c7   : > { %5008 = vst [vmem:[%s6085_s12 + $0xa8] sm:$0xff] %v4936_v47   ;;  %v3093_v29 = vadd.f32 %v3092_v36, %v6433_v43  ;;  %v3501_v13 = vmax.f32 %v3379_v23, 0.0 }
 0x2c8   : > { %v3094_v0 = vpop.f32.mrf.mxu0  ;;  %v3383_v42 = vpop.f32.mrf.mxu1 }
 0x2c9   : > { %v3382_v19 = vadd.f32 %v3381_v44, %v3093_v29  ;;  %v6441_v42 = vld [vmem:[#allocation16_spill] sm:$0xff] }
 0x2ca   : > { %v3097_v1 = vpop.f32.mrf.mxu0  ;;  %v3386_v35 = vpop.f32.mrf.mxu1 }
 0x2cb   : > { %v3502_v15 = vmax.f32 %v3382_v19, 0.0  ;;  %v3098_v37 = vadd.f32 %v3097_v1, %v6434_v53 }
 0x2cc   : > { %v3099_v24 = vpop.f32.mrf.mxu0  ;;  %v3388_v60 = vpop.f32.mrf.mxu1 }
 0x2cd   : > { %v4941_v14 = vpack.c.bf16 %v3502_v15, %v3501_v13  ;;  %v3387_v31 = vadd.f32 %v3386_v35, %v3098_v37  ;;  %v6442_v60 = vld [vmem:[#allocation17_spill] sm:$0xff] }
 0x2ce   : > { %v3100_v22 = vpop.f32.mrf.mxu0  ;;  %v3389_v52 = vpop.f32.mrf.mxu1 }
 0x2cf   : > { %5009 = vst [vmem:[%s6085_s12 + $0xb0] sm:$0xff] %v4941_v14   ;;  %v3101_v21 = vadd.f32 %v3100_v22, %v6435_v10  ;;  %v3503_v33 = vmax.f32 %v3387_v31, 0.0 }
 0x2d0   : > { %v3102_v11 = vpop.f32.mrf.mxu0  ;;  %v3391_v58 = vpop.f32.mrf.mxu1 }
 0x2d1   : > { %v3390_v25 = vadd.f32 %v3389_v52, %v3101_v21  ;;  %v6443_v58 = vld [vmem:[#allocation18_spill] sm:$0xff] }
 0x2d2   : > { %v3105_v55 = vpop.f32.mrf.mxu0  ;;  %v3394_v57 = vpop.f32.mrf.mxu1 }
 0x2d3   : > { %v3504_v49 = vmax.f32 %v3390_v25, 0.0  ;;  %v3106_v28 = vadd.f32 %v3105_v55, %v6436_v26 }
 0x2d4   : > { %v3107_v63 = vpop.f32.mrf.mxu0  ;;  %v3396_v8 = vpop.f32.mrf.mxu1 }
 0x2d5   : > { %v4946_v16 = vpack.c.bf16 %v3504_v49, %v3503_v33  ;;  %v3395_v9 = vadd.f32 %v3394_v57, %v3106_v28  ;;  %v6444_v8 = vld [vmem:[#allocation19_spill] sm:$0xff] }
 0x2d6   : > { %v3108_v59 = vpop.f32.mrf.mxu0  ;;  %v3397_v32 = vpop.f32.mrf.mxu1 }
 0x2d7   : > { %5010 = vst [vmem:[%s6085_s12 + $0xb8] sm:$0xff] %v4946_v16   ;;  %v3109_v61 = vadd.f32 %v3108_v59, %v6437_v6  ;;  %v3505_v40 = vmax.f32 %v3395_v9, 0.0 }
 0x2d8   : > { %v3110_v56 = vpop.f32.mrf.mxu0  ;;  %v3399_v46 = vpop.f32.mrf.mxu1 }
 0x2d9   : > { %v3398_v38 = vadd.f32 %v3397_v32, %v3109_v61  ;;  %v6445_v46 = vld [vmem:[#allocation20_spill] sm:$0xff] }
 0x2da   : > { %v3113_v5 = vpop.f32.mrf.mxu0  ;;  %v3402_v34 = vpop.f32.mrf.mxu1 }
 0x2db   : > { %v3506_v39 = vmax.f32 %v3398_v38, 0.0  ;;  %v3114_v7 = vadd.f32 %v3113_v5, %v6438_v17 }
 0x2dc   : > { %v3115_v18 = vpop.f32.mrf.mxu0  ;;  %v3404_v54 = vpop.f32.mrf.mxu1 }
 0x2dd   : > { %v4951_v45 = vpack.c.bf16 %v3506_v39, %v3505_v40  ;;  %v3403_v2 = vadd.f32 %v3402_v34, %v3114_v7  ;;  %v6446_v54 = vld [vmem:[#allocation21_spill] sm:$0xff] }
 0x2de   : > { %v3116_v48 = vpop.f32.mrf.mxu0  ;;  %v3405_v12 = vpop.f32.mrf.mxu1 }
 0x2df   : > { %5011 = vst [vmem:[%s6085_s12 + $0xc0] sm:$0xff] %v4951_v45   ;;  %v3117_v30 = vadd.f32 %v3116_v48, %v6439_v4  ;;  %v3507_v3 = vmax.f32 %v3403_v2, 0.0 }
 0x2e0   : > { %v3118_v50 = vpop.f32.mrf.mxu0  ;;  %v3407_v62 = vpop.f32.mrf.mxu1 }
 0x2e1   : > { %v3406_v41 = vadd.f32 %v3405_v12, %v3117_v30  ;;  %v6447_v62 = vld [vmem:[#allocation22_spill] sm:$0xff] }
 0x2e2   : > { %v3121_v27 = vpop.f32.mrf.mxu0  ;;  %v3410_v23 = vpop.f32.mrf.mxu1 }
 0x2e3   : > { %v3508_v47 = vmax.f32 %v3406_v41, 0.0  ;;  %v3122_v36 = vadd.f32 %v3121_v27, %v6440_v51 }
 0x2e4   : > { %v3123_v43 = vpop.f32.mrf.mxu0  ;;  %v3412_v44 = vpop.f32.mrf.mxu1 }
 0x2e5   : > { %v4956_v29 = vpack.c.bf16 %v3508_v47, %v3507_v3  ;;  %v3411_v19 = vadd.f32 %v3410_v23, %v3122_v36  ;;  %v6448_v44 = vld [vmem:[#allocation23_spill] sm:$0xff] }
 0x2e6   : > { %v3124_v0 = vpop.f32.mrf.mxu0  ;;  %v3413_v13 = vpop.f32.mrf.mxu1 }
 0x2e7   : > { %5012 = vst [vmem:[%s6085_s12 + $0xc8] sm:$0xff] %v4956_v29   ;;  %v3125_v1 = vadd.f32 %v3124_v0, %v6441_v42  ;;  %v3509_v24 = vmax.f32 %v3411_v19, 0.0 }
 0x2e8   : > { %v3126_v15 = vpop.f32.mrf.mxu0  ;;  %v3415_v37 = vpop.f32.mrf.mxu1 }
 0x2e9   : > { %v3414_v53 = vadd.f32 %v3413_v13, %v3125_v1 }
 0x2ea   : > { %v3129_v35 = vpop.f32.mrf.mxu0  ;;  %v3418_v31 = vpop.f32.mrf.mxu1 }
 0x2eb   : > { %v3510_v14 = vmax.f32 %v3414_v53, 0.0  ;;  %v3130_v22 = vadd.f32 %v3129_v35, %v6442_v60 }
 0x2ec   : > { %v3131_v10 = vpop.f32.mrf.mxu0  ;;  %v3420_v52 = vpop.f32.mrf.mxu1 }
 0x2ed   : > { %v4961_v21 = vpack.c.bf16 %v3510_v14, %v3509_v24  ;;  %v3419_v25 = vadd.f32 %v3418_v31, %v3130_v22 }
 0x2ee   : > { %v3132_v11 = vpop.f32.mrf.mxu0  ;;  %v3421_v33 = vpop.f32.mrf.mxu1 }
 0x2ef   : > { %5013 = vst [vmem:[%s6085_s12 + $0xd0] sm:$0xff] %v4961_v21   ;;  %v3133_v55 = vadd.f32 %v3132_v11, %v6443_v58  ;;  %v3511_v63 = vmax.f32 %v3419_v25, 0.0  ;;  %v6449_v21 = vld [vmem:[#allocation24_spill] sm:$0xff] }
 0x2f0   : > { %v3134_v49 = vpop.f32.mrf.mxu0  ;;  %v3423_v28 = vpop.f32.mrf.mxu1 }
 0x2f1   : > { %v3422_v26 = vadd.f32 %v3421_v33, %v3133_v55 }
 0x2f2   : > { %v3137_v57 = vpop.f32.mrf.mxu0  ;;  %v3426_v9 = vpop.f32.mrf.mxu1 }
 0x2f3   : > { %v3512_v16 = vmax.f32 %v3422_v26, 0.0  ;;  %v3138_v59 = vadd.f32 %v3137_v57, %v6444_v8  ;;  %v6450_v26 = vld [vmem:[#allocation25_spill] sm:$0xff] }
 0x2f4   : > { %v3139_v6 = vpop.f32.mrf.mxu0  ;;  %v3428_v32 = vpop.f32.mrf.mxu1 }
 0x2f5   : > { %v4966_v61 = vpack.c.bf16 %v3512_v16, %v3511_v63  ;;  %v3427_v38 = vadd.f32 %v3426_v9, %v3138_v59 }
 0x2f6   : > { %v3140_v56 = vpop.f32.mrf.mxu0  ;;  %v3429_v40 = vpop.f32.mrf.mxu1 }
 0x2f7   : > { %5014 = vst [vmem:[%s6085_s12 + $0xd8] sm:$0xff] %v4966_v61   ;;  %v3141_v5 = vadd.f32 %v3140_v56, %v6445_v46  ;;  %v3513_v18 = vmax.f32 %v3427_v38, 0.0 }
 0x2f8   : > { %v3142_v39 = vpop.f32.mrf.mxu0  ;;  %v3431_v7 = vpop.f32.mrf.mxu1 }
 0x2f9   : > { %v3430_v17 = vadd.f32 %v3429_v40, %v3141_v5 }
 0x2fa   : > { %v3145_v34 = vpop.f32.mrf.mxu0  ;;  %v3434_v2 = vpop.f32.mrf.mxu1 }
 0x2fb   : > { %v3514_v45 = vmax.f32 %v3430_v17, 0.0  ;;  %v3146_v48 = vadd.f32 %v3145_v34, %v6446_v54 }
 0x2fc   : > { %v3147_v4 = vpop.f32.mrf.mxu0  ;;  %v3436_v12 = vpop.f32.mrf.mxu1 }
 0x2fd   : > { %v4971_v30 = vpack.c.bf16 %v3514_v45, %v3513_v18  ;;  %v3435_v41 = vadd.f32 %v3434_v2, %v3146_v48 }
 0x2fe   : > { %v3148_v50 = vpop.f32.mrf.mxu0  ;;  %v3437_v3 = vpop.f32.mrf.mxu1 }
 0x2ff   : > { %5015 = vst [vmem:[%s6085_s12 + $0xe0] sm:$0xff] %v4971_v30   ;;  %v3149_v27 = vadd.f32 %v3148_v50, %v6447_v62  ;;  %v3515_v43 = vmax.f32 %v3435_v41, 0.0 }
 0x300   : > { %v3150_v47 = vpop.f32.mrf.mxu0  ;;  %v3439_v36 = vpop.f32.mrf.mxu1 }
 0x301   : > { %v3438_v51 = vadd.f32 %v3437_v3, %v3149_v27 }
 0x302   : > { %v3153_v23 = vpop.f32.mrf.mxu0  ;;  %v3442_v19 = vpop.f32.mrf.mxu1 }
 0x303   : > { %v3516_v29 = vmax.f32 %v3438_v51, 0.0  ;;  %v3154_v0 = vadd.f32 %v3153_v23, %v6448_v44 }
 0x304   : > { %v3155_v42 = vpop.f32.mrf.mxu0  ;;  %v3444_v13 = vpop.f32.mrf.mxu1 }
 0x305   : > { %v4976_v1 = vpack.c.bf16 %v3516_v29, %v3515_v43  ;;  %v3443_v53 = vadd.f32 %v3442_v19, %v3154_v0 }
 0x306   : > { %v3156_v15 = vpop.f32.mrf.mxu0  ;;  %v3445_v35 = vpop.f32.mrf.mxu1 }
 0x307   : > { %5016 = vst [vmem:[%s6085_s12 + $0xe8] sm:$0xff] %v4976_v1   ;;  %v3157_v37 = vadd.f32 %v3156_v15, %v6061_v20  ;;  %v3517_v31 = vmax.f32 %v3443_v53, 0.0 }
 0x308   : > { %v3158_v24 = vpop.f32.mrf.mxu0  ;;  %v3447_v60 = vpop.f32.mrf.mxu1 }
 0x309   : > { %v3446_v14 = vadd.f32 %v3445_v35, %v3157_v37 }
 0x30a   : > { %v3161_v22 = vpop.f32.mrf.mxu0  ;;  %v3450_v11 = vpop.f32.mrf.mxu1 }
 0x30b   : > { %v3518_v10 = vmax.f32 %v3446_v14, 0.0  ;;  %v3162_v52 = vadd.f32 %v3161_v22, %v6449_v21 }
 0x30c   : > { %v3163_v25 = vpop.f32.mrf.mxu0  ;;  %v3452_v55 = vpop.f32.mrf.mxu1 }
 0x30d   : > { %v4981_v58 = vpack.c.bf16 %v3518_v10, %v3517_v31  ;;  %v3451_v49 = vadd.f32 %v3450_v11, %v3162_v52 }
 0x30e   : > { %v3164_v33 = vpop.f32.mrf.mxu0  ;;  %v3453_v20 = vpop.f32.mrf.mxu1 }
 0x30f   : > { %5017 = vst [vmem:[%s6085_s12 + $0xf0] sm:$0xff] %v4981_v58   ;;  %v3165_v28 = vadd.f32 %v3164_v33, %v6450_v26  ;;  %v3519_v8 = vmax.f32 %v3451_v49, 0.0 }
 0x310   : > { %v3166_v57 = vpop.f32.mrf.mxu0  ;;  %v3455_v16 = vpop.f32.mrf.mxu1 }
 0x311   : > { %v3454_v63 = vadd.f32 %v3453_v20, %v3165_v28 }
 0x313   : > { %v3520_v59 = vmax.f32 %v3454_v63, 0.0  ;;  %3847 = sbr.rel (!%p5346_p3) target bundleno = 873 (0x369), region = 36 }
 0x315   : > { %v4986_v9 = vpack.c.bf16 %v3520_v59, %v3519_v8 }
 0x317   : > { %5018 = vst [vmem:[%s6085_s12 + $0xf8] sm:$0xff] %v4986_v9  }
 0x318   : > { %s6461_s21 = smov (!%p3850_p9, %s3849_s21), 64 }
 0x319   : > { %s4745_s28 = sshll.u32 %s6461_s21, 6 }
 0x31a   : > { %p4748_p10 = scmp.eq.s32.totalorder %s4745_s28, 0 }
 0x31b   : > { %s6209_s29 = sshrl.u32 (!%p4748_p10), %s6461_s21, 6 }
 0x31c   : > { %3859 = sbr.rel (%p4748_p10) target bundleno = 873 (0x369), region = 40  ;;  %p4749_p11 = scmp.le.s32.totalorder (!%p4748_p10), %s6209_s29, 0 }
 0x321   : > { %4277 = sbr.rel (%p4749_p11) target bundleno = 856 (0x358), region = 118  ;;  %s6451_s14 = smov (!%p4749_p11), %s6203_s27 }
 0x322   : > { %s6452_s20 = smov (!%p4749_p11), %s6085_s12  ;;  %s6218_s24 = smov (!%p4749_p11), 0  }
 0x323   : > { %s6220_s30 = smov (!%p4749_p11), 0  }
 0x326 LB: >> { %v3876_v6 = vld [vmem:[%s5267_s20] sm:$0xf]  ;;  %v3878_v61 = vld [vmem:[%s5267_s20 + $0x4] sm:$0xf]  ;;  %v3880_v32 = vld [vmem:[%s5267_s20 + $0x8] sm:$0xf]  ;;  %s5275_s30 = sphi %s6220_s30, %s3870_s30   ;;  %s5271_s24 = sphi %s6218_s24, %s6453_s24   ;;  %s5267_s20 = sphi %s6452_s20, %s4009_s20   ;;  %s5263_s14 = sphi %s6451_s14, %s4010_s14  }
 0x327   : >> { %3877 = vst [vmem:[%s5263_s14] sm:$0xf] %v3876_v6  ;;  %3879 = vst [vmem:[%s5263_s14 + $0x4] sm:$0xf] %v3878_v61  ;;  %v3882_v56 = vld [vmem:[%s5267_s20 + $0xc] sm:$0xf]  ;;  %s4004_s4 = sadd.s32 1, %s5271_s24 }
 0x328   : >> { %3881 = vst [vmem:[%s5263_s14 + $0x8] sm:$0xf] %v3880_v32  ;;  %v3884_v38 = vld [vmem:[%s5267_s20 + $0x10] sm:$0xf]  ;;  %v3886_v46 = vld [vmem:[%s5267_s20 + $0x14] sm:$0xf]  ;;  %p4005_p12 = scmp.ge.s32.totalorder %s4004_s4, %s6209_s29 }
 0x329   : >> { %3883 = vst [vmem:[%s5263_s14 + $0xc] sm:$0xf] %v3882_v56  ;;  %3885 = vst [vmem:[%s5263_s14 + $0x10] sm:$0xf] %v3884_v38  ;;  %v3888_v5 = vld [vmem:[%s5267_s20 + $0x18] sm:$0xf] }
 0x32a   : >> { %3887 = vst [vmem:[%s5263_s14 + $0x14] sm:$0xf] %v3886_v46  ;;  %v3890_v40 = vld [vmem:[%s5267_s20 + $0x1c] sm:$0xf]  ;;  %v3892_v39 = vld [vmem:[%s5267_s20 + $0x20] sm:$0xf] }
 0x32b   : >> { %3889 = vst [vmem:[%s5263_s14 + $0x18] sm:$0xf] %v3888_v5  ;;  %3891 = vst [vmem:[%s5263_s14 + $0x1c] sm:$0xf] %v3890_v40  ;;  %v3894_v17 = vld [vmem:[%s5267_s20 + $0x24] sm:$0xf] }
 0x32c   : >> { %3893 = vst [vmem:[%s5263_s14 + $0x20] sm:$0xf] %v3892_v39  ;;  %v3896_v7 = vld [vmem:[%s5267_s20 + $0x28] sm:$0xf]  ;;  %v3898_v34 = vld [vmem:[%s5267_s20 + $0x2c] sm:$0xf] }
 0x32d   : >> { %3895 = vst [vmem:[%s5263_s14 + $0x24] sm:$0xf] %v3894_v17  ;;  %3897 = vst [vmem:[%s5263_s14 + $0x28] sm:$0xf] %v3896_v7  ;;  %v3900_v18 = vld [vmem:[%s5267_s20 + $0x30] sm:$0xf] }
 0x32e   : >> { %3899 = vst [vmem:[%s5263_s14 + $0x2c] sm:$0xf] %v3898_v34  ;;  %v3902_v45 = vld [vmem:[%s5267_s20 + $0x34] sm:$0xf]  ;;  %v3904_v54 = vld [vmem:[%s5267_s20 + $0x38] sm:$0xf] }
 0x32f   : >> { %3901 = vst [vmem:[%s5263_s14 + $0x30] sm:$0xf] %v3900_v18  ;;  %3903 = vst [vmem:[%s5263_s14 + $0x34] sm:$0xf] %v3902_v45  ;;  %v3906_v48 = vld [vmem:[%s5267_s20 + $0x3c] sm:$0xf] }
 0x330   : >> { %3905 = vst [vmem:[%s5263_s14 + $0x38] sm:$0xf] %v3904_v54  ;;  %v3908_v2 = vld [vmem:[%s5267_s20 + $0x40] sm:$0xf]  ;;  %v3910_v4 = vld [vmem:[%s5267_s20 + $0x44] sm:$0xf] }
 0x331   : >> { %3907 = vst [vmem:[%s5263_s14 + $0x3c] sm:$0xf] %v3906_v48  ;;  %3909 = vst [vmem:[%s5263_s14 + $0x40] sm:$0xf] %v3908_v2  ;;  %v3912_v30 = vld [vmem:[%s5267_s20 + $0x48] sm:$0xf] }
 0x332   : >> { %3911 = vst [vmem:[%s5263_s14 + $0x44] sm:$0xf] %v3910_v4  ;;  %v3914_v12 = vld [vmem:[%s5267_s20 + $0x4c] sm:$0xf]  ;;  %v3916_v50 = vld [vmem:[%s5267_s20 + $0x50] sm:$0xf] }
 0x333   : >> { %3913 = vst [vmem:[%s5263_s14 + $0x48] sm:$0xf] %v3912_v30  ;;  %3915 = vst [vmem:[%s5263_s14 + $0x4c] sm:$0xf] %v3914_v12  ;;  %v3918_v41 = vld [vmem:[%s5267_s20 + $0x54] sm:$0xf] }
 0x334   : >> { %3917 = vst [vmem:[%s5263_s14 + $0x50] sm:$0xf] %v3916_v50  ;;  %v3920_v62 = vld [vmem:[%s5267_s20 + $0x58] sm:$0xf]  ;;  %v3922_v27 = vld [vmem:[%s5267_s20 + $0x5c] sm:$0xf] }
 0x335   : >> { %3919 = vst [vmem:[%s5263_s14 + $0x54] sm:$0xf] %v3918_v41  ;;  %3921 = vst [vmem:[%s5263_s14 + $0x58] sm:$0xf] %v3920_v62  ;;  %v3924_v3 = vld [vmem:[%s5267_s20 + $0x60] sm:$0xf] }
 0x336   : >> { %3923 = vst [vmem:[%s5263_s14 + $0x5c] sm:$0xf] %v3922_v27  ;;  %v3926_v47 = vld [vmem:[%s5267_s20 + $0x64] sm:$0xf]  ;;  %v3928_v51 = vld [vmem:[%s5267_s20 + $0x68] sm:$0xf] }
 0x337   : >> { %3925 = vst [vmem:[%s5263_s14 + $0x60] sm:$0xf] %v3924_v3  ;;  %3927 = vst [vmem:[%s5263_s14 + $0x64] sm:$0xf] %v3926_v47  ;;  %v3930_v36 = vld [vmem:[%s5267_s20 + $0x6c] sm:$0xf] }
 0x338   : >> { %3929 = vst [vmem:[%s5263_s14 + $0x68] sm:$0xf] %v3928_v51  ;;  %v3932_v23 = vld [vmem:[%s5267_s20 + $0x70] sm:$0xf]  ;;  %v3934_v43 = vld [vmem:[%s5267_s20 + $0x74] sm:$0xf] }
 0x339   : >> { %3931 = vst [vmem:[%s5263_s14 + $0x6c] sm:$0xf] %v3930_v36  ;;  %3933 = vst [vmem:[%s5263_s14 + $0x70] sm:$0xf] %v3932_v23  ;;  %v3936_v29 = vld [vmem:[%s5267_s20 + $0x78] sm:$0xf] }
 0x33a   : >> { %3935 = vst [vmem:[%s5263_s14 + $0x74] sm:$0xf] %v3934_v43  ;;  %v3938_v44 = vld [vmem:[%s5267_s20 + $0x7c] sm:$0xf]  ;;  %v3940_v0 = vld [vmem:[%s5267_s20 + $0x80] sm:$0xf] }
 0x33b   : >> { %3937 = vst [vmem:[%s5263_s14 + $0x78] sm:$0xf] %v3936_v29  ;;  %3939 = vst [vmem:[%s5263_s14 + $0x7c] sm:$0xf] %v3938_v44  ;;  %v3942_v19 = vld [vmem:[%s5267_s20 + $0x84] sm:$0xf] }
 0x33c   : >> { %3941 = vst [vmem:[%s5263_s14 + $0x80] sm:$0xf] %v3940_v0  ;;  %v3944_v42 = vld [vmem:[%s5267_s20 + $0x88] sm:$0xf]  ;;  %v3946_v1 = vld [vmem:[%s5267_s20 + $0x8c] sm:$0xf] }
 0x33d   : >> { %3943 = vst [vmem:[%s5263_s14 + $0x84] sm:$0xf] %v3942_v19  ;;  %3945 = vst [vmem:[%s5263_s14 + $0x88] sm:$0xf] %v3944_v42  ;;  %v3948_v13 = vld [vmem:[%s5267_s20 + $0x90] sm:$0xf] }
 0x33e   : >> { %3947 = vst [vmem:[%s5263_s14 + $0x8c] sm:$0xf] %v3946_v1  ;;  %v3950_v15 = vld [vmem:[%s5267_s20 + $0x94] sm:$0xf]  ;;  %v3952_v53 = vld [vmem:[%s5267_s20 + $0x98] sm:$0xf] }
 0x33f   : >> { %3949 = vst [vmem:[%s5263_s14 + $0x90] sm:$0xf] %v3948_v13  ;;  %3951 = vst [vmem:[%s5263_s14 + $0x94] sm:$0xf] %v3950_v15  ;;  %v3954_v37 = vld [vmem:[%s5267_s20 + $0x9c] sm:$0xf] }
 0x340   : >> { %3953 = vst [vmem:[%s5263_s14 + $0x98] sm:$0xf] %v3952_v53  ;;  %v3956_v35 = vld [vmem:[%s5267_s20 + $0xa0] sm:$0xf]  ;;  %v3958_v24 = vld [vmem:[%s5267_s20 + $0xa4] sm:$0xf] }
 0x341   : >> { %3955 = vst [vmem:[%s5263_s14 + $0x9c] sm:$0xf] %v3954_v37  ;;  %3957 = vst [vmem:[%s5263_s14 + $0xa0] sm:$0xf] %v3956_v35  ;;  %v3960_v14 = vld [vmem:[%s5267_s20 + $0xa8] sm:$0xf] }
 0x342   : >> { %3959 = vst [vmem:[%s5263_s14 + $0xa4] sm:$0xf] %v3958_v24  ;;  %v3962_v60 = vld [vmem:[%s5267_s20 + $0xac] sm:$0xf]  ;;  %v3964_v22 = vld [vmem:[%s5267_s20 + $0xb0] sm:$0xf] }
 0x343   : >> { %3961 = vst [vmem:[%s5263_s14 + $0xa8] sm:$0xf] %v3960_v14  ;;  %3963 = vst [vmem:[%s5263_s14 + $0xac] sm:$0xf] %v3962_v60  ;;  %v3966_v31 = vld [vmem:[%s5267_s20 + $0xb4] sm:$0xf] }
 0x344   : >> { %3965 = vst [vmem:[%s5263_s14 + $0xb0] sm:$0xf] %v3964_v22  ;;  %v3968_v10 = vld [vmem:[%s5267_s20 + $0xb8] sm:$0xf]  ;;  %v3970_v21 = vld [vmem:[%s5267_s20 + $0xbc] sm:$0xf] }
 0x345   : >> { %3967 = vst [vmem:[%s5263_s14 + $0xb4] sm:$0xf] %v3966_v31  ;;  %3969 = vst [vmem:[%s5263_s14 + $0xb8] sm:$0xf] %v3968_v10  ;;  %v3972_v52 = vld [vmem:[%s5267_s20 + $0xc0] sm:$0xf] }
 0x346   : >> { %3971 = vst [vmem:[%s5263_s14 + $0xbc] sm:$0xf] %v3970_v21  ;;  %v3974_v11 = vld [vmem:[%s5267_s20 + $0xc4] sm:$0xf]  ;;  %v3976_v25 = vld [vmem:[%s5267_s20 + $0xc8] sm:$0xf] }
 0x347   : >> { %3973 = vst [vmem:[%s5263_s14 + $0xc0] sm:$0xf] %v3972_v52  ;;  %3975 = vst [vmem:[%s5263_s14 + $0xc4] sm:$0xf] %v3974_v11  ;;  %v3978_v58 = vld [vmem:[%s5267_s20 + $0xcc] sm:$0xf] }
 0x348   : >> { %3977 = vst [vmem:[%s5263_s14 + $0xc8] sm:$0xf] %v3976_v25  ;;  %v3980_v55 = vld [vmem:[%s5267_s20 + $0xd0] sm:$0xf]  ;;  %v3982_v33 = vld [vmem:[%s5267_s20 + $0xd4] sm:$0xf] }
 0x349   : >> { %3979 = vst [vmem:[%s5263_s14 + $0xcc] sm:$0xf] %v3978_v58  ;;  %3981 = vst [vmem:[%s5263_s14 + $0xd0] sm:$0xf] %v3980_v55  ;;  %v3984_v49 = vld [vmem:[%s5267_s20 + $0xd8] sm:$0xf] }
 0x34a   : >> { %3983 = vst [vmem:[%s5263_s14 + $0xd4] sm:$0xf] %v3982_v33  ;;  %v3986_v26 = vld [vmem:[%s5267_s20 + $0xdc] sm:$0xf]  ;;  %v3988_v28 = vld [vmem:[%s5267_s20 + $0xe0] sm:$0xf] }
 0x34b   : >> { %3985 = vst [vmem:[%s5263_s14 + $0xd8] sm:$0xf] %v3984_v49  ;;  %3987 = vst [vmem:[%s5263_s14 + $0xdc] sm:$0xf] %v3986_v26  ;;  %v3990_v20 = vld [vmem:[%s5267_s20 + $0xe4] sm:$0xf] }
 0x34c   : >> { %3989 = vst [vmem:[%s5263_s14 + $0xe0] sm:$0xf] %v3988_v28  ;;  %v3992_v57 = vld [vmem:[%s5267_s20 + $0xe8] sm:$0xf]  ;;  %v3994_v63 = vld [vmem:[%s5267_s20 + $0xec] sm:$0xf] }
 0x34d   : >> { %3991 = vst [vmem:[%s5263_s14 + $0xe4] sm:$0xf] %v3990_v20  ;;  %3993 = vst [vmem:[%s5263_s14 + $0xe8] sm:$0xf] %v3992_v57  ;;  %v3996_v16 = vld [vmem:[%s5267_s20 + $0xf0] sm:$0xf] }
 0x34e   : >> { %3995 = vst [vmem:[%s5263_s14 + $0xec] sm:$0xf] %v3994_v63  ;;  %v3998_v8 = vld [vmem:[%s5267_s20 + $0xf4] sm:$0xf]  ;;  %v4000_v59 = vld [vmem:[%s5267_s20 + $0xf8] sm:$0xf] }
 0x34f   : >> { %3997 = vst [vmem:[%s5263_s14 + $0xf0] sm:$0xf] %v3996_v16  ;;  %3999 = vst [vmem:[%s5263_s14 + $0xf4] sm:$0xf] %v3998_v8  ;;  %v4002_v9 = vld [vmem:[%s5267_s20 + $0xfc] sm:$0xf] }
 0x350   : >> { %4001 = vst [vmem:[%s5263_s14 + $0xf8] sm:$0xf] %v4000_v59  ;;  %4003 = vst [vmem:[%s5263_s14 + $0xfc] sm:$0xf] %v4002_v9  ;;  %s6463_s4 = smov (%p4005_p12, %s4004_s4), 0  ;;  %s3870_s30 = sadd.s32 1, %s5275_s30  }
 0x351   : >> { %s4750_s5 = sshll.u32 %s6463_s4, 8  ;;  %p3869_p13 = scmp.ge.s32.totalorder %s3870_s30, %s6209_s29 }
 0x352   : >> { %s4009_s20 = scalar_lea.vmem %s6085_s12, %s4750_s5 [#allocation2]   ;;  %s4010_s14 = scalar_lea.vmem %s6203_s27, %s4750_s5  }
 0x353   : >> { %s6453_s24 = smov %s6463_s4  ;;  %3872 = sbr.rel (!%p3869_p13) target bundleno = 806 (0x326), region = 124 }
 0x358 PF: > { %s6377_s6 = sand.u32 63, %s6461_s21   ;;  %s4826_s7 = sshll.u32 %s6209_s29, 8 }
 0x359   : > { %s4015_s8 = scalar_lea.vmem %s6085_s12, %s4826_s7 [#allocation2]   ;;  %s4017_s9 = scalar_lea.vmem %s6203_s27, %s4826_s7  }
 0x35a   : > { %p4755_p0 = scmp.le.s32.totalorder %s6377_s6, 0 }
 0x35b   : > { %s5277_s10 = smov (!%p4755_p0), %s4017_s9   ;;  %s5281_s11 = smov (!%p4755_p0), %s4015_s8  }
 0x35c   : > { %4291 = sbr.rel (%p4755_p0) target bundleno = 873 (0x369), region = 129  ;;  %s5285_s17 = smov (!%p4755_p0), 0  }
 0x35d   : > { %s5289_s19 = smov (!%p4755_p0), 0  }
 0x361 LB: >> { %v4027_v6 = vld [vmem:[%s5283_s11] sm:$0xf]  ;;  %s4029_s21 = sadd.s32 1, %s5287_s17  ;;  %s4021_s19 = sadd.s32 1, %s5291_s19   ;;  %s5291_s19 = sphi %s5289_s19, %s4021_s19   ;;  %s5287_s17 = sphi %s5285_s17, %s5286_s17   ;;  %s5283_s11 = sphi %s5281_s11, %s4034_s11   ;;  %s5279_s10 = sphi %s5277_s10, %s4035_s10  }
 0x362   : >> { %4028 = vst [vmem:[%s5279_s10] sm:$0xf] %v4027_v6  ;;  %p4030_p1 = scmp.ge.s32.totalorder %s4029_s21, %s6377_s6  ;;  %p4020_p2 = scmp.ge.s32.totalorder %s4021_s19, %s6377_s6 }
 0x364   : >> { %s6465_s21 = smov (%p4030_p1, %s4029_s21), 0  ;;  %4023 = sbr.rel (!%p4020_p2) target bundleno = 865 (0x361), region = 135 }
 0x365   : >> { %s4756_s12 = sshll.u32 %s6465_s21, 2  ;;  %s5286_s17 = smov %s6465_s21  }
 0x366   : >> { %s4034_s11 = scalar_lea.vmem %s4015_s8, %s4756_s12 [#allocation2]   ;;  %s4035_s10 = scalar_lea.vmem %s4017_s9, %s4756_s12  }
 0x369 PF: > { %s13_s16 = sadd.s32 1, %s5259_s16   ;;  %s6454_s12 = smov %s5247_s13 }
 0x36a   : > { %p10_p3 = scmp.ge.s32.totalorder %s13_s16, 5   ;;  %s6455_s13 = smov %s5355_s22 }
 0x36b   : > { %s6456_s14 = smov %s5255_s15  ;;  %s6457_s15 = smov %s6459_s18 }
 0x36c   :  { %12 = sbr.rel (!%p10_p3) target bundleno = 3 (0x3), region = 146 }

// kernel: cnn_forward.12
= control target key start
LH: loop header
LB: loop body
LE: loop exit
PB: predicated region body
PF: predicated region fallthrough
CT: control target
= control target key end

     0   :  { %s459_s6 = smov 0   ;;  %s601_s0 = inlined_call_operand.vmem [shape: bf16[26,2,13,256], index: 0, kind: input, shape index: {}]   ;;  %s602_s1 = inlined_call_operand.vmem [shape: bf16[26,13,128], index: 1, kind: output, shape index: {}]  }
   0x1 LB: > { %s420_s7 = sadd.s32 4294967295, %s447_s6   ;;  %p424_p0 = scmp.ge.s32.totalorder %s447_s6, 1  ;;  %s447_s6 = sphi %s459_s6, %s11_s6  }
   0x2   : > { %p89_p1 = scmp.lt.s32.totalorder %s447_s6, 3 }
   0x4   : > { %p90_p2 = pnand %p424_p0, %p89_p1 }
   0x5   : > { %s111_s8 = smul.u32 (!%p90_p2), 13, %s420_s7 }
   0x6   : > { %93 = sbr.rel (%p90_p2) target bundleno = 50 (0x32), region = 24 }
   0x7   : > { %p112_p3 = scmp.lt.s32.totalorder (!%p90_p2), %s111_s8, 25 }
   0xb   : > { %s606_s8 = smov (!%p112_p3, %s111_s8), 25  ;;  %vm308_vm0 = vcmask 1042432   ;;  %vm309_vm1 = vsmask.f32 2304 }
   0xc   : > { %s431_s9 = sshll.u32 %s606_s8, 5  ;;  %s432_s10 = sshll.u32 %s606_s8, 3  ;;  %vm481_vm2 = vmand %vm308_vm0, %vm309_vm1 }
   0xd   : > { %s470_s13 = scalar_lea.vmem %s601_s0, %s431_s9  ;;  %s475_s16 = scalar_lea.vmem %s602_s1, %s432_s10 }
   0xe   : > { %v125_v0 = vld [vmem:[%s470_s13] sm:$0xff]  ;;  %v127_v1 = vld [vmem:[%s470_s13 + $0x10] sm:$0xff]  ;;  %v126_v2 = vld [vmem:[%s470_s13 + $0x8] sm:$0x77] }
   0xf   : > { %v177_v3 = vmax.bf16 %v127_v1, %v125_v0  ;;  %v128_v4 = vld [vmem:[%s470_s13 + $0x18] sm:$0x77]  ;;  %v129_v6 = vld [vmem:[%s470_s13 + $0x20] sm:$0xff]  ;;  %v131_v8 = vld [vmem:[%s470_s13 + $0x30] sm:$0xff] }
  0x10   : > { %v178_v7 = vmax.bf16 %v128_v4, %v126_v2  ;;  %v130_v9 = vld [vmem:[%s470_s13 + $0x28] sm:$0x77]  ;;  %v132_v10 = vld [vmem:[%s470_s13 + $0x38] sm:$0x77]  ;;  %v311_v12 = vld [vmem:[%s475_s16 + $0x4] sm:$0x7]  ;;  %v179_v13 = vmax.bf16 %v131_v8, %v129_v6 }
  0x11   : > { %v229_v11 = vrot.slane %v177_v3, 4  ;;  %v180_v14 = vmax.bf16 %v132_v10, %v130_v9  ;;  %v133_v15 = vld [vmem:[%s470_s13 + $0x40] sm:$0xff]  ;;  %v135_v16 = vld [vmem:[%s470_s13 + $0x50] sm:$0xff]  ;;  %v134_v19 = vld [vmem:[%s470_s13 + $0x48] sm:$0x77] }
  0x12   : > { %v230_v17 = vrot.slane %v178_v7, 4  ;;  %v181_v18 = vmax.bf16 %v135_v16, %v133_v15  ;;  %v136_v20 = vld [vmem:[%s470_s13 + $0x58] sm:$0x77]  ;;  %v137_v21 = vld [vmem:[%s470_s13 + $0x60] sm:$0xff]  ;;  %v231_v23 = vrot.slane %v179_v13, 4  ;;  %v139_v27 = vld [vmem:[%s470_s13 + $0x70] sm:$0xff] }
  0x13   : > { %v281_v22 = vmax.bf16 %v229_v11, %v177_v3  ;;  %v232_v24 = vrot.slane %v180_v14, 4  ;;  %v315_v25 = vld [vmem:[%s475_s16 + $0xc] sm:$0x7]  ;;  %v182_v26 = vmax.bf16 %v136_v20, %v134_v19  ;;  %v141_v28 = vld [vmem:[%s470_s13 + $0x80] sm:$0xff]  ;;  %v183_v31 = vmax.bf16 %v139_v27, %v137_v21  ;;  %v140_v33 = vld [vmem:[%s470_s13 + $0x78] sm:$0x77] }
  0x14   : > { %v282_v29 = vmax.bf16 %v230_v17, %v178_v7  ;;  %v233_v30 = vrot.slane %v181_v18, 4  ;;  %v138_v32 = vld [vmem:[%s470_s13 + $0x68] sm:$0x77]  ;;  %v143_v34 = vld [vmem:[%s470_s13 + $0x90] sm:$0xff]  ;;  %v283_v35 = vmax.bf16 %v231_v23, %v179_v13  ;;  %v145_v40 = vld [vmem:[%s470_s13 + $0xa0] sm:$0xff] }
  0x15   : > { %307 = vst [vmem:[%s475_s16] sm:$0xf] %v281_v22  ;;  %v284_v36 = vmax.bf16 %v232_v24, %v180_v14  ;;  %v234_v37 = vrot.slane %v182_v26, 4  ;;  %v184_v38 = vmax.bf16 %v140_v33, %v138_v32  ;;  %v142_v39 = vld [vmem:[%s470_s13 + $0x88] sm:$0x77]  ;;  %v319_v43 = vld [vmem:[%s475_s16 + $0x14] sm:$0x7]  ;;  %v185_v45 = vmax.bf16 %v143_v34, %v141_v28 }
  0x16   : > { %v312_v41 = vsel %vm481_vm2, %v282_v29, %v311_v12  ;;  %v285_v42 = vmax.bf16 %v233_v30, %v181_v18  ;;  %v235_v44 = vrot.slane %v183_v31, 4  ;;  %v144_v46 = vld [vmem:[%s470_s13 + $0x98] sm:$0x77]  ;;  %v147_v47 = vld [vmem:[%s470_s13 + $0xb0] sm:$0xff]  ;;  %314 = vst [vmem:[%s475_s16 + $0x8] sm:$0xf] %v283_v35 }
  0x17   : > { %313 = vst [vmem:[%s475_s16 + $0x4] sm:$0x7] %v312_v41  ;;  %v316_v48 = vsel %vm481_vm2, %v284_v36, %v315_v25  ;;  %v286_v49 = vmax.bf16 %v234_v37, %v182_v26  ;;  %v236_v50 = vrot.slane %v184_v38, 4  ;;  %v186_v51 = vmax.bf16 %v144_v46, %v142_v39  ;;  %v146_v52 = vld [vmem:[%s470_s13 + $0xa8] sm:$0x77]  ;;  %v149_v54 = vld [vmem:[%s470_s13 + $0xc0] sm:$0xff] }
  0x18   : > { %v148_v53 = vld [vmem:[%s470_s13 + $0xb8] sm:$0x77]  ;;  %317 = vst [vmem:[%s475_s16 + $0xc] sm:$0x7] %v316_v48  ;;  %318 = vst [vmem:[%s475_s16 + $0x10] sm:$0xf] %v285_v42  ;;  %v287_v55 = vmax.bf16 %v235_v44, %v183_v31  ;;  %v187_v58 = vmax.bf16 %v147_v47, %v145_v40 }
  0x19   : > { %v323_v56 = vld [vmem:[%s475_s16 + $0x1c] sm:$0x7]  ;;  %v237_v57 = vrot.slane %v185_v45, 4  ;;  %v188_v59 = vmax.bf16 %v148_v53, %v146_v52  ;;  %v151_v60 = vld [vmem:[%s470_s13 + $0xd0] sm:$0xff]  ;;  %v150_v61 = vld [vmem:[%s470_s13 + $0xc8] sm:$0x77]  ;;  %v320_v62 = vsel %vm481_vm2, %v286_v49, %v319_v43  ;;  %v288_v63 = vmax.bf16 %v236_v50, %v184_v38 }
  0x1a   : > { %v238_v0 = vrot.slane %v186_v51, 4  ;;  %v327_v1 = vld [vmem:[%s475_s16 + $0x24] sm:$0x7]  ;;  %v189_v2 = vmax.bf16 %v151_v60, %v149_v54  ;;  %v152_v3 = vld [vmem:[%s470_s13 + $0xd8] sm:$0x77]  ;;  %v239_v7 = vrot.slane %v187_v58, 4 }
  0x1b   : > { %v153_v4 = vld [vmem:[%s470_s13 + $0xe0] sm:$0xff]  ;;  %321 = vst [vmem:[%s475_s16 + $0x14] sm:$0x7] %v320_v62  ;;  %322 = vst [vmem:[%s475_s16 + $0x18] sm:$0xf] %v287_v55  ;;  %v289_v6 = vmax.bf16 %v237_v57, %v185_v45  ;;  %v240_v8 = vrot.slane %v188_v59, 4  ;;  %v190_v9 = vmax.bf16 %v152_v3, %v150_v61  ;;  %v324_v13 = vsel %vm481_vm2, %v288_v63, %v323_v56 }
  0x1c   : > { %v155_v10 = vld [vmem:[%s470_s13 + $0xf0] sm:$0xff]  ;;  %v154_v11 = vld [vmem:[%s470_s13 + $0xe8] sm:$0x77]  ;;  %v157_v12 = vld [vmem:[%s470_s13 + $0x100] sm:$0xff]  ;;  %v290_v14 = vmax.bf16 %v238_v0, %v186_v51  ;;  %v241_v16 = vrot.slane %v189_v2, 4  ;;  %v291_v20 = vmax.bf16 %v239_v7, %v187_v58 }
  0x1d   : > { %v331_v15 = vld [vmem:[%s475_s16 + $0x2c] sm:$0x7]  ;;  %v191_v17 = vmax.bf16 %v155_v10, %v153_v4  ;;  %v156_v18 = vld [vmem:[%s470_s13 + $0xf8] sm:$0x77]  ;;  %v159_v19 = vld [vmem:[%s470_s13 + $0x110] sm:$0xff]  ;;  %v292_v21 = vmax.bf16 %v240_v8, %v188_v59  ;;  %v242_v22 = vrot.slane %v190_v9, 4 }
  0x1e   : > { %325 = vst [vmem:[%s475_s16 + $0x1c] sm:$0x7] %v324_v13  ;;  %326 = vst [vmem:[%s475_s16 + $0x20] sm:$0xf] %v289_v6  ;;  %v192_v23 = vmax.bf16 %v156_v18, %v154_v11  ;;  %v158_v24 = vld [vmem:[%s470_s13 + $0x108] sm:$0x77]  ;;  %v328_v27 = vsel %vm481_vm2, %v290_v14, %v327_v1  ;;  %v293_v28 = vmax.bf16 %v241_v16, %v189_v2 }
  0x1f   : > { %v160_v25 = vld [vmem:[%s470_s13 + $0x118] sm:$0x77]  ;;  %v161_v26 = vld [vmem:[%s470_s13 + $0x120] sm:$0xff]  ;;  %v335_v29 = vld [vmem:[%s475_s16 + $0x34] sm:$0x7]  ;;  %v243_v30 = vrot.slane %v191_v17, 4  ;;  %v193_v31 = vmax.bf16 %v159_v19, %v157_v12  ;;  %v332_v34 = vsel %vm481_vm2, %v292_v21, %v331_v15  ;;  %v294_v35 = vmax.bf16 %v242_v22, %v190_v9 }
  0x20   : > { %v163_v32 = vld [vmem:[%s470_s13 + $0x130] sm:$0xff]  ;;  %v162_v33 = vld [vmem:[%s470_s13 + $0x128] sm:$0x77]  ;;  %329 = vst [vmem:[%s475_s16 + $0x24] sm:$0x7] %v328_v27  ;;  %v244_v36 = vrot.slane %v192_v23, 4  ;;  %v194_v38 = vmax.bf16 %v160_v25, %v158_v24 }
  0x21   : > { %330 = vst [vmem:[%s475_s16 + $0x28] sm:$0xf] %v291_v20  ;;  %v339_v37 = vld [vmem:[%s475_s16 + $0x3c] sm:$0x7]  ;;  %v165_v40 = vld [vmem:[%s470_s13 + $0x140] sm:$0xff]  ;;  %v295_v41 = vmax.bf16 %v243_v30, %v191_v17  ;;  %v245_v42 = vrot.slane %v193_v31, 4  ;;  %v195_v43 = vmax.bf16 %v163_v32, %v161_v26  ;;  %v336_v48 = vsel %vm481_vm2, %v294_v35, %v335_v29 }
  0x22   : > { %v164_v39 = vld [vmem:[%s470_s13 + $0x138] sm:$0x77]  ;;  %333 = vst [vmem:[%s475_s16 + $0x2c] sm:$0x7] %v332_v34  ;;  %334 = vst [vmem:[%s475_s16 + $0x30] sm:$0xf] %v293_v28  ;;  %v296_v49 = vmax.bf16 %v244_v36, %v192_v23 }
  0x23   : > { %v196_v44 = vmax.bf16 %v164_v39, %v162_v33  ;;  %v167_v45 = vld [vmem:[%s470_s13 + $0x150] sm:$0xff]  ;;  %v166_v46 = vld [vmem:[%s470_s13 + $0x148] sm:$0x77]  ;;  %v168_v47 = vld [vmem:[%s470_s13 + $0x158] sm:$0x77]  ;;  %v246_v50 = vrot.slane %v194_v38, 4  ;;  %v297_v55 = vmax.bf16 %v245_v42, %v193_v31 }
  0x24   : > { %v343_v51 = vld [vmem:[%s475_s16 + $0x44] sm:$0x7]  ;;  %v197_v52 = vmax.bf16 %v167_v45, %v165_v40  ;;  %v171_v54 = vld [vmem:[%s470_s13 + $0x170] sm:$0xff]  ;;  %337 = vst [vmem:[%s475_s16 + $0x34] sm:$0x7] %v336_v48  ;;  %v247_v56 = vrot.slane %v195_v43, 4  ;;  %v198_v58 = vmax.bf16 %v168_v47, %v166_v46  ;;  %v340_v61 = vsel %vm481_vm2, %v296_v49, %v339_v37 }
  0x25   : > { %v169_v53 = vld [vmem:[%s470_s13 + $0x160] sm:$0xff]  ;;  %338 = vst [vmem:[%s475_s16 + $0x38] sm:$0xf] %v295_v41  ;;  %v248_v57 = vrot.slane %v196_v44, 4  ;;  %v170_v59 = vld [vmem:[%s470_s13 + $0x168] sm:$0x77]  ;;  %v298_v62 = vmax.bf16 %v246_v50, %v194_v38 }
  0x26   : > { %v172_v60 = vld [vmem:[%s470_s13 + $0x178] sm:$0x77]  ;;  %v347_v63 = vld [vmem:[%s475_s16 + $0x4c] sm:$0x7]  ;;  %v249_v0 = vrot.slane %v197_v52, 4  ;;  %v199_v1 = vmax.bf16 %v171_v54, %v169_v53  ;;  %v173_v2 = vld [vmem:[%s470_s13 + $0x180] sm:$0xff]  ;;  %v299_v4 = vmax.bf16 %v247_v56, %v195_v43 }
  0x27   : > { %v175_v3 = vld [vmem:[%s470_s13 + $0x190] sm:$0xff]  ;;  %341 = vst [vmem:[%s475_s16 + $0x3c] sm:$0x7] %v340_v61  ;;  %342 = vst [vmem:[%s475_s16 + $0x40] sm:$0xf] %v297_v55  ;;  %v300_v6 = vmax.bf16 %v248_v57, %v196_v44  ;;  %v250_v7 = vrot.slane %v198_v58, 4  ;;  %v200_v8 = vmax.bf16 %v172_v60, %v170_v59  ;;  %v344_v11 = vsel %vm481_vm2, %v298_v62, %v343_v51 }
  0x28   : > { %v174_v9 = vld [vmem:[%s470_s13 + $0x188] sm:$0x77]  ;;  %v176_v10 = vld [vmem:[%s470_s13 + $0x198] sm:$0x77]  ;;  %v301_v12 = vmax.bf16 %v249_v0, %v197_v52  ;;  %v351_v13 = vld [vmem:[%s475_s16 + $0x54] sm:$0x7]  ;;  %v201_v15 = vmax.bf16 %v175_v3, %v173_v2 }
  0x29   : > { %v251_v14 = vrot.slane %v199_v1, 4  ;;  %345 = vst [vmem:[%s475_s16 + $0x44] sm:$0x7] %v344_v11  ;;  %346 = vst [vmem:[%s475_s16 + $0x48] sm:$0xf] %v299_v4  ;;  %v348_v16 = vsel %vm481_vm2, %v300_v6, %v347_v63  ;;  %v302_v17 = vmax.bf16 %v250_v7, %v198_v58  ;;  %v252_v18 = vrot.slane %v200_v8, 4 }
  0x2a   : > { %v202_v19 = vmax.bf16 %v176_v10, %v174_v9  ;;  %349 = vst [vmem:[%s475_s16 + $0x4c] sm:$0x7] %v348_v16  ;;  %350 = vst [vmem:[%s475_s16 + $0x50] sm:$0xf] %v301_v12  ;;  %v355_v21 = vld [vmem:[%s475_s16 + $0x5c] sm:$0x7] }
  0x2b   : > { %v303_v20 = vmax.bf16 %v251_v14, %v199_v1  ;;  %v253_v22 = vrot.slane %v201_v15, 4  ;;  %v352_v23 = vsel %vm481_vm2, %v302_v17, %v351_v13  ;;  %v304_v24 = vmax.bf16 %v252_v18, %v200_v8  ;;  %v359_v27 = vld [vmem:[%s475_s16 + $0x64] sm:$0x7] }
  0x2c   : > { %v254_v25 = vrot.slane %v202_v19, 4  ;;  %353 = vst [vmem:[%s475_s16 + $0x54] sm:$0x7] %v352_v23 }
  0x2d   : > { %354 = vst [vmem:[%s475_s16 + $0x58] sm:$0xf] %v303_v20  ;;  %v305_v26 = vmax.bf16 %v253_v22, %v201_v15  ;;  %v356_v28 = vsel %vm481_vm2, %v304_v24, %v355_v21 }
  0x2e   : > { %v306_v29 = vmax.bf16 %v254_v25, %v202_v19  ;;  %357 = vst [vmem:[%s475_s16 + $0x5c] sm:$0x7] %v356_v28 }
  0x2f   : > { %358 = vst [vmem:[%s475_s16 + $0x60] sm:$0xf] %v305_v26 }
  0x30   : > { %v360_v30 = vsel %vm481_vm2, %v306_v29, %v359_v27 }
  0x31   : > { %361 = vst [vmem:[%s475_s16 + $0x64] sm:$0x7] %v360_v30 }
  0x32 PF: > { %s11_s6 = sadd.s32 1, %s447_s6  }
  0x33   : > { %p8_p4 = scmp.ge.s32.totalorder %s11_s6, 4  }
  0x35   :  { %10 = sbr.rel (!%p8_p4) target bundleno = 1 (0x1), region = 54 }

// kernel: cnn_forward.13
= control target key start
LH: loop header
LB: loop body
LE: loop exit
PB: predicated region body
PF: predicated region fallthrough
CT: control target
= control target key end

     0   :  { %s6476_s12 = smov 0   ;;  %s6478_s13 = smov 0   ;;  %s8202_s0 = inlined_call_operand.vmem [shape: bf16[200,2048], index: 0, kind: input, shape index: {}]   ;;  %s8203_s1 = inlined_call_operand.vmem [shape: bf16[2048,256], index: 1, kind: input, shape index: {}]   ;;  %s8204_s2 = inlined_call_operand.vmem [shape: f32[1,256], index: 2, kind: input, shape index: {}]   ;;  %s8205_s3 = inlined_call_operand.vmem [shape: bf16[200,256], index: 3, kind: output, shape index: {}]  }
   0x1   :  { %s6480_s14 = smov 0   ;;  %s6482_s15 = smov 0  }
   0x2   :  { %s6484_s16 = smov 0  }
   0x3 LB: > { %s22_s17 = sadd.s32 1, %s6450_s15  ;;  %s5009_s18 = sadd.s32 4294967295, %s6454_s16   ;;  %s6454_s16 = sphi %s6484_s16, %s13_s16   ;;  %s6450_s15 = sphi %s6482_s15, %s8210_s15   ;;  %s6446_s14 = sphi %s6480_s14, %s8209_s14   ;;  %s6442_s13 = sphi %s6478_s13, %s8208_s13   ;;  %s6438_s12 = sphi %s6476_s12, %s8207_s12  }
   0x4   : > { %p23_p0 = scmp.ge.s32.totalorder %s22_s17, 2  ;;  %p65_p1 = scmp.ne.s32.totalorder %s6442_s13, %s6438_s12 }
   0x5   : > { %p66_p2 = scmp.eq.s32.totalorder %s6454_s16, 0  ;;  %p123_p4 = scmp.eq.s32.totalorder %s5009_s18, 1 }
   0x6   : > { %s8212_s17 = smov (%p23_p0, %s22_s17), 0  ;;  %s58_s20 = sadd.s32 1, %s6442_s13 }
   0x7   : > { %p67_p3 = por %p66_p2, %p65_p1  ;;  %s55_s19 = ssub.s32 %s6450_s15, %s8212_s17 }
   0x8   : > { %p56_p5 = scmp.eq.s32.totalorder %s55_s19, 0  ;;  %p6511_p6 = por %p123_p4, %p65_p1 }
   0x9   : > { %p5013_p7 = scmp.ge.s32.totalorder %s6454_s16, 2 }
   0xa   : > { %s6516_s22 = scalar_select %p56_p5, %s6442_s13, %s58_s20  }
   0xb   : > { %155 = sbr.rel (%p5013_p7) target bundleno = 190 (0xbe), region = 20 }
  0x10   : > { %158 = sbr.rel (!%p67_p3) target bundleno = 190 (0xbe), region = 24  ;;  %s160_s23 = sand.u32 (%p67_p3), 1, %s6442_s13  }
  0x11   : > { %s5015_s24 = sshll.u32 (%p67_p3), %s6450_s15, 2  ;;  %s5014_s25 = sshll.u32 (%p67_p3), %s160_s23, 10 }
  0x12   : > { %s6524_s28 = scalar_lea.vmem (%p67_p3), %s8203_s1, %s5015_s24  ;;  %s6528_s29 = scalar_lea.vmem (%p67_p3), [#allocation2], %s5014_s25 }
  0x13   : > { %v181_v0 = vld [vmem:[%s6524_s28] sm:$0xf] (%p67_p3)  ;;  %v183_v1 = vld [vmem:[%s6524_s28 + $0x8] sm:$0xf] (%p67_p3)  ;;  %v185_v2 = vld [vmem:[%s6524_s28 + $0x10] sm:$0xf] (%p67_p3) }
  0x14   : > { %182 = vst [vmem:[%s6528_s29] sm:$0xf] (%p67_p3), %v181_v0  ;;  %184 = vst [vmem:[%s6528_s29 + $0x4] sm:$0xf] (%p67_p3), %v183_v1  ;;  %v187_v3 = vld [vmem:[%s6524_s28 + $0x18] sm:$0xf] (%p67_p3) }
  0x15   : > { %v189_v4 = vld [vmem:[%s6524_s28 + $0x20] sm:$0xf]  ;;  %186 = vst [vmem:[%s6528_s29 + $0x8] sm:$0xf] %v185_v2  ;;  %188 = vst [vmem:[%s6528_s29 + $0xc] sm:$0xf] %v187_v3 }
  0x16   : > { %190 = vst [vmem:[%s6528_s29 + $0x10] sm:$0xf] %v189_v4  ;;  %v191_v5 = vld [vmem:[%s6524_s28 + $0x28] sm:$0xf]  ;;  %v193_v6 = vld [vmem:[%s6524_s28 + $0x30] sm:$0xf] }
  0x17   : > { %v195_v7 = vld [vmem:[%s6524_s28 + $0x38] sm:$0xf]  ;;  %192 = vst [vmem:[%s6528_s29 + $0x14] sm:$0xf] %v191_v5  ;;  %194 = vst [vmem:[%s6528_s29 + $0x18] sm:$0xf] %v193_v6 }
  0x18   : > { %196 = vst [vmem:[%s6528_s29 + $0x1c] sm:$0xf] %v195_v7  ;;  %v197_v8 = vld [vmem:[%s6524_s28 + $0x40] sm:$0xf]  ;;  %v199_v9 = vld [vmem:[%s6524_s28 + $0x48] sm:$0xf] }
  0x19   : > { %v201_v10 = vld [vmem:[%s6524_s28 + $0x50] sm:$0xf]  ;;  %198 = vst [vmem:[%s6528_s29 + $0x20] sm:$0xf] %v197_v8  ;;  %200 = vst [vmem:[%s6528_s29 + $0x24] sm:$0xf] %v199_v9 }
  0x1a   : > { %202 = vst [vmem:[%s6528_s29 + $0x28] sm:$0xf] %v201_v10  ;;  %v203_v11 = vld [vmem:[%s6524_s28 + $0x58] sm:$0xf]  ;;  %v205_v12 = vld [vmem:[%s6524_s28 + $0x60] sm:$0xf] }
  0x1b   : > { %v207_v13 = vld [vmem:[%s6524_s28 + $0x68] sm:$0xf]  ;;  %204 = vst [vmem:[%s6528_s29 + $0x2c] sm:$0xf] %v203_v11  ;;  %206 = vst [vmem:[%s6528_s29 + $0x30] sm:$0xf] %v205_v12 }
  0x1c   : > { %208 = vst [vmem:[%s6528_s29 + $0x34] sm:$0xf] %v207_v13  ;;  %v209_v14 = vld [vmem:[%s6524_s28 + $0x70] sm:$0xf]  ;;  %v211_v15 = vld [vmem:[%s6524_s28 + $0x78] sm:$0xf] }
  0x1d   : > { %v213_v16 = vld [vmem:[%s6524_s28 + $0x80] sm:$0xf]  ;;  %210 = vst [vmem:[%s6528_s29 + $0x38] sm:$0xf] %v209_v14  ;;  %212 = vst [vmem:[%s6528_s29 + $0x3c] sm:$0xf] %v211_v15 }
  0x1e   : > { %214 = vst [vmem:[%s6528_s29 + $0x40] sm:$0xf] %v213_v16  ;;  %v215_v17 = vld [vmem:[%s6524_s28 + $0x88] sm:$0xf]  ;;  %v217_v18 = vld [vmem:[%s6524_s28 + $0x90] sm:$0xf] }
  0x1f   : > { %v219_v19 = vld [vmem:[%s6524_s28 + $0x98] sm:$0xf]  ;;  %216 = vst [vmem:[%s6528_s29 + $0x44] sm:$0xf] %v215_v17  ;;  %218 = vst [vmem:[%s6528_s29 + $0x48] sm:$0xf] %v217_v18 }
  0x20   : > { %220 = vst [vmem:[%s6528_s29 + $0x4c] sm:$0xf] %v219_v19  ;;  %v221_v20 = vld [vmem:[%s6524_s28 + $0xa0] sm:$0xf]  ;;  %v223_v21 = vld [vmem:[%s6524_s28 + $0xa8] sm:$0xf] }
  0x21   : > { %v225_v22 = vld [vmem:[%s6524_s28 + $0xb0] sm:$0xf]  ;;  %222 = vst [vmem:[%s6528_s29 + $0x50] sm:$0xf] %v221_v20  ;;  %224 = vst [vmem:[%s6528_s29 + $0x54] sm:$0xf] %v223_v21 }
  0x22   : > { %226 = vst [vmem:[%s6528_s29 + $0x58] sm:$0xf] %v225_v22  ;;  %v227_v23 = vld [vmem:[%s6524_s28 + $0xb8] sm:$0xf]  ;;  %v229_v24 = vld [vmem:[%s6524_s28 + $0xc0] sm:$0xf] }
  0x23   : > { %v231_v25 = vld [vmem:[%s6524_s28 + $0xc8] sm:$0xf]  ;;  %228 = vst [vmem:[%s6528_s29 + $0x5c] sm:$0xf] %v227_v23  ;;  %230 = vst [vmem:[%s6528_s29 + $0x60] sm:$0xf] %v229_v24 }
  0x24   : > { %232 = vst [vmem:[%s6528_s29 + $0x64] sm:$0xf] %v231_v25  ;;  %v233_v26 = vld [vmem:[%s6524_s28 + $0xd0] sm:$0xf]  ;;  %v235_v27 = vld [vmem:[%s6524_s28 + $0xd8] sm:$0xf] }
  0x25   : > { %v237_v28 = vld [vmem:[%s6524_s28 + $0xe0] sm:$0xf]  ;;  %234 = vst [vmem:[%s6528_s29 + $0x68] sm:$0xf] %v233_v26  ;;  %236 = vst [vmem:[%s6528_s29 + $0x6c] sm:$0xf] %v235_v27 }
  0x26   : > { %238 = vst [vmem:[%s6528_s29 + $0x70] sm:$0xf] %v237_v28  ;;  %v239_v29 = vld [vmem:[%s6524_s28 + $0xe8] sm:$0xf]  ;;  %v241_v30 = vld [vmem:[%s6524_s28 + $0xf0] sm:$0xf] }
  0x27   : > { %v243_v31 = vld [vmem:[%s6524_s28 + $0xf8] sm:$0xf]  ;;  %240 = vst [vmem:[%s6528_s29 + $0x74] sm:$0xf] %v239_v29  ;;  %242 = vst [vmem:[%s6528_s29 + $0x78] sm:$0xf] %v241_v30 }
  0x28   : > { %244 = vst [vmem:[%s6528_s29 + $0x7c] sm:$0xf] %v243_v31  ;;  %v245_v32 = vld [vmem:[%s6524_s28 + $0x100] sm:$0xf]  ;;  %v247_v33 = vld [vmem:[%s6524_s28 + $0x108] sm:$0xf] }
  0x29   : > { %v249_v34 = vld [vmem:[%s6524_s28 + $0x110] sm:$0xf]  ;;  %246 = vst [vmem:[%s6528_s29 + $0x80] sm:$0xf] %v245_v32  ;;  %248 = vst [vmem:[%s6528_s29 + $0x84] sm:$0xf] %v247_v33 }
  0x2a   : > { %250 = vst [vmem:[%s6528_s29 + $0x88] sm:$0xf] %v249_v34  ;;  %v251_v35 = vld [vmem:[%s6524_s28 + $0x118] sm:$0xf]  ;;  %v253_v36 = vld [vmem:[%s6524_s28 + $0x120] sm:$0xf] }
  0x2b   : > { %v255_v37 = vld [vmem:[%s6524_s28 + $0x128] sm:$0xf]  ;;  %252 = vst [vmem:[%s6528_s29 + $0x8c] sm:$0xf] %v251_v35  ;;  %254 = vst [vmem:[%s6528_s29 + $0x90] sm:$0xf] %v253_v36 }
  0x2c   : > { %256 = vst [vmem:[%s6528_s29 + $0x94] sm:$0xf] %v255_v37  ;;  %v257_v38 = vld [vmem:[%s6524_s28 + $0x130] sm:$0xf]  ;;  %v259_v39 = vld [vmem:[%s6524_s28 + $0x138] sm:$0xf] }
  0x2d   : > { %v261_v40 = vld [vmem:[%s6524_s28 + $0x140] sm:$0xf]  ;;  %258 = vst [vmem:[%s6528_s29 + $0x98] sm:$0xf] %v257_v38  ;;  %260 = vst [vmem:[%s6528_s29 + $0x9c] sm:$0xf] %v259_v39 }
  0x2e   : > { %262 = vst [vmem:[%s6528_s29 + $0xa0] sm:$0xf] %v261_v40  ;;  %v263_v41 = vld [vmem:[%s6524_s28 + $0x148] sm:$0xf]  ;;  %v265_v42 = vld [vmem:[%s6524_s28 + $0x150] sm:$0xf] }
  0x2f   : > { %v267_v43 = vld [vmem:[%s6524_s28 + $0x158] sm:$0xf]  ;;  %264 = vst [vmem:[%s6528_s29 + $0xa4] sm:$0xf] %v263_v41  ;;  %266 = vst [vmem:[%s6528_s29 + $0xa8] sm:$0xf] %v265_v42 }
  0x30   : > { %268 = vst [vmem:[%s6528_s29 + $0xac] sm:$0xf] %v267_v43  ;;  %v269_v44 = vld [vmem:[%s6524_s28 + $0x160] sm:$0xf]  ;;  %v271_v45 = vld [vmem:[%s6524_s28 + $0x168] sm:$0xf] }
  0x31   : > { %v273_v46 = vld [vmem:[%s6524_s28 + $0x170] sm:$0xf]  ;;  %270 = vst [vmem:[%s6528_s29 + $0xb0] sm:$0xf] %v269_v44  ;;  %272 = vst [vmem:[%s6528_s29 + $0xb4] sm:$0xf] %v271_v45 }
  0x32   : > { %274 = vst [vmem:[%s6528_s29 + $0xb8] sm:$0xf] %v273_v46  ;;  %v275_v47 = vld [vmem:[%s6524_s28 + $0x178] sm:$0xf]  ;;  %v277_v48 = vld [vmem:[%s6524_s28 + $0x180] sm:$0xf] }
  0x33   : > { %v279_v49 = vld [vmem:[%s6524_s28 + $0x188] sm:$0xf]  ;;  %276 = vst [vmem:[%s6528_s29 + $0xbc] sm:$0xf] %v275_v47  ;;  %278 = vst [vmem:[%s6528_s29 + $0xc0] sm:$0xf] %v277_v48 }
  0x34   : > { %280 = vst [vmem:[%s6528_s29 + $0xc4] sm:$0xf] %v279_v49  ;;  %v281_v50 = vld [vmem:[%s6524_s28 + $0x190] sm:$0xf]  ;;  %v283_v51 = vld [vmem:[%s6524_s28 + $0x198] sm:$0xf] }
  0x35   : > { %v285_v52 = vld [vmem:[%s6524_s28 + $0x1a0] sm:$0xf]  ;;  %282 = vst [vmem:[%s6528_s29 + $0xc8] sm:$0xf] %v281_v50  ;;  %284 = vst [vmem:[%s6528_s29 + $0xcc] sm:$0xf] %v283_v51 }
  0x36   : > { %286 = vst [vmem:[%s6528_s29 + $0xd0] sm:$0xf] %v285_v52  ;;  %v287_v53 = vld [vmem:[%s6524_s28 + $0x1a8] sm:$0xf]  ;;  %v289_v54 = vld [vmem:[%s6524_s28 + $0x1b0] sm:$0xf] }
  0x37   : > { %v291_v55 = vld [vmem:[%s6524_s28 + $0x1b8] sm:$0xf]  ;;  %288 = vst [vmem:[%s6528_s29 + $0xd4] sm:$0xf] %v287_v53  ;;  %290 = vst [vmem:[%s6528_s29 + $0xd8] sm:$0xf] %v289_v54 }
  0x38   : > { %292 = vst [vmem:[%s6528_s29 + $0xdc] sm:$0xf] %v291_v55  ;;  %v293_v56 = vld [vmem:[%s6524_s28 + $0x1c0] sm:$0xf]  ;;  %v295_v57 = vld [vmem:[%s6524_s28 + $0x1c8] sm:$0xf] }
  0x39   : > { %v297_v58 = vld [vmem:[%s6524_s28 + $0x1d0] sm:$0xf]  ;;  %294 = vst [vmem:[%s6528_s29 + $0xe0] sm:$0xf] %v293_v56  ;;  %296 = vst [vmem:[%s6528_s29 + $0xe4] sm:$0xf] %v295_v57 }
  0x3a   : > { %298 = vst [vmem:[%s6528_s29 + $0xe8] sm:$0xf] %v297_v58  ;;  %v299_v59 = vld [vmem:[%s6524_s28 + $0x1d8] sm:$0xf]  ;;  %v301_v60 = vld [vmem:[%s6524_s28 + $0x1e0] sm:$0xf] }
  0x3b   : > { %v303_v61 = vld [vmem:[%s6524_s28 + $0x1e8] sm:$0xf]  ;;  %300 = vst [vmem:[%s6528_s29 + $0xec] sm:$0xf] %v299_v59  ;;  %302 = vst [vmem:[%s6528_s29 + $0xf0] sm:$0xf] %v301_v60 }
  0x3c   : > { %304 = vst [vmem:[%s6528_s29 + $0xf4] sm:$0xf] %v303_v61  ;;  %v305_v62 = vld [vmem:[%s6524_s28 + $0x1f0] sm:$0xf]  ;;  %v307_v63 = vld [vmem:[%s6524_s28 + $0x1f8] sm:$0xf] }
  0x3d   : > { %v309_v0 = vld [vmem:[%s6524_s28 + $0x200] sm:$0xf]  ;;  %306 = vst [vmem:[%s6528_s29 + $0xf8] sm:$0xf] %v305_v62  ;;  %308 = vst [vmem:[%s6528_s29 + $0xfc] sm:$0xf] %v307_v63 }
  0x3e   : > { %310 = vst [vmem:[%s6528_s29 + $0x100] sm:$0xf] %v309_v0  ;;  %v311_v1 = vld [vmem:[%s6524_s28 + $0x208] sm:$0xf]  ;;  %v313_v2 = vld [vmem:[%s6524_s28 + $0x210] sm:$0xf] }
  0x3f   : > { %v315_v3 = vld [vmem:[%s6524_s28 + $0x218] sm:$0xf]  ;;  %312 = vst [vmem:[%s6528_s29 + $0x104] sm:$0xf] %v311_v1  ;;  %314 = vst [vmem:[%s6528_s29 + $0x108] sm:$0xf] %v313_v2 }
  0x40   : > { %316 = vst [vmem:[%s6528_s29 + $0x10c] sm:$0xf] %v315_v3  ;;  %v317_v4 = vld [vmem:[%s6524_s28 + $0x220] sm:$0xf]  ;;  %v319_v5 = vld [vmem:[%s6524_s28 + $0x228] sm:$0xf] }
  0x41   : > { %v321_v6 = vld [vmem:[%s6524_s28 + $0x230] sm:$0xf]  ;;  %318 = vst [vmem:[%s6528_s29 + $0x110] sm:$0xf] %v317_v4  ;;  %320 = vst [vmem:[%s6528_s29 + $0x114] sm:$0xf] %v319_v5 }
  0x42   : > { %322 = vst [vmem:[%s6528_s29 + $0x118] sm:$0xf] %v321_v6  ;;  %v323_v7 = vld [vmem:[%s6524_s28 + $0x238] sm:$0xf]  ;;  %v325_v8 = vld [vmem:[%s6524_s28 + $0x240] sm:$0xf] }
  0x43   : > { %v327_v9 = vld [vmem:[%s6524_s28 + $0x248] sm:$0xf]  ;;  %324 = vst [vmem:[%s6528_s29 + $0x11c] sm:$0xf] %v323_v7  ;;  %326 = vst [vmem:[%s6528_s29 + $0x120] sm:$0xf] %v325_v8 }
  0x44   : > { %328 = vst [vmem:[%s6528_s29 + $0x124] sm:$0xf] %v327_v9  ;;  %v329_v10 = vld [vmem:[%s6524_s28 + $0x250] sm:$0xf]  ;;  %v331_v11 = vld [vmem:[%s6524_s28 + $0x258] sm:$0xf] }
  0x45   : > { %v333_v12 = vld [vmem:[%s6524_s28 + $0x260] sm:$0xf]  ;;  %330 = vst [vmem:[%s6528_s29 + $0x128] sm:$0xf] %v329_v10  ;;  %332 = vst [vmem:[%s6528_s29 + $0x12c] sm:$0xf] %v331_v11 }
  0x46   : > { %334 = vst [vmem:[%s6528_s29 + $0x130] sm:$0xf] %v333_v12  ;;  %v335_v13 = vld [vmem:[%s6524_s28 + $0x268] sm:$0xf]  ;;  %v337_v14 = vld [vmem:[%s6524_s28 + $0x270] sm:$0xf] }
  0x47   : > { %v339_v15 = vld [vmem:[%s6524_s28 + $0x278] sm:$0xf]  ;;  %336 = vst [vmem:[%s6528_s29 + $0x134] sm:$0xf] %v335_v13  ;;  %338 = vst [vmem:[%s6528_s29 + $0x138] sm:$0xf] %v337_v14 }
  0x48   : > { %340 = vst [vmem:[%s6528_s29 + $0x13c] sm:$0xf] %v339_v15  ;;  %v341_v16 = vld [vmem:[%s6524_s28 + $0x280] sm:$0xf]  ;;  %v343_v17 = vld [vmem:[%s6524_s28 + $0x288] sm:$0xf] }
  0x49   : > { %v345_v18 = vld [vmem:[%s6524_s28 + $0x290] sm:$0xf]  ;;  %342 = vst [vmem:[%s6528_s29 + $0x140] sm:$0xf] %v341_v16  ;;  %344 = vst [vmem:[%s6528_s29 + $0x144] sm:$0xf] %v343_v17 }
  0x4a   : > { %346 = vst [vmem:[%s6528_s29 + $0x148] sm:$0xf] %v345_v18  ;;  %v347_v19 = vld [vmem:[%s6524_s28 + $0x298] sm:$0xf]  ;;  %v349_v20 = vld [vmem:[%s6524_s28 + $0x2a0] sm:$0xf] }
  0x4b   : > { %v351_v21 = vld [vmem:[%s6524_s28 + $0x2a8] sm:$0xf]  ;;  %348 = vst [vmem:[%s6528_s29 + $0x14c] sm:$0xf] %v347_v19  ;;  %350 = vst [vmem:[%s6528_s29 + $0x150] sm:$0xf] %v349_v20 }
  0x4c   : > { %352 = vst [vmem:[%s6528_s29 + $0x154] sm:$0xf] %v351_v21  ;;  %v353_v22 = vld [vmem:[%s6524_s28 + $0x2b0] sm:$0xf]  ;;  %v355_v23 = vld [vmem:[%s6524_s28 + $0x2b8] sm:$0xf] }
  0x4d   : > { %v357_v24 = vld [vmem:[%s6524_s28 + $0x2c0] sm:$0xf]  ;;  %354 = vst [vmem:[%s6528_s29 + $0x158] sm:$0xf] %v353_v22  ;;  %356 = vst [vmem:[%s6528_s29 + $0x15c] sm:$0xf] %v355_v23 }
  0x4e   : > { %358 = vst [vmem:[%s6528_s29 + $0x160] sm:$0xf] %v357_v24  ;;  %v359_v25 = vld [vmem:[%s6524_s28 + $0x2c8] sm:$0xf]  ;;  %v361_v26 = vld [vmem:[%s6524_s28 + $0x2d0] sm:$0xf] }
  0x4f   : > { %v363_v27 = vld [vmem:[%s6524_s28 + $0x2d8] sm:$0xf]  ;;  %360 = vst [vmem:[%s6528_s29 + $0x164] sm:$0xf] %v359_v25  ;;  %362 = vst [vmem:[%s6528_s29 + $0x168] sm:$0xf] %v361_v26 }
  0x50   : > { %364 = vst [vmem:[%s6528_s29 + $0x16c] sm:$0xf] %v363_v27  ;;  %v365_v28 = vld [vmem:[%s6524_s28 + $0x2e0] sm:$0xf]  ;;  %v367_v29 = vld [vmem:[%s6524_s28 + $0x2e8] sm:$0xf] }
  0x51   : > { %v369_v30 = vld [vmem:[%s6524_s28 + $0x2f0] sm:$0xf]  ;;  %366 = vst [vmem:[%s6528_s29 + $0x170] sm:$0xf] %v365_v28  ;;  %368 = vst [vmem:[%s6528_s29 + $0x174] sm:$0xf] %v367_v29 }
  0x52   : > { %370 = vst [vmem:[%s6528_s29 + $0x178] sm:$0xf] %v369_v30  ;;  %v371_v31 = vld [vmem:[%s6524_s28 + $0x2f8] sm:$0xf]  ;;  %v373_v32 = vld [vmem:[%s6524_s28 + $0x300] sm:$0xf] }
  0x53   : > { %v375_v33 = vld [vmem:[%s6524_s28 + $0x308] sm:$0xf]  ;;  %372 = vst [vmem:[%s6528_s29 + $0x17c] sm:$0xf] %v371_v31  ;;  %374 = vst [vmem:[%s6528_s29 + $0x180] sm:$0xf] %v373_v32 }
  0x54   : > { %376 = vst [vmem:[%s6528_s29 + $0x184] sm:$0xf] %v375_v33  ;;  %v377_v34 = vld [vmem:[%s6524_s28 + $0x310] sm:$0xf]  ;;  %v379_v35 = vld [vmem:[%s6524_s28 + $0x318] sm:$0xf] }
  0x55   : > { %v381_v36 = vld [vmem:[%s6524_s28 + $0x320] sm:$0xf]  ;;  %378 = vst [vmem:[%s6528_s29 + $0x188] sm:$0xf] %v377_v34  ;;  %380 = vst [vmem:[%s6528_s29 + $0x18c] sm:$0xf] %v379_v35 }
  0x56   : > { %382 = vst [vmem:[%s6528_s29 + $0x190] sm:$0xf] %v381_v36  ;;  %v383_v37 = vld [vmem:[%s6524_s28 + $0x328] sm:$0xf]  ;;  %v385_v38 = vld [vmem:[%s6524_s28 + $0x330] sm:$0xf] }
  0x57   : > { %v387_v39 = vld [vmem:[%s6524_s28 + $0x338] sm:$0xf]  ;;  %384 = vst [vmem:[%s6528_s29 + $0x194] sm:$0xf] %v383_v37  ;;  %386 = vst [vmem:[%s6528_s29 + $0x198] sm:$0xf] %v385_v38 }
  0x58   : > { %388 = vst [vmem:[%s6528_s29 + $0x19c] sm:$0xf] %v387_v39  ;;  %v389_v40 = vld [vmem:[%s6524_s28 + $0x340] sm:$0xf]  ;;  %v391_v41 = vld [vmem:[%s6524_s28 + $0x348] sm:$0xf] }
  0x59   : > { %v393_v42 = vld [vmem:[%s6524_s28 + $0x350] sm:$0xf]  ;;  %390 = vst [vmem:[%s6528_s29 + $0x1a0] sm:$0xf] %v389_v40  ;;  %392 = vst [vmem:[%s6528_s29 + $0x1a4] sm:$0xf] %v391_v41 }
  0x5a   : > { %394 = vst [vmem:[%s6528_s29 + $0x1a8] sm:$0xf] %v393_v42  ;;  %v395_v43 = vld [vmem:[%s6524_s28 + $0x358] sm:$0xf]  ;;  %v397_v44 = vld [vmem:[%s6524_s28 + $0x360] sm:$0xf] }
  0x5b   : > { %v399_v45 = vld [vmem:[%s6524_s28 + $0x368] sm:$0xf]  ;;  %396 = vst [vmem:[%s6528_s29 + $0x1ac] sm:$0xf] %v395_v43  ;;  %398 = vst [vmem:[%s6528_s29 + $0x1b0] sm:$0xf] %v397_v44 }
  0x5c   : > { %400 = vst [vmem:[%s6528_s29 + $0x1b4] sm:$0xf] %v399_v45  ;;  %v401_v46 = vld [vmem:[%s6524_s28 + $0x370] sm:$0xf]  ;;  %v403_v47 = vld [vmem:[%s6524_s28 + $0x378] sm:$0xf] }
  0x5d   : > { %v405_v48 = vld [vmem:[%s6524_s28 + $0x380] sm:$0xf]  ;;  %402 = vst [vmem:[%s6528_s29 + $0x1b8] sm:$0xf] %v401_v46  ;;  %404 = vst [vmem:[%s6528_s29 + $0x1bc] sm:$0xf] %v403_v47 }
  0x5e   : > { %406 = vst [vmem:[%s6528_s29 + $0x1c0] sm:$0xf] %v405_v48  ;;  %v407_v49 = vld [vmem:[%s6524_s28 + $0x388] sm:$0xf]  ;;  %v409_v50 = vld [vmem:[%s6524_s28 + $0x390] sm:$0xf] }
  0x5f   : > { %v411_v51 = vld [vmem:[%s6524_s28 + $0x398] sm:$0xf]  ;;  %408 = vst [vmem:[%s6528_s29 + $0x1c4] sm:$0xf] %v407_v49  ;;  %410 = vst [vmem:[%s6528_s29 + $0x1c8] sm:$0xf] %v409_v50 }
  0x60   : > { %412 = vst [vmem:[%s6528_s29 + $0x1cc] sm:$0xf] %v411_v51  ;;  %v413_v52 = vld [vmem:[%s6524_s28 + $0x3a0] sm:$0xf]  ;;  %v415_v53 = vld [vmem:[%s6524_s28 + $0x3a8] sm:$0xf] }
  0x61   : > { %v417_v54 = vld [vmem:[%s6524_s28 + $0x3b0] sm:$0xf]  ;;  %414 = vst [vmem:[%s6528_s29 + $0x1d0] sm:$0xf] %v413_v52  ;;  %416 = vst [vmem:[%s6528_s29 + $0x1d4] sm:$0xf] %v415_v53 }
  0x62   : > { %418 = vst [vmem:[%s6528_s29 + $0x1d8] sm:$0xf] %v417_v54  ;;  %v419_v55 = vld [vmem:[%s6524_s28 + $0x3b8] sm:$0xf]  ;;  %v421_v56 = vld [vmem:[%s6524_s28 + $0x3c0] sm:$0xf] }
  0x63   : > { %v423_v57 = vld [vmem:[%s6524_s28 + $0x3c8] sm:$0xf]  ;;  %420 = vst [vmem:[%s6528_s29 + $0x1dc] sm:$0xf] %v419_v55  ;;  %422 = vst [vmem:[%s6528_s29 + $0x1e0] sm:$0xf] %v421_v56 }
  0x64   : > { %424 = vst [vmem:[%s6528_s29 + $0x1e4] sm:$0xf] %v423_v57  ;;  %v425_v58 = vld [vmem:[%s6524_s28 + $0x3d0] sm:$0xf]  ;;  %v427_v59 = vld [vmem:[%s6524_s28 + $0x3d8] sm:$0xf] }
  0x65   : > { %v429_v60 = vld [vmem:[%s6524_s28 + $0x3e0] sm:$0xf]  ;;  %426 = vst [vmem:[%s6528_s29 + $0x1e8] sm:$0xf] %v425_v58  ;;  %428 = vst [vmem:[%s6528_s29 + $0x1ec] sm:$0xf] %v427_v59 }
  0x66   : > { %430 = vst [vmem:[%s6528_s29 + $0x1f0] sm:$0xf] %v429_v60  ;;  %v431_v61 = vld [vmem:[%s6524_s28 + $0x3e8] sm:$0xf]  ;;  %v433_v62 = vld [vmem:[%s6524_s28 + $0x3f0] sm:$0xf] }
  0x67   : > { %v435_v63 = vld [vmem:[%s6524_s28 + $0x3f8] sm:$0xf]  ;;  %432 = vst [vmem:[%s6528_s29 + $0x1f4] sm:$0xf] %v431_v61  ;;  %434 = vst [vmem:[%s6528_s29 + $0x1f8] sm:$0xf] %v433_v62 }
  0x68   : > { %436 = vst [vmem:[%s6528_s29 + $0x1fc] sm:$0xf] %v435_v63  ;;  %v437_v0 = vld [vmem:[%s6524_s28 + $0x400] sm:$0xf]  ;;  %v439_v1 = vld [vmem:[%s6524_s28 + $0x408] sm:$0xf] }
  0x69   : > { %v441_v2 = vld [vmem:[%s6524_s28 + $0x410] sm:$0xf]  ;;  %438 = vst [vmem:[%s6528_s29 + $0x200] sm:$0xf] %v437_v0  ;;  %440 = vst [vmem:[%s6528_s29 + $0x204] sm:$0xf] %v439_v1 }
  0x6a   : > { %442 = vst [vmem:[%s6528_s29 + $0x208] sm:$0xf] %v441_v2  ;;  %v443_v3 = vld [vmem:[%s6524_s28 + $0x418] sm:$0xf]  ;;  %v445_v4 = vld [vmem:[%s6524_s28 + $0x420] sm:$0xf] }
  0x6b   : > { %v447_v5 = vld [vmem:[%s6524_s28 + $0x428] sm:$0xf]  ;;  %444 = vst [vmem:[%s6528_s29 + $0x20c] sm:$0xf] %v443_v3  ;;  %446 = vst [vmem:[%s6528_s29 + $0x210] sm:$0xf] %v445_v4 }
  0x6c   : > { %448 = vst [vmem:[%s6528_s29 + $0x214] sm:$0xf] %v447_v5  ;;  %v449_v6 = vld [vmem:[%s6524_s28 + $0x430] sm:$0xf]  ;;  %v451_v7 = vld [vmem:[%s6524_s28 + $0x438] sm:$0xf] }
  0x6d   : > { %v453_v8 = vld [vmem:[%s6524_s28 + $0x440] sm:$0xf]  ;;  %450 = vst [vmem:[%s6528_s29 + $0x218] sm:$0xf] %v449_v6  ;;  %452 = vst [vmem:[%s6528_s29 + $0x21c] sm:$0xf] %v451_v7 }
  0x6e   : > { %454 = vst [vmem:[%s6528_s29 + $0x220] sm:$0xf] %v453_v8  ;;  %v455_v9 = vld [vmem:[%s6524_s28 + $0x448] sm:$0xf]  ;;  %v457_v10 = vld [vmem:[%s6524_s28 + $0x450] sm:$0xf] }
  0x6f   : > { %v459_v11 = vld [vmem:[%s6524_s28 + $0x458] sm:$0xf]  ;;  %456 = vst [vmem:[%s6528_s29 + $0x224] sm:$0xf] %v455_v9  ;;  %458 = vst [vmem:[%s6528_s29 + $0x228] sm:$0xf] %v457_v10 }
  0x70   : > { %460 = vst [vmem:[%s6528_s29 + $0x22c] sm:$0xf] %v459_v11  ;;  %v461_v12 = vld [vmem:[%s6524_s28 + $0x460] sm:$0xf]  ;;  %v463_v13 = vld [vmem:[%s6524_s28 + $0x468] sm:$0xf] }
  0x71   : > { %v465_v14 = vld [vmem:[%s6524_s28 + $0x470] sm:$0xf]  ;;  %462 = vst [vmem:[%s6528_s29 + $0x230] sm:$0xf] %v461_v12  ;;  %464 = vst [vmem:[%s6528_s29 + $0x234] sm:$0xf] %v463_v13 }
  0x72   : > { %466 = vst [vmem:[%s6528_s29 + $0x238] sm:$0xf] %v465_v14  ;;  %v467_v15 = vld [vmem:[%s6524_s28 + $0x478] sm:$0xf]  ;;  %v469_v16 = vld [vmem:[%s6524_s28 + $0x480] sm:$0xf] }
  0x73   : > { %v471_v17 = vld [vmem:[%s6524_s28 + $0x488] sm:$0xf]  ;;  %468 = vst [vmem:[%s6528_s29 + $0x23c] sm:$0xf] %v467_v15  ;;  %470 = vst [vmem:[%s6528_s29 + $0x240] sm:$0xf] %v469_v16 }
  0x74   : > { %472 = vst [vmem:[%s6528_s29 + $0x244] sm:$0xf] %v471_v17  ;;  %v473_v18 = vld [vmem:[%s6524_s28 + $0x490] sm:$0xf]  ;;  %v475_v19 = vld [vmem:[%s6524_s28 + $0x498] sm:$0xf] }
  0x75   : > { %v477_v20 = vld [vmem:[%s6524_s28 + $0x4a0] sm:$0xf]  ;;  %474 = vst [vmem:[%s6528_s29 + $0x248] sm:$0xf] %v473_v18  ;;  %476 = vst [vmem:[%s6528_s29 + $0x24c] sm:$0xf] %v475_v19 }
  0x76   : > { %478 = vst [vmem:[%s6528_s29 + $0x250] sm:$0xf] %v477_v20  ;;  %v479_v21 = vld [vmem:[%s6524_s28 + $0x4a8] sm:$0xf]  ;;  %v481_v22 = vld [vmem:[%s6524_s28 + $0x4b0] sm:$0xf] }
  0x77   : > { %v483_v23 = vld [vmem:[%s6524_s28 + $0x4b8] sm:$0xf]  ;;  %480 = vst [vmem:[%s6528_s29 + $0x254] sm:$0xf] %v479_v21  ;;  %482 = vst [vmem:[%s6528_s29 + $0x258] sm:$0xf] %v481_v22 }
  0x78   : > { %484 = vst [vmem:[%s6528_s29 + $0x25c] sm:$0xf] %v483_v23  ;;  %v485_v24 = vld [vmem:[%s6524_s28 + $0x4c0] sm:$0xf]  ;;  %v487_v25 = vld [vmem:[%s6524_s28 + $0x4c8] sm:$0xf] }
  0x79   : > { %v489_v26 = vld [vmem:[%s6524_s28 + $0x4d0] sm:$0xf]  ;;  %486 = vst [vmem:[%s6528_s29 + $0x260] sm:$0xf] %v485_v24  ;;  %488 = vst [vmem:[%s6528_s29 + $0x264] sm:$0xf] %v487_v25 }
  0x7a   : > { %490 = vst [vmem:[%s6528_s29 + $0x268] sm:$0xf] %v489_v26  ;;  %v491_v27 = vld [vmem:[%s6524_s28 + $0x4d8] sm:$0xf]  ;;  %v493_v28 = vld [vmem:[%s6524_s28 + $0x4e0] sm:$0xf] }
  0x7b   : > { %v495_v29 = vld [vmem:[%s6524_s28 + $0x4e8] sm:$0xf]  ;;  %492 = vst [vmem:[%s6528_s29 + $0x26c] sm:$0xf] %v491_v27  ;;  %494 = vst [vmem:[%s6528_s29 + $0x270] sm:$0xf] %v493_v28 }
  0x7c   : > { %496 = vst [vmem:[%s6528_s29 + $0x274] sm:$0xf] %v495_v29  ;;  %v497_v30 = vld [vmem:[%s6524_s28 + $0x4f0] sm:$0xf]  ;;  %v499_v31 = vld [vmem:[%s6524_s28 + $0x4f8] sm:$0xf] }
  0x7d   : > { %v501_v32 = vld [vmem:[%s6524_s28 + $0x500] sm:$0xf]  ;;  %498 = vst [vmem:[%s6528_s29 + $0x278] sm:$0xf] %v497_v30  ;;  %500 = vst [vmem:[%s6528_s29 + $0x27c] sm:$0xf] %v499_v31 }
  0x7e   : > { %502 = vst [vmem:[%s6528_s29 + $0x280] sm:$0xf] %v501_v32  ;;  %v503_v33 = vld [vmem:[%s6524_s28 + $0x508] sm:$0xf]  ;;  %v505_v34 = vld [vmem:[%s6524_s28 + $0x510] sm:$0xf] }
  0x7f   : > { %v507_v35 = vld [vmem:[%s6524_s28 + $0x518] sm:$0xf]  ;;  %504 = vst [vmem:[%s6528_s29 + $0x284] sm:$0xf] %v503_v33  ;;  %506 = vst [vmem:[%s6528_s29 + $0x288] sm:$0xf] %v505_v34 }
  0x80   : > { %508 = vst [vmem:[%s6528_s29 + $0x28c] sm:$0xf] %v507_v35  ;;  %v509_v36 = vld [vmem:[%s6524_s28 + $0x520] sm:$0xf]  ;;  %v511_v37 = vld [vmem:[%s6524_s28 + $0x528] sm:$0xf] }
  0x81   : > { %v513_v38 = vld [vmem:[%s6524_s28 + $0x530] sm:$0xf]  ;;  %510 = vst [vmem:[%s6528_s29 + $0x290] sm:$0xf] %v509_v36  ;;  %512 = vst [vmem:[%s6528_s29 + $0x294] sm:$0xf] %v511_v37 }
  0x82   : > { %514 = vst [vmem:[%s6528_s29 + $0x298] sm:$0xf] %v513_v38  ;;  %v515_v39 = vld [vmem:[%s6524_s28 + $0x538] sm:$0xf]  ;;  %v517_v40 = vld [vmem:[%s6524_s28 + $0x540] sm:$0xf] }
  0x83   : > { %v519_v41 = vld [vmem:[%s6524_s28 + $0x548] sm:$0xf]  ;;  %516 = vst [vmem:[%s6528_s29 + $0x29c] sm:$0xf] %v515_v39  ;;  %518 = vst [vmem:[%s6528_s29 + $0x2a0] sm:$0xf] %v517_v40 }
  0x84   : > { %520 = vst [vmem:[%s6528_s29 + $0x2a4] sm:$0xf] %v519_v41  ;;  %v521_v42 = vld [vmem:[%s6524_s28 + $0x550] sm:$0xf]  ;;  %v523_v43 = vld [vmem:[%s6524_s28 + $0x558] sm:$0xf] }
  0x85   : > { %v525_v44 = vld [vmem:[%s6524_s28 + $0x560] sm:$0xf]  ;;  %522 = vst [vmem:[%s6528_s29 + $0x2a8] sm:$0xf] %v521_v42  ;;  %524 = vst [vmem:[%s6528_s29 + $0x2ac] sm:$0xf] %v523_v43 }
  0x86   : > { %526 = vst [vmem:[%s6528_s29 + $0x2b0] sm:$0xf] %v525_v44  ;;  %v527_v45 = vld [vmem:[%s6524_s28 + $0x568] sm:$0xf]  ;;  %v529_v46 = vld [vmem:[%s6524_s28 + $0x570] sm:$0xf] }
  0x87   : > { %v531_v47 = vld [vmem:[%s6524_s28 + $0x578] sm:$0xf]  ;;  %528 = vst [vmem:[%s6528_s29 + $0x2b4] sm:$0xf] %v527_v45  ;;  %530 = vst [vmem:[%s6528_s29 + $0x2b8] sm:$0xf] %v529_v46 }
  0x88   : > { %532 = vst [vmem:[%s6528_s29 + $0x2bc] sm:$0xf] %v531_v47  ;;  %v533_v48 = vld [vmem:[%s6524_s28 + $0x580] sm:$0xf]  ;;  %v535_v49 = vld [vmem:[%s6524_s28 + $0x588] sm:$0xf] }
  0x89   : > { %v537_v50 = vld [vmem:[%s6524_s28 + $0x590] sm:$0xf]  ;;  %534 = vst [vmem:[%s6528_s29 + $0x2c0] sm:$0xf] %v533_v48  ;;  %536 = vst [vmem:[%s6528_s29 + $0x2c4] sm:$0xf] %v535_v49 }
  0x8a   : > { %538 = vst [vmem:[%s6528_s29 + $0x2c8] sm:$0xf] %v537_v50  ;;  %v539_v51 = vld [vmem:[%s6524_s28 + $0x598] sm:$0xf]  ;;  %v541_v52 = vld [vmem:[%s6524_s28 + $0x5a0] sm:$0xf] }
  0x8b   : > { %v543_v53 = vld [vmem:[%s6524_s28 + $0x5a8] sm:$0xf]  ;;  %540 = vst [vmem:[%s6528_s29 + $0x2cc] sm:$0xf] %v539_v51  ;;  %542 = vst [vmem:[%s6528_s29 + $0x2d0] sm:$0xf] %v541_v52 }
  0x8c   : > { %544 = vst [vmem:[%s6528_s29 + $0x2d4] sm:$0xf] %v543_v53  ;;  %v545_v54 = vld [vmem:[%s6524_s28 + $0x5b0] sm:$0xf]  ;;  %v547_v55 = vld [vmem:[%s6524_s28 + $0x5b8] sm:$0xf] }
  0x8d   : > { %v549_v56 = vld [vmem:[%s6524_s28 + $0x5c0] sm:$0xf]  ;;  %546 = vst [vmem:[%s6528_s29 + $0x2d8] sm:$0xf] %v545_v54  ;;  %548 = vst [vmem:[%s6528_s29 + $0x2dc] sm:$0xf] %v547_v55 }
  0x8e   : > { %550 = vst [vmem:[%s6528_s29 + $0x2e0] sm:$0xf] %v549_v56  ;;  %v551_v57 = vld [vmem:[%s6524_s28 + $0x5c8] sm:$0xf]  ;;  %v553_v58 = vld [vmem:[%s6524_s28 + $0x5d0] sm:$0xf] }
  0x8f   : > { %v555_v59 = vld [vmem:[%s6524_s28 + $0x5d8] sm:$0xf]  ;;  %552 = vst [vmem:[%s6528_s29 + $0x2e4] sm:$0xf] %v551_v57  ;;  %554 = vst [vmem:[%s6528_s29 + $0x2e8] sm:$0xf] %v553_v58 }
  0x90   : > { %556 = vst [vmem:[%s6528_s29 + $0x2ec] sm:$0xf] %v555_v59  ;;  %v557_v60 = vld [vmem:[%s6524_s28 + $0x5e0] sm:$0xf]  ;;  %v559_v61 = vld [vmem:[%s6524_s28 + $0x5e8] sm:$0xf] }
  0x91   : > { %v561_v62 = vld [vmem:[%s6524_s28 + $0x5f0] sm:$0xf]  ;;  %558 = vst [vmem:[%s6528_s29 + $0x2f0] sm:$0xf] %v557_v60  ;;  %560 = vst [vmem:[%s6528_s29 + $0x2f4] sm:$0xf] %v559_v61 }
  0x92   : > { %562 = vst [vmem:[%s6528_s29 + $0x2f8] sm:$0xf] %v561_v62  ;;  %v563_v63 = vld [vmem:[%s6524_s28 + $0x5f8] sm:$0xf]  ;;  %v565_v0 = vld [vmem:[%s6524_s28 + $0x600] sm:$0xf] }
  0x93   : > { %v567_v1 = vld [vmem:[%s6524_s28 + $0x608] sm:$0xf]  ;;  %564 = vst [vmem:[%s6528_s29 + $0x2fc] sm:$0xf] %v563_v63  ;;  %566 = vst [vmem:[%s6528_s29 + $0x300] sm:$0xf] %v565_v0 }
  0x94   : > { %568 = vst [vmem:[%s6528_s29 + $0x304] sm:$0xf] %v567_v1  ;;  %v569_v2 = vld [vmem:[%s6524_s28 + $0x610] sm:$0xf]  ;;  %v571_v3 = vld [vmem:[%s6524_s28 + $0x618] sm:$0xf] }
  0x95   : > { %v573_v4 = vld [vmem:[%s6524_s28 + $0x620] sm:$0xf]  ;;  %570 = vst [vmem:[%s6528_s29 + $0x308] sm:$0xf] %v569_v2  ;;  %572 = vst [vmem:[%s6528_s29 + $0x30c] sm:$0xf] %v571_v3 }
  0x96   : > { %574 = vst [vmem:[%s6528_s29 + $0x310] sm:$0xf] %v573_v4  ;;  %v575_v5 = vld [vmem:[%s6524_s28 + $0x628] sm:$0xf]  ;;  %v577_v6 = vld [vmem:[%s6524_s28 + $0x630] sm:$0xf] }
  0x97   : > { %v579_v7 = vld [vmem:[%s6524_s28 + $0x638] sm:$0xf]  ;;  %576 = vst [vmem:[%s6528_s29 + $0x314] sm:$0xf] %v575_v5  ;;  %578 = vst [vmem:[%s6528_s29 + $0x318] sm:$0xf] %v577_v6 }
  0x98   : > { %580 = vst [vmem:[%s6528_s29 + $0x31c] sm:$0xf] %v579_v7  ;;  %v581_v8 = vld [vmem:[%s6524_s28 + $0x640] sm:$0xf]  ;;  %v583_v9 = vld [vmem:[%s6524_s28 + $0x648] sm:$0xf] }
  0x99   : > { %v585_v10 = vld [vmem:[%s6524_s28 + $0x650] sm:$0xf]  ;;  %582 = vst [vmem:[%s6528_s29 + $0x320] sm:$0xf] %v581_v8  ;;  %584 = vst [vmem:[%s6528_s29 + $0x324] sm:$0xf] %v583_v9 }
  0x9a   : > { %586 = vst [vmem:[%s6528_s29 + $0x328] sm:$0xf] %v585_v10  ;;  %v587_v11 = vld [vmem:[%s6524_s28 + $0x658] sm:$0xf]  ;;  %v589_v12 = vld [vmem:[%s6524_s28 + $0x660] sm:$0xf] }
  0x9b   : > { %v591_v13 = vld [vmem:[%s6524_s28 + $0x668] sm:$0xf]  ;;  %588 = vst [vmem:[%s6528_s29 + $0x32c] sm:$0xf] %v587_v11  ;;  %590 = vst [vmem:[%s6528_s29 + $0x330] sm:$0xf] %v589_v12 }
  0x9c   : > { %592 = vst [vmem:[%s6528_s29 + $0x334] sm:$0xf] %v591_v13  ;;  %v593_v14 = vld [vmem:[%s6524_s28 + $0x670] sm:$0xf]  ;;  %v595_v15 = vld [vmem:[%s6524_s28 + $0x678] sm:$0xf] }
  0x9d   : > { %v597_v16 = vld [vmem:[%s6524_s28 + $0x680] sm:$0xf]  ;;  %594 = vst [vmem:[%s6528_s29 + $0x338] sm:$0xf] %v593_v14  ;;  %596 = vst [vmem:[%s6528_s29 + $0x33c] sm:$0xf] %v595_v15 }
  0x9e   : > { %598 = vst [vmem:[%s6528_s29 + $0x340] sm:$0xf] %v597_v16  ;;  %v599_v17 = vld [vmem:[%s6524_s28 + $0x688] sm:$0xf]  ;;  %v601_v18 = vld [vmem:[%s6524_s28 + $0x690] sm:$0xf] }
  0x9f   : > { %v603_v19 = vld [vmem:[%s6524_s28 + $0x698] sm:$0xf]  ;;  %600 = vst [vmem:[%s6528_s29 + $0x344] sm:$0xf] %v599_v17  ;;  %602 = vst [vmem:[%s6528_s29 + $0x348] sm:$0xf] %v601_v18 }
  0xa0   : > { %604 = vst [vmem:[%s6528_s29 + $0x34c] sm:$0xf] %v603_v19  ;;  %v605_v20 = vld [vmem:[%s6524_s28 + $0x6a0] sm:$0xf]  ;;  %v607_v21 = vld [vmem:[%s6524_s28 + $0x6a8] sm:$0xf] }
  0xa1   : > { %v609_v22 = vld [vmem:[%s6524_s28 + $0x6b0] sm:$0xf]  ;;  %606 = vst [vmem:[%s6528_s29 + $0x350] sm:$0xf] %v605_v20  ;;  %608 = vst [vmem:[%s6528_s29 + $0x354] sm:$0xf] %v607_v21 }
  0xa2   : > { %610 = vst [vmem:[%s6528_s29 + $0x358] sm:$0xf] %v609_v22  ;;  %v611_v23 = vld [vmem:[%s6524_s28 + $0x6b8] sm:$0xf]  ;;  %v613_v24 = vld [vmem:[%s6524_s28 + $0x6c0] sm:$0xf] }
  0xa3   : > { %v615_v25 = vld [vmem:[%s6524_s28 + $0x6c8] sm:$0xf]  ;;  %612 = vst [vmem:[%s6528_s29 + $0x35c] sm:$0xf] %v611_v23  ;;  %614 = vst [vmem:[%s6528_s29 + $0x360] sm:$0xf] %v613_v24 }
  0xa4   : > { %616 = vst [vmem:[%s6528_s29 + $0x364] sm:$0xf] %v615_v25  ;;  %v617_v26 = vld [vmem:[%s6524_s28 + $0x6d0] sm:$0xf]  ;;  %v619_v27 = vld [vmem:[%s6524_s28 + $0x6d8] sm:$0xf] }
  0xa5   : > { %v621_v28 = vld [vmem:[%s6524_s28 + $0x6e0] sm:$0xf]  ;;  %618 = vst [vmem:[%s6528_s29 + $0x368] sm:$0xf] %v617_v26  ;;  %620 = vst [vmem:[%s6528_s29 + $0x36c] sm:$0xf] %v619_v27 }
  0xa6   : > { %622 = vst [vmem:[%s6528_s29 + $0x370] sm:$0xf] %v621_v28  ;;  %v623_v29 = vld [vmem:[%s6524_s28 + $0x6e8] sm:$0xf]  ;;  %v625_v30 = vld [vmem:[%s6524_s28 + $0x6f0] sm:$0xf] }
  0xa7   : > { %v627_v31 = vld [vmem:[%s6524_s28 + $0x6f8] sm:$0xf]  ;;  %624 = vst [vmem:[%s6528_s29 + $0x374] sm:$0xf] %v623_v29  ;;  %626 = vst [vmem:[%s6528_s29 + $0x378] sm:$0xf] %v625_v30 }
  0xa8   : > { %628 = vst [vmem:[%s6528_s29 + $0x37c] sm:$0xf] %v627_v31  ;;  %v629_v32 = vld [vmem:[%s6524_s28 + $0x700] sm:$0xf]  ;;  %v631_v33 = vld [vmem:[%s6524_s28 + $0x708] sm:$0xf] }
  0xa9   : > { %v633_v34 = vld [vmem:[%s6524_s28 + $0x710] sm:$0xf]  ;;  %630 = vst [vmem:[%s6528_s29 + $0x380] sm:$0xf] %v629_v32  ;;  %632 = vst [vmem:[%s6528_s29 + $0x384] sm:$0xf] %v631_v33 }
  0xaa   : > { %634 = vst [vmem:[%s6528_s29 + $0x388] sm:$0xf] %v633_v34  ;;  %v635_v35 = vld [vmem:[%s6524_s28 + $0x718] sm:$0xf]  ;;  %v637_v36 = vld [vmem:[%s6524_s28 + $0x720] sm:$0xf] }
  0xab   : > { %v639_v37 = vld [vmem:[%s6524_s28 + $0x728] sm:$0xf]  ;;  %636 = vst [vmem:[%s6528_s29 + $0x38c] sm:$0xf] %v635_v35  ;;  %638 = vst [vmem:[%s6528_s29 + $0x390] sm:$0xf] %v637_v36 }
  0xac   : > { %640 = vst [vmem:[%s6528_s29 + $0x394] sm:$0xf] %v639_v37  ;;  %v641_v38 = vld [vmem:[%s6524_s28 + $0x730] sm:$0xf]  ;;  %v643_v39 = vld [vmem:[%s6524_s28 + $0x738] sm:$0xf] }
  0xad   : > { %v645_v40 = vld [vmem:[%s6524_s28 + $0x740] sm:$0xf]  ;;  %642 = vst [vmem:[%s6528_s29 + $0x398] sm:$0xf] %v641_v38  ;;  %644 = vst [vmem:[%s6528_s29 + $0x39c] sm:$0xf] %v643_v39 }
  0xae   : > { %646 = vst [vmem:[%s6528_s29 + $0x3a0] sm:$0xf] %v645_v40  ;;  %v647_v41 = vld [vmem:[%s6524_s28 + $0x748] sm:$0xf]  ;;  %v649_v42 = vld [vmem:[%s6524_s28 + $0x750] sm:$0xf] }
  0xaf   : > { %v651_v43 = vld [vmem:[%s6524_s28 + $0x758] sm:$0xf]  ;;  %648 = vst [vmem:[%s6528_s29 + $0x3a4] sm:$0xf] %v647_v41  ;;  %650 = vst [vmem:[%s6528_s29 + $0x3a8] sm:$0xf] %v649_v42 }
  0xb0   : > { %652 = vst [vmem:[%s6528_s29 + $0x3ac] sm:$0xf] %v651_v43  ;;  %v653_v44 = vld [vmem:[%s6524_s28 + $0x760] sm:$0xf]  ;;  %v655_v45 = vld [vmem:[%s6524_s28 + $0x768] sm:$0xf] }
  0xb1   : > { %v657_v46 = vld [vmem:[%s6524_s28 + $0x770] sm:$0xf]  ;;  %654 = vst [vmem:[%s6528_s29 + $0x3b0] sm:$0xf] %v653_v44  ;;  %656 = vst [vmem:[%s6528_s29 + $0x3b4] sm:$0xf] %v655_v45 }
  0xb2   : > { %658 = vst [vmem:[%s6528_s29 + $0x3b8] sm:$0xf] %v657_v46  ;;  %v659_v47 = vld [vmem:[%s6524_s28 + $0x778] sm:$0xf]  ;;  %v661_v48 = vld [vmem:[%s6524_s28 + $0x780] sm:$0xf] }
  0xb3   : > { %v663_v49 = vld [vmem:[%s6524_s28 + $0x788] sm:$0xf]  ;;  %660 = vst [vmem:[%s6528_s29 + $0x3bc] sm:$0xf] %v659_v47  ;;  %662 = vst [vmem:[%s6528_s29 + $0x3c0] sm:$0xf] %v661_v48 }
  0xb4   : > { %664 = vst [vmem:[%s6528_s29 + $0x3c4] sm:$0xf] %v663_v49  ;;  %v665_v50 = vld [vmem:[%s6524_s28 + $0x790] sm:$0xf]  ;;  %v667_v51 = vld [vmem:[%s6524_s28 + $0x798] sm:$0xf] }
  0xb5   : > { %v669_v52 = vld [vmem:[%s6524_s28 + $0x7a0] sm:$0xf]  ;;  %666 = vst [vmem:[%s6528_s29 + $0x3c8] sm:$0xf] %v665_v50  ;;  %668 = vst [vmem:[%s6528_s29 + $0x3cc] sm:$0xf] %v667_v51 }
  0xb6   : > { %670 = vst [vmem:[%s6528_s29 + $0x3d0] sm:$0xf] %v669_v52  ;;  %v671_v53 = vld [vmem:[%s6524_s28 + $0x7a8] sm:$0xf]  ;;  %v673_v54 = vld [vmem:[%s6524_s28 + $0x7b0] sm:$0xf] }
  0xb7   : > { %v675_v55 = vld [vmem:[%s6524_s28 + $0x7b8] sm:$0xf]  ;;  %672 = vst [vmem:[%s6528_s29 + $0x3d4] sm:$0xf] %v671_v53  ;;  %674 = vst [vmem:[%s6528_s29 + $0x3d8] sm:$0xf] %v673_v54 }
  0xb8   : > { %676 = vst [vmem:[%s6528_s29 + $0x3dc] sm:$0xf] %v675_v55  ;;  %v677_v56 = vld [vmem:[%s6524_s28 + $0x7c0] sm:$0xf]  ;;  %v679_v57 = vld [vmem:[%s6524_s28 + $0x7c8] sm:$0xf] }
  0xb9   : > { %v681_v58 = vld [vmem:[%s6524_s28 + $0x7d0] sm:$0xf]  ;;  %678 = vst [vmem:[%s6528_s29 + $0x3e0] sm:$0xf] %v677_v56  ;;  %680 = vst [vmem:[%s6528_s29 + $0x3e4] sm:$0xf] %v679_v57 }
  0xba   : > { %682 = vst [vmem:[%s6528_s29 + $0x3e8] sm:$0xf] %v681_v58  ;;  %v683_v59 = vld [vmem:[%s6524_s28 + $0x7d8] sm:$0xf]  ;;  %v685_v60 = vld [vmem:[%s6524_s28 + $0x7e0] sm:$0xf] }
  0xbb   : > { %v687_v61 = vld [vmem:[%s6524_s28 + $0x7e8] sm:$0xf]  ;;  %684 = vst [vmem:[%s6528_s29 + $0x3ec] sm:$0xf] %v683_v59  ;;  %686 = vst [vmem:[%s6528_s29 + $0x3f0] sm:$0xf] %v685_v60 }
  0xbc   : > { %688 = vst [vmem:[%s6528_s29 + $0x3f4] sm:$0xf] %v687_v61  ;;  %v689_v62 = vld [vmem:[%s6524_s28 + $0x7f0] sm:$0xf]  ;;  %v691_v63 = vld [vmem:[%s6524_s28 + $0x7f8] sm:$0xf] }
  0xbd   : > { %690 = vst [vmem:[%s6528_s29 + $0x3f8] sm:$0xf] %v689_v62  ;;  %692 = vst [vmem:[%s6528_s29 + $0x3fc] sm:$0xf] %v691_v63 }
  0xbe PF: > { %p5016_p8 = scmp.ge.s32.totalorder %s6454_s16, 1  ;;  %p1233_p9 = scmp.lt.s32.totalorder %s6454_s16, 3 }
  0xc0   : > { %p1234_p10 = pnand %p5016_p8, %p1233_p9 }
  0xc1   : > { %s1240_s30 = sand.u32 (!%p1234_p10), 1, %s6438_s12   ;;  %p1278_p11 = scmp.lt.s32.totalorder (!%p1234_p10), %s6446_s14, 1 }
  0xc2   : > { %1237 = sbr.rel (%p1234_p10) target bundleno = 855 (0x357), region = 69  ;;  %s5017_s10 = sshll.u32 (!%p1234_p10), %s1240_s30, 10 }
  0xc3   : > { %s7069_s19 = scalar_lea.vmem (!%p1234_p10), [#allocation2], %s5017_s10  ;;  %s6231_s9 = smul.u32 (!%p1234_p10), 100, %s1240_s30 }
  0xc5   : > { %s8092_s10 = scalar_lea.vmem (!%p1234_p10), [#allocation3], %s6231_s9 }
  0xc7   : > { %v7046_v0 = vld [vmem:[%s8202_s0] sm:$0xff]  ;;  %v7056_v2 = vld [vmem:[%s8202_s0 + $0x8] sm:$0xff]  ;;  %v6272_v6 = vld [vmem:[%s7069_s19 + $0x78] sm:$0xff]   ;;  %s1279_s25 = scalar_select %p1278_p11, %s6446_s14, 1 }
  0xc8   : > { %v7051_v1 = vld [vmem:[%s8202_s0 + $0x40] sm:$0xff]  ;;  %v7065_v4 = vld [vmem:[%s8202_s0 + $0x48] sm:$0xff]  ;;  %v6273_v7 = vld [vmem:[%s7069_s19 + $0xf8] sm:$0xff]   ;;  %5479 = vmatprep.subr.bf16.mxu0 %v6272_v6  ;;  %s5380_s12 = sshll.u32 (%p6511_p6), %s6446_s14, 2 }
  0xc9   : > { %v5020_v3 = vcombine.high %v7046_v0, %v7051_v1  ;;  %v5022_v5 = vcombine.high %v7056_v2, %v7065_v4  ;;  %v6274_v8 = vld [vmem:[%s7069_s19 + $0x38] sm:$0xff]   ;;  %5573 = vmatprep.subr.bf16.mxu1 %v6273_v7  ;;  %v6276_v10 = vld [vmem:[%s7069_s19 + $0x70] sm:$0xff]   ;;  %v6280_v14 = vld [vmem:[%s7069_s19 + $0x68] sm:$0xff]   ;;  %v5019_v42 = vcombine.low %v7046_v0, %v7051_v1  ;;  %v5021_v43 = vcombine.low %v7056_v2, %v7065_v4  ;;  %s1280_s4 = scalar_lea.vmem %s8204_s2, %s1279_s25  ;;  %s8137_s18 = scalar_lea.vmem (%p6511_p6), %s8205_s3, %s5380_s12 }
  0xca   : > { %v6275_v9 = vld [vmem:[%s7069_s19 + $0xb8] sm:$0xff]   ;;  %5480 = vmatpush3.bf16.msra.mxu0 %v6274_v8  ;;  %v6277_v11 = vld [vmem:[%s7069_s19 + $0xf0] sm:$0xff]   ;;  %v6281_v15 = vld [vmem:[%s7069_s19 + $0xe8] sm:$0xff]  }
  0xcb   : > { %3562 = vmatprep.mubr.bf16.mxu0 %v5020_v3  ;;  %3698 = vmatprep.mubr.bf16.mxu1 %v5022_v5  ;;  %v6278_v12 = vld [vmem:[%s7069_s19 + $0x30] sm:$0xff]   ;;  %v6282_v16 = vld [vmem:[%s7069_s19 + $0x28] sm:$0xff]   ;;  %v6284_v18 = vld [vmem:[%s7069_s19 + $0x60] sm:$0xff]  }
  0xcc   : > { %5574 = vmatpush3.bf16.msra.mxu1 %v6275_v9  ;;  %5481 = vmatprep.subr.bf16.mxu0 %v6276_v10  ;;  %v6279_v13 = vld [vmem:[%s7069_s19 + $0xb0] sm:$0xff]   ;;  %v6283_v17 = vld [vmem:[%s7069_s19 + $0xa8] sm:$0xff]   ;;  %v6285_v19 = vld [vmem:[%s7069_s19 + $0xe0] sm:$0xff]  }
  0xcd   : > { %5575 = vmatprep.subr.bf16.mxu1 %v6277_v11  ;;  %v6286_v20 = vld [vmem:[%s7069_s19 + $0x20] sm:$0xff]   ;;  %v6288_v22 = vld [vmem:[%s7069_s19 + $0x58] sm:$0xff]   ;;  %v6292_v26 = vld [vmem:[%s7069_s19 + $0x50] sm:$0xff]  }
  0xce   : > { %5482 = vmatpush3.bf16.msra.mxu0 %v6278_v12  ;;  %v6287_v21 = vld [vmem:[%s7069_s19 + $0xa0] sm:$0xff]   ;;  %v6289_v23 = vld [vmem:[%s7069_s19 + $0xd8] sm:$0xff]   ;;  %v6293_v27 = vld [vmem:[%s7069_s19 + $0xd0] sm:$0xff]  }
  0xcf   : > { %5483 = vmatprep.subr.bf16.mxu0 %v6280_v14  ;;  %v6290_v24 = vld [vmem:[%s7069_s19 + $0x18] sm:$0xff]   ;;  %v6294_v28 = vld [vmem:[%s7069_s19 + $0x10] sm:$0xff]   ;;  %v6296_v30 = vld [vmem:[%s7069_s19 + $0x48] sm:$0xff]  }
  0xd0   : > { %5576 = vmatpush3.bf16.msra.mxu1 %v6279_v13  ;;  %v6291_v25 = vld [vmem:[%s7069_s19 + $0x98] sm:$0xff]   ;;  %v6295_v29 = vld [vmem:[%s7069_s19 + $0x90] sm:$0xff]   ;;  %v6297_v31 = vld [vmem:[%s7069_s19 + $0xc8] sm:$0xff]  }
  0xd1   : > { %5577 = vmatprep.subr.bf16.mxu1 %v6281_v15  ;;  %v6298_v32 = vld [vmem:[%s7069_s19 + $0x8] sm:$0xff]   ;;  %v6300_v34 = vld [vmem:[%s7069_s19 + $0x40] sm:$0xff]   ;;  %v6304_v44 = vld [vmem:[%s7069_s19 + $0x178] sm:$0xff]  }
  0xd2   : > { %5484 = vmatpush3.bf16.msra.mxu0 %v6282_v16  ;;  %v6299_v33 = vld [vmem:[%s7069_s19 + $0x88] sm:$0xff]   ;;  %v1299_v35 = vld [vmem:[%s8202_s0 + $0x80] sm:$0xff]  ;;  %v6305_v45 = vld [vmem:[%s7069_s19 + $0x138] sm:$0xff]  }
  0xd3   : > { %5485 = vmatprep.subr.bf16.mxu0 %v6284_v18  ;;  %v1307_v36 = vld [vmem:[%s8202_s0 + $0xc0] sm:$0xff]  ;;  %v1300_v38 = vld [vmem:[%s8202_s0 + $0x88] sm:$0xff]  ;;  %v6306_v47 = vld [vmem:[%s7069_s19 + $0x1f8] sm:$0xff]  }
  0xd4   : > { %5578 = vmatpush3.bf16.msra.mxu1 %v6283_v17  ;;  %v6301_v37 = vld [vmem:[%s7069_s19 + $0xc0] sm:$0xff]   ;;  %v1308_v39 = vld [vmem:[%s8202_s0 + $0xc8] sm:$0xff]  ;;  %v5036_v46 = vcombine.high %v1299_v35, %v1307_v36  ;;  %v6307_v49 = vld [vmem:[%s7069_s19 + $0x1b8] sm:$0xff]   ;;  %v5035_v56 = vcombine.low %v1299_v35, %v1307_v36 }
  0xd5   : > { %5579 = vmatprep.subr.bf16.mxu1 %v6285_v19  ;;  %v6302_v40 = vld [vmem:[%s7069_s19] sm:$0xff]   ;;  %v5038_v48 = vcombine.high %v1300_v38, %v1308_v39  ;;  %v6308_v51 = vld [vmem:[%s7069_s19 + $0x170] sm:$0xff]   ;;  %v1316_v54 = vld [vmem:[%s8202_s0 + $0x108] sm:$0xff]  ;;  %v5037_v58 = vcombine.low %v1300_v38, %v1308_v39 }
  0xd6   : > { %5486 = vmatpush3.bf16.msra.mxu0 %v6286_v20  ;;  %v6303_v41 = vld [vmem:[%s7069_s19 + $0x80] sm:$0xff]   ;;  %v6309_v52 = vld [vmem:[%s7069_s19 + $0x130] sm:$0xff]   ;;  %v1324_v55 = vld [vmem:[%s8202_s0 + $0x148] sm:$0xff] }
  0xd7   : > { %5487 = vmatprep.subr.bf16.mxu0 %v6288_v22  ;;  %v1315_v50 = vld [vmem:[%s8202_s0 + $0x100] sm:$0xff]  ;;  %v6310_v57 = vld [vmem:[%s7069_s19 + $0x1f0] sm:$0xff]   ;;  %v5054_v61 = vcombine.high %v1316_v54, %v1324_v55  ;;  %v6312_v0 = vld [vmem:[%s7069_s19 + $0x168] sm:$0xff]   ;;  %v5053_v7 = vcombine.low %v1316_v54, %v1324_v55 }
  0xd8   : > { %5580 = vmatpush3.bf16.msra.mxu1 %v6287_v21  ;;  %v1323_v53 = vld [vmem:[%s8202_s0 + $0x140] sm:$0xff]  ;;  %v6311_v60 = vld [vmem:[%s7069_s19 + $0x1b0] sm:$0xff]   ;;  %v6313_v1 = vld [vmem:[%s7069_s19 + $0x128] sm:$0xff]  }
  0xd9   : > { %5581 = vmatprep.subr.bf16.mxu1 %v6289_v23  ;;  %v5052_v59 = vcombine.high %v1315_v50, %v1323_v53  ;;  %v1331_v62 = vld [vmem:[%s8202_s0 + $0x180] sm:$0xff]  ;;  %v6314_v2 = vld [vmem:[%s7069_s19 + $0x1e8] sm:$0xff]   ;;  %v5051_v6 = vcombine.low %v1315_v50, %v1323_v53  ;;  %v6320_v19 = vld [vmem:[%s7069_s19 + $0x158] sm:$0xff]  }
  0xda   : > { %5488 = vmatpush3.bf16.msra.mxu0 %v6290_v24  ;;  %v1339_v63 = vld [vmem:[%s8202_s0 + $0x1c0] sm:$0xff]  ;;  %v1332_v3 = vld [vmem:[%s8202_s0 + $0x188] sm:$0xff]  ;;  %v6321_v22 = vld [vmem:[%s7069_s19 + $0x118] sm:$0xff]  }
  0xdb   : > { %5489 = vmatprep.subr.bf16.mxu0 %v6292_v26  ;;  %v1340_v4 = vld [vmem:[%s8202_s0 + $0x1c8] sm:$0xff]  ;;  %v5068_v8 = vcombine.high %v1331_v62, %v1339_v63  ;;  %v6316_v10 = vld [vmem:[%s7069_s19 + $0x160] sm:$0xff]   ;;  %v5067_v18 = vcombine.low %v1331_v62, %v1339_v63  ;;  %v6322_v24 = vld [vmem:[%s7069_s19 + $0x1d8] sm:$0xff]  }
  0xdc   : > { %5582 = vmatpush3.bf16.msra.mxu1 %v6291_v25  ;;  %v6315_v5 = vld [vmem:[%s7069_s19 + $0x1a8] sm:$0xff]   ;;  %v5070_v9 = vcombine.high %v1332_v3, %v1340_v4  ;;  %v6317_v11 = vld [vmem:[%s7069_s19 + $0x120] sm:$0xff]   ;;  %v5069_v20 = vcombine.low %v1332_v3, %v1340_v4  ;;  %v6323_v26 = vld [vmem:[%s7069_s19 + $0x198] sm:$0xff]  }
  0xdd   : > { %5583 = vmatprep.subr.bf16.mxu1 %v6293_v27  ;;  %v6318_v12 = vld [vmem:[%s7069_s19 + $0x1e0] sm:$0xff]   ;;  %v1348_v16 = vld [vmem:[%s8202_s0 + $0x208] sm:$0xff]  ;;  %v6327_v36 = vld [vmem:[%s7069_s19 + $0x190] sm:$0xff]  }
  0xde   : > { %5490 = vmatpush3.bf16.msra.mxu0 %v6294_v28  ;;  %v6319_v13 = vld [vmem:[%s7069_s19 + $0x1a0] sm:$0xff]   ;;  %v1356_v17 = vld [vmem:[%s8202_s0 + $0x248] sm:$0xff]  ;;  %v6342_v63 = vld [vmem:[%s7069_s19 + $0x2f8] sm:$0xff]  }
  0xdf   : > { %5491 = vmatprep.subr.bf16.mxu0 %v6296_v30  ;;  %v1347_v14 = vld [vmem:[%s8202_s0 + $0x200] sm:$0xff]  ;;  %v5086_v23 = vcombine.high %v1348_v16, %v1356_v17  ;;  %v1364_v28 = vld [vmem:[%s8202_s0 + $0x288] sm:$0xff]  ;;  %v6324_v30 = vld [vmem:[%s7069_s19 + $0x150] sm:$0xff]  }
  0xe0   : > { %5584 = vmatpush3.bf16.msra.mxu1 %v6295_v29  ;;  %v1355_v15 = vld [vmem:[%s8202_s0 + $0x240] sm:$0xff]  ;;  %v1372_v29 = vld [vmem:[%s8202_s0 + $0x2c8] sm:$0xff] }
  0xe1   : > { %5585 = vmatprep.subr.bf16.mxu1 %v6297_v31  ;;  %v5084_v21 = vcombine.high %v1347_v14, %v1355_v15  ;;  %v1363_v25 = vld [vmem:[%s8202_s0 + $0x280] sm:$0xff]  ;;  %v6325_v31 = vld [vmem:[%s7069_s19 + $0x110] sm:$0xff]   ;;  %v1420_v3 = vld [vmem:[%s8202_s0 + $0x448] sm:$0xff] }
  0xe2   : > { %5492 = vmatpush3.bf16.msra.mxu0 %v6298_v32  ;;  %v1371_v27 = vld [vmem:[%s8202_s0 + $0x2c0] sm:$0xff]  ;;  %v5083_v32 = vcombine.low %v1347_v14, %v1355_v15 }
  0xe3   : > { %5493 = vmatprep.subr.bf16.mxu0 %v6300_v34  ;;  %v5085_v34 = vcombine.low %v1348_v16, %v1356_v17  ;;  %v5100_v35 = vcombine.high %v1363_v25, %v1371_v27  ;;  %v1379_v38 = vld [vmem:[%s8202_s0 + $0x300] sm:$0xff] }
  0xe4   : > { %5586 = vmatpush3.bf16.msra.mxu1 %v6299_v33  ;;  %v6326_v33 = vld [vmem:[%s7069_s19 + $0x1d0] sm:$0xff]   ;;  %v1387_v39 = vld [vmem:[%s8202_s0 + $0x340] sm:$0xff] }
  0xe5   : > { %5587 = vmatprep.subr.bf16.mxu1 %v6301_v37  ;;  %v5102_v37 = vcombine.high %v1364_v28, %v1372_v29  ;;  %v6332_v50 = vld [vmem:[%s7069_s19 + $0x140] sm:$0xff]  }
  0xe6   : > { %5494 = vmatpush3.bf16.msra.mxu0 %v6302_v40  ;;  %v6328_v40 = vld [vmem:[%s7069_s19 + $0x148] sm:$0xff]   ;;  %v6335_v53 = vld [vmem:[%s7069_s19 + $0x180] sm:$0xff]  }
  0xe7   : > { %5667 = vmatprep.subr.bf16.mxu0 %v6304_v44  ;;  %v6330_v44 = vld [vmem:[%s7069_s19 + $0x1c8] sm:$0xff]   ;;  %v1395_v54 = vld [vmem:[%s8202_s0 + $0x380] sm:$0xff] }
  0xe8   : > { %5588 = vmatpush3.bf16.msra.mxu1 %v6303_v41  ;;  %v1380_v41 = vld [vmem:[%s8202_s0 + $0x308] sm:$0xff]  ;;  %v1403_v55 = vld [vmem:[%s8202_s0 + $0x3c0] sm:$0xff] }
  0xe9   : > { %3563 = vmatmul.mubr.bf16.vlgmr.msra.gmra.mxu0 %v5019_v42  ;;  %5761 = vmatprep.subr.bf16.mxu1 %v6306_v47  ;;  %v1388_v42 = vld [vmem:[%s8202_s0 + $0x348] sm:$0xff]  ;;  %v5101_v47 = vcombine.low %v1364_v28, %v1372_v29  ;;  %v5131_v4 = vcombine.low %v1395_v54, %v1403_v55  ;;  %v1443_v16 = vld [vmem:[%s8202_s0 + $0x500] sm:$0xff] }
  0xea   : > { %5668 = vmatpush3.bf16.msra.mxu0 %v6305_v45  ;;  %3570 = vmatprep.mubr.bf16.mxu0 %v5036_v46  ;;  %v5099_v45 = vcombine.low %v1363_v25, %v1371_v27  ;;  %v6331_v46 = vld [vmem:[%s7069_s19 + $0x188] sm:$0xff]   ;;  %v1451_v17 = vld [vmem:[%s8202_s0 + $0x540] sm:$0xff] }
  0xeb   : > { %3699 = vmatmul.mubr.bf16.vlgmr.msra.gmra.mxu1 %v5021_v43  ;;  %5669 = vmatprep.subr.bf16.mxu0 %v6308_v51  ;;  %v6329_v43 = vld [vmem:[%s7069_s19 + $0x108] sm:$0xff]   ;;  %v6333_v51 = vld [vmem:[%s7069_s19 + $0x100] sm:$0xff]   ;;  %v5179_v28 = vcombine.low %v1443_v16, %v1451_v17 }
  0xec   : > { %5762 = vmatpush3.bf16.msra.mxu1 %v6307_v49  ;;  %3706 = vmatprep.mubr.bf16.mxu1 %v5038_v48  ;;  %v5116_v48 = vcombine.high %v1379_v38, %v1387_v39  ;;  %v5118_v49 = vcombine.high %v1380_v41, %v1388_v42  ;;  %v1467_v25 = vld [vmem:[%s8202_s0 + $0x5c0] sm:$0xff]  ;;  %v1468_v27 = vld [vmem:[%s8202_s0 + $0x5c8] sm:$0xff] }
  0xed   : > { %5763 = vmatprep.subr.bf16.mxu1 %v6310_v57  ;;  %v1404_v57 = vld [vmem:[%s8202_s0 + $0x3c8] sm:$0xff] }
  0xee   : > { %5670 = vmatpush3.bf16.msra.mxu0 %v6309_v52  ;;  %v6334_v52 = vld [vmem:[%s7069_s19 + $0x1c0] sm:$0xff]  }
  0xef   : > { %5671 = vmatprep.subr.bf16.mxu0 %v6312_v0  ;;  %v1411_v0 = vld [vmem:[%s8202_s0 + $0x400] sm:$0xff] }
  0xf0   : > { %5764 = vmatpush3.bf16.msra.mxu1 %v6311_v60  ;;  %v5117_v60 = vcombine.low %v1380_v41, %v1388_v42  ;;  %v1294_v41 = vld [vmem:[%s8202_s0 + $0x58] sm:$0xff] }
  0xf1   : > { %3571 = vmatmul.mubr.bf16.gmra.mxu0 %v5035_v56  ;;  %5765 = vmatprep.subr.bf16.mxu1 %v6314_v2  ;;  %v1396_v56 = vld [vmem:[%s8202_s0 + $0x388] sm:$0xff] }
  0xf2   : > { %3578 = vmatprep.mubr.bf16.mxu0 %v5052_v59  ;;  %5672 = vmatpush3.bf16.msra.mxu0 %v6313_v1  ;;  %v6340_v59 = vld [vmem:[%s7069_s19 + $0x278] sm:$0xff]   ;;  %v5134_v62 = vcombine.high %v1396_v56, %v1404_v57  ;;  %v1419_v1 = vld [vmem:[%s8202_s0 + $0x440] sm:$0xff]  ;;  %v1412_v2 = vld [vmem:[%s8202_s0 + $0x408] sm:$0xff] }
  0xf3   : > { %3707 = vmatmul.mubr.bf16.gmra.mxu1 %v5037_v58  ;;  %5673 = vmatprep.subr.bf16.mxu0 %v6316_v10  ;;  %v5115_v58 = vcombine.low %v1379_v38, %v1387_v39  ;;  %v1428_v10 = vld [vmem:[%s8202_s0 + $0x488] sm:$0xff]  ;;  %v1285_v38 = vld [vmem:[%s8202_s0 + $0x10] sm:$0xff] }
  0xf4   : > { %3714 = vmatprep.mubr.bf16.mxu1 %v5054_v61  ;;  %5766 = vmatpush3.bf16.msra.mxu1 %v6315_v5  ;;  %v5132_v61 = vcombine.high %v1395_v54, %v1403_v55  ;;  %v5133_v5 = vcombine.low %v1396_v56, %v1404_v57  ;;  %v1293_v39 = vld [vmem:[%s8202_s0 + $0x50] sm:$0xff] }
  0xf5   : > { %5767 = vmatprep.subr.bf16.mxu1 %v6318_v12  ;;  %v5147_v12 = vcombine.low %v1411_v0, %v1419_v1  ;;  %v6344_v56 = vld [vmem:[%s7069_s19 + $0x270] sm:$0xff]  }
  0xf6   : > { %5674 = vmatpush3.bf16.msra.mxu0 %v6317_v11  ;;  %v1436_v11 = vld [vmem:[%s8202_s0 + $0x4c8] sm:$0xff]  ;;  %v6345_v57 = vld [vmem:[%s7069_s19 + $0x230] sm:$0xff]  }
  0xf7   : > { %5675 = vmatprep.subr.bf16.mxu0 %v6320_v19  ;;  %v5166_v15 = vcombine.high %v1428_v10, %v1436_v11  ;;  %v1452_v19 = vld [vmem:[%s8202_s0 + $0x548] sm:$0xff] }
  0xf8   : > { %5768 = vmatpush3.bf16.msra.mxu1 %v6319_v13  ;;  %v5149_v13 = vcombine.low %v1412_v2, %v1420_v3 }
  0xf9   : > { %3579 = vmatmul.mubr.bf16.gmra.mxu0 %v5051_v6  ;;  %5769 = vmatprep.subr.bf16.mxu1 %v6322_v24  ;;  %v5148_v6 = vcombine.high %v1411_v0, %v1419_v1  ;;  %v1459_v24 = vld [vmem:[%s8202_s0 + $0x580] sm:$0xff]  ;;  %v1326_v0 = vld [vmem:[%s8202_s0 + $0x158] sm:$0xff]  ;;  %v6350_v1 = vld [vmem:[%s7069_s19 + $0x2e8] sm:$0xff]  }
  0xfa   : > { %3586 = vmatprep.mubr.bf16.mxu0 %v5068_v8  ;;  %5676 = vmatpush3.bf16.msra.mxu0 %v6321_v22  ;;  %v1427_v8 = vld [vmem:[%s8202_s0 + $0x480] sm:$0xff]  ;;  %v5180_v22 = vcombine.high %v1443_v16, %v1451_v17  ;;  %v6356_v16 = vld [vmem:[%s7069_s19 + $0x258] sm:$0xff]  }
  0xfb   : > { %3715 = vmatmul.mubr.bf16.gmra.mxu1 %v5053_v7  ;;  %5677 = vmatprep.subr.bf16.mxu0 %v6324_v30  ;;  %v5150_v7 = vcombine.high %v1412_v2, %v1420_v3  ;;  %v5196_v30 = vcombine.high %v1459_v24, %v1467_v25  ;;  %v6358_v17 = vld [vmem:[%s7069_s19 + $0x2d8] sm:$0xff]  }
  0xfc   : > { %3722 = vmatprep.mubr.bf16.mxu1 %v5070_v9  ;;  %5770 = vmatpush3.bf16.msra.mxu1 %v6323_v26  ;;  %v1435_v9 = vld [vmem:[%s8202_s0 + $0x4c0] sm:$0xff]  ;;  %v1460_v26 = vld [vmem:[%s8202_s0 + $0x588] sm:$0xff] }
  0xfd   : > { %5771 = vmatprep.subr.bf16.mxu1 %v6326_v33  ;;  %v5164_v14 = vcombine.high %v1427_v8, %v1435_v9  ;;  %v1476_v33 = vld [vmem:[%s8202_s0 + $0x608] sm:$0xff] }
  0xfe   : > { %5678 = vmatpush3.bf16.msra.mxu0 %v6325_v31  ;;  %v5198_v31 = vcombine.high %v1460_v26, %v1468_v27 }
  0xff   : > { %5679 = vmatprep.subr.bf16.mxu0 %v6328_v40  ;;  %v1286_v40 = vld [vmem:[%s8202_s0 + $0x18] sm:$0xff] }
 0x100   : > { %5772 = vmatpush3.bf16.msra.mxu1 %v6327_v36 }
 0x101   : > { %3587 = vmatmul.mubr.bf16.gmra.mxu0 %v5067_v18  ;;  %5773 = vmatprep.subr.bf16.mxu1 %v6330_v44  ;;  %v1444_v18 = vld [vmem:[%s8202_s0 + $0x508] sm:$0xff]  ;;  %v5024_v44 = vcombine.high %v1285_v38, %v1293_v39 }
 0x102   : > { %3594 = vmatprep.mubr.bf16.mxu0 %v5084_v21  ;;  %5680 = vmatpush3.bf16.msra.mxu0 %v6329_v43  ;;  %v5165_v21 = vcombine.low %v1428_v10, %v1436_v11  ;;  %v5181_v29 = vcombine.low %v1444_v18, %v1452_v19  ;;  %v5213_v43 = vcombine.low %v1476_v33, %v1476_v33  ;;  %v1341_v10 = vld [vmem:[%s8202_s0 + $0x1d0] sm:$0xff]  ;;  %v6353_v11 = vld [vmem:[%s7069_s19 + $0x220] sm:$0xff]  }
 0x103   : > { %3723 = vmatmul.mubr.bf16.gmra.mxu1 %v5069_v20  ;;  %5681 = vmatprep.subr.bf16.mxu0 %v6332_v50  ;;  %v5163_v20 = vcombine.low %v1427_v8, %v1435_v9  ;;  %v1310_v50 = vld [vmem:[%s8202_s0 + $0xd8] sm:$0xff]  ;;  %v6352_v8 = vld [vmem:[%s7069_s19 + $0x260] sm:$0xff]   ;;  %v1333_v9 = vld [vmem:[%s8202_s0 + $0x190] sm:$0xff] }
 0x104   : > { %3730 = vmatprep.mubr.bf16.mxu1 %v5086_v23  ;;  %5774 = vmatpush3.bf16.msra.mxu1 %v6331_v46  ;;  %v5182_v23 = vcombine.high %v1444_v18, %v1452_v19  ;;  %v1301_v46 = vld [vmem:[%s8202_s0 + $0x90] sm:$0xff] }
 0x105   : > { %5775 = vmatprep.subr.bf16.mxu1 %v6334_v52  ;;  %v6341_v52 = vld [vmem:[%s7069_s19 + $0x238] sm:$0xff]  }
 0x106   : > { %5682 = vmatpush3.bf16.msra.mxu0 %v6333_v51  ;;  %v5025_v51 = vcombine.low %v1286_v40, %v1294_v41 }
 0x107   : > { %5855 = vmatprep.subr.bf16.mxu0 %v6340_v59  ;;  %v1325_v59 = vld [vmem:[%s8202_s0 + $0x150] sm:$0xff] }
 0x108   : > { %5776 = vmatpush3.bf16.msra.mxu1 %v6335_v53  ;;  %v6343_v53 = vld [vmem:[%s7069_s19 + $0x2b8] sm:$0xff]  }
 0x109   : > { %3595 = vmatmul.mubr.bf16.gmra.mxu0 %v5083_v32  ;;  %5949 = vmatprep.subr.bf16.mxu1 %v6342_v63  ;;  %v1475_v32 = vld [vmem:[%s8202_s0 + $0x600] sm:$0xff]  ;;  %v1318_v63 = vld [vmem:[%s8202_s0 + $0x118] sm:$0xff] }
 0x10a   : > { %3602 = vmatprep.mubr.bf16.mxu0 %v5100_v35  ;;  %v5197_v35 = vcombine.low %v1460_v26, %v1468_v27  ;;  %v5212_v36 = vcombine.high %v1475_v32, %v1475_v32  ;;  %v5211_v42 = vcombine.low %v1475_v32, %v1475_v32  ;;  %v5057_v19 = vcombine.low %v1318_v63, %v1326_v0  ;;  %v1349_v26 = vld [vmem:[%s8202_s0 + $0x210] sm:$0xff]  ;;  %v6364_v32 = vld [vmem:[%s7069_s19 + $0x248] sm:$0xff]  }
 0x10b   : > { %3731 = vmatmul.mubr.bf16.gmra.mxu1 %v5085_v34  ;;  %v5195_v34 = vcombine.low %v1459_v24, %v1467_v25  ;;  %v6362_v25 = vld [vmem:[%s7069_s19 + $0x2d0] sm:$0xff]  }
 0x10c   : > { %3738 = vmatprep.mubr.bf16.mxu1 %v5102_v37  ;;  %v5214_v37 = vcombine.high %v1476_v33, %v1476_v33  ;;  %v1357_v27 = vld [vmem:[%s8202_s0 + $0x250] sm:$0xff]  ;;  %v6366_v33 = vld [vmem:[%s7069_s19 + $0x2c8] sm:$0xff]  }
 0x111   : > { %3603 = vmatmul.mubr.bf16.gmra.mxu0 %v5099_v45  ;;  %v5026_v45 = vcombine.high %v1286_v40, %v1294_v41  ;;  %v6368_v40 = vld [vmem:[%s7069_s19 + $0x240] sm:$0xff]  }
 0x112   : > { %3610 = vmatprep.mubr.bf16.mxu0 %v5116_v48  ;;  %v5023_v48 = vcombine.low %v1285_v38, %v1293_v39  ;;  %v6365_v38 = vld [vmem:[%s7069_s19 + $0x208] sm:$0xff]   ;;  %v6370_v41 = vld [vmem:[%s7069_s19 + $0x2c0] sm:$0xff]  }
 0x113   : > { %3739 = vmatmul.mubr.bf16.gmra.mxu1 %v5101_v47  ;;  %v1309_v47 = vld [vmem:[%s8202_s0 + $0xd0] sm:$0xff]  ;;  %v6367_v39 = vld [vmem:[%s7069_s19 + $0x288] sm:$0xff]  }
 0x114   : > { %3746 = vmatprep.mubr.bf16.mxu1 %v5118_v49  ;;  %v1302_v49 = vld [vmem:[%s8202_s0 + $0x98] sm:$0xff]  ;;  %v5040_v54 = vcombine.high %v1301_v46, %v1309_v47  ;;  %v5039_v2 = vcombine.low %v1301_v46, %v1309_v47  ;;  %v6371_v47 = vld [vmem:[%s7069_s19 + $0x280] sm:$0xff]  }
 0x115   : > { %v5042_v55 = vcombine.high %v1302_v49, %v1310_v50  ;;  %v5041_v3 = vcombine.low %v1302_v49, %v1310_v50  ;;  %v1374_v46 = vld [vmem:[%s8202_s0 + $0x2d8] sm:$0xff]  ;;  %v5087_v49 = vcombine.low %v1349_v26, %v1357_v27 }
 0x116   : > { %v6378_v50 = vld [vmem:[%s7069_s19 + $0x3f8] sm:$0xff]  }
 0x119   : > { %3611 = vmatmul.mubr.bf16.gmra.mxu0 %v5115_v58  ;;  %v1317_v58 = vld [vmem:[%s8202_s0 + $0x110] sm:$0xff] }
 0x11a   : > { %3618 = vmatprep.mubr.bf16.mxu0 %v5132_v61  ;;  %v6347_v61 = vld [vmem:[%s7069_s19 + $0x2b0] sm:$0xff]   ;;  %v5055_v18 = vcombine.low %v1317_v58, %v1325_v59 }
 0x11b   : > { %3747 = vmatmul.mubr.bf16.gmra.mxu1 %v5117_v60  ;;  %v6346_v60 = vld [vmem:[%s7069_s19 + $0x2f0] sm:$0xff]  }
 0x11c   : > { %3754 = vmatprep.mubr.bf16.mxu1 %v5134_v62  ;;  %v6348_v62 = vld [vmem:[%s7069_s19 + $0x268] sm:$0xff]  }
 0x121   : > { %3619 = vmatmul.mubr.bf16.gmra.mxu0 %v5131_v4  ;;  %v5056_v4 = vcombine.high %v1317_v58, %v1325_v59 }
 0x122   : > { %3626 = vmatprep.mubr.bf16.mxu0 %v5148_v6  ;;  %v6349_v6 = vld [vmem:[%s7069_s19 + $0x228] sm:$0xff]  }
 0x123   : > { %3755 = vmatmul.mubr.bf16.gmra.mxu1 %v5133_v5  ;;  %v5058_v5 = vcombine.high %v1318_v63, %v1326_v0  ;;  %v1405_v63 = vld [vmem:[%s8202_s0 + $0x3d0] sm:$0xff]  ;;  %v1398_v0 = vld [vmem:[%s8202_s0 + $0x398] sm:$0xff] }
 0x124   : > { %3762 = vmatprep.mubr.bf16.mxu1 %v5150_v7  ;;  %v6351_v7 = vld [vmem:[%s7069_s19 + $0x2a8] sm:$0xff]  }
 0x129   : > { %3627 = vmatmul.mubr.bf16.gmra.mxu0 %v5147_v12  ;;  %v6354_v12 = vld [vmem:[%s7069_s19 + $0x2e0] sm:$0xff]  }
 0x12a   : > { %3634 = vmatprep.mubr.bf16.mxu0 %v5164_v14  ;;  %v1342_v14 = vld [vmem:[%s8202_s0 + $0x1d8] sm:$0xff] }
 0x12b   : > { %3763 = vmatmul.mubr.bf16.gmra.mxu1 %v5149_v13  ;;  %v1334_v13 = vld [vmem:[%s8202_s0 + $0x198] sm:$0xff] }
 0x12c   : > { %3770 = vmatprep.mubr.bf16.mxu1 %v5166_v15  ;;  %v6355_v15 = vld [vmem:[%s7069_s19 + $0x2a0] sm:$0xff]   ;;  %v5074_v24 = vcombine.high %v1334_v13, %v1342_v14 }
 0x131   : > { %3635 = vmatmul.mubr.bf16.gmra.mxu0 %v5163_v20  ;;  %v5072_v20 = vcombine.high %v1333_v9, %v1341_v10 }
 0x132   : > { %3642 = vmatprep.mubr.bf16.mxu0 %v5180_v22  ;;  %v6359_v22 = vld [vmem:[%s7069_s19 + $0x298] sm:$0xff]  }
 0x133   : > { %3771 = vmatmul.mubr.bf16.gmra.mxu1 %v5165_v21  ;;  %v6357_v21 = vld [vmem:[%s7069_s19 + $0x218] sm:$0xff]  }
 0x134   : > { %3778 = vmatprep.mubr.bf16.mxu1 %v5182_v23  ;;  %v6360_v23 = vld [vmem:[%s7069_s19 + $0x250] sm:$0xff]  }
 0x139   : > { %3643 = vmatmul.mubr.bf16.gmra.mxu0 %v5179_v28  ;;  %v6361_v28 = vld [vmem:[%s7069_s19 + $0x210] sm:$0xff]  }
 0x13a   : > { %3650 = vmatprep.mubr.bf16.mxu0 %v5196_v30  ;;  %v1358_v30 = vld [vmem:[%s8202_s0 + $0x258] sm:$0xff] }
 0x13b   : > { %3779 = vmatmul.mubr.bf16.gmra.mxu1 %v5181_v29  ;;  %v1350_v29 = vld [vmem:[%s8202_s0 + $0x218] sm:$0xff] }
 0x13c   : > { %3786 = vmatprep.mubr.bf16.mxu1 %v5198_v31  ;;  %v6363_v31 = vld [vmem:[%s7069_s19 + $0x290] sm:$0xff]  }
 0x141   : > { %3651 = vmatmul.mubr.bf16.gmra.mxu0 %v5195_v34  ;;  %v5071_v34 = vcombine.low %v1333_v9, %v1341_v10  ;;  %v1422_v9 = vld [vmem:[%s8202_s0 + $0x458] sm:$0xff] }
 0x142   : > { %3658 = vmatprep.mubr.bf16.mxu0 %v5212_v36  ;;  %v5088_v36 = vcombine.high %v1349_v26, %v1357_v27 }
 0x143   : > { %3787 = vmatmul.mubr.bf16.gmra.mxu1 %v5197_v35  ;;  %v5073_v35 = vcombine.low %v1334_v13, %v1342_v14  ;;  %v1429_v14 = vld [vmem:[%s8202_s0 + $0x490] sm:$0xff] }
 0x144   : > { %3794 = vmatprep.mubr.bf16.mxu1 %v5214_v37  ;;  %v5090_v37 = vcombine.high %v1350_v29, %v1358_v30 }
 0x149   : > { %3659 = vmatmul.mubr.bf16.gmra.mxu0 %v5211_v42  ;;  %v1365_v42 = vld [vmem:[%s8202_s0 + $0x290] sm:$0xff] }
 0x14a   : > { %3834 = vmatprep.mubr.bf16.mxu0 %v5024_v44  ;;  %v1366_v44 = vld [vmem:[%s8202_s0 + $0x298] sm:$0xff] }
 0x14b   : > { %3795 = vmatmul.mubr.bf16.gmra.mxu1 %v5213_v43  ;;  %v1373_v43 = vld [vmem:[%s8202_s0 + $0x2d0] sm:$0xff]  ;;  %v5105_v59 = vcombine.low %v1366_v44, %v1374_v46 }
 0x14c   : > { %3970 = vmatprep.mubr.bf16.mxu1 %v5026_v45  ;;  %v6369_v45 = vld [vmem:[%s7069_s19 + $0x200] sm:$0xff]   ;;  %v5103_v58 = vcombine.low %v1365_v42, %v1373_v43 }
 0x151   : > { %3835 = vmatmul.mubr.bf16.vlgmr.msra.gmra.mxu0 %v5023_v48  ;;  %v6376_v48 = vld [vmem:[%s7069_s19 + $0x378] sm:$0xff]  }
 0x152   : > { %5856 = vmatpush3.bf16.msra.mxu0 %v6341_v52  ;;  %3842 = vmatprep.mubr.bf16.mxu0 %v5040_v54  ;;  %v5104_v52 = vcombine.high %v1365_v42, %v1373_v43  ;;  %v1381_v54 = vld [vmem:[%s8202_s0 + $0x310] sm:$0xff] }
 0x153   : > { %3971 = vmatmul.mubr.bf16.vlgmr.msra.gmra.mxu1 %v5025_v51  ;;  %5857 = vmatprep.subr.bf16.mxu0 %v6344_v56  ;;  %v5089_v51 = vcombine.low %v1350_v29, %v1358_v30  ;;  %v1382_v56 = vld [vmem:[%s8202_s0 + $0x318] sm:$0xff]  ;;  %v1461_v30 = vld [vmem:[%s8202_s0 + $0x590] sm:$0xff] }
 0x154   : > { %5950 = vmatpush3.bf16.msra.mxu1 %v6343_v53  ;;  %3978 = vmatprep.mubr.bf16.mxu1 %v5042_v55  ;;  %v5106_v53 = vcombine.high %v1366_v44, %v1374_v46  ;;  %v1389_v55 = vld [vmem:[%s8202_s0 + $0x350] sm:$0xff]  ;;  %v7466_v46 = vld [vmem:[%s1280_s4] ss:$0 sm:$0xff] }
 0x155   : > { %5951 = vmatprep.subr.bf16.mxu1 %v6346_v60  ;;  %v5120_v60 = vcombine.high %v1381_v54, %v1389_v55 }
 0x156   : > { %5858 = vmatpush3.bf16.msra.mxu0 %v6345_v57  ;;  %v1390_v57 = vld [vmem:[%s8202_s0 + $0x358] sm:$0xff] }
 0x157   : > { %5859 = vmatprep.subr.bf16.mxu0 %v6348_v62  ;;  %v1397_v62 = vld [vmem:[%s8202_s0 + $0x390] sm:$0xff] }
 0x158   : > { %5952 = vmatpush3.bf16.msra.mxu1 %v6347_v61  ;;  %v5122_v61 = vcombine.high %v1382_v56, %v1390_v57  ;;  %v5135_v10 = vcombine.low %v1397_v62, %v1405_v63 }
 0x159   : > { %5953 = vmatprep.subr.bf16.mxu1 %v6350_v1  ;;  %3843 = vmatmul.mubr.bf16.gmra.mxu0 %v5039_v2  ;;  %v1406_v1 = vld [vmem:[%s8202_s0 + $0x3d8] sm:$0xff]  ;;  %v5119_v2 = vcombine.low %v1381_v54, %v1389_v55 }
 0x15a   : > { %3850 = vmatprep.mubr.bf16.mxu0 %v5056_v4  ;;  %5860 = vmatpush3.bf16.msra.mxu0 %v6349_v6  ;;  %v5136_v4 = vcombine.high %v1397_v62, %v1405_v63  ;;  %v1413_v6 = vld [vmem:[%s8202_s0 + $0x410] sm:$0xff] }
 0x15b   : > { %3979 = vmatmul.mubr.bf16.gmra.mxu1 %v5041_v3  ;;  %5861 = vmatprep.subr.bf16.mxu0 %v6352_v8  ;;  %v5121_v3 = vcombine.low %v1382_v56, %v1390_v57  ;;  %v1414_v8 = vld [vmem:[%s8202_s0 + $0x418] sm:$0xff] }
 0x15c   : > { %3986 = vmatprep.mubr.bf16.mxu1 %v5058_v5  ;;  %5954 = vmatpush3.bf16.msra.mxu1 %v6351_v7  ;;  %v5138_v5 = vcombine.high %v1398_v0, %v1406_v1  ;;  %v1421_v7 = vld [vmem:[%s8202_s0 + $0x450] sm:$0xff]  ;;  %v5154_v13 = vcombine.high %v1414_v8, %v1422_v9 }
 0x15d   : > { %5955 = vmatprep.subr.bf16.mxu1 %v6354_v12  ;;  %v5152_v12 = vcombine.high %v1413_v6, %v1421_v7 }
 0x15e   : > { %5862 = vmatpush3.bf16.msra.mxu0 %v6353_v11  ;;  %v5137_v11 = vcombine.low %v1398_v0, %v1406_v1 }
 0x15f   : > { %5863 = vmatprep.subr.bf16.mxu0 %v6356_v16  ;;  %v1430_v16 = vld [vmem:[%s8202_s0 + $0x498] sm:$0xff] }
 0x160   : > { %5956 = vmatpush3.bf16.msra.mxu1 %v6355_v15  ;;  %v1437_v15 = vld [vmem:[%s8202_s0 + $0x4d0] sm:$0xff] }
 0x161   : > { %3851 = vmatmul.mubr.bf16.gmra.mxu0 %v5055_v18  ;;  %5957 = vmatprep.subr.bf16.mxu1 %v6358_v17  ;;  %v1438_v17 = vld [vmem:[%s8202_s0 + $0x4d8] sm:$0xff]  ;;  %v5151_v18 = vcombine.low %v1413_v6, %v1421_v7  ;;  %v5167_v26 = vcombine.low %v1429_v14, %v1437_v15 }
 0x162   : > { %3858 = vmatprep.mubr.bf16.mxu0 %v5072_v20  ;;  %5864 = vmatpush3.bf16.msra.mxu0 %v6357_v21  ;;  %v5168_v20 = vcombine.high %v1429_v14, %v1437_v15  ;;  %v5170_v21 = vcombine.high %v1430_v16, %v1438_v17  ;;  %v5169_v27 = vcombine.low %v1430_v16, %v1438_v17  ;;  %v7499_v15 = vld [vmem:[%s8202_s0 + $0xa8] sm:$0xff] }
 0x163   : > { %3987 = vmatmul.mubr.bf16.gmra.mxu1 %v5057_v19  ;;  %5865 = vmatprep.subr.bf16.mxu0 %v6360_v23  ;;  %v5153_v19 = vcombine.low %v1414_v8, %v1422_v9  ;;  %v1453_v23 = vld [vmem:[%s8202_s0 + $0x550] sm:$0xff]  ;;  %v7504_v16 = vld [vmem:[%s8202_s0 + $0xe8] sm:$0xff] }
 0x164   : > { %3994 = vmatprep.mubr.bf16.mxu1 %v5074_v24  ;;  %5958 = vmatpush3.bf16.msra.mxu1 %v6359_v22  ;;  %v1445_v22 = vld [vmem:[%s8202_s0 + $0x510] sm:$0xff]  ;;  %v1446_v24 = vld [vmem:[%s8202_s0 + $0x518] sm:$0xff] }
 0x165   : > { %5959 = vmatprep.subr.bf16.mxu1 %v6362_v25  ;;  %v1454_v25 = vld [vmem:[%s8202_s0 + $0x558] sm:$0xff] }
 0x166   : > { %5866 = vmatpush3.bf16.msra.mxu0 %v6361_v28  ;;  %v5184_v28 = vcombine.high %v1445_v22, %v1453_v23  ;;  %v5186_v29 = vcombine.high %v1446_v24, %v1454_v25 }
 0x167   : > { %5867 = vmatprep.subr.bf16.mxu0 %v6364_v32  ;;  %v1462_v32 = vld [vmem:[%s8202_s0 + $0x598] sm:$0xff] }
 0x168   : > { %5960 = vmatpush3.bf16.msra.mxu1 %v6363_v31  ;;  %v1469_v31 = vld [vmem:[%s8202_s0 + $0x5d0] sm:$0xff] }
 0x169   : > { %3859 = vmatmul.mubr.bf16.gmra.mxu0 %v5071_v34  ;;  %5961 = vmatprep.subr.bf16.mxu1 %v6366_v33  ;;  %v1470_v33 = vld [vmem:[%s8202_s0 + $0x5d8] sm:$0xff]  ;;  %v5183_v34 = vcombine.low %v1445_v22, %v1453_v23 }
 0x16a   : > { %3866 = vmatprep.mubr.bf16.mxu0 %v5088_v36  ;;  %5868 = vmatpush3.bf16.msra.mxu0 %v6365_v38  ;;  %v5200_v36 = vcombine.high %v1461_v30, %v1469_v31  ;;  %v1477_v38 = vld [vmem:[%s8202_s0 + $0x610] sm:$0xff]  ;;  %v6379_v22 = vld [vmem:[%s7069_s19 + $0x3b8] sm:$0xff]  }
 0x16b   : > { %3995 = vmatmul.mubr.bf16.gmra.mxu1 %v5073_v35  ;;  %5869 = vmatprep.subr.bf16.mxu0 %v6368_v40  ;;  %v5185_v35 = vcombine.low %v1446_v24, %v1454_v25  ;;  %v5199_v40 = vcombine.low %v1461_v30, %v1469_v31  ;;  %v5216_v42 = vcombine.high %v1477_v38, %v1477_v38  ;;  %v6382_v31 = vld [vmem:[%s7069_s19 + $0x3f0] sm:$0xff]  }
 0x16c   : > { %4002 = vmatprep.mubr.bf16.mxu1 %v5090_v37  ;;  %5962 = vmatpush3.bf16.msra.mxu1 %v6367_v39  ;;  %v5202_v37 = vcombine.high %v1462_v32, %v1470_v33  ;;  %v1478_v39 = vld [vmem:[%s8202_s0 + $0x618] sm:$0xff]  ;;  %v5215_v56 = vcombine.low %v1477_v38, %v1477_v38  ;;  %v6383_v38 = vld [vmem:[%s7069_s19 + $0x3b0] sm:$0xff]  }
 0x16d   : > { %5963 = vmatprep.subr.bf16.mxu1 %v6370_v41  ;;  %v5201_v41 = vcombine.low %v1462_v32, %v1470_v33  ;;  %v5218_v43 = vcombine.high %v1478_v39, %v1478_v39 }
 0x16e   : > { %5870 = vmatpush3.bf16.msra.mxu0 %v6369_v45 }
 0x16f   : > { %6043 = vmatprep.subr.bf16.mxu0 %v6376_v48  ;;  %v1287_v48 = vld [vmem:[%s8202_s0 + $0x20] sm:$0xff] }
 0x170   : > { %5964 = vmatpush3.bf16.msra.mxu1 %v6371_v47 }
 0x171   : > { %3867 = vmatmul.mubr.bf16.gmra.mxu0 %v5087_v49  ;;  %6137 = vmatprep.subr.bf16.mxu1 %v6378_v50  ;;  %v1295_v49 = vld [vmem:[%s8202_s0 + $0x60] sm:$0xff] }
 0x172   : > { %3874 = vmatprep.mubr.bf16.mxu0 %v5104_v52  ;;  %v1288_v52 = vld [vmem:[%s8202_s0 + $0x28] sm:$0xff]  ;;  %v5027_v14 = vcombine.low %v1287_v48, %v1295_v49 }
 0x173   : > { %4003 = vmatmul.mubr.bf16.gmra.mxu1 %v5089_v51 }
 0x174   : > { %4010 = vmatprep.mubr.bf16.mxu1 %v5106_v53  ;;  %v1296_v53 = vld [vmem:[%s8202_s0 + $0x68] sm:$0xff] }
 0x175   : > { %v5030_v62 = vcombine.high %v1288_v52, %v1296_v53 }
 0x179   : > { %3875 = vmatmul.mubr.bf16.gmra.mxu0 %v5103_v58 }
 0x17a   : > { %3882 = vmatprep.mubr.bf16.mxu0 %v5120_v60  ;;  %v5028_v60 = vcombine.high %v1287_v48, %v1295_v49 }
 0x17b   : > { %4011 = vmatmul.mubr.bf16.gmra.mxu1 %v5105_v59  ;;  %v5217_v59 = vcombine.low %v1478_v39, %v1478_v39  ;;  %v6384_v39 = vld [vmem:[%s7069_s19 + $0x368] sm:$0xff]  }
 0x17c   : > { %4018 = vmatprep.mubr.bf16.mxu1 %v5122_v61 }
 0x181   : > { %3883 = vmatmul.mubr.bf16.gmra.mxu0 %v5119_v2 }
 0x182   : > { %3890 = vmatprep.mubr.bf16.mxu0 %v5136_v4 }
 0x183   : > { %4019 = vmatmul.mubr.bf16.gmra.mxu1 %v5121_v3 }
 0x184   : > { %4026 = vmatprep.mubr.bf16.mxu1 %v5138_v5 }
 0x189   : > { %3891 = vmatmul.mubr.bf16.gmra.mxu0 %v5135_v10  ;;  %v7489_v10 = vld [vmem:[%s8202_s0 + $0xa0] sm:$0xff] }
 0x18a   : > { %3898 = vmatprep.mubr.bf16.mxu0 %v5152_v12 }
 0x18b   : > { %4027 = vmatmul.mubr.bf16.gmra.mxu1 %v5137_v11  ;;  %v7494_v11 = vld [vmem:[%s8202_s0 + $0xe0] sm:$0xff] }
 0x18c   : > { %4034 = vmatprep.mubr.bf16.mxu1 %v5154_v13  ;;  %v5044_v23 = vcombine.high %v7489_v10, %v7494_v11  ;;  %v5043_v49 = vcombine.low %v7489_v10, %v7494_v11 }
 0x191   : > { %3899 = vmatmul.mubr.bf16.gmra.mxu0 %v5151_v18 }
 0x192   : > { %3906 = vmatprep.mubr.bf16.mxu0 %v5168_v20  ;;  %v6377_v20 = vld [vmem:[%s7069_s19 + $0x338] sm:$0xff]  }
 0x193   : > { %4035 = vmatmul.mubr.bf16.gmra.mxu1 %v5153_v19  ;;  %v5029_v19 = vcombine.low %v1288_v52, %v1296_v53  ;;  %v5045_v52 = vcombine.low %v7499_v15, %v7504_v16 }
 0x194   : > { %4042 = vmatprep.mubr.bf16.mxu1 %v5170_v21 }
 0x199   : > { %3907 = vmatmul.mubr.bf16.gmra.mxu0 %v5167_v26 }
 0x19a   : > { %3914 = vmatprep.mubr.bf16.mxu0 %v5184_v28  ;;  %v6380_v28 = vld [vmem:[%s7069_s19 + $0x370] sm:$0xff]  }
 0x19b   : > { %4043 = vmatmul.mubr.bf16.gmra.mxu1 %v5169_v27  ;;  %v5046_v27 = vcombine.high %v7499_v15, %v7504_v16  ;;  %v6392_v15 = vld [vmem:[%s7069_s19 + $0x358] sm:$0xff]  }
 0x19c   : > { %4050 = vmatprep.mubr.bf16.mxu1 %v5186_v29 }
 0x1a1   : > { %3915 = vmatmul.mubr.bf16.gmra.mxu0 %v5183_v34  ;;  %v6381_v34 = vld [vmem:[%s7069_s19 + $0x330] sm:$0xff]  }
 0x1a2   : > { %3922 = vmatprep.mubr.bf16.mxu0 %v5200_v36 }
 0x1a3   : > { %4051 = vmatmul.mubr.bf16.gmra.mxu1 %v5185_v35  ;;  %v7522_v35 = vld [vmem:[%s8202_s0 + $0x120] sm:$0xff] }
 0x1a4   : > { %4058 = vmatprep.mubr.bf16.mxu1 %v5202_v37  ;;  %v7527_v37 = vld [vmem:[%s8202_s0 + $0x160] sm:$0xff] }
 0x1a5   : > { %v5060_v53 = vcombine.high %v7522_v35, %v7527_v37 }
 0x1a9   : > { %v5495_v44 = vpop.f32.mrf.mxu0  ;;  %3923 = vmatmul.mubr.bf16.gmra.mxu0 %v5199_v40 }
 0x1aa   : > { %3930 = vmatprep.mubr.bf16.mxu0 %v5216_v42 }
 0x1ab   : > { %v5589_v45 = vpop.f32.mrf.mxu1  ;;  %4059 = vmatmul.mubr.bf16.gmra.mxu1 %v5201_v41  ;;  %v5496_v47 = vpop.f32.mrf.mxu0 }
 0x1ac   : > { %4066 = vmatprep.mubr.bf16.mxu1 %v5218_v43  ;;  %v5497_v50 = vadd.f32 %v5496_v47, %v5495_v44  ;;  %v7536_v43 = vld [vmem:[%s8202_s0 + $0x128] sm:$0xff] }
 0x1ad   : > { %v5590_v51 = vpop.f32.mrf.mxu1  ;;  %v5498_v55 = vpop.f32.mrf.mxu0  ;;  %v7541_v44 = vld [vmem:[%s8202_s0 + $0x168] sm:$0xff] }
 0x1ae   : > { %v5591_v54 = vadd.f32 %v5590_v51, %v5589_v45  ;;  %v3565_v57 = vadd.f32 %v5497_v50, %v7466_v46  ;;  %v6386_v45 = vld [vmem:[%s7069_s19 + $0x3e8] sm:$0xff]  }
 0x1af   : > { %v5592_v58 = vpop.f32.mrf.mxu1  ;;  %v5499_v61 = vpop.f32.mrf.mxu0 }
 0x1b0   : > { %v7481_v63 = vadd.f32 %v5591_v54, %v3565_v57  ;;  %v5500_v0 = vadd.f32 %v5499_v61, %v5498_v55  ;;  %v5062_v55 = vcombine.high %v7536_v43, %v7541_v44  ;;  %v6388_v61 = vld [vmem:[%s7069_s19 + $0x360] sm:$0xff]  }
 0x1b1   : > { %v5593_v1 = vpop.f32.mrf.mxu1  ;;  %v5501_v3 = vpop.f32.mrf.mxu0  ;;  %3931 = vmatmul.mubr.bf16.gmra.mxu0 %v5215_v56  ;;  %v6385_v56 = vld [vmem:[%s7069_s19 + $0x328] sm:$0xff]  }
 0x1b2   : > { %v5594_v2 = vadd.f32 %v5593_v1, %v5592_v58  ;;  %v3568_v4 = vadd.f32 %v5500_v0, %v7466_v46  ;;  %4106 = vmatprep.mubr.bf16.mxu0 %v5028_v60  ;;  %v6387_v60 = vld [vmem:[%s7069_s19 + $0x3a8] sm:$0xff]   ;;  %v6390_v1 = vld [vmem:[%s7069_s19 + $0x3e0] sm:$0xff]  }
 0x1b3   : > { %v5595_v5 = vpop.f32.mrf.mxu1  ;;  %4067 = vmatmul.mubr.bf16.gmra.mxu1 %v5217_v59  ;;  %v5502_v6 = vpop.f32.mrf.mxu0 }
 0x1b4   : > { %4242 = vmatprep.mubr.bf16.mxu1 %v5030_v62  ;;  %v7484_v7 = vadd.f32 %v5594_v2, %v3568_v4  ;;  %v5503_v8 = vadd.f32 %v5502_v6, %v5501_v3  ;;  %v7563_v4 = vld [vmem:[%s8202_s0 + $0x1a0] sm:$0xff] }
 0x1b5   : > { %v5596_v9 = vpop.f32.mrf.mxu1  ;;  %v5504_v13 = vpop.f32.mrf.mxu0  ;;  %v7568_v6 = vld [vmem:[%s8202_s0 + $0x1e0] sm:$0xff] }
 0x1b6   : > { %v5597_v12 = vadd.f32 %v5596_v9, %v5595_v5  ;;  %v3573_v17 = vadd.f32 %v5503_v8, %v7466_v46  ;;  %v7573_v8 = vld [vmem:[%s8202_s0 + $0x1a8] sm:$0xff]  ;;  %v6389_v9 = vld [vmem:[%s7069_s19 + $0x320] sm:$0xff]  }
 0x1b7   : > { %v5598_v18 = vpop.f32.mrf.mxu1  ;;  %v5505_v21 = vpop.f32.mrf.mxu0 }
 0x1b8   : > { %v7511_v24 = vadd.f32 %v5597_v12, %v3573_v17  ;;  %v5506_v25 = vadd.f32 %v5505_v21, %v5504_v13  ;;  %v7581_v13 = vld [vmem:[%s8202_s0 + $0x1e8] sm:$0xff] }
 0x1b9   : > { %v5599_v26 = vpop.f32.mrf.mxu1  ;;  %v5507_v30 = vpop.f32.mrf.mxu0  ;;  %4107 = vmatmul.mubr.bf16.vlgmr.msra.gmra.mxu0 %v5027_v14  ;;  %v6391_v14 = vld [vmem:[%s7069_s19 + $0x3a0] sm:$0xff]  }
 0x1ba   : > { %v5600_v29 = vadd.f32 %v5599_v26, %v5598_v18  ;;  %v3576_v32 = vadd.f32 %v5506_v25, %v7466_v46  ;;  %6044 = vmatpush3.bf16.msra.mxu0 %v6377_v20  ;;  %4114 = vmatprep.mubr.bf16.mxu0 %v5044_v23  ;;  %v5059_v18 = vcombine.low %v7522_v35, %v7527_v37  ;;  %v6398_v35 = vld [vmem:[%s7069_s19 + $0x3d0] sm:$0xff]  }
 0x1bb   : > { %v5601_v33 = vpop.f32.mrf.mxu1  ;;  %4243 = vmatmul.mubr.bf16.vlgmr.msra.gmra.mxu1 %v5029_v19  ;;  %v5508_v36 = vpop.f32.mrf.mxu0  ;;  %6045 = vmatprep.subr.bf16.mxu0 %v6380_v28  ;;  %v6394_v19 = vld [vmem:[%s7069_s19 + $0x3d8] sm:$0xff]   ;;  %v5076_v23 = vcombine.high %v7563_v4, %v7568_v6  ;;  %v5078_v26 = vcombine.high %v7573_v8, %v7581_v13 }
 0x1bc   : > { %6138 = vmatpush3.bf16.msra.mxu1 %v6379_v22  ;;  %v7531_v40 = vadd.f32 %v5600_v29, %v3576_v32  ;;  %v5509_v41 = vadd.f32 %v5508_v36, %v5507_v30  ;;  %4250 = vmatprep.mubr.bf16.mxu1 %v5046_v27  ;;  %v5061_v22 = vcombine.low %v7536_v43, %v7541_v44  ;;  %v6393_v27 = vld [vmem:[%s7069_s19 + $0x318] sm:$0xff]   ;;  %v6396_v32 = vld [vmem:[%s7069_s19 + $0x350] sm:$0xff]  }
 0x1bd   : > { %v5602_v42 = vpop.f32.mrf.mxu1  ;;  %v5510_v48 = vpop.f32.mrf.mxu0  ;;  %6139 = vmatprep.subr.bf16.mxu1 %v6382_v31  ;;  %v6395_v31 = vld [vmem:[%s7069_s19 + $0x398] sm:$0xff]   ;;  %v6397_v43 = vld [vmem:[%s7069_s19 + $0x310] sm:$0xff]  }
 0x1be   : > { %v5603_v47 = vadd.f32 %v5602_v42, %v5601_v33  ;;  %v3581_v50 = vadd.f32 %v5509_v41, %v7466_v46  ;;  %6046 = vmatpush3.bf16.msra.mxu0 %v6381_v34  ;;  %v7610_v41 = vld [vmem:[%s8202_s0 + $0x260] sm:$0xff]  ;;  %v7615_v42 = vld [vmem:[%s8202_s0 + $0x228] sm:$0xff] }
 0x1bf   : > { %v5604_v51 = vpop.f32.mrf.mxu1  ;;  %v5511_v54 = vpop.f32.mrf.mxu0  ;;  %6047 = vmatprep.subr.bf16.mxu0 %v6384_v39 }
 0x1c0   : > { %6140 = vmatpush3.bf16.msra.mxu1 %v6383_v38  ;;  %v7554_v57 = vadd.f32 %v5603_v47, %v3581_v50  ;;  %v5512_v58 = vadd.f32 %v5511_v54, %v5510_v48  ;;  %v7605_v38 = vld [vmem:[%s8202_s0 + $0x220] sm:$0xff]  ;;  %v7623_v48 = vld [vmem:[%s8202_s0 + $0x268] sm:$0xff] }
 0x1c1   : > { %v5605_v59 = vpop.f32.mrf.mxu1  ;;  %6141 = vmatprep.subr.bf16.mxu1 %v6386_v45  ;;  %v5513_v0 = vpop.f32.mrf.mxu0  ;;  %4115 = vmatmul.mubr.bf16.gmra.mxu0 %v5043_v49  ;;  %v6399_v49 = vld [vmem:[%s7069_s19 + $0x390] sm:$0xff]   ;;  %v6400_v50 = vld [vmem:[%s7069_s19 + $0x348] sm:$0xff]  }
 0x1c2   : > { %v5606_v62 = vadd.f32 %v5605_v59, %v5604_v51  ;;  %v3584_v2 = vadd.f32 %v5512_v58, %v7466_v46  ;;  %4122 = vmatprep.mubr.bf16.mxu0 %v5060_v53  ;;  %6048 = vmatpush3.bf16.msra.mxu0 %v6385_v56  ;;  %v5075_v53 = vcombine.low %v7563_v4, %v7568_v6  ;;  %v6402_v54 = vld [vmem:[%s7069_s19 + $0x3c8] sm:$0xff]   ;;  %v6404_v4 = vld [vmem:[%s7069_s19 + $0x340] sm:$0xff]  }
 0x1c3   : > { %v5607_v3 = vpop.f32.mrf.mxu1  ;;  %4251 = vmatmul.mubr.bf16.gmra.mxu1 %v5045_v52  ;;  %v5514_v5 = vpop.f32.mrf.mxu0  ;;  %6049 = vmatprep.subr.bf16.mxu0 %v6388_v61  ;;  %v5077_v58 = vcombine.low %v7573_v8, %v7581_v13  ;;  %v5092_v59 = vcombine.high %v7605_v38, %v7610_v41  ;;  %v5094_v61 = vcombine.high %v7615_v42, %v7623_v48  ;;  %v6406_v8 = vld [vmem:[%s7069_s19 + $0x3c0] sm:$0xff]  }
 0x1c4   : > { %4258 = vmatprep.mubr.bf16.mxu1 %v5062_v55  ;;  %v7576_v10 = vadd.f32 %v5606_v62, %v3584_v2  ;;  %v5515_v11 = vadd.f32 %v5514_v5, %v5513_v0  ;;  %6142 = vmatpush3.bf16.msra.mxu1 %v6387_v60  ;;  %v6401_v62 = vld [vmem:[%s7069_s19 + $0x308] sm:$0xff]   ;;  %v1367_v13 = vld [vmem:[%s8202_s0 + $0x2a0] sm:$0xff] }
 0x1c5   : > { %v5608_v12 = vpop.f32.mrf.mxu1  ;;  %v5516_v17 = vpop.f32.mrf.mxu0  ;;  %6143 = vmatprep.subr.bf16.mxu1 %v6390_v1 }
 0x1c6   : > { %v5609_v16 = vadd.f32 %v5608_v12, %v5607_v3  ;;  %v3589_v20 = vadd.f32 %v5515_v11, %v7466_v46  ;;  %6050 = vmatpush3.bf16.msra.mxu0 %v6389_v9  ;;  %v6403_v3 = vld [vmem:[%s7069_s19 + $0x388] sm:$0xff]  }
 0x1c7   : > { %v5610_v21 = vpop.f32.mrf.mxu1  ;;  %v5517_v25 = vpop.f32.mrf.mxu0  ;;  %6051 = vmatprep.subr.bf16.mxu0 %v6392_v15  ;;  %v6405_v15 = vld [vmem:[%s7069_s19 + $0x300] sm:$0xff]  }
 0x1c8   : > { %v7596_v28 = vadd.f32 %v5609_v16, %v3589_v20  ;;  %v5518_v29 = vadd.f32 %v5517_v25, %v5516_v17  ;;  %6144 = vmatpush3.bf16.msra.mxu1 %v6391_v14  ;;  %v1375_v14 = vld [vmem:[%s8202_s0 + $0x2e0] sm:$0xff]  ;;  %v1376_v20 = vld [vmem:[%s8202_s0 + $0x2e8] sm:$0xff]  ;;  %v5091_v25 = vcombine.low %v7605_v38, %v7610_v41 }
 0x1c9   : > { %v5611_v30 = vpop.f32.mrf.mxu1  ;;  %v5519_v34 = vpop.f32.mrf.mxu0  ;;  %4123 = vmatmul.mubr.bf16.gmra.mxu0 %v5059_v18  ;;  %6145 = vmatprep.subr.bf16.mxu1 %v6394_v19  ;;  %v1368_v19 = vld [vmem:[%s8202_s0 + $0x2a8] sm:$0xff] }
 0x1ca   : > { %v5612_v33 = vadd.f32 %v5611_v30, %v5610_v21  ;;  %v3592_v36 = vadd.f32 %v5518_v29, %v7466_v46  ;;  %4130 = vmatprep.mubr.bf16.mxu0 %v5076_v23  ;;  %6052 = vmatpush3.bf16.msra.mxu0 %v6393_v27  ;;  %v6407_v21 = vld [vmem:[%s7069_s19 + $0x380] sm:$0xff]   ;;  %v5093_v29 = vcombine.low %v7615_v42, %v7623_v48 }
 0x1cb   : > { %v5613_v37 = vpop.f32.mrf.mxu1  ;;  %4259 = vmatmul.mubr.bf16.gmra.mxu1 %v5061_v22  ;;  %v5520_v39 = vpop.f32.mrf.mxu0  ;;  %6053 = vmatprep.subr.bf16.mxu0 %v6396_v32  ;;  %v5108_v30 = vcombine.high %v1367_v13, %v1375_v14  ;;  %v5110_v32 = vcombine.high %v1368_v19, %v1376_v20  ;;  %v1383_v42 = vld [vmem:[%s8202_s0 + $0x320] sm:$0xff] }
 0x1cc   : > { %4266 = vmatprep.mubr.bf16.mxu1 %v5078_v26  ;;  %v7618_v44 = vadd.f32 %v5612_v33, %v3592_v36  ;;  %v5521_v45 = vadd.f32 %v5520_v39, %v5519_v34  ;;  %6146 = vmatpush3.bf16.msra.mxu1 %v6395_v31 }
 0x1cd   : > { %v5614_v47 = vpop.f32.mrf.mxu1  ;;  %v5522_v52 = vpop.f32.mrf.mxu0  ;;  %6147 = vmatprep.subr.bf16.mxu1 %v6398_v35 }
 0x1ce   : > { %v5615_v51 = vadd.f32 %v5614_v47, %v5613_v37  ;;  %v3597_v55 = vadd.f32 %v5521_v45, %v7466_v46  ;;  %6054 = vmatpush3.bf16.msra.mxu0 %v6397_v43  ;;  %v1391_v43 = vld [vmem:[%s8202_s0 + $0x360] sm:$0xff] }
 0x1cf   : > { %v5616_v56 = vpop.f32.mrf.mxu1  ;;  %v5523_v60 = vpop.f32.mrf.mxu0  ;;  %6055 = vmatprep.subr.bf16.mxu0 %v6400_v50  ;;  %v1392_v50 = vld [vmem:[%s8202_s0 + $0x368] sm:$0xff] }
 0x1d0   : > { %v7638_v0 = vadd.f32 %v5615_v51, %v3597_v55  ;;  %v5524_v1 = vadd.f32 %v5523_v60, %v5522_v52  ;;  %6148 = vmatpush3.bf16.msra.mxu1 %v6399_v49  ;;  %v1384_v49 = vld [vmem:[%s8202_s0 + $0x328] sm:$0xff] }
 0x1d1   : > { %v5617_v2 = vpop.f32.mrf.mxu1  ;;  %v5525_v6 = vpop.f32.mrf.mxu0  ;;  %4131 = vmatmul.mubr.bf16.gmra.mxu0 %v5075_v53  ;;  %6149 = vmatprep.subr.bf16.mxu1 %v6402_v54  ;;  %v5107_v53 = vcombine.low %v1367_v13, %v1375_v14  ;;  %v5126_v60 = vcombine.high %v1384_v49, %v1392_v50  ;;  %v1400_v14 = vld [vmem:[%s8202_s0 + $0x3a8] sm:$0xff] }
 0x1d2   : > { %v5618_v5 = vadd.f32 %v5617_v2, %v5616_v56  ;;  %v3600_v9 = vadd.f32 %v5524_v1, %v7466_v46  ;;  %4138 = vmatprep.mubr.bf16.mxu0 %v5092_v59  ;;  %6056 = vmatpush3.bf16.msra.mxu0 %v6401_v62  ;;  %v5109_v56 = vcombine.low %v1368_v19, %v1376_v20 }
 0x1d3   : > { %v5619_v11 = vpop.f32.mrf.mxu1  ;;  %4267 = vmatmul.mubr.bf16.gmra.mxu1 %v5077_v58  ;;  %v5526_v12 = vpop.f32.mrf.mxu0  ;;  %6057 = vmatprep.subr.bf16.mxu0 %v6404_v4  ;;  %v5124_v58 = vcombine.high %v1383_v42, %v1391_v43  ;;  %v5123_v19 = vcombine.low %v1383_v42, %v1391_v43  ;;  %v1416_v43 = vld [vmem:[%s8202_s0 + $0x428] sm:$0xff] }
 0x1d4   : > { %4274 = vmatprep.mubr.bf16.mxu1 %v5094_v61  ;;  %v7651_v16 = vadd.f32 %v5618_v5, %v3600_v9  ;;  %v5527_v17 = vadd.f32 %v5526_v12, %v5525_v6  ;;  %6150 = vmatpush3.bf16.msra.mxu1 %v6403_v3  ;;  %v1407_v9 = vld [vmem:[%s8202_s0 + $0x3e0] sm:$0xff] }
 0x1d5   : > { %v5620_v18 = vpop.f32.mrf.mxu1  ;;  %v5528_v23 = vpop.f32.mrf.mxu0  ;;  %6151 = vmatprep.subr.bf16.mxu1 %v6406_v8  ;;  %v1399_v8 = vld [vmem:[%s8202_s0 + $0x3a0] sm:$0xff] }
 0x1d6   : > { %v5621_v22 = vadd.f32 %v5620_v18, %v5619_v11  ;;  %v3605_v26 = vadd.f32 %v5527_v17, %v7466_v46  ;;  %6058 = vmatpush3.bf16.msra.mxu0 %v6405_v15  ;;  %v1408_v15 = vld [vmem:[%s8202_s0 + $0x3e8] sm:$0xff] }
 0x1d7   : > { %v5622_v27 = vpop.f32.mrf.mxu1  ;;  %v5529_v31 = vpop.f32.mrf.mxu0 }
 0x1d8   : > { %v7665_v33 = vadd.f32 %v5621_v22, %v3605_v26  ;;  %v5530_v34 = vadd.f32 %v5529_v31, %v5528_v23  ;;  %6152 = vmatpush3.bf16.msra.mxu1 %v6407_v21  ;;  %v5125_v22 = vcombine.low %v1384_v49, %v1392_v50  ;;  %v5140_v23 = vcombine.high %v1399_v8, %v1407_v9 }
 0x1d9   : > { %v5623_v35 = vpop.f32.mrf.mxu1  ;;  %v5531_v37 = vpop.f32.mrf.mxu0  ;;  %4139 = vmatmul.mubr.bf16.gmra.mxu0 %v5091_v25  ;;  %v5142_v26 = vcombine.high %v1400_v14, %v1408_v15  ;;  %v5139_v50 = vcombine.low %v1399_v8, %v1407_v9 }
 0x1da   : > { %v5624_v36 = vadd.f32 %v5623_v35, %v5622_v27  ;;  %v3608_v38 = vadd.f32 %v5530_v34, %v7466_v46  ;;  %4146 = vmatprep.mubr.bf16.mxu0 %v5108_v30 }
 0x1db   : > { %v5625_v39 = vpop.f32.mrf.mxu1  ;;  %4275 = vmatmul.mubr.bf16.gmra.mxu1 %v5093_v29  ;;  %v5532_v41 = vpop.f32.mrf.mxu0 }
 0x1dc   : > { %4282 = vmatprep.mubr.bf16.mxu1 %v5110_v32  ;;  %v7674_v45 = vadd.f32 %v5624_v36, %v3608_v38  ;;  %v5533_v47 = vadd.f32 %v5532_v41, %v5531_v37  ;;  %v1415_v37 = vld [vmem:[%s8202_s0 + $0x420] sm:$0xff] }
 0x1dd   : > { %v5626_v48 = vpop.f32.mrf.mxu1  ;;  %v5534_v52 = vpop.f32.mrf.mxu0  ;;  %v1423_v38 = vld [vmem:[%s8202_s0 + $0x460] sm:$0xff] }
 0x1de   : > { %v5627_v51 = vadd.f32 %v5626_v48, %v5625_v39  ;;  %v3613_v54 = vadd.f32 %v5533_v47, %v7466_v46  ;;  %v1424_v47 = vld [vmem:[%s8202_s0 + $0x468] sm:$0xff] }
 0x1df   : > { %v5628_v55 = vpop.f32.mrf.mxu1  ;;  %v5535_v59 = vpop.f32.mrf.mxu0 }
 0x1e0   : > { %v7683_v61 = vadd.f32 %v5627_v51, %v3613_v54  ;;  %v5536_v62 = vadd.f32 %v5535_v59, %v5534_v52  ;;  %v5156_v54 = vcombine.high %v1415_v37, %v1423_v38 }
 0x1e1   : > { %v5629_v1 = vpop.f32.mrf.mxu1  ;;  %v5537_v3 = vpop.f32.mrf.mxu0  ;;  %4147 = vmatmul.mubr.bf16.gmra.mxu0 %v5107_v53  ;;  %v5141_v53 = vcombine.low %v1400_v14, %v1408_v15  ;;  %v1440_v14 = vld [vmem:[%s8202_s0 + $0x4e8] sm:$0xff] }
 0x1e2   : > { %v5630_v2 = vadd.f32 %v5629_v1, %v5628_v55  ;;  %v3616_v4 = vadd.f32 %v5536_v62, %v7466_v46  ;;  %4154 = vmatprep.mubr.bf16.mxu0 %v5124_v58 }
 0x1e3   : > { %v5631_v5 = vpop.f32.mrf.mxu1  ;;  %4283 = vmatmul.mubr.bf16.gmra.mxu1 %v5109_v56  ;;  %v5538_v6 = vpop.f32.mrf.mxu0  ;;  %v5158_v56 = vcombine.high %v1416_v43, %v1424_v47 }
 0x1e4   : > { %4290 = vmatprep.mubr.bf16.mxu1 %v5126_v60  ;;  %v7692_v11 = vadd.f32 %v5630_v2, %v3616_v4  ;;  %v5539_v12 = vadd.f32 %v5538_v6, %v5537_v3  ;;  %v1439_v6 = vld [vmem:[%s8202_s0 + $0x4e0] sm:$0xff] }
 0x1e5   : > { %v5632_v13 = vpop.f32.mrf.mxu1  ;;  %v5540_v18 = vpop.f32.mrf.mxu0 }
 0x1e6   : > { %v5633_v17 = vadd.f32 %v5632_v13, %v5631_v5  ;;  %v3621_v20 = vadd.f32 %v5539_v12, %v7466_v46  ;;  %v1431_v5 = vld [vmem:[%s8202_s0 + $0x4a0] sm:$0xff]  ;;  %v1432_v13 = vld [vmem:[%s8202_s0 + $0x4a8] sm:$0xff] }
 0x1e7   : > { %v5634_v21 = vpop.f32.mrf.mxu1  ;;  %v5541_v25 = vpop.f32.mrf.mxu0 }
 0x1e8   : > { %v7701_v27 = vadd.f32 %v5633_v17, %v3621_v20  ;;  %v5542_v29 = vadd.f32 %v5541_v25, %v5540_v18  ;;  %v5155_v18 = vcombine.low %v1415_v37, %v1423_v38  ;;  %v5174_v25 = vcombine.high %v1432_v13, %v1440_v14  ;;  %v1447_v37 = vld [vmem:[%s8202_s0 + $0x520] sm:$0xff] }
 0x1e9   : > { %v5635_v30 = vpop.f32.mrf.mxu1  ;;  %v5543_v32 = vpop.f32.mrf.mxu0  ;;  %4155 = vmatmul.mubr.bf16.gmra.mxu0 %v5123_v19  ;;  %v1455_v38 = vld [vmem:[%s8202_s0 + $0x560] sm:$0xff] }
 0x1ea   : > { %v5636_v31 = vadd.f32 %v5635_v30, %v5634_v21  ;;  %v3624_v34 = vadd.f32 %v5542_v29, %v7466_v46  ;;  %4162 = vmatprep.mubr.bf16.mxu0 %v5140_v23  ;;  %v5157_v21 = vcombine.low %v1416_v43, %v1424_v47  ;;  %v1448_v47 = vld [vmem:[%s8202_s0 + $0x528] sm:$0xff] }
 0x1eb   : > { %v5637_v35 = vpop.f32.mrf.mxu1  ;;  %4291 = vmatmul.mubr.bf16.gmra.mxu1 %v5125_v22  ;;  %v5544_v36 = vpop.f32.mrf.mxu0  ;;  %v5172_v22 = vcombine.high %v1431_v5, %v1439_v6 }
 0x1ec   : > { %4298 = vmatprep.mubr.bf16.mxu1 %v5142_v26  ;;  %v7710_v39 = vadd.f32 %v5636_v31, %v3624_v34  ;;  %v5545_v41 = vadd.f32 %v5544_v36, %v5543_v32 }
 0x1ed   : > { %v5638_v42 = vpop.f32.mrf.mxu1  ;;  %v5546_v49 = vpop.f32.mrf.mxu0 }
 0x1ee   : > { %v5639_v48 = vadd.f32 %v5638_v42, %v5637_v35  ;;  %v3629_v51 = vadd.f32 %v5545_v41, %v7466_v46 }
 0x1ef   : > { %v5640_v52 = vpop.f32.mrf.mxu1  ;;  %v5547_v55 = vpop.f32.mrf.mxu0 }
 0x1f0   : > { %v7719_v58 = vadd.f32 %v5639_v48, %v3629_v51  ;;  %v5548_v59 = vadd.f32 %v5547_v55, %v5546_v49  ;;  %v1456_v48 = vld [vmem:[%s8202_s0 + $0x568] sm:$0xff]  ;;  %v5171_v51 = vcombine.low %v1431_v5, %v1439_v6  ;;  %v5188_v55 = vcombine.high %v1447_v37, %v1455_v38  ;;  %v1463_v6 = vld [vmem:[%s8202_s0 + $0x5a0] sm:$0xff] }
 0x1f1   : > { %v5641_v60 = vpop.f32.mrf.mxu1  ;;  %v5549_v1 = vpop.f32.mrf.mxu0  ;;  %4163 = vmatmul.mubr.bf16.gmra.mxu0 %v5139_v50 }
 0x1f2   : > { %v5642_v62 = vadd.f32 %v5641_v60, %v5640_v52  ;;  %v3632_v2 = vadd.f32 %v5548_v59, %v7466_v46  ;;  %4170 = vmatprep.mubr.bf16.mxu0 %v5156_v54  ;;  %v5173_v54 = vcombine.low %v1432_v13, %v1440_v14  ;;  %v5190_v59 = vcombine.high %v1448_v47, %v1456_v48 }
 0x1f3   : > { %v5643_v3 = vpop.f32.mrf.mxu1  ;;  %4299 = vmatmul.mubr.bf16.gmra.mxu1 %v5141_v53  ;;  %v5550_v4 = vpop.f32.mrf.mxu0 }
 0x1f4   : > { %4306 = vmatprep.mubr.bf16.mxu1 %v5158_v56  ;;  %v7728_v8 = vadd.f32 %v5642_v62, %v3632_v2  ;;  %v5551_v9 = vadd.f32 %v5550_v4, %v5549_v1 }
 0x1f5   : > { %v5644_v12 = vpop.f32.mrf.mxu1  ;;  %v5552_v17 = vpop.f32.mrf.mxu0 }
 0x1f6   : > { %v5645_v15 = vadd.f32 %v5644_v12, %v5643_v3  ;;  %v3637_v19 = vadd.f32 %v5551_v9, %v7466_v46  ;;  %v1471_v12 = vld [vmem:[%s8202_s0 + $0x5e0] sm:$0xff] }
 0x1f7   : > { %v5646_v20 = vpop.f32.mrf.mxu1  ;;  %v5553_v23 = vpop.f32.mrf.mxu0 }
 0x1f8   : > { %v7737_v26 = vadd.f32 %v5645_v15, %v3637_v19  ;;  %v5554_v29 = vadd.f32 %v5553_v23, %v5552_v17  ;;  %v1464_v17 = vld [vmem:[%s8202_s0 + $0x5a8] sm:$0xff] }
 0x1f9   : > { %v5647_v30 = vpop.f32.mrf.mxu1  ;;  %v5555_v32 = vpop.f32.mrf.mxu0  ;;  %4171 = vmatmul.mubr.bf16.gmra.mxu0 %v5155_v18  ;;  %v1472_v18 = vld [vmem:[%s8202_s0 + $0x5e8] sm:$0xff] }
 0x1fa   : > { %v5648_v31 = vadd.f32 %v5647_v30, %v5646_v20  ;;  %v3640_v34 = vadd.f32 %v5554_v29, %v7466_v46  ;;  %4178 = vmatprep.mubr.bf16.mxu0 %v5172_v22  ;;  %v5204_v29 = vcombine.high %v1463_v6, %v1471_v12 }
 0x1fb   : > { %v5649_v35 = vpop.f32.mrf.mxu1  ;;  %4307 = vmatmul.mubr.bf16.gmra.mxu1 %v5157_v21  ;;  %v5556_v36 = vpop.f32.mrf.mxu0  ;;  %v5187_v21 = vcombine.low %v1447_v37, %v1455_v38  ;;  %v1479_v38 = vld [vmem:[%s8202_s0 + $0x620] sm:$0xff] }
 0x1fc   : > { %4314 = vmatprep.mubr.bf16.mxu1 %v5174_v25  ;;  %v7746_v41 = vadd.f32 %v5648_v31, %v3640_v34  ;;  %v5557_v42 = vadd.f32 %v5556_v36, %v5555_v32  ;;  %v5189_v25 = vcombine.low %v1448_v47, %v1456_v48  ;;  %v5206_v31 = vcombine.high %v1464_v17, %v1472_v18 }
 0x1fd   : > { %v5650_v43 = vpop.f32.mrf.mxu1  ;;  %v5558_v50 = vpop.f32.mrf.mxu0 }
 0x1fe   : > { %v5651_v49 = vadd.f32 %v5650_v43, %v5649_v35  ;;  %v3645_v52 = vadd.f32 %v5557_v42, %v7466_v46 }
 0x1ff   : > { %v5652_v53 = vpop.f32.mrf.mxu1  ;;  %v5559_v56 = vpop.f32.mrf.mxu0 }
 0x200   : > { %v7755_v60 = vadd.f32 %v5651_v49, %v3645_v52  ;;  %v5560_v62 = vadd.f32 %v5559_v56, %v5558_v50 }
 0x201   : > { %v5653_v1 = vpop.f32.mrf.mxu1  ;;  %v5561_v3 = vpop.f32.mrf.mxu0  ;;  %4179 = vmatmul.mubr.bf16.gmra.mxu0 %v5171_v51  ;;  %v1480_v51 = vld [vmem:[%s8202_s0 + $0x628] sm:$0xff] }
 0x202   : > { %v5654_v2 = vadd.f32 %v5653_v1, %v5652_v53  ;;  %v3648_v4 = vadd.f32 %v5560_v62, %v7466_v46  ;;  %4186 = vmatprep.mubr.bf16.mxu0 %v5188_v55  ;;  %v5220_v62 = vcombine.high %v1479_v38, %v1479_v38 }
 0x203   : > { %v5655_v9 = vpop.f32.mrf.mxu1  ;;  %4315 = vmatmul.mubr.bf16.gmra.mxu1 %v5173_v54  ;;  %v5562_v5 = vpop.f32.mrf.mxu0  ;;  %v5203_v54 = vcombine.low %v1463_v6, %v1471_v12  ;;  %v1289_v6 = vld [vmem:[%s8202_s0 + $0x30] sm:$0xff] }
 0x204   : > { %4322 = vmatprep.mubr.bf16.mxu1 %v5190_v59  ;;  %v7764_v13 = vadd.f32 %v5654_v2, %v3648_v4  ;;  %v5563_v14 = vadd.f32 %v5562_v5, %v5561_v3  ;;  %v5205_v59 = vcombine.low %v1464_v17, %v1472_v18  ;;  %v5222_v2 = vcombine.high %v1480_v51, %v1480_v51  ;;  %v1290_v17 = vld [vmem:[%s8202_s0 + $0x38] sm:$0xff] }
 0x205   : > { %v5656_v15 = vpop.f32.mrf.mxu1  ;;  %v5564_v20 = vpop.f32.mrf.mxu0  ;;  %v1298_v18 = vld [vmem:[%s8202_s0 + $0x78] sm:$0xff] }
 0x206   : > { %v5657_v19 = vadd.f32 %v5656_v15, %v5655_v9  ;;  %v3653_v22 = vadd.f32 %v5563_v14, %v7466_v46 }
 0x207   : > { %v5658_v23 = vpop.f32.mrf.mxu1  ;;  %v5565_v30 = vpop.f32.mrf.mxu0 }
 0x208   : > { %v7773_v32 = vadd.f32 %v5657_v19, %v3653_v22  ;;  %v5566_v34 = vadd.f32 %v5565_v30, %v5564_v20 }
 0x209   : > { %v5659_v35 = vpop.f32.mrf.mxu1  ;;  %v5567_v42 = vpop.f32.mrf.mxu0  ;;  %4187 = vmatmul.mubr.bf16.gmra.mxu0 %v5187_v21  ;;  %v5219_v21 = vcombine.low %v1479_v38, %v1479_v38 }
 0x20a   : > { %v5660_v36 = vadd.f32 %v5659_v35, %v5658_v23  ;;  %v3656_v43 = vadd.f32 %v5566_v34, %v7466_v46  ;;  %4194 = vmatprep.mubr.bf16.mxu0 %v5204_v29 }
 0x20b   : > { %v5661_v49 = vpop.f32.mrf.mxu1  ;;  %4323 = vmatmul.mubr.bf16.gmra.mxu1 %v5189_v25  ;;  %v5568_v37 = vpop.f32.mrf.mxu0  ;;  %v5221_v25 = vcombine.low %v1480_v51, %v1480_v51 }
 0x20c   : > { %4330 = vmatprep.mubr.bf16.mxu1 %v5206_v31  ;;  %v7779_v47 = vadd.f32 %v5660_v36, %v3656_v43  ;;  %v5569_v48 = vadd.f32 %v5568_v37, %v5567_v42  ;;  %v5034_v31 = vcombine.high %v1290_v17, %v1298_v18 }
 0x20d   : > { %v5662_v50 = vpop.f32.mrf.mxu1  ;;  %v5570_v53 = vpop.f32.mrf.mxu0 }
 0x20e   : > { %v5663_v52 = vadd.f32 %v5662_v50, %v5661_v49  ;;  %v3661_v55 = vadd.f32 %v5569_v48, %v7466_v46  ;;  %v1297_v46 = vld [vmem:[%s8202_s0 + $0x70] sm:$0xff]  ;;  %v1314_v53 = vld [vmem:[%s8202_s0 + $0xf8] sm:$0xff] }
 0x20f   : > { %v5664_v56 = vpop.f32.mrf.mxu1  ;;  %v5571_v1 = vpop.f32.mrf.mxu0  ;;  %v5032_v29 = vcombine.high %v1289_v6, %v1297_v46  ;;  %v1313_v48 = vld [vmem:[%s8202_s0 + $0xf0] sm:$0xff] }
 0x210   : > { %v7785_v3 = vadd.f32 %v5663_v52, %v3661_v55  ;;  %v5031_v56 = vcombine.low %v1289_v6, %v1297_v46  ;;  %v5033_v1 = vcombine.low %v1290_v17, %v1298_v18  ;;  %v1329_v46 = vld [vmem:[%s8202_s0 + $0x170] sm:$0xff] }
 0x211   : > { %v5665_v4 = vpop.f32.mrf.mxu1  ;;  %v5683_v9 = vpop.f32.mrf.mxu0  ;;  %4195 = vmatmul.mubr.bf16.gmra.mxu0 %v5203_v54 }
 0x212   : > { %4202 = vmatprep.mubr.bf16.mxu0 %v5220_v62 }
 0x213   : > { %v5777_v5 = vpop.f32.mrf.mxu1  ;;  %4331 = vmatmul.mubr.bf16.gmra.mxu1 %v5205_v59  ;;  %v5684_v14 = vpop.f32.mrf.mxu0 }
 0x214   : > { %4338 = vmatprep.mubr.bf16.mxu1 %v5222_v2  ;;  %v5685_v12 = vadd.f32 %v5684_v14, %v5683_v9 }
 0x215   : > { %v5778_v15 = vpop.f32.mrf.mxu1  ;;  %v5686_v20 = vpop.f32.mrf.mxu0 }
 0x216   : > { %v5779_v19 = vadd.f32 %v5778_v15, %v5777_v5  ;;  %v3837_v22 = vadd.f32 %v5685_v12, %v7481_v63  ;;  %v1305_v63 = vld [vmem:[%s8202_s0 + $0xb0] sm:$0xff] }
 0x217   : > { %v5780_v23 = vpop.f32.mrf.mxu1  ;;  %v5687_v30 = vpop.f32.mrf.mxu0  ;;  %v5048_v2 = vcombine.high %v1305_v63, %v1313_v48 }
 0x218   : > { %v7800_v34 = vadd.f32 %v5779_v19, %v3837_v22  ;;  %v5688_v35 = vadd.f32 %v5687_v30, %v5686_v20  ;;  %v5047_v30 = vcombine.low %v1305_v63, %v1313_v48  ;;  %v1345_v48 = vld [vmem:[%s8202_s0 + $0x1f0] sm:$0xff] }
 0x219   : > { %v5781_v36 = vpop.f32.mrf.mxu1  ;;  %v5689_v43 = vpop.f32.mrf.mxu0  ;;  %4203 = vmatmul.mubr.bf16.gmra.mxu0 %v5219_v21 }
 0x21a   : > { %v5782_v42 = vadd.f32 %v5781_v36, %v5780_v23  ;;  %v3840_v49 = vadd.f32 %v5688_v35, %v7484_v7  ;;  %4378 = vmatprep.mubr.bf16.mxu0 %v5032_v29  ;;  %v1306_v7 = vld [vmem:[%s8202_s0 + $0xb8] sm:$0xff] }
 0x21b   : > { %v5783_v37 = vpop.f32.mrf.mxu1  ;;  %4339 = vmatmul.mubr.bf16.gmra.mxu1 %v5221_v25  ;;  %v5690_v38 = vpop.f32.mrf.mxu0  ;;  %v5050_v9 = vcombine.high %v1306_v7, %v1314_v53  ;;  %v1330_v23 = vld [vmem:[%s8202_s0 + $0x178] sm:$0xff]  ;;  %v5049_v36 = vcombine.low %v1306_v7, %v1314_v53 }
 0x21c   : > { %4514 = vmatprep.mubr.bf16.mxu1 %v5034_v31  ;;  %v7809_v50 = vadd.f32 %v5782_v42, %v3840_v49  ;;  %v5691_v51 = vadd.f32 %v5690_v38, %v5689_v43 }
 0x21d   : > { %v5784_v52 = vpop.f32.mrf.mxu1  ;;  %v5692_v55 = vpop.f32.mrf.mxu0 }
 0x21e   : > { %v5785_v54 = vadd.f32 %v5784_v52, %v5783_v37  ;;  %v3845_v59 = vadd.f32 %v5691_v51, %v7511_v24  ;;  %v1321_v24 = vld [vmem:[%s8202_s0 + $0x130] sm:$0xff] }
 0x21f   : > { %v5786_v62 = vpop.f32.mrf.mxu1  ;;  %v5693_v4 = vpop.f32.mrf.mxu0  ;;  %v5064_v42 = vcombine.high %v1321_v24, %v1329_v46 }
 0x220   : > { %v7818_v5 = vadd.f32 %v5785_v54, %v3845_v59  ;;  %v5694_v14 = vadd.f32 %v5693_v4, %v5692_v55  ;;  %v5063_v4 = vcombine.low %v1321_v24, %v1329_v46  ;;  %v1361_v46 = vld [vmem:[%s8202_s0 + $0x270] sm:$0xff] }
 0x221   : > { %v5787_v12 = vpop.f32.mrf.mxu1  ;;  %v5695_v19 = vpop.f32.mrf.mxu0  ;;  %4379 = vmatmul.mubr.bf16.vlgmr.msra.gmra.mxu0 %v5031_v56 }
 0x222   : > { %v5788_v15 = vadd.f32 %v5787_v12, %v5786_v62  ;;  %v3848_v20 = vadd.f32 %v5694_v14, %v7531_v40  ;;  %4386 = vmatprep.mubr.bf16.mxu0 %v5048_v2  ;;  %v1322_v40 = vld [vmem:[%s8202_s0 + $0x138] sm:$0xff] }
 0x223   : > { %v5789_v21 = vpop.f32.mrf.mxu1  ;;  %4515 = vmatmul.mubr.bf16.vlgmr.msra.gmra.mxu1 %v5033_v1  ;;  %v5696_v6 = vpop.f32.mrf.mxu0  ;;  %v5066_v49 = vcombine.high %v1322_v40, %v1330_v23  ;;  %v1346_v62 = vld [vmem:[%s8202_s0 + $0x1f8] sm:$0xff]  ;;  %v5065_v12 = vcombine.low %v1322_v40, %v1330_v23 }
 0x224   : > { %4522 = vmatprep.mubr.bf16.mxu1 %v5050_v9  ;;  %v7827_v17 = vadd.f32 %v5788_v15, %v3848_v20  ;;  %v5697_v18 = vadd.f32 %v5696_v6, %v5695_v19 }
 0x225   : > { %v5790_v22 = vpop.f32.mrf.mxu1  ;;  %v5698_v29 = vpop.f32.mrf.mxu0 }
 0x226   : > { %v5791_v25 = vadd.f32 %v5790_v22, %v5789_v21  ;;  %v3853_v31 = vadd.f32 %v5697_v18, %v7554_v57  ;;  %v1337_v57 = vld [vmem:[%s8202_s0 + $0x1b0] sm:$0xff] }
 0x227   : > { %v5792_v35 = vpop.f32.mrf.mxu1  ;;  %v5699_v43 = vpop.f32.mrf.mxu0  ;;  %v5080_v15 = vcombine.high %v1337_v57, %v1345_v48 }
 0x228   : > { %v7836_v37 = vadd.f32 %v5791_v25, %v3853_v31  ;;  %v5700_v38 = vadd.f32 %v5699_v43, %v5698_v29  ;;  %v5079_v43 = vcombine.low %v1337_v57, %v1345_v48  ;;  %v1377_v48 = vld [vmem:[%s8202_s0 + $0x2f0] sm:$0xff] }
 0x229   : > { %v5793_v51 = vpop.f32.mrf.mxu1  ;;  %v5701_v54 = vpop.f32.mrf.mxu0  ;;  %4387 = vmatmul.mubr.bf16.gmra.mxu0 %v5047_v30 }
 0x22a   : > { %v5794_v52 = vadd.f32 %v5793_v51, %v5792_v35  ;;  %v3856_v55 = vadd.f32 %v5700_v38, %v7576_v10  ;;  %4394 = vmatprep.mubr.bf16.mxu0 %v5064_v42  ;;  %v1338_v10 = vld [vmem:[%s8202_s0 + $0x1b8] sm:$0xff] }
 0x22b   : > { %v5795_v56 = vpop.f32.mrf.mxu1  ;;  %4523 = vmatmul.mubr.bf16.gmra.mxu1 %v5049_v36  ;;  %v5702_v63 = vpop.f32.mrf.mxu0  ;;  %v5082_v20 = vcombine.high %v1338_v10, %v1346_v62  ;;  %v1362_v35 = vld [vmem:[%s8202_s0 + $0x278] sm:$0xff]  ;;  %v5081_v51 = vcombine.low %v1338_v10, %v1346_v62 }
 0x22c   : > { %4530 = vmatprep.mubr.bf16.mxu1 %v5066_v49  ;;  %v7845_v7 = vadd.f32 %v5794_v52, %v3856_v55  ;;  %v5703_v53 = vadd.f32 %v5702_v63, %v5701_v54 }
 0x22d   : > { %v5796_v59 = vpop.f32.mrf.mxu1  ;;  %v5704_v2 = vpop.f32.mrf.mxu0 }
 0x22e   : > { %v5797_v1 = vadd.f32 %v5796_v59, %v5795_v56  ;;  %v3861_v9 = vadd.f32 %v5703_v53, %v7596_v28  ;;  %v1353_v28 = vld [vmem:[%s8202_s0 + $0x230] sm:$0xff] }
 0x22f   : > { %v5798_v14 = vpop.f32.mrf.mxu1  ;;  %v5705_v19 = vpop.f32.mrf.mxu0  ;;  %v5096_v52 = vcombine.high %v1353_v28, %v1361_v46 }
 0x230   : > { %v7854_v21 = vadd.f32 %v5797_v1, %v3861_v9  ;;  %v5706_v6 = vadd.f32 %v5705_v19, %v5704_v2  ;;  %v5095_v19 = vcombine.low %v1353_v28, %v1361_v46  ;;  %v1393_v46 = vld [vmem:[%s8202_s0 + $0x370] sm:$0xff] }
 0x231   : > { %v5799_v18 = vpop.f32.mrf.mxu1  ;;  %v5707_v25 = vpop.f32.mrf.mxu0  ;;  %4395 = vmatmul.mubr.bf16.gmra.mxu0 %v5063_v4 }
 0x232   : > { %v5800_v22 = vadd.f32 %v5799_v18, %v5798_v14  ;;  %v3864_v29 = vadd.f32 %v5706_v6, %v7618_v44  ;;  %4402 = vmatprep.mubr.bf16.mxu0 %v5080_v15  ;;  %v1354_v44 = vld [vmem:[%s8202_s0 + $0x238] sm:$0xff] }
 0x233   : > { %v5801_v30 = vpop.f32.mrf.mxu1  ;;  %4531 = vmatmul.mubr.bf16.gmra.mxu1 %v5065_v12  ;;  %v5708_v24 = vpop.f32.mrf.mxu0  ;;  %v5098_v55 = vcombine.high %v1354_v44, %v1362_v35  ;;  %v1378_v14 = vld [vmem:[%s8202_s0 + $0x2f8] sm:$0xff]  ;;  %v5097_v18 = vcombine.low %v1354_v44, %v1362_v35 }
 0x234   : > { %4538 = vmatprep.mubr.bf16.mxu1 %v5082_v20  ;;  %v7863_v40 = vadd.f32 %v5800_v22, %v3864_v29  ;;  %v5709_v23 = vadd.f32 %v5708_v24, %v5707_v25 }
 0x235   : > { %v5802_v31 = vpop.f32.mrf.mxu1  ;;  %v5710_v42 = vpop.f32.mrf.mxu0 }
 0x236   : > { %v5803_v36 = vadd.f32 %v5802_v31, %v5801_v30  ;;  %v3869_v49 = vadd.f32 %v5709_v23, %v7638_v0  ;;  %v1369_v0 = vld [vmem:[%s8202_s0 + $0x2b0] sm:$0xff] }
 0x237   : > { %v5804_v38 = vpop.f32.mrf.mxu1  ;;  %v5711_v54 = vpop.f32.mrf.mxu0  ;;  %v5112_v22 = vcombine.high %v1369_v0, %v1377_v48 }
 0x238   : > { %v7872_v56 = vadd.f32 %v5803_v36, %v3869_v49  ;;  %v5712_v63 = vadd.f32 %v5711_v54, %v5710_v42  ;;  %v5111_v54 = vcombine.low %v1369_v0, %v1377_v48  ;;  %v1409_v48 = vld [vmem:[%s8202_s0 + $0x3f0] sm:$0xff] }
 0x239   : > { %v5805_v53 = vpop.f32.mrf.mxu1  ;;  %v5713_v1 = vpop.f32.mrf.mxu0  ;;  %4403 = vmatmul.mubr.bf16.gmra.mxu0 %v5079_v43 }
 0x23a   : > { %v5806_v59 = vadd.f32 %v5805_v53, %v5804_v38  ;;  %v3872_v2 = vadd.f32 %v5712_v63, %v7651_v16  ;;  %4410 = vmatprep.mubr.bf16.mxu0 %v5096_v52  ;;  %v1370_v16 = vld [vmem:[%s8202_s0 + $0x2b8] sm:$0xff] }
 0x23b   : > { %v5807_v4 = vpop.f32.mrf.mxu1  ;;  %4539 = vmatmul.mubr.bf16.gmra.mxu1 %v5081_v51  ;;  %v5714_v57 = vpop.f32.mrf.mxu0  ;;  %v5114_v29 = vcombine.high %v1370_v16, %v1378_v14  ;;  %v1394_v38 = vld [vmem:[%s8202_s0 + $0x378] sm:$0xff]  ;;  %v5113_v53 = vcombine.low %v1370_v16, %v1378_v14 }
 0x23c   : > { %4546 = vmatprep.mubr.bf16.mxu1 %v5098_v55  ;;  %v7881_v10 = vadd.f32 %v5806_v59, %v3872_v2  ;;  %v5715_v62 = vadd.f32 %v5714_v57, %v5713_v1 }
 0x23d   : > { %v5808_v9 = vpop.f32.mrf.mxu1  ;;  %v5716_v15 = vpop.f32.mrf.mxu0 }
 0x23e   : > { %v5809_v12 = vadd.f32 %v5808_v9, %v5807_v4  ;;  %v3877_v20 = vadd.f32 %v5715_v62, %v7665_v33  ;;  %v1385_v33 = vld [vmem:[%s8202_s0 + $0x330] sm:$0xff] }
 0x23f   : > { %v5810_v6 = vpop.f32.mrf.mxu1  ;;  %v5717_v25 = vpop.f32.mrf.mxu0  ;;  %v5128_v59 = vcombine.high %v1385_v33, %v1393_v46 }
 0x240   : > { %v7890_v30 = vadd.f32 %v5809_v12, %v3877_v20  ;;  %v5718_v24 = vadd.f32 %v5717_v25, %v5716_v15  ;;  %v5127_v25 = vcombine.low %v1385_v33, %v1393_v46  ;;  %v1425_v46 = vld [vmem:[%s8202_s0 + $0x470] sm:$0xff] }
 0x241   : > { %v5811_v23 = vpop.f32.mrf.mxu1  ;;  %v5719_v36 = vpop.f32.mrf.mxu0  ;;  %4411 = vmatmul.mubr.bf16.gmra.mxu0 %v5095_v19 }
 0x242   : > { %v5812_v31 = vadd.f32 %v5811_v23, %v5810_v6  ;;  %v3880_v42 = vadd.f32 %v5718_v24, %v7674_v45  ;;  %4418 = vmatprep.mubr.bf16.mxu0 %v5112_v22  ;;  %v1386_v45 = vld [vmem:[%s8202_s0 + $0x338] sm:$0xff] }
 0x243   : > { %v5813_v43 = vpop.f32.mrf.mxu1  ;;  %4547 = vmatmul.mubr.bf16.gmra.mxu1 %v5097_v18  ;;  %v5720_v28 = vpop.f32.mrf.mxu0  ;;  %v5130_v2 = vcombine.high %v1386_v45, %v1394_v38  ;;  %v1410_v6 = vld [vmem:[%s8202_s0 + $0x3f8] sm:$0xff]  ;;  %v5129_v23 = vcombine.low %v1386_v45, %v1394_v38 }
 0x244   : > { %4554 = vmatprep.mubr.bf16.mxu1 %v5114_v29  ;;  %v7899_v44 = vadd.f32 %v5812_v31, %v3880_v42  ;;  %v5721_v35 = vadd.f32 %v5720_v28, %v5719_v36 }
 0x245   : > { %v5814_v49 = vpop.f32.mrf.mxu1  ;;  %v5722_v52 = vpop.f32.mrf.mxu0 }
 0x246   : > { %v5815_v51 = vadd.f32 %v5814_v49, %v5813_v43  ;;  %v3885_v55 = vadd.f32 %v5721_v35, %v7683_v61  ;;  %v1401_v61 = vld [vmem:[%s8202_s0 + $0x3b0] sm:$0xff] }
 0x247   : > { %v5816_v63 = vpop.f32.mrf.mxu1  ;;  %v5723_v1 = vpop.f32.mrf.mxu0  ;;  %v5144_v31 = vcombine.high %v1401_v61, %v1409_v48 }
 0x248   : > { %v7908_v4 = vadd.f32 %v5815_v51, %v3885_v55  ;;  %v5724_v57 = vadd.f32 %v5723_v1, %v5722_v52  ;;  %v5143_v1 = vcombine.low %v1401_v61, %v1409_v48  ;;  %v1441_v48 = vld [vmem:[%s8202_s0 + $0x4f0] sm:$0xff] }
 0x249   : > { %v5817_v62 = vpop.f32.mrf.mxu1  ;;  %v5725_v12 = vpop.f32.mrf.mxu0  ;;  %4419 = vmatmul.mubr.bf16.gmra.mxu0 %v5111_v54 }
 0x24a   : > { %v5818_v9 = vadd.f32 %v5817_v62, %v5816_v63  ;;  %v3888_v15 = vadd.f32 %v5724_v57, %v7692_v11  ;;  %4426 = vmatprep.mubr.bf16.mxu0 %v5128_v59  ;;  %v1402_v11 = vld [vmem:[%s8202_s0 + $0x3b8] sm:$0xff] }
 0x24b   : > { %v5819_v19 = vpop.f32.mrf.mxu1  ;;  %4555 = vmatmul.mubr.bf16.gmra.mxu1 %v5113_v53  ;;  %v5726_v0 = vpop.f32.mrf.mxu0  ;;  %v5146_v42 = vcombine.high %v1402_v11, %v1410_v6  ;;  %v1426_v63 = vld [vmem:[%s8202_s0 + $0x478] sm:$0xff]  ;;  %v5145_v62 = vcombine.low %v1402_v11, %v1410_v6 }
 0x24c   : > { %4562 = vmatprep.mubr.bf16.mxu1 %v5130_v2  ;;  %v7917_v16 = vadd.f32 %v5818_v9, %v3888_v15  ;;  %v5727_v14 = vadd.f32 %v5726_v0, %v5725_v12 }
 0x24d   : > { %v5820_v20 = vpop.f32.mrf.mxu1  ;;  %v5728_v22 = vpop.f32.mrf.mxu0 }
 0x24e   : > { %v5821_v18 = vadd.f32 %v5820_v20, %v5819_v19  ;;  %v3893_v29 = vadd.f32 %v5727_v14, %v7701_v27  ;;  %v1417_v27 = vld [vmem:[%s8202_s0 + $0x430] sm:$0xff] }
 0x24f   : > { %v5822_v24 = vpop.f32.mrf.mxu1  ;;  %v5729_v36 = vpop.f32.mrf.mxu0  ;;  %v5160_v9 = vcombine.high %v1417_v27, %v1425_v46 }
 0x250   : > { %v7926_v43 = vadd.f32 %v5821_v18, %v3893_v29  ;;  %v5730_v28 = vadd.f32 %v5729_v36, %v5728_v22  ;;  %v5159_v36 = vcombine.low %v1417_v27, %v1425_v46  ;;  %v1457_v46 = vld [vmem:[%s8202_s0 + $0x570] sm:$0xff] }
 0x251   : > { %v5823_v35 = vpop.f32.mrf.mxu1  ;;  %v5731_v51 = vpop.f32.mrf.mxu0  ;;  %4427 = vmatmul.mubr.bf16.gmra.mxu0 %v5127_v25 }
 0x252   : > { %v5824_v49 = vadd.f32 %v5823_v35, %v5822_v24  ;;  %v3896_v52 = vadd.f32 %v5730_v28, %v7710_v39  ;;  %4434 = vmatprep.mubr.bf16.mxu0 %v5144_v31  ;;  %v1418_v39 = vld [vmem:[%s8202_s0 + $0x438] sm:$0xff] }
 0x253   : > { %v5825_v54 = vpop.f32.mrf.mxu1  ;;  %4563 = vmatmul.mubr.bf16.gmra.mxu1 %v5129_v23  ;;  %v5732_v33 = vpop.f32.mrf.mxu0  ;;  %v5162_v15 = vcombine.high %v1418_v39, %v1426_v63  ;;  %v1442_v24 = vld [vmem:[%s8202_s0 + $0x4f8] sm:$0xff]  ;;  %v5161_v35 = vcombine.low %v1418_v39, %v1426_v63 }
 0x254   : > { %4570 = vmatprep.mubr.bf16.mxu1 %v5146_v42  ;;  %v7935_v45 = vadd.f32 %v5824_v49, %v3896_v52  ;;  %v5733_v38 = vadd.f32 %v5732_v33, %v5731_v51 }
 0x255   : > { %v5826_v55 = vpop.f32.mrf.mxu1  ;;  %v5734_v59 = vpop.f32.mrf.mxu0 }
 0x256   : > { %v5827_v53 = vadd.f32 %v5826_v55, %v5825_v54  ;;  %v3901_v2 = vadd.f32 %v5733_v38, %v7719_v58  ;;  %v1433_v58 = vld [vmem:[%s8202_s0 + $0x4b0] sm:$0xff] }
 0x257   : > { %v5828_v57 = vpop.f32.mrf.mxu1  ;;  %v5735_v12 = vpop.f32.mrf.mxu0  ;;  %v5176_v49 = vcombine.high %v1433_v58, %v1441_v48 }
 0x258   : > { %v7944_v19 = vadd.f32 %v5827_v53, %v3901_v2  ;;  %v5736_v0 = vadd.f32 %v5735_v12, %v5734_v59  ;;  %v5175_v12 = vcombine.low %v1433_v58, %v1441_v48  ;;  %v1473_v48 = vld [vmem:[%s8202_s0 + $0x5f0] sm:$0xff] }
 0x259   : > { %v5829_v14 = vpop.f32.mrf.mxu1  ;;  %v5737_v18 = vpop.f32.mrf.mxu0  ;;  %4435 = vmatmul.mubr.bf16.gmra.mxu0 %v5143_v1 }
 0x25a   : > { %v5830_v20 = vadd.f32 %v5829_v14, %v5828_v57  ;;  %v3904_v22 = vadd.f32 %v5736_v0, %v7728_v8  ;;  %4442 = vmatprep.mubr.bf16.mxu0 %v5160_v9  ;;  %v1434_v8 = vld [vmem:[%s8202_s0 + $0x4b8] sm:$0xff] }
 0x25b   : > { %v5831_v25 = vpop.f32.mrf.mxu1  ;;  %4571 = vmatmul.mubr.bf16.gmra.mxu1 %v5145_v62  ;;  %v5738_v61 = vpop.f32.mrf.mxu0  ;;  %v5178_v52 = vcombine.high %v1434_v8, %v1442_v24  ;;  %v1458_v57 = vld [vmem:[%s8202_s0 + $0x578] sm:$0xff]  ;;  %v5177_v14 = vcombine.low %v1434_v8, %v1442_v24 }
 0x25c   : > { %4578 = vmatprep.mubr.bf16.mxu1 %v5162_v15  ;;  %v7953_v11 = vadd.f32 %v5830_v20, %v3904_v22  ;;  %v5739_v6 = vadd.f32 %v5738_v61, %v5737_v18 }
 0x25d   : > { %v5832_v29 = vpop.f32.mrf.mxu1  ;;  %v5740_v31 = vpop.f32.mrf.mxu0 }
 0x25e   : > { %v5833_v23 = vadd.f32 %v5832_v29, %v5831_v25  ;;  %v3909_v42 = vadd.f32 %v5739_v6, %v7737_v26  ;;  %v1449_v26 = vld [vmem:[%s8202_s0 + $0x530] sm:$0xff] }
 0x25f   : > { %v5834_v28 = vpop.f32.mrf.mxu1  ;;  %v5741_v51 = vpop.f32.mrf.mxu0  ;;  %v5192_v20 = vcombine.high %v1449_v26, %v1457_v46 }
 0x260   : > { %v7962_v54 = vadd.f32 %v5833_v23, %v3909_v42  ;;  %v5742_v33 = vadd.f32 %v5741_v51, %v5740_v31  ;;  %v5191_v51 = vcombine.low %v1449_v26, %v1457_v46 }
 0x261   : > { %v5835_v38 = vpop.f32.mrf.mxu1  ;;  %v5743_v53 = vpop.f32.mrf.mxu0  ;;  %4443 = vmatmul.mubr.bf16.gmra.mxu0 %v5159_v36 }
 0x262   : > { %v5836_v55 = vadd.f32 %v5835_v38, %v5834_v28  ;;  %v3912_v59 = vadd.f32 %v5742_v33, %v7746_v41  ;;  %4450 = vmatprep.mubr.bf16.mxu0 %v5176_v49  ;;  %v1450_v41 = vld [vmem:[%s8202_s0 + $0x538] sm:$0xff] }
 0x263   : > { %v5837_v1 = vpop.f32.mrf.mxu1  ;;  %4579 = vmatmul.mubr.bf16.gmra.mxu1 %v5161_v35  ;;  %v5744_v27 = vpop.f32.mrf.mxu0  ;;  %v5194_v22 = vcombine.high %v1450_v41, %v1458_v57  ;;  %v1474_v28 = vld [vmem:[%s8202_s0 + $0x5f8] sm:$0xff]  ;;  %v5193_v38 = vcombine.low %v1450_v41, %v1458_v57 }
 0x264   : > { %4586 = vmatprep.mubr.bf16.mxu1 %v5178_v52  ;;  %v7971_v39 = vadd.f32 %v5836_v55, %v3912_v59  ;;  %v5745_v63 = vadd.f32 %v5744_v27, %v5743_v53 }
 0x265   : > { %v5838_v2 = vpop.f32.mrf.mxu1  ;;  %v5746_v9 = vpop.f32.mrf.mxu0 }
 0x266   : > { %v5839_v62 = vadd.f32 %v5838_v2, %v5837_v1  ;;  %v3917_v15 = vadd.f32 %v5745_v63, %v7755_v60  ;;  %v1465_v60 = vld [vmem:[%s8202_s0 + $0x5b0] sm:$0xff] }
 0x267   : > { %v5840_v0 = vpop.f32.mrf.mxu1  ;;  %v5747_v18 = vpop.f32.mrf.mxu0  ;;  %v5208_v55 = vcombine.high %v1465_v60, %v1473_v48 }
 0x268   : > { %v7980_v25 = vadd.f32 %v5839_v62, %v3917_v15  ;;  %v5748_v61 = vadd.f32 %v5747_v18, %v5746_v9  ;;  %v1482_v15 = vld [vmem:[%s8202_s0 + $0x638] sm:$0xff] }
 0x269   : > { %v5841_v6 = vpop.f32.mrf.mxu1  ;;  %v5749_v23 = vpop.f32.mrf.mxu0  ;;  %4451 = vmatmul.mubr.bf16.gmra.mxu0 %v5175_v12 }
 0x26a   : > { %v5842_v29 = vadd.f32 %v5841_v6, %v5840_v0  ;;  %v3920_v31 = vadd.f32 %v5748_v61, %v7764_v13  ;;  %4458 = vmatprep.mubr.bf16.mxu0 %v5192_v20  ;;  %v1466_v13 = vld [vmem:[%s8202_s0 + $0x5b8] sm:$0xff] }
 0x26b   : > { %v5843_v36 = vpop.f32.mrf.mxu1  ;;  %4587 = vmatmul.mubr.bf16.gmra.mxu1 %v5177_v14  ;;  %v5750_v58 = vpop.f32.mrf.mxu0  ;;  %v5210_v59 = vcombine.high %v1466_v13, %v1474_v28 }
 0x26c   : > { %4594 = vmatprep.mubr.bf16.mxu1 %v5194_v22  ;;  %v7989_v8 = vadd.f32 %v5842_v29, %v3920_v31  ;;  %v5751_v24 = vadd.f32 %v5750_v58, %v5749_v23  ;;  %v5209_v22 = vcombine.low %v1466_v13, %v1474_v28  ;;  %v5226_v29 = vcombine.high %v1482_v15, %v1482_v15 }
 0x26d   : > { %v5844_v42 = vpop.f32.mrf.mxu1  ;;  %v5752_v49 = vpop.f32.mrf.mxu0 }
 0x26e   : > { %v5845_v35 = vadd.f32 %v5844_v42, %v5843_v36  ;;  %v3925_v52 = vadd.f32 %v5751_v24, %v7773_v32  ;;  %v1481_v32 = vld [vmem:[%s8202_s0 + $0x630] sm:$0xff] }
 0x26f   : > { %v5846_v33 = vpop.f32.mrf.mxu1  ;;  %v5753_v53 = vpop.f32.mrf.mxu0  ;;  %v5224_v61 = vcombine.high %v1481_v32, %v1481_v32 }
 0x270   : > { %v7998_v1 = vadd.f32 %v5845_v35, %v3925_v52  ;;  %v5754_v27 = vadd.f32 %v5753_v53, %v5752_v49  ;;  %v5225_v49 = vcombine.low %v1482_v15, %v1482_v15 }
 0x271   : > { %v5847_v63 = vpop.f32.mrf.mxu1  ;;  %v5755_v62 = vpop.f32.mrf.mxu0  ;;  %4459 = vmatmul.mubr.bf16.gmra.mxu0 %v5191_v51 }
 0x272   : > { %v5848_v2 = vadd.f32 %v5847_v63, %v5846_v33  ;;  %v3928_v9 = vadd.f32 %v5754_v27, %v7779_v47  ;;  %4466 = vmatprep.mubr.bf16.mxu0 %v5208_v55  ;;  %v5207_v47 = vcombine.low %v1465_v60, %v1473_v48 }
 0x273   : > { %v5849_v12 = vpop.f32.mrf.mxu1  ;;  %4595 = vmatmul.mubr.bf16.gmra.mxu1 %v5193_v38  ;;  %v5756_v26 = vpop.f32.mrf.mxu0 }
 0x274   : > { %4602 = vmatprep.mubr.bf16.mxu1 %v5210_v59  ;;  %v8004_v46 = vadd.f32 %v5848_v2, %v3928_v9  ;;  %v5757_v41 = vadd.f32 %v5756_v26, %v5755_v62 }
 0x275   : > { %v5850_v57 = vpop.f32.mrf.mxu1  ;;  %v5758_v14 = vpop.f32.mrf.mxu0 }
 0x276   : > { %v5851_v0 = vadd.f32 %v5850_v57, %v5849_v12  ;;  %v3933_v20 = vadd.f32 %v5757_v41, %v7785_v3  ;;  %v5223_v3 = vcombine.low %v1481_v32, %v1481_v32 }
 0x277   : > { %v5852_v18 = vpop.f32.mrf.mxu1  ;;  %v5759_v6 = vpop.f32.mrf.mxu0 }
 0x278   : > { %v8010_v23 = vadd.f32 %v5851_v0, %v3933_v20 }
 0x279   : > { %v5853_v31 = vpop.f32.mrf.mxu1  ;;  %v5871_v36 = vpop.f32.mrf.mxu0  ;;  %4467 = vmatmul.mubr.bf16.gmra.mxu0 %v5207_v47 }
 0x27a   : > { %4474 = vmatprep.mubr.bf16.mxu0 %v5224_v61 }
 0x27b   : > { %v5965_v58 = vpop.f32.mrf.mxu1  ;;  %4603 = vmatmul.mubr.bf16.gmra.mxu1 %v5209_v22  ;;  %v5872_v24 = vpop.f32.mrf.mxu0 }
 0x27c   : > { %4610 = vmatprep.mubr.bf16.mxu1 %v5226_v29  ;;  %v5873_v42 = vadd.f32 %v5872_v24, %v5871_v36 }
 0x27d   : > { %v5966_v35 = vpop.f32.mrf.mxu1  ;;  %v5874_v48 = vpop.f32.mrf.mxu0 }
 0x27e   : > { %v5967_v60 = vadd.f32 %v5966_v35, %v5965_v58  ;;  %v4109_v13 = vadd.f32 %v5873_v42, %v7800_v34 }
 0x27f   : > { %v5968_v28 = vpop.f32.mrf.mxu1  ;;  %v5875_v51 = vpop.f32.mrf.mxu0 }
 0x280   : > { %v8013_v52 = vadd.f32 %v5967_v60, %v4109_v13  ;;  %v5876_v33 = vadd.f32 %v5875_v51, %v5874_v48 }
 0x281   : > { %v5969_v38 = vpop.f32.mrf.mxu1  ;;  %v5877_v53 = vpop.f32.mrf.mxu0  ;;  %4475 = vmatmul.mubr.bf16.gmra.mxu0 %v5223_v3 }
 0x282   : > { %v5970_v55 = vadd.f32 %v5969_v38, %v5968_v28  ;;  %v4112_v59 = vadd.f32 %v5876_v33, %v7809_v50 }
 0x283   : > { %v5971_v27 = vpop.f32.mrf.mxu1  ;;  %4611 = vmatmul.mubr.bf16.gmra.mxu1 %v5225_v49  ;;  %v5878_v63 = vpop.f32.mrf.mxu0 }
 0x284   : > { %v8016_v2 = vadd.f32 %v5970_v55, %v4112_v59  ;;  %v5879_v62 = vadd.f32 %v5878_v63, %v5877_v53 }
 0x285   : > { %v5972_v9 = vpop.f32.mrf.mxu1  ;;  %v5880_v12 = vpop.f32.mrf.mxu0 }
 0x286   : > { %v5973_v34 = vadd.f32 %v5972_v9, %v5971_v27  ;;  %v4117_v26 = vadd.f32 %v5879_v62, %v7818_v5 }
 0x287   : > { %v5974_v32 = vpop.f32.mrf.mxu1  ;;  %v5881_v41 = vpop.f32.mrf.mxu0 }
 0x288   : > { %v8019_v57 = vadd.f32 %v5973_v34, %v4117_v26  ;;  %v5882_v15 = vadd.f32 %v5881_v41, %v5880_v12 }
 0x289   : > { %v5975_v0 = vpop.f32.mrf.mxu1  ;;  %v5883_v47 = vpop.f32.mrf.mxu0 }
 0x28a   : > { %v5976_v14 = vadd.f32 %v5975_v0, %v5974_v32  ;;  %v4120_v50 = vadd.f32 %v5882_v15, %v7827_v17 }
 0x28b   : > { %v5977_v20 = vpop.f32.mrf.mxu1  ;;  %v5884_v18 = vpop.f32.mrf.mxu0 }
 0x28c   : > { %v8022_v22 = vadd.f32 %v5976_v14, %v4120_v50  ;;  %v5885_v61 = vadd.f32 %v5884_v18, %v5883_v47 }
 0x28d   : > { %v5978_v6 = vpop.f32.mrf.mxu1  ;;  %v5886_v31 = vpop.f32.mrf.mxu0 }
 0x28e   : > { %v5979_v29 = vadd.f32 %v5978_v6, %v5977_v20  ;;  %v4125_v5 = vadd.f32 %v5885_v61, %v7836_v37 }
 0x28f   : > { %v5980_v36 = vpop.f32.mrf.mxu1  ;;  %v5887_v58 = vpop.f32.mrf.mxu0 }
 0x290   : > { %v8025_v24 = vadd.f32 %v5979_v29, %v4125_v5  ;;  %v5888_v42 = vadd.f32 %v5887_v58, %v5886_v31 }
 0x291   : > { %v5981_v35 = vpop.f32.mrf.mxu1  ;;  %v5889_v48 = vpop.f32.mrf.mxu0 }
 0x292   : > { %v5982_v60 = vadd.f32 %v5981_v35, %v5980_v36  ;;  %v4128_v17 = vadd.f32 %v5888_v42, %v7845_v7 }
 0x293   : > { %v5983_v3 = vpop.f32.mrf.mxu1  ;;  %v5890_v13 = vpop.f32.mrf.mxu0 }
 0x294   : > { %v8028_v28 = vadd.f32 %v5982_v60, %v4128_v17  ;;  %v5891_v49 = vadd.f32 %v5890_v13, %v5889_v48 }
 0x295   : > { %v5984_v51 = vpop.f32.mrf.mxu1  ;;  %v5892_v38 = vpop.f32.mrf.mxu0 }
 0x296   : > { %v5985_v33 = vadd.f32 %v5984_v51, %v5983_v3  ;;  %v4133_v37 = vadd.f32 %v5891_v49, %v7854_v21 }
 0x297   : > { %v5986_v55 = vpop.f32.mrf.mxu1  ;;  %v5893_v53 = vpop.f32.mrf.mxu0 }
 0x298   : > { %v8031_v59 = vadd.f32 %v5985_v33, %v4133_v37  ;;  %v5894_v27 = vadd.f32 %v5893_v53, %v5892_v38 }
 0x299   : > { %v5987_v63 = vpop.f32.mrf.mxu1  ;;  %v5895_v9 = vpop.f32.mrf.mxu0 }
 0x29a   : > { %v5988_v62 = vadd.f32 %v5987_v63, %v5986_v55  ;;  %v4136_v7 = vadd.f32 %v5894_v27, %v7863_v40 }
 0x29b   : > { %v5989_v34 = vpop.f32.mrf.mxu1  ;;  %v5896_v12 = vpop.f32.mrf.mxu0 }
 0x29c   : > { %v8034_v26 = vadd.f32 %v5988_v62, %v4136_v7  ;;  %v5897_v32 = vadd.f32 %v5896_v12, %v5895_v9 }
 0x29d   : > { %v5990_v41 = vpop.f32.mrf.mxu1  ;;  %v5898_v0 = vpop.f32.mrf.mxu0 }
 0x29e   : > { %v5991_v15 = vadd.f32 %v5990_v41, %v5989_v34  ;;  %v4141_v21 = vadd.f32 %v5897_v32, %v7872_v56 }
 0x29f   : > { %v5992_v14 = vpop.f32.mrf.mxu1  ;;  %v5899_v47 = vpop.f32.mrf.mxu0 }
 0x2a0   : > { %v8037_v50 = vadd.f32 %v5991_v15, %v4141_v21  ;;  %v5900_v20 = vadd.f32 %v5899_v47, %v5898_v0 }
 0x2a1   : > { %v5993_v18 = vpop.f32.mrf.mxu1  ;;  %v5901_v6 = vpop.f32.mrf.mxu0 }
 0x2a2   : > { %v5994_v61 = vadd.f32 %v5993_v18, %v5992_v14  ;;  %v4144_v40 = vadd.f32 %v5900_v20, %v7881_v10 }
 0x2a3   : > { %v5995_v29 = vpop.f32.mrf.mxu1  ;;  %v5902_v31 = vpop.f32.mrf.mxu0 }
 0x2a4   : > { %v8040_v5 = vadd.f32 %v5994_v61, %v4144_v40  ;;  %v5903_v36 = vadd.f32 %v5902_v31, %v5901_v6 }
 0x2a5   : > { %v5996_v58 = vpop.f32.mrf.mxu1  ;;  %v5904_v35 = vpop.f32.mrf.mxu0 }
 0x2a6   : > { %v5997_v42 = vadd.f32 %v5996_v58, %v5995_v29  ;;  %v4149_v56 = vadd.f32 %v5903_v36, %v7890_v30 }
 0x2a7   : > { %v5998_v60 = vpop.f32.mrf.mxu1  ;;  %v5905_v48 = vpop.f32.mrf.mxu0 }
 0x2a8   : > { %v8043_v17 = vadd.f32 %v5997_v42, %v4149_v56  ;;  %v5906_v3 = vadd.f32 %v5905_v48, %v5904_v35 }
 0x2a9   : > { %v5999_v13 = vpop.f32.mrf.mxu1  ;;  %v5907_v51 = vpop.f32.mrf.mxu0 }
 0x2aa   : > { %v6000_v49 = vadd.f32 %v5999_v13, %v5998_v60  ;;  %v4152_v10 = vadd.f32 %v5906_v3, %v7899_v44 }
 0x2ab   : > { %v6001_v33 = vpop.f32.mrf.mxu1  ;;  %v5908_v38 = vpop.f32.mrf.mxu0 }
 0x2ac   : > { %v8046_v37 = vadd.f32 %v6000_v49, %v4152_v10  ;;  %v5909_v55 = vadd.f32 %v5908_v38, %v5907_v51 }
 0x2ad   : > { %v6002_v53 = vpop.f32.mrf.mxu1  ;;  %v5910_v63 = vpop.f32.mrf.mxu0 }
 0x2ae   : > { %v6003_v27 = vadd.f32 %v6002_v53, %v6001_v33  ;;  %v4157_v30 = vadd.f32 %v5909_v55, %v7908_v4 }
 0x2af   : > { %v6004_v62 = vpop.f32.mrf.mxu1  ;;  %v5911_v9 = vpop.f32.mrf.mxu0 }
 0x2b0   : > { %v8049_v7 = vadd.f32 %v6003_v27, %v4157_v30  ;;  %v5912_v34 = vadd.f32 %v5911_v9, %v5910_v63 }
 0x2b1   : > { %v6005_v12 = vpop.f32.mrf.mxu1  ;;  %v5913_v41 = vpop.f32.mrf.mxu0 }
 0x2b2   : > { %v6006_v32 = vadd.f32 %v6005_v12, %v6004_v62  ;;  %v4160_v44 = vadd.f32 %v5912_v34, %v7917_v16 }
 0x2b3   : > { %v6007_v15 = vpop.f32.mrf.mxu1  ;;  %v5914_v0 = vpop.f32.mrf.mxu0 }
 0x2b4   : > { %v8052_v21 = vadd.f32 %v6006_v32, %v4160_v44  ;;  %v5915_v14 = vadd.f32 %v5914_v0, %v5913_v41 }
 0x2b5   : > { %v6008_v47 = vpop.f32.mrf.mxu1  ;;  %v5916_v18 = vpop.f32.mrf.mxu0 }
 0x2b6   : > { %v6009_v20 = vadd.f32 %v6008_v47, %v6007_v15  ;;  %v4165_v4 = vadd.f32 %v5915_v14, %v7926_v43 }
 0x2b7   : > { %v6010_v61 = vpop.f32.mrf.mxu1  ;;  %v5917_v6 = vpop.f32.mrf.mxu0 }
 0x2b8   : > { %v8055_v40 = vadd.f32 %v6009_v20, %v4165_v4  ;;  %v5918_v29 = vadd.f32 %v5917_v6, %v5916_v18 }
 0x2b9   : > { %v6011_v31 = vpop.f32.mrf.mxu1  ;;  %v5919_v58 = vpop.f32.mrf.mxu0 }
 0x2ba   : > { %v6012_v36 = vadd.f32 %v6011_v31, %v6010_v61  ;;  %v4168_v16 = vadd.f32 %v5918_v29, %v7935_v45 }
 0x2bb   : > { %v6013_v42 = vpop.f32.mrf.mxu1  ;;  %v5920_v35 = vpop.f32.mrf.mxu0 }
 0x2bc   : > { %v8058_v56 = vadd.f32 %v6012_v36, %v4168_v16  ;;  %v5921_v60 = vadd.f32 %v5920_v35, %v5919_v58 }
 0x2bd   : > { %v6014_v48 = vpop.f32.mrf.mxu1  ;;  %v5922_v13 = vpop.f32.mrf.mxu0 }
 0x2be   : > { %v6015_v3 = vadd.f32 %v6014_v48, %v6013_v42  ;;  %v4173_v43 = vadd.f32 %v5921_v60, %v7944_v19 }
 0x2bf   : > { %v6016_v49 = vpop.f32.mrf.mxu1  ;;  %v5923_v51 = vpop.f32.mrf.mxu0 }
 0x2c0   : > { %v8061_v10 = vadd.f32 %v6015_v3, %v4173_v43  ;;  %v5924_v33 = vadd.f32 %v5923_v51, %v5922_v13 }
 0x2c1   : > { %v6017_v38 = vpop.f32.mrf.mxu1  ;;  %v5925_v53 = vpop.f32.mrf.mxu0 }
 0x2c2   : > { %v6018_v55 = vadd.f32 %v6017_v38, %v6016_v49  ;;  %v4176_v45 = vadd.f32 %v5924_v33, %v7953_v11 }
 0x2c3   : > { %v6019_v27 = vpop.f32.mrf.mxu1  ;;  %v5926_v63 = vpop.f32.mrf.mxu0 }
 0x2c4   : > { %v8064_v30 = vadd.f32 %v6018_v55, %v4176_v45  ;;  %v5927_v62 = vadd.f32 %v5926_v63, %v5925_v53 }
 0x2c5   : > { %v6020_v9 = vpop.f32.mrf.mxu1  ;;  %v5928_v12 = vpop.f32.mrf.mxu0 }
 0x2c6   : > { %v6021_v34 = vadd.f32 %v6020_v9, %v6019_v27  ;;  %v4181_v19 = vadd.f32 %v5927_v62, %v7962_v54 }
 0x2c7   : > { %v6022_v32 = vpop.f32.mrf.mxu1  ;;  %v5929_v41 = vpop.f32.mrf.mxu0 }
 0x2c8   : > { %v8067_v44 = vadd.f32 %v6021_v34, %v4181_v19  ;;  %v5930_v15 = vadd.f32 %v5929_v41, %v5928_v12 }
 0x2c9   : > { %v6023_v0 = vpop.f32.mrf.mxu1  ;;  %v5931_v47 = vpop.f32.mrf.mxu0 }
 0x2ca   : > { %v6024_v14 = vadd.f32 %v6023_v0, %v6022_v32  ;;  %v4184_v11 = vadd.f32 %v5930_v15, %v7971_v39 }
 0x2cb   : > { %v6025_v20 = vpop.f32.mrf.mxu1  ;;  %v5932_v18 = vpop.f32.mrf.mxu0 }
 0x2cc   : > { %v8070_v4 = vadd.f32 %v6024_v14, %v4184_v11  ;;  %v5933_v61 = vadd.f32 %v5932_v18, %v5931_v47 }
 0x2cd   : > { %v6026_v6 = vpop.f32.mrf.mxu1  ;;  %v5934_v31 = vpop.f32.mrf.mxu0 }
 0x2ce   : > { %v6027_v29 = vadd.f32 %v6026_v6, %v6025_v20  ;;  %v4189_v54 = vadd.f32 %v5933_v61, %v7980_v25 }
 0x2cf   : > { %v6028_v36 = vpop.f32.mrf.mxu1  ;;  %v5935_v58 = vpop.f32.mrf.mxu0 }
 0x2d0   : > { %v8073_v16 = vadd.f32 %v6027_v29, %v4189_v54  ;;  %v5936_v42 = vadd.f32 %v5935_v58, %v5934_v31 }
 0x2d1   : > { %v6029_v35 = vpop.f32.mrf.mxu1  ;;  %v5937_v48 = vpop.f32.mrf.mxu0 }
 0x2d2   : > { %v6030_v60 = vadd.f32 %v6029_v35, %v6028_v36  ;;  %v4192_v39 = vadd.f32 %v5936_v42, %v7989_v8 }
 0x2d3   : > { %v6031_v3 = vpop.f32.mrf.mxu1  ;;  %v5938_v13 = vpop.f32.mrf.mxu0 }
 0x2d4   : > { %v8076_v43 = vadd.f32 %v6030_v60, %v4192_v39  ;;  %v5939_v49 = vadd.f32 %v5938_v13, %v5937_v48 }
 0x2d5   : > { %v6032_v51 = vpop.f32.mrf.mxu1  ;;  %v5940_v38 = vpop.f32.mrf.mxu0 }
 0x2d6   : > { %v6033_v33 = vadd.f32 %v6032_v51, %v6031_v3  ;;  %v4197_v25 = vadd.f32 %v5939_v49, %v7998_v1 }
 0x2d7   : > { %v6034_v55 = vpop.f32.mrf.mxu1  ;;  %v5941_v53 = vpop.f32.mrf.mxu0 }
 0x2d8   : > { %v8079_v45 = vadd.f32 %v6033_v33, %v4197_v25  ;;  %v5942_v27 = vadd.f32 %v5941_v53, %v5940_v38 }
 0x2d9   : > { %v6035_v63 = vpop.f32.mrf.mxu1  ;;  %v5943_v9 = vpop.f32.mrf.mxu0 }
 0x2da   : > { %v6036_v62 = vadd.f32 %v6035_v63, %v6034_v55  ;;  %v4200_v8 = vadd.f32 %v5942_v27, %v8004_v46 }
 0x2db   : > { %v6037_v34 = vpop.f32.mrf.mxu1  ;;  %v5944_v12 = vpop.f32.mrf.mxu0 }
 0x2dc   : > { %v8082_v19 = vadd.f32 %v6036_v62, %v4200_v8  ;;  %v5945_v32 = vadd.f32 %v5944_v12, %v5943_v9 }
 0x2dd   : > { %v6038_v41 = vpop.f32.mrf.mxu1  ;;  %v5946_v0 = vpop.f32.mrf.mxu0 }
 0x2de   : > { %v6039_v15 = vadd.f32 %v6038_v41, %v6037_v34  ;;  %v4205_v1 = vadd.f32 %v5945_v32, %v8010_v23 }
 0x2df   : > { %v6040_v14 = vpop.f32.mrf.mxu1  ;;  %v5947_v47 = vpop.f32.mrf.mxu0 }
 0x2e0   : > { %v8085_v11 = vadd.f32 %v6039_v15, %v4205_v1 }
 0x2e1   : > { %v6041_v20 = vpop.f32.mrf.mxu1  ;;  %v6059_v18 = vpop.f32.mrf.mxu0 }
 0x2e3   : > { %v6153_v61 = vpop.f32.mrf.mxu1  ;;  %v6060_v6 = vpop.f32.mrf.mxu0 }
 0x2e4   : > { %v6061_v46 = vadd.f32 %v6060_v6, %v6059_v18 }
 0x2e5   : > { %v6154_v29 = vpop.f32.mrf.mxu1  ;;  %v6062_v31 = vpop.f32.mrf.mxu0 }
 0x2e6   : > { %v4381_v54 = vadd.f32 %v6061_v46, %v8013_v52  ;;  %v6155_v42 = vadd.f32 %v6154_v29, %v6153_v61 }
 0x2e7   : > { %v6156_v36 = vpop.f32.mrf.mxu1  ;;  %v6063_v58 = vpop.f32.mrf.mxu0 }
 0x2e8   : > { %v6064_v35 = vadd.f32 %v6063_v58, %v6062_v31  ;;  %v4517_v48 = vadd.f32 %v6155_v42, %v4381_v54 }
 0x2e9   : > { %v6157_v60 = vpop.f32.mrf.mxu1  ;;  %v6065_v23 = vpop.f32.mrf.mxu0 }
 0x2ea   : > { %v4384_v39 = vadd.f32 %v6064_v35, %v8016_v2  ;;  %v6158_v3 = vadd.f32 %v6157_v60, %v6156_v36  ;;  %v4618_v55 = vmax.f32 %v4517_v48, 0.0 }
 0x2eb   : > { %v6159_v13 = vpop.f32.mrf.mxu1  ;;  %v6066_v49 = vpop.f32.mrf.mxu0 }
 0x2ec   : > { %v4520_v51 = vadd.f32 %v6158_v3, %v4384_v39  ;;  %v6067_v33 = vadd.f32 %v6066_v49, %v6065_v23 }
 0x2ed   : > { %v6160_v38 = vpop.f32.mrf.mxu1  ;;  %v6068_v25 = vpop.f32.mrf.mxu0 }
 0x2ee   : > { %v4619_v52 = vmax.f32 %v4520_v51, 0.0  ;;  %v4389_v53 = vadd.f32 %v6067_v33, %v8019_v57  ;;  %v6161_v9 = vadd.f32 %v6160_v38, %v6159_v13 }
 0x2ef   : > { %v6162_v27 = vpop.f32.mrf.mxu1  ;;  %v6069_v63 = vpop.f32.mrf.mxu0 }
 0x2f0   : > { %v5411_v62 = vpack.c.bf16 %v4619_v52, %v4618_v55  ;;  %v6070_v8 = vadd.f32 %v6069_v63, %v6068_v25  ;;  %v4525_v12 = vadd.f32 %v6161_v9, %v4389_v53 }
 0x2f1   : > { %v6163_v34 = vpop.f32.mrf.mxu1  ;;  %v6071_v2 = vpop.f32.mrf.mxu0 }
 0x2f2   : > { %5412 = vst [vmem:[%s8092_s10] sm:$0xff] %v5411_v62   ;;  %v4392_v32 = vadd.f32 %v6070_v8, %v8022_v22  ;;  %v6164_v41 = vadd.f32 %v6163_v34, %v6162_v27  ;;  %v4620_v20 = vmax.f32 %v4525_v12, 0.0 }
 0x2f3   : > { %v6165_v15 = vpop.f32.mrf.mxu1  ;;  %v6072_v0 = vpop.f32.mrf.mxu0 }
 0x2f4   : > { %v4528_v1 = vadd.f32 %v6164_v41, %v4392_v32  ;;  %v6073_v57 = vadd.f32 %v6072_v0, %v6071_v2 }
 0x2f5   : > { %v6166_v14 = vpop.f32.mrf.mxu1  ;;  %v6074_v47 = vpop.f32.mrf.mxu0 }
 0x2f6   : > { %v4621_v18 = vmax.f32 %v4528_v1, 0.0  ;;  %v4397_v61 = vadd.f32 %v6073_v57, %v8025_v24  ;;  %v6167_v31 = vadd.f32 %v6166_v14, %v6165_v15 }
 0x2f7   : > { %v6168_v6 = vpop.f32.mrf.mxu1  ;;  %v6075_v46 = vpop.f32.mrf.mxu0 }
 0x2f8   : > { %v5416_v29 = vpack.c.bf16 %v4621_v18, %v4620_v20  ;;  %v6076_v54 = vadd.f32 %v6075_v46, %v6074_v47  ;;  %v4533_v22 = vadd.f32 %v6167_v31, %v4397_v61 }
 0x2f9   : > { %v6169_v36 = vpop.f32.mrf.mxu1  ;;  %v6077_v58 = vpop.f32.mrf.mxu0 }
 0x2fa   : > { %5468 = vst [vmem:[%s8092_s10 + $0x8] sm:$0xff] %v5416_v29   ;;  %v4400_v42 = vadd.f32 %v6076_v54, %v8028_v28  ;;  %v6170_v35 = vadd.f32 %v6169_v36, %v6168_v6  ;;  %v4622_v24 = vmax.f32 %v4533_v22, 0.0 }
 0x2fb   : > { %v6171_v60 = vpop.f32.mrf.mxu1  ;;  %v6078_v23 = vpop.f32.mrf.mxu0 }
 0x2fc   : > { %v4536_v48 = vadd.f32 %v6170_v35, %v4400_v42  ;;  %v6079_v39 = vadd.f32 %v6078_v23, %v6077_v58 }
 0x2fd   : > { %v6172_v3 = vpop.f32.mrf.mxu1  ;;  %v6080_v13 = vpop.f32.mrf.mxu0 }
 0x2fe   : > { %v4623_v49 = vmax.f32 %v4536_v48, 0.0  ;;  %v4405_v51 = vadd.f32 %v6079_v39, %v8031_v59  ;;  %v6173_v55 = vadd.f32 %v6172_v3, %v6171_v60 }
 0x2ff   : > { %v6174_v33 = vpop.f32.mrf.mxu1  ;;  %v6081_v38 = vpop.f32.mrf.mxu0 }
 0x300   : > { %v5421_v25 = vpack.c.bf16 %v4623_v49, %v4622_v24  ;;  %v6082_v52 = vadd.f32 %v6081_v38, %v6080_v13  ;;  %v4541_v28 = vadd.f32 %v6173_v55, %v4405_v51 }
 0x301   : > { %v6175_v53 = vpop.f32.mrf.mxu1  ;;  %v6083_v27 = vpop.f32.mrf.mxu0 }
 0x302   : > { %5469 = vst [vmem:[%s8092_s10 + $0x10] sm:$0xff] %v5421_v25   ;;  %v4408_v63 = vadd.f32 %v6082_v52, %v8034_v26  ;;  %v6176_v62 = vadd.f32 %v6175_v53, %v6174_v33  ;;  %v4624_v59 = vmax.f32 %v4541_v28, 0.0 }
 0x303   : > { %v6177_v9 = vpop.f32.mrf.mxu1  ;;  %v6084_v8 = vpop.f32.mrf.mxu0 }
 0x304   : > { %v4544_v34 = vadd.f32 %v6176_v62, %v4408_v63  ;;  %v6085_v2 = vadd.f32 %v6084_v8, %v6083_v27 }
 0x305   : > { %v6178_v12 = vpop.f32.mrf.mxu1  ;;  %v6086_v32 = vpop.f32.mrf.mxu0 }
 0x306   : > { %v4625_v41 = vmax.f32 %v4544_v34, 0.0  ;;  %v4413_v15 = vadd.f32 %v6085_v2, %v8037_v50  ;;  %v6179_v14 = vadd.f32 %v6178_v12, %v6177_v9 }
 0x307   : > { %v6180_v0 = vpop.f32.mrf.mxu1  ;;  %v6087_v1 = vpop.f32.mrf.mxu0 }
 0x308   : > { %v5426_v57 = vpack.c.bf16 %v4625_v41, %v4624_v59  ;;  %v6088_v47 = vadd.f32 %v6087_v1, %v6086_v32  ;;  %v4549_v26 = vadd.f32 %v6179_v14, %v4413_v15 }
 0x309   : > { %v6181_v20 = vpop.f32.mrf.mxu1  ;;  %v6089_v18 = vpop.f32.mrf.mxu0 }
 0x30a   : > { %5470 = vst [vmem:[%s8092_s10 + $0x18] sm:$0xff] %v5426_v57   ;;  %v4416_v61 = vadd.f32 %v6088_v47, %v8040_v5  ;;  %v6182_v6 = vadd.f32 %v6181_v20, %v6180_v0  ;;  %v4626_v50 = vmax.f32 %v4549_v26, 0.0 }
 0x30b   : > { %v6183_v46 = vpop.f32.mrf.mxu1  ;;  %v6090_v29 = vpop.f32.mrf.mxu0 }
 0x30c   : > { %v4552_v31 = vadd.f32 %v6182_v6, %v4416_v61  ;;  %v6091_v54 = vadd.f32 %v6090_v29, %v6089_v18 }
 0x30d   : > { %v6184_v36 = vpop.f32.mrf.mxu1  ;;  %v6092_v58 = vpop.f32.mrf.mxu0 }
 0x30e   : > { %v4627_v22 = vmax.f32 %v4552_v31, 0.0  ;;  %v4421_v42 = vadd.f32 %v6091_v54, %v8043_v17  ;;  %v6185_v48 = vadd.f32 %v6184_v36, %v6183_v46 }
 0x30f   : > { %v6186_v35 = vpop.f32.mrf.mxu1  ;;  %v6093_v60 = vpop.f32.mrf.mxu0 }
 0x310   : > { %v5431_v23 = vpack.c.bf16 %v4627_v22, %v4626_v50  ;;  %v6094_v39 = vadd.f32 %v6093_v60, %v6092_v58  ;;  %v4557_v5 = vadd.f32 %v6185_v48, %v4421_v42 }
 0x311   : > { %v6187_v3 = vpop.f32.mrf.mxu1  ;;  %v6095_v13 = vpop.f32.mrf.mxu0 }
 0x312   : > { %5471 = vst [vmem:[%s8092_s10 + $0x20] sm:$0xff] %v5431_v23   ;;  %v4424_v24 = vadd.f32 %v6094_v39, %v8046_v37  ;;  %v6188_v49 = vadd.f32 %v6187_v3, %v6186_v35  ;;  %v4628_v17 = vmax.f32 %v4557_v5, 0.0 }
 0x313   : > { %v6189_v51 = vpop.f32.mrf.mxu1  ;;  %v6096_v33 = vpop.f32.mrf.mxu0 }
 0x314   : > { %v4560_v38 = vadd.f32 %v6188_v49, %v4424_v24  ;;  %v6097_v25 = vadd.f32 %v6096_v33, %v6095_v13 }
 0x315   : > { %v6190_v55 = vpop.f32.mrf.mxu1  ;;  %v6098_v52 = vpop.f32.mrf.mxu0 }
 0x316   : > { %v4629_v53 = vmax.f32 %v4560_v38, 0.0  ;;  %v4429_v27 = vadd.f32 %v6097_v25, %v8049_v7  ;;  %v6191_v9 = vadd.f32 %v6190_v55, %v6189_v51 }
 0x317   : > { %v6192_v28 = vpop.f32.mrf.mxu1  ;;  %v6099_v63 = vpop.f32.mrf.mxu0 }
 0x318   : > { %v5436_v62 = vpack.c.bf16 %v4629_v53, %v4628_v17  ;;  %v6100_v8 = vadd.f32 %v6099_v63, %v6098_v52  ;;  %v4565_v37 = vadd.f32 %v6191_v9, %v4429_v27 }
 0x319   : > { %v6193_v34 = vpop.f32.mrf.mxu1  ;;  %v6101_v2 = vpop.f32.mrf.mxu0 }
 0x31a   : > { %5472 = vst [vmem:[%s8092_s10 + $0x28] sm:$0xff] %v5436_v62   ;;  %v4432_v12 = vadd.f32 %v6100_v8, %v8052_v21  ;;  %v6194_v32 = vadd.f32 %v6193_v34, %v6192_v28  ;;  %v4630_v7 = vmax.f32 %v4565_v37, 0.0 }
 0x31b   : > { %v6195_v59 = vpop.f32.mrf.mxu1  ;;  %v6102_v41 = vpop.f32.mrf.mxu0 }
 0x31c   : > { %v4568_v15 = vadd.f32 %v6194_v32, %v4432_v12  ;;  %v6103_v0 = vadd.f32 %v6102_v41, %v6101_v2 }
 0x31d   : > { %v6196_v1 = vpop.f32.mrf.mxu1  ;;  %v6104_v57 = vpop.f32.mrf.mxu0 }
 0x31e   : > { %v4631_v14 = vmax.f32 %v4568_v15, 0.0  ;;  %v4437_v47 = vadd.f32 %v6103_v0, %v8055_v40  ;;  %v6197_v61 = vadd.f32 %v6196_v1, %v6195_v59 }
 0x31f   : > { %v6198_v20 = vpop.f32.mrf.mxu1  ;;  %v6105_v18 = vpop.f32.mrf.mxu0 }
 0x320   : > { %v5441_v26 = vpack.c.bf16 %v4631_v14, %v4630_v7  ;;  %v6106_v6 = vadd.f32 %v6105_v18, %v6104_v57  ;;  %v4573_v21 = vadd.f32 %v6197_v61, %v4437_v47 }
 0x321   : > { %v6199_v46 = vpop.f32.mrf.mxu1  ;;  %v6107_v29 = vpop.f32.mrf.mxu0 }
 0x322   : > { %5473 = vst [vmem:[%s8092_s10 + $0x30] sm:$0xff] %v5441_v26   ;;  %v4440_v31 = vadd.f32 %v6106_v6, %v8058_v56  ;;  %v6200_v54 = vadd.f32 %v6199_v46, %v6198_v20  ;;  %v4632_v40 = vmax.f32 %v4573_v21, 0.0 }
 0x323   : > { %v6201_v36 = vpop.f32.mrf.mxu1  ;;  %v6108_v58 = vpop.f32.mrf.mxu0 }
 0x324   : > { %v4576_v50 = vadd.f32 %v6200_v54, %v4440_v31  ;;  %v6109_v22 = vadd.f32 %v6108_v58, %v6107_v29 }
 0x325   : > { %v6202_v42 = vpop.f32.mrf.mxu1  ;;  %v6110_v35 = vpop.f32.mrf.mxu0 }
 0x326   : > { %v4633_v60 = vmax.f32 %v4576_v50, 0.0  ;;  %v4445_v23 = vadd.f32 %v6109_v22, %v8061_v10  ;;  %v6203_v13 = vadd.f32 %v6202_v42, %v6201_v36 }
 0x327   : > { %v6204_v48 = vpop.f32.mrf.mxu1  ;;  %v6111_v39 = vpop.f32.mrf.mxu0 }
 0x328   : > { %v5446_v3 = vpack.c.bf16 %v4633_v60, %v4632_v40  ;;  %v6112_v5 = vadd.f32 %v6111_v39, %v6110_v35  ;;  %v4581_v56 = vadd.f32 %v6203_v13, %v4445_v23 }
 0x329   : > { %v6205_v24 = vpop.f32.mrf.mxu1  ;;  %v6113_v49 = vpop.f32.mrf.mxu0 }
 0x32a   : > { %5474 = vst [vmem:[%s8092_s10 + $0x38] sm:$0xff] %v5446_v3   ;;  %v4448_v51 = vadd.f32 %v6112_v5, %v8064_v30  ;;  %v6206_v33 = vadd.f32 %v6205_v24, %v6204_v48  ;;  %v4634_v10 = vmax.f32 %v4581_v56, 0.0 }
 0x32b   : > { %v6207_v38 = vpop.f32.mrf.mxu1  ;;  %v6114_v25 = vpop.f32.mrf.mxu0 }
 0x32c   : > { %v4584_v55 = vadd.f32 %v6206_v33, %v4448_v51  ;;  %v6115_v52 = vadd.f32 %v6114_v25, %v6113_v49 }
 0x32d   : > { %v6208_v17 = vpop.f32.mrf.mxu1  ;;  %v6116_v53 = vpop.f32.mrf.mxu0 }
 0x32e   : > { %v4635_v27 = vmax.f32 %v4584_v55, 0.0  ;;  %v4453_v28 = vadd.f32 %v6115_v52, %v8067_v44  ;;  %v6209_v8 = vadd.f32 %v6208_v17, %v6207_v38 }
 0x32f   : > { %v6210_v63 = vpop.f32.mrf.mxu1  ;;  %v6117_v62 = vpop.f32.mrf.mxu0 }
 0x330   : > { %v5451_v9 = vpack.c.bf16 %v4635_v27, %v4634_v10  ;;  %v6118_v34 = vadd.f32 %v6117_v62, %v6116_v53  ;;  %v4589_v30 = vadd.f32 %v6209_v8, %v4453_v28  ;;  %v4801_v8 = vld [vmem:[%s8092_s10 + $0x8] sm:$0xf] (%p6511_p6) }
 0x331   : > { %v6211_v2 = vpop.f32.mrf.mxu1  ;;  %v6119_v37 = vpop.f32.mrf.mxu0  ;;  %4802 = vst [vmem:[%s8137_s18 + $0x10] sm:$0xf] (%p6511_p6), %v4801_v8 }
 0x332   : > { %5475 = vst [vmem:[%s8092_s10 + $0x40] sm:$0xff] %v5451_v9   ;;  %v4456_v12 = vadd.f32 %v6118_v34, %v8070_v4  ;;  %v6212_v32 = vadd.f32 %v6211_v2, %v6210_v63  ;;  %v4636_v44 = vmax.f32 %v4589_v30, 0.0  ;;  %v4799_v9 = vld [vmem:[%s8092_s10 + $0x4] sm:$0xf] (%p6511_p6)  ;;  %v4803_v34 = vld [vmem:[%s8092_s10 + $0xc] sm:$0xf] (%p6511_p6) }
 0x333   : > { %v6213_v59 = vpop.f32.mrf.mxu1  ;;  %v6120_v41 = vpop.f32.mrf.mxu0  ;;  %v4805_v2 = vld [vmem:[%s8092_s10 + $0x10] sm:$0xf] (%p6511_p6)  ;;  %4800 = vst [vmem:[%s8137_s18 + $0x8] sm:$0xf] (%p6511_p6), %v4799_v9  ;;  %4804 = vst [vmem:[%s8137_s18 + $0x18] sm:$0xf] (%p6511_p6), %v4803_v34 }
 0x334   : > { %v4592_v15 = vadd.f32 %v6212_v32, %v4456_v12  ;;  %v6121_v0 = vadd.f32 %v6120_v41, %v6119_v37  ;;  %4806 = vst [vmem:[%s8137_s18 + $0x20] sm:$0xf] (%p6511_p6), %v4805_v2  ;;  %v4807_v37 = vld [vmem:[%s8092_s10 + $0x14] sm:$0xf] (%p6511_p6)  ;;  %v4809_v30 = vld [vmem:[%s8092_s10 + $0x18] sm:$0xf] (%p6511_p6) }
 0x335   : > { %v6214_v1 = vpop.f32.mrf.mxu1  ;;  %v6122_v57 = vpop.f32.mrf.mxu0  ;;  %v4811_v12 = vld [vmem:[%s8092_s10 + $0x1c] sm:$0xf] (%p6511_p6)  ;;  %4808 = vst [vmem:[%s8137_s18 + $0x28] sm:$0xf] (%p6511_p6), %v4807_v37  ;;  %4810 = vst [vmem:[%s8137_s18 + $0x30] sm:$0xf] (%p6511_p6), %v4809_v30 }
 0x336   : > { %v4637_v7 = vmax.f32 %v4592_v15, 0.0  ;;  %v4461_v14 = vadd.f32 %v6121_v0, %v8073_v16  ;;  %v6215_v26 = vadd.f32 %v6214_v1, %v6213_v59  ;;  %4812 = vst [vmem:[%s8137_s18 + $0x38] sm:$0xf] (%p6511_p6), %v4811_v12  ;;  %v4813_v32 = vld [vmem:[%s8092_s10 + $0x20] sm:$0xf] (%p6511_p6) }
 0x337   : > { %v6216_v47 = vpop.f32.mrf.mxu1  ;;  %v6123_v20 = vpop.f32.mrf.mxu0  ;;  %v4815_v59 = vld [vmem:[%s8092_s10 + $0x24] sm:$0xf] (%p6511_p6)  ;;  %v4817_v41 = vld [vmem:[%s8092_s10 + $0x28] sm:$0xf] (%p6511_p6)  ;;  %4814 = vst [vmem:[%s8137_s18 + $0x40] sm:$0xf] (%p6511_p6), %v4813_v32 }
 0x338   : > { %v5456_v18 = vpack.c.bf16 %v4637_v7, %v4636_v44  ;;  %v6124_v61 = vadd.f32 %v6123_v20, %v6122_v57  ;;  %v4597_v4 = vadd.f32 %v6215_v26, %v4461_v14  ;;  %4816 = vst [vmem:[%s8137_s18 + $0x48] sm:$0xf] (%p6511_p6), %v4815_v59  ;;  %4818 = vst [vmem:[%s8137_s18 + $0x50] sm:$0xf] (%p6511_p6), %v4817_v41  ;;  %v4819_v15 = vld [vmem:[%s8092_s10 + $0x2c] sm:$0xf] (%p6511_p6) }
 0x339   : > { %v6217_v6 = vpop.f32.mrf.mxu1  ;;  %v6125_v46 = vpop.f32.mrf.mxu0  ;;  %v4821_v0 = vld [vmem:[%s8092_s10 + $0x30] sm:$0xf] (%p6511_p6)  ;;  %v4823_v1 = vld [vmem:[%s8092_s10 + $0x34] sm:$0xf] (%p6511_p6)  ;;  %4820 = vst [vmem:[%s8137_s18 + $0x58] sm:$0xf] (%p6511_p6), %v4819_v15 }
 0x33a   : > { %5476 = vst [vmem:[%s8092_s10 + $0x48] sm:$0xff] %v5456_v18   ;;  %v4464_v29 = vadd.f32 %v6124_v61, %v8076_v43  ;;  %v6218_v21 = vadd.f32 %v6217_v6, %v6216_v47  ;;  %v4638_v16 = vmax.f32 %v4597_v4, 0.0  ;;  %4822 = vst [vmem:[%s8137_s18 + $0x60] sm:$0xf] (%p6511_p6), %v4821_v0  ;;  %v4825_v57 = vld [vmem:[%s8092_s10 + $0x38] sm:$0xf] (%p6511_p6) }
 0x33b   : > { %v6219_v31 = vpop.f32.mrf.mxu1  ;;  %v6126_v54 = vpop.f32.mrf.mxu0  ;;  %4824 = vst [vmem:[%s8137_s18 + $0x68] sm:$0xf] (%p6511_p6), %v4823_v1  ;;  %v4827_v44 = vld [vmem:[%s8092_s10 + $0x3c] sm:$0xf] (%p6511_p6)  ;;  %v4829_v7 = vld [vmem:[%s8092_s10 + $0x40] sm:$0xf] (%p6511_p6) }
 0x33c   : > { %v4600_v36 = vadd.f32 %v6218_v21, %v4464_v29  ;;  %v6127_v58 = vadd.f32 %v6126_v54, %v6125_v46  ;;  %4826 = vst [vmem:[%s8137_s18 + $0x70] sm:$0xf] (%p6511_p6), %v4825_v57  ;;  %4828 = vst [vmem:[%s8137_s18 + $0x78] sm:$0xf] (%p6511_p6), %v4827_v44  ;;  %v4831_v14 = vld [vmem:[%s8092_s10 + $0x44] sm:$0xf] (%p6511_p6) }
 0x33d   : > { %v6220_v50 = vpop.f32.mrf.mxu1  ;;  %v6128_v22 = vpop.f32.mrf.mxu0  ;;  %4830 = vst [vmem:[%s8137_s18 + $0x80] sm:$0xf] (%p6511_p6), %v4829_v7  ;;  %4832 = vst [vmem:[%s8137_s18 + $0x88] sm:$0xf] (%p6511_p6), %v4831_v14 }
 0x33e   : > { %v4639_v42 = vmax.f32 %v4600_v36, 0.0  ;;  %v4469_v35 = vadd.f32 %v6127_v58, %v8079_v45  ;;  %v6221_v48 = vadd.f32 %v6220_v50, %v6219_v31 }
 0x33f   : > { %v6222_v40 = vpop.f32.mrf.mxu1  ;;  %v6129_v60 = vpop.f32.mrf.mxu0 }
 0x340   : > { %v5461_v23 = vpack.c.bf16 %v4639_v42, %v4638_v16  ;;  %v6130_v39 = vadd.f32 %v6129_v60, %v6128_v22  ;;  %v4605_v43 = vadd.f32 %v6221_v48, %v4469_v35 }
 0x341   : > { %v6223_v3 = vpop.f32.mrf.mxu1  ;;  %v6131_v13 = vpop.f32.mrf.mxu0  ;;  %v4833_v47 = vld [vmem:[%s8092_s10 + $0x48] sm:$0xf] (%p6511_p6)  ;;  %v4835_v20 = vld [vmem:[%s8092_s10 + $0x4c] sm:$0xf] (%p6511_p6) }
 0x342   : > { %5477 = vst [vmem:[%s8092_s10 + $0x50] sm:$0xff] %v5461_v23   ;;  %v4472_v5 = vadd.f32 %v6130_v39, %v8082_v19  ;;  %v6224_v24 = vadd.f32 %v6223_v3, %v6222_v40  ;;  %v4640_v25 = vmax.f32 %v4605_v43, 0.0  ;;  %4834 = vst [vmem:[%s8137_s18 + $0x90] sm:$0xf] (%p6511_p6), %v4833_v47 }
 0x343   : > { %v6225_v49 = vpop.f32.mrf.mxu1  ;;  %v6132_v56 = vpop.f32.mrf.mxu0  ;;  %4836 = vst [vmem:[%s8137_s18 + $0x98] sm:$0xf] (%p6511_p6), %v4835_v20 }
 0x344   : > { %v4608_v51 = vadd.f32 %v6224_v24, %v4472_v5  ;;  %v6133_v33 = vadd.f32 %v6132_v56, %v6131_v13 }
 0x345   : > { %v6226_v38 = vpop.f32.mrf.mxu1  ;;  %v6134_v45 = vpop.f32.mrf.mxu0 }
 0x346   : > { %v4641_v55 = vmax.f32 %v4608_v51, 0.0  ;;  %v4477_v52 = vadd.f32 %v6133_v33, %v8085_v11  ;;  %v6227_v17 = vadd.f32 %v6226_v38, %v6225_v49  ;;  %v4797_v11 = vld [vmem:[%s8092_s10] sm:$0xf] (%p6511_p6) }
 0x347   : > { %v6228_v53 = vpop.f32.mrf.mxu1  ;;  %v6135_v10 = vpop.f32.mrf.mxu0  ;;  %4798 = vst [vmem:[%s8137_s18] sm:$0xf] (%p6511_p6), %v4797_v11 }
 0x348   : > { %v5466_v27 = vpack.c.bf16 %v4641_v55, %v4640_v25  ;;  %v4613_v28 = vadd.f32 %v6227_v17, %v4477_v52 }
 0x349   : > { %v6229_v63 = vpop.f32.mrf.mxu1  ;;  %v4837_v18 = vld [vmem:[%s8092_s10 + $0x50] sm:$0xf] (%p6511_p6)  ;;  %v4839_v26 = vld [vmem:[%s8092_s10 + $0x54] sm:$0xf] (%p6511_p6) }
 0x34a   : > { %5478 = vst [vmem:[%s8092_s10 + $0x58] sm:$0xff] %v5466_v27   ;;  %v4642_v19 = vmax.f32 %v4613_v28, 0.0  ;;  %4775 = sbr.rel (!%p6511_p6) target bundleno = 855 (0x357), region = 77  ;;  %4838 = vst [vmem:[%s8137_s18 + $0xa0] sm:$0xf] (%p6511_p6), %v4837_v18 }
 0x34b   : > { %4840 = vst [vmem:[%s8137_s18 + $0xa8] sm:$0xf] (%p6511_p6), %v4839_v26 }
 0x34c   : > { %v5407_v62 = vpack.c.bf16 %v4642_v19, %v4642_v19 }
 0x34e   : > { %4768 = vst [vmem:[%s8092_s10 + $0x60] sm:$0xf] %v5407_v62 }
 0x351   : > { %v4841_v61 = vld [vmem:[%s8092_s10 + $0x58] sm:$0xf]  ;;  %v4843_v6 = vld [vmem:[%s8092_s10 + $0x5c] sm:$0xf] }
 0x352   : > { %4842 = vst [vmem:[%s8137_s18 + $0xb0] sm:$0xf] %v4841_v61  ;;  %4844 = vst [vmem:[%s8137_s18 + $0xb8] sm:$0xf] %v4843_v6 }
 0x355   : > { %v4845_v46 = vld [vmem:[%s8092_s10 + $0x60] sm:$0xf] }
 0x356   : > { %4846 = vst [vmem:[%s8137_s18 + $0xc0] sm:$0xf] %v4845_v46 }
 0x357 PF: > { %s13_s16 = sadd.s32 1, %s6454_s16   ;;  %s8207_s12 = smov %s6442_s13 }
 0x358   : > { %p10_p12 = scmp.ge.s32.totalorder %s13_s16, 4   ;;  %s8208_s13 = smov %s6516_s22 }
 0x359   : > { %s8209_s14 = smov %s6450_s15  ;;  %s8210_s15 = smov %s8212_s17 }
 0x35a   :  { %12 = sbr.rel (!%p10_p12) target bundleno = 3 (0x3), region = 155 }

// kernel: cnn_forward.14
= control target key start
LH: loop header
LB: loop body
LE: loop exit
PB: predicated region body
PF: predicated region fallthrough
CT: control target
= control target key end

     0   :  { %s279_s6 = smov 0   ;;  %s344_s0 = inlined_call_operand.vmem [shape: bf16[10,2,5,512], index: 0, kind: input, shape index: {}]   ;;  %s345_s1 = inlined_call_operand.vmem [shape: bf16[10,5,256], index: 1, kind: output, shape index: {}]  }
   0x1 LB: > { %s240_s7 = sadd.s32 4294967295, %s267_s6   ;;  %p244_p0 = scmp.ge.s32.totalorder %s267_s6, 1  ;;  %s267_s6 = sphi %s279_s6, %s11_s6  }
   0x2   : > { %p89_p1 = scmp.lt.s32.totalorder %s267_s6, 3 }
   0x4   : > { %p90_p2 = pnand %p244_p0, %p89_p1 }
   0x5   : > { %s111_s8 = smul.u32 (!%p90_p2), 5, %s240_s7 }
   0x6   : > { %93 = sbr.rel (%p90_p2) target bundleno = 29 (0x1d), region = 24 }
   0x7   : > { %p112_p3 = scmp.lt.s32.totalorder (!%p90_p2), %s111_s8, 9 }
   0xb   : > { %vm160_vm0 = vcmask 1042432   ;;  %vm161_vm1 = vsmask.f32 2304  ;;  %vm163_vm2 = vcmask 1046532   ;;  %vm164_vm3 = vsmask.f32 6400 }
   0xc   : > { %s349_s8 = smov (!%p112_p3, %s111_s8), 9  ;;  %vm162_vm4 = vmand %vm160_vm0, %vm161_vm1 }
   0xd   : > { %s251_s9 = sshll.u32 %s349_s8, 5  ;;  %s252_s10 = sshll.u32 %s349_s8, 3  ;;  %vm165_vm5 = vmand %vm163_vm2, %vm164_vm3 }
   0xe   : > { %s290_s13 = scalar_lea.vmem %s344_s0, %s251_s9  ;;  %s295_s16 = scalar_lea.vmem %s345_s1, %s252_s10  ;;  %vm301_vm6 = vmor %vm165_vm5, %vm162_vm4 }
   0xf   : > { %v125_v0 = vld [vmem:[%s290_s13] sm:$0x77]  ;;  %v126_v1 = vld [vmem:[%s290_s13 + $0x8] sm:$0x77]  ;;  %v127_v2 = vld [vmem:[%s290_s13 + $0x10] sm:$0x77] }
  0x10   : > { %v128_v3 = vld [vmem:[%s290_s13 + $0x18] sm:$0x77]  ;;  %v145_v4 = vmax.bf16 %v127_v2, %v125_v0  ;;  %v129_v6 = vld [vmem:[%s290_s13 + $0x20] sm:$0x77]  ;;  %v130_v8 = vld [vmem:[%s290_s13 + $0x28] sm:$0x77] }
  0x11   : > { %v146_v7 = vmax.bf16 %v128_v3, %v126_v1  ;;  %v131_v9 = vld [vmem:[%s290_s13 + $0x30] sm:$0x77]  ;;  %v132_v10 = vld [vmem:[%s290_s13 + $0x38] sm:$0x77]  ;;  %v167_v11 = vld [vmem:[%s295_s16] sm:$0x77] }
  0x12   : > { %v147_v12 = vmax.bf16 %v131_v9, %v129_v6  ;;  %v148_v13 = vmax.bf16 %v132_v10, %v130_v8  ;;  %v133_v14 = vld [vmem:[%s290_s13 + $0x40] sm:$0x77]  ;;  %v134_v15 = vld [vmem:[%s290_s13 + $0x48] sm:$0x77]  ;;  %v135_v18 = vld [vmem:[%s290_s13 + $0x50] sm:$0x77] }
  0x13   : > { %v155_v16 = vmax.bf16 %v146_v7, %v145_v4  ;;  %v170_v17 = vld [vmem:[%s295_s16 + $0x8] sm:$0x77]  ;;  %v136_v19 = vld [vmem:[%s290_s13 + $0x58] sm:$0x77]  ;;  %v149_v21 = vmax.bf16 %v135_v18, %v133_v14  ;;  %v137_v23 = vld [vmem:[%s290_s13 + $0x60] sm:$0x77] }
  0x14   : > { %v156_v20 = vmax.bf16 %v148_v13, %v147_v12  ;;  %v150_v22 = vmax.bf16 %v136_v19, %v134_v15  ;;  %v138_v24 = vld [vmem:[%s290_s13 + $0x68] sm:$0x77]  ;;  %v139_v25 = vld [vmem:[%s290_s13 + $0x70] sm:$0x77]  ;;  %v140_v28 = vld [vmem:[%s290_s13 + $0x78] sm:$0x77] }
  0x15   : > { %v168_v26 = vsel %vm301_vm6, %v155_v16, %v167_v11  ;;  %v173_v27 = vld [vmem:[%s295_s16 + $0x10] sm:$0x77]  ;;  %v151_v29 = vmax.bf16 %v139_v25, %v137_v23  ;;  %v141_v30 = vld [vmem:[%s290_s13 + $0x80] sm:$0x77]  ;;  %v152_v33 = vmax.bf16 %v140_v28, %v138_v24  ;;  %v142_v34 = vld [vmem:[%s290_s13 + $0x88] sm:$0x77] }
  0x16   : > { %169 = vst [vmem:[%s295_s16] sm:$0x77] %v168_v26  ;;  %v171_v31 = vsel %vm301_vm6, %v156_v20, %v170_v17  ;;  %v157_v32 = vmax.bf16 %v150_v22, %v149_v21  ;;  %v143_v35 = vld [vmem:[%s290_s13 + $0x90] sm:$0x77]  ;;  %v144_v36 = vld [vmem:[%s290_s13 + $0x98] sm:$0x77] }
  0x17   : > { %172 = vst [vmem:[%s295_s16 + $0x8] sm:$0x77] %v171_v31  ;;  %v176_v37 = vld [vmem:[%s295_s16 + $0x18] sm:$0x77]  ;;  %v153_v38 = vmax.bf16 %v143_v35, %v141_v30  ;;  %v154_v39 = vmax.bf16 %v144_v36, %v142_v34  ;;  %v158_v41 = vmax.bf16 %v152_v33, %v151_v29  ;;  %v179_v42 = vld [vmem:[%s295_s16 + $0x20] sm:$0x77] }
  0x18   : > { %v174_v40 = vsel %vm301_vm6, %v157_v32, %v173_v27 }
  0x19   : > { %175 = vst [vmem:[%s295_s16 + $0x10] sm:$0x77] %v174_v40  ;;  %v159_v43 = vmax.bf16 %v154_v39, %v153_v38  ;;  %v177_v44 = vsel %vm301_vm6, %v158_v41, %v176_v37 }
  0x1a   : > { %178 = vst [vmem:[%s295_s16 + $0x18] sm:$0x77] %v177_v44 }
  0x1b   : > { %v180_v45 = vsel %vm301_vm6, %v159_v43, %v179_v42 }
  0x1c   : > { %181 = vst [vmem:[%s295_s16 + $0x20] sm:$0x77] %v180_v45 }
  0x1d PF: > { %s11_s6 = sadd.s32 1, %s267_s6  }
  0x1e   : > { %p8_p4 = scmp.ge.s32.totalorder %s11_s6, 4  }
  0x20   :  { %10 = sbr.rel (!%p8_p4) target bundleno = 1 (0x1), region = 54 }

// kernel: cnn_forward.16
= control target key start
LH: loop header
LB: loop body
LE: loop exit
PB: predicated region body
PF: predicated region fallthrough
CT: control target
= control target key end

     0   :  { %s190_s6 = smov 0   ;;  %s210_s0 = inlined_call_operand.vmem [shape: bf16[2,2,1,256], index: 0, kind: input, shape index: {}]   ;;  %s211_s1 = inlined_call_operand.vmem [shape: bf16[2,1,128], index: 1, kind: output, shape index: {}]  }
   0x1 LB: > { %s170_s7 = sadd.s32 4294967295, %s192_s6   ;;  %p174_p0 = scmp.ge.s32.totalorder %s192_s6, 1  ;;  %s192_s6 = sphi %s190_s6, %s11_s6  }
   0x2   : > { %p86_p1 = scmp.lt.s32.totalorder %s192_s6, 3 }
   0x4   : > { %p87_p2 = pnand %p174_p0, %p86_p1 }
   0x5   : > { %p103_p3 = scmp.lt.s32.totalorder (!%p87_p2), %s170_s7, 1 }
   0x6   : > { %90 = sbr.rel (%p87_p2) target bundleno = 23 (0x17), region = 24 }
   0xb   : > { %s213_s7 = smov (!%p103_p3, %s170_s7), 1  ;;  %vm117_vm0 = vcmask 1040384   ;;  %vm118_vm1 = vsmask.f32 256 }
   0xc   : > { %s175_s8 = sshll.u32 %s213_s7, 2  ;;  %s109_s14 = scalar_lea.vmem %s211_s1, %s213_s7  ;;  %vm119_vm2 = vmand %vm117_vm0, %vm118_vm1 }
   0xd   : > { %s106_s11 = scalar_lea.vmem %s210_s0, %s175_s8  ;;  %v120_v4 = vld [vmem:[%s109_s14] sm:$0x1] }
   0xe   : > { %v110_v0 = vld [vmem:[%s106_s11] sm:$0x3]  ;;  %v111_v1 = vld [vmem:[%s106_s11 + $0x2] sm:$0x3] }
   0xf   : > { %v112_v2 = vmax.bf16 %v111_v1, %v110_v0 }
  0x11   : > { %v114_v3 = vrot.slane %v112_v2, 1 }
  0x13   : > { %v116_v5 = vmax.bf16 %v114_v3, %v112_v2 }
  0x15   : > { %v121_v6 = vsel %vm119_vm2, %v116_v5, %v120_v4 }
  0x16   : > { %122 = vst [vmem:[%s109_s14] sm:$0x1] %v121_v6 }
  0x17 PF: > { %s11_s6 = sadd.s32 1, %s192_s6  }
  0x18   : > { %p8_p4 = scmp.ge.s32.totalorder %s11_s6, 4  }
  0x1a   :  { %10 = sbr.rel (!%p8_p4) target bundleno = 1 (0x1), region = 54 }

// kernel: cnn_forward.17
= control target key start
LH: loop header
LB: loop body
LE: loop exit
PB: predicated region body
PF: predicated region fallthrough
CT: control target
= control target key end

     0   :  { %v557_v1 = vmov 0.0   ;;  %vm558_vm0 = vmmov 0   ;;  %s759_s0 = inlined_call_operand.vmem [shape: bf16[2,128], index: 0, kind: input, shape index: {}]   ;;  %s760_s1 = inlined_call_operand.vmem [shape: f32[128,64], index: 1, kind: input, shape index: {}]   ;;  %s761_s2 = inlined_call_operand.vmem [shape: f32[1,64], index: 2, kind: input, shape index: {}]   ;;  %s762_s3 = inlined_call_operand.vmem [shape: f32[64,32], index: 3, kind: input, shape index: {}]   ;;  %s763_s4 = inlined_call_operand.vmem [shape: f32[1,32], index: 4, kind: input, shape index: {}]   ;;  %s764_s5 = inlined_call_operand.vmem [shape: f32[32,16], index: 5, kind: input, shape index: {}]   ;;  %s765_s6 = inlined_call_operand.vmem [shape: f32[1,16], index: 6, kind: input, shape index: {}]   ;;  %s766_s7 = inlined_call_operand.vmem [shape: f32[16,2], index: 7, kind: input, shape index: {}]   ;;  %s767_s8 = inlined_call_operand.vmem [shape: f32[1,2], index: 8, kind: input, shape index: {}]   ;;  %s768_s9 = inlined_call_operand.hbm [shape: f32[2,2], index: 9, kind: output, shape index: {}]  }
   0x1   :  { %v50_v0 = vld [vmem:[%s760_s1 + $0x78] sm:$0xff]  ;;  %456 = vmatprep.subr.mxu0 %v557_v1  ;;  %v49_v2 = vld [vmem:[%s760_s1 + $0x70] sm:$0xff]  ;;  %488 = vmatprep.mubr.msk.f32.mxu0 %vm558_vm0, %v557_v1  ;;  %v48_v3 = vld [vmem:[%s760_s1 + $0x68] sm:$0xff] }
   0x2   :  { %457 = vmatpush3.msra.mxu0 %v50_v0  ;;  %491 = vmatprep.subr.mxu1 %v557_v1  ;;  %v47_v4 = vld [vmem:[%s760_s1 + $0x60] sm:$0xff]  ;;  %v136_v5 = vld [vmem:[%s762_s3 + $0x38] sm:$0xff]  ;;  %v135_v6 = vld [vmem:[%s762_s3 + $0x30] sm:$0xff] }
   0x3   :  { %458 = vmatprep.subr.mxu0 %v557_v1  ;;  %507 = vmatprep.mubr.msk.f32.mxu1 %vm558_vm0, %v557_v1  ;;  %v46_v7 = vld [vmem:[%s760_s1 + $0x58] sm:$0xff]  ;;  %v134_v8 = vld [vmem:[%s762_s3 + $0x28] sm:$0xff] }
   0x4   :  { %459 = vmatpush3.msra.mxu0 %v49_v2  ;;  %492 = vmatpush3.msra.mxu1 %v136_v5 }
   0x5   :  { %460 = vmatprep.subr.mxu0 %v557_v1  ;;  %493 = vmatprep.subr.mxu1 %v557_v1 }
   0x6   :  { %461 = vmatpush3.msra.mxu0 %v48_v3 }
   0x7   :  { %462 = vmatprep.subr.mxu0 %v557_v1 }
   0x8   :  { %14 = vsyncpa [#allocation3], 0  ;;  %463 = vmatpush3.msra.mxu0 %v47_v4  ;;  %494 = vmatpush3.msra.mxu1 %v135_v6  ;;  %v45_v9 = vld [vmem:[%s760_s1 + $0x50] sm:$0xff]  ;;  %v133_v10 = vld [vmem:[%s762_s3 + $0x20] sm:$0xff]  ;;  %vm144_vm1 = vcmask 523264   ;;  %vm230_vm2 = vcmask 261120  }
   0x9   :  { %464 = vmatprep.subr.mxu0 %v557_v1  ;;  %495 = vmatprep.subr.mxu1 %v557_v1  ;;  %v44_v11 = vld [vmem:[%s760_s1 + $0x48] sm:$0xff]  ;;  %v132_v12 = vld [vmem:[%s762_s3 + $0x18] sm:$0xff]  ;;  %v43_v13 = vld [vmem:[%s760_s1 + $0x40] sm:$0xff]  ;;  %vm314_vm3 = vcmask 130048   ;;  %vm388_vm4 = vcmask 9216  }
   0xa   :  { %465 = vmatpush3.msra.mxu0 %v46_v7  ;;  %496 = vmatpush3.msra.mxu1 %v134_v8  ;;  %v42_v14 = vld [vmem:[%s760_s1 + $0x38] sm:$0xff]  ;;  %v41_v15 = vld [vmem:[%s760_s1 + $0x30] sm:$0xff]  ;;  %v40_v16 = vld [vmem:[%s760_s1 + $0x28] sm:$0xff] }
   0xb   :  { %466 = vmatprep.subr.mxu0 %v557_v1  ;;  %497 = vmatprep.subr.mxu1 %v557_v1  ;;  %v39_v17 = vld [vmem:[%s760_s1 + $0x20] sm:$0xff]  ;;  %v38_v18 = vld [vmem:[%s760_s1 + $0x18] sm:$0xff]  ;;  %v37_v19 = vld [vmem:[%s760_s1 + $0x10] sm:$0xff] }
   0xc   :  { %467 = vmatpush3.msra.mxu0 %v45_v9  ;;  %498 = vmatpush3.msra.mxu1 %v133_v10  ;;  %v33_v20 = vld [vmem:[%s759_s0] sm:$0x1]  ;;  %v36_v21 = vld [vmem:[%s760_s1 + $0x8] sm:$0xff]  ;;  %v131_v24 = vld [vmem:[%s762_s3 + $0x10] sm:$0xff] }
   0xd   :  { %468 = vmatprep.subr.mxu0 %v557_v1  ;;  %499 = vmatprep.subr.mxu1 %v557_v1  ;;  %v35_v22 = vld [vmem:[%s760_s1] sm:$0xff]  ;;  %v34_v23 = vunpack.c.l.bf16 %v33_v20  ;;  %v130_v25 = vld [vmem:[%s762_s3 + $0x8] sm:$0xff]  ;;  %v222_v32 = vld [vmem:[%s764_s5 + $0x18] sm:$0xff] }
   0xe   :  { %469 = vmatpush3.msra.mxu0 %v44_v11  ;;  %500 = vmatpush3.msra.mxu1 %v132_v12  ;;  %v129_v26 = vld [vmem:[%s762_s3] sm:$0xff]  ;;  %v221_v33 = vld [vmem:[%s764_s5 + $0x10] sm:$0xff]  ;;  %v220_v34 = vld [vmem:[%s764_s5 + $0x8] sm:$0xff] }
   0xf   :  { %470 = vmatprep.subr.mxu0 %v557_v1  ;;  %501 = vmatprep.subr.mxu1 %v557_v1  ;;  %v415_v27 = vld [vmem:[%s761_s2] ss:$0 sm:$0xff]  ;;  %v306_v41 = vld [vmem:[%s766_s7 + $0x8] sm:$0xff] }
  0x10   :  { %471 = vmatpush3.msra.mxu0 %v43_v13  ;;  %502 = vmatpush3.msra.mxu1 %v131_v24  ;;  %v219_v35 = vld [vmem:[%s764_s5] sm:$0xff] }
  0x11   :  { %472 = vmatprep.subr.mxu0 %v557_v1  ;;  %503 = vmatprep.subr.mxu1 %v557_v1  ;;  %v416_v36 = vld [vmem:[%s763_s4] ss:$0 sm:$0xff] }
  0x12   :  { %473 = vmatpush3.msra.mxu0 %v42_v14  ;;  %504 = vmatpush3.msra.mxu1 %v130_v25  ;;  %v305_v42 = vld [vmem:[%s766_s7] sm:$0xff] }
  0x13   :  { %474 = vmatprep.subr.mxu0 %v557_v1  ;;  %505 = vmatprep.subr.mxu1 %v557_v1  ;;  %v418_v43 = vld [vmem:[%s765_s6] ss:$0 sm:$0xff]  ;;  %s559_s6 = smov [#allocation2]  }
  0x14   :  { %475 = vmatpush3.msra.mxu0 %v41_v15  ;;  %506 = vmatpush3.msra.mxu1 %v129_v26  ;;  %v420_v48 = vld [vmem:[%s767_s8] ss:$0 sm:$0xff]  ;;  %s407_s7 = sshll.u32 %s559_s6, 4  ;;  %s408_s7 = int_to_ptr.vmem [resolvable:$true] %s407_s7 }
  0x15   :  { %476 = vmatprep.subr.mxu0 %v557_v1  ;;  %510 = vmatprep.subr.mxu1 %v557_v1  ;;  %s535_s8 = scalar_lea.vmem %s408_s7, 32  ;;  %p540_p1 = scmp.lt.s32.totalorder %s408_s7, %s408_s7 }
  0x16   :  { %477 = vmatpush3.msra.mxu0 %v40_v16  ;;  %p536_p0 = scmp.ne.s32.totalorder %s408_s7, %s535_s8  ;;  %p541_p2 = scmp.lt.s32.totalorder %s535_s8, %s535_s8 }
  0x17   :  { %478 = vmatprep.subr.mxu0 %v557_v1 }
  0x18   :  { %479 = vmatpush3.msra.mxu0 %v39_v17  ;;  %p542_p3 = por %p541_p2, %p540_p1 }
  0x19   :  { %480 = vmatprep.subr.mxu0 %v557_v1 }
  0x1a   :  { %481 = vmatpush3.msra.mxu0 %v38_v18  ;;  %p543_p4 = pnand %p542_p3, %p536_p0 }
  0x1b   :  { %482 = vmatprep.subr.mxu0 %v557_v1 }
  0x1c   :  { %483 = vmatpush3.msra.mxu0 %v37_v19 }
  0x1d   :  { %484 = vmatprep.subr.mxu0 %v557_v1 }
  0x1e   :  { %485 = vmatpush3.msra.mxu0 %v36_v21 }
  0x1f   :  { %486 = vmatprep.subr.mxu0 %v557_v1 }
  0x20   :  { %487 = vmatpush3.msra.mxu0 %v35_v22 }
  0x21   :  { %489 = vmatmul.mubr.f32.vlgmr.msra.gmra.mxu0 %v34_v23 }
  0xe1   :  { %v124_v28 = vpop.f32.mrf.mxu0 }
  0xe2   :  { %v125_v29 = vadd.f32 %v415_v27, %v124_v28 }
  0xe3   :  { %v490_v30 = vpop.f32.mrf.mxu0 }
  0xe4   :  { %v128_v31 = vmax.f32 %v125_v29, 0.0 }
  0xe6   :  { %508 = vmatmul.mubr.msk.f32.vlgmr.msra.gmra.mxu1 %vm144_vm1, %v128_v31 }
  0xe7   :  { %511 = vmatpush3.msra.mxu1 %v222_v32  ;;  %518 = vmatprep.mubr.msk.f32.mxu1 %vm558_vm0, %v557_v1 }
  0xe8   :  { %512 = vmatprep.subr.mxu1 %v557_v1 }
  0xe9   :  { %513 = vmatpush3.msra.mxu1 %v221_v33 }
  0xea   :  { %514 = vmatprep.subr.mxu1 %v557_v1 }
  0xeb   :  { %515 = vmatpush3.msra.mxu1 %v220_v34 }
  0xec   :  { %516 = vmatprep.subr.mxu1 %v557_v1 }
  0xed   :  { %517 = vmatpush3.msra.mxu1 %v219_v35 }
  0xee   :  { %521 = vmatprep.subr.mxu1 %v557_v1 }
 0x1a6   :  { %v214_v37 = vpop.f32.mrf.mxu1 }
 0x1a7   :  { %v215_v38 = vadd.f32 %v416_v36, %v214_v37 }
 0x1a8   :  { %v509_v39 = vpop.f32.mrf.mxu1 }
 0x1a9   :  { %v218_v40 = vmax.f32 %v215_v38, 0.0 }
 0x1ab   :  { %519 = vmatmul.mubr.msk.f32.vlgmr.msra.gmra.mxu1 %vm230_vm2, %v218_v40 }
 0x1ac   :  { %525 = vmatprep.mubr.msk.f32.mxu1 %vm558_vm0, %v557_v1  ;;  %522 = vmatpush3.msra.mxu1 %v306_v41 }
 0x1ad   :  { %523 = vmatprep.subr.mxu1 %v557_v1 }
 0x1ae   :  { %524 = vmatpush3.msra.mxu1 %v305_v42 }
 0x26b   :  { %v300_v44 = vpop.f32.mrf.mxu1 }
 0x26c   :  { %v301_v45 = vadd.f32 %v418_v43, %v300_v44 }
 0x26d   :  { %v520_v46 = vpop.f32.mrf.mxu1 }
 0x26e   :  { %v304_v47 = vmax.f32 %v301_v45, 0.0 }
 0x270   :  { %526 = vmatmul.mubr.msk.f32.vlgmr.msra.gmra.mxu1 %vm314_vm3, %v304_v47 }
 0x330   :  { %v384_v49 = vpop.f32.mrf.mxu1 }
 0x331   :  { %v385_v50 = vadd.f32 %v420_v48, %v384_v49 }
 0x332   :  { %v527_v51 = vpop.f32.mrf.mxu1 }
 0x333   :  { %v389_v52 = vsel %vm388_vm4, %v385_v50, -inf }
 0x334   :  { %390 = vmax.xlane.f32.xlu0 %v389_v52 }
 0x3bd   :  { %v391_v53 = vpop.xlane.xlu0 %390 }
 0x3be   :  { %v392_v54 = vsub.f32 %v385_v50, %v391_v53 }
 0x3c0   :  { %v393_v55 = vmul.f32 1.442695, %v392_v54 }
 0x3c2   :  { %531 = vpow2.f32 %v393_v55 }
 0x3cf   :  { %v532_v56 = vpop.eup %531 }
 0x3d0   :  { %v395_v57 = vsel %vm388_vm4, %v532_v56, 0.0 }
 0x3d1   :  { %396 = vadd.xlane.f32.xlu0 %v395_v57 }
 0x45a   :  { %v397_v58 = vpop.xlane.xlu0 %396 }
 0x45b   :  { %533 = vrcp.f32 %v397_v58 }
 0x468   :  { %v534_v59 = vpop.eup %533 }
 0x469   :  { %v399_v60 = vmul.f32 %v534_v59, %v532_v56 }
 0x46b   :  { %400 = vst.msk [vmem:[#allocation2] sm:$0x3] %vm388_vm4, %v399_v60 }
 0x46c   :  { %546 = shalt.err (!%p543_p4)
}
 0x46d   :  { %410 = dma.vmem_to_hbm [thread:$0]  %s408_s7, 32, %s768_s9, [#allocation3]  }
 0x46e   :  { %555 = dma.done.wait [#allocation3], 32  }
 0x46f   :  { %556 = vsyncadd [#allocation3], 4294967264 }
 0x470   :  { %414 = vsyncpa [#allocation3], 1 }

// kernel: cnn_forward.15
= control target key start
LH: loop header
LB: loop body
LE: loop exit
PB: predicated region body
PF: predicated region fallthrough
CT: control target
= control target key end

     0   :  { %s4619_s1 = inlined_call_operand.vmem [shape: bf16[4096,128], index: 1, kind: input, shape index: {}]   ;;  %s4620_s0 = inlined_call_operand.vmem [shape: bf16[8,4096], index: 0, kind: input, shape index: {}]   ;;  %s4621_s2 = inlined_call_operand.vmem [shape: f32[1,128], index: 2, kind: input, shape index: {}]   ;;  %s4622_s3 = inlined_call_operand.vmem [shape: bf16[8,128], index: 3, kind: output, shape index: {}]  }
   0x1   :  { %v3486_v0 = vld [vmem:[%s4619_s1 + $0x78] sm:$0xff]   ;;  %v3490_v4 = vld [vmem:[%s4619_s1 + $0x70] sm:$0xff]   ;;  %v3494_v8 = vld [vmem:[%s4619_s1 + $0x68] sm:$0xff]  }
   0x2   :  { %v3487_v1 = vld [vmem:[%s4619_s1 + $0xf8] sm:$0xff]   ;;  %3134 = vmatprep.subr.bf16.mxu0 %v3486_v0  ;;  %v3491_v5 = vld [vmem:[%s4619_s1 + $0xf0] sm:$0xff]   ;;  %v3495_v9 = vld [vmem:[%s4619_s1 + $0xe8] sm:$0xff]  }
   0x3   :  { %v3488_v2 = vld [vmem:[%s4619_s1 + $0x38] sm:$0xff]   ;;  %3156 = vmatprep.subr.bf16.mxu1 %v3487_v1  ;;  %v3492_v6 = vld [vmem:[%s4619_s1 + $0x30] sm:$0xff]   ;;  %v3496_v10 = vld [vmem:[%s4619_s1 + $0x28] sm:$0xff]  }
   0x4   :  { %v3489_v3 = vld [vmem:[%s4619_s1 + $0xb8] sm:$0xff]   ;;  %3135 = vmatpush3.bf16.msra.mxu0 %v3488_v2  ;;  %v3493_v7 = vld [vmem:[%s4619_s1 + $0xb0] sm:$0xff]   ;;  %v3497_v11 = vld [vmem:[%s4619_s1 + $0xa8] sm:$0xff]  }
   0x5   :  { %3157 = vmatpush3.bf16.msra.mxu1 %v3489_v3  ;;  %3136 = vmatprep.subr.bf16.mxu0 %v3490_v4  ;;  %v3498_v12 = vld [vmem:[%s4619_s1 + $0x60] sm:$0xff]   ;;  %v3502_v16 = vld [vmem:[%s4619_s1 + $0x58] sm:$0xff]   ;;  %v3506_v20 = vld [vmem:[%s4619_s1 + $0x50] sm:$0xff]  }
   0x6   :  { %3158 = vmatprep.subr.bf16.mxu1 %v3491_v5  ;;  %v3499_v13 = vld [vmem:[%s4619_s1 + $0xe0] sm:$0xff]   ;;  %v3503_v17 = vld [vmem:[%s4619_s1 + $0xd8] sm:$0xff]   ;;  %v3507_v21 = vld [vmem:[%s4619_s1 + $0xd0] sm:$0xff]  }
   0x7   :  { %v3500_v14 = vld [vmem:[%s4619_s1 + $0x20] sm:$0xff]   ;;  %v3504_v18 = vld [vmem:[%s4619_s1 + $0x18] sm:$0xff]   ;;  %v3508_v22 = vld [vmem:[%s4619_s1 + $0x10] sm:$0xff]  }
   0x8   :  { %3137 = vmatpush3.bf16.msra.mxu0 %v3492_v6  ;;  %v3501_v15 = vld [vmem:[%s4619_s1 + $0xa0] sm:$0xff]   ;;  %v3505_v19 = vld [vmem:[%s4619_s1 + $0x98] sm:$0xff]   ;;  %v3509_v23 = vld [vmem:[%s4619_s1 + $0x90] sm:$0xff]  }
   0x9   :  { %3159 = vmatpush3.bf16.msra.mxu1 %v3493_v7  ;;  %3138 = vmatprep.subr.bf16.mxu0 %v3494_v8  ;;  %v3510_v24 = vld [vmem:[%s4619_s1 + $0x48] sm:$0xff]   ;;  %v3514_v28 = vld [vmem:[%s4619_s1 + $0x40] sm:$0xff]   ;;  %v3522_v38 = vld [vmem:[%s4619_s1 + $0x178] sm:$0xff]  }
   0xa   :  { %3160 = vmatprep.subr.bf16.mxu1 %v3495_v9  ;;  %v3511_v25 = vld [vmem:[%s4619_s1 + $0xc8] sm:$0xff]   ;;  %v3515_v29 = vld [vmem:[%s4619_s1 + $0xc0] sm:$0xff]   ;;  %v3523_v39 = vld [vmem:[%s4619_s1 + $0x1f8] sm:$0xff]  }
   0xb   :  { %v3512_v26 = vld [vmem:[%s4619_s1 + $0x8] sm:$0xff]   ;;  %v3516_v30 = vld [vmem:[%s4619_s1] sm:$0xff]   ;;  %v3524_v40 = vld [vmem:[%s4619_s1 + $0x138] sm:$0xff]  }
   0xc   :  { %3139 = vmatpush3.bf16.msra.mxu0 %v3496_v10  ;;  %v3513_v27 = vld [vmem:[%s4619_s1 + $0x88] sm:$0xff]   ;;  %v3517_v31 = vld [vmem:[%s4619_s1 + $0x80] sm:$0xff]   ;;  %v3525_v41 = vld [vmem:[%s4619_s1 + $0x1b8] sm:$0xff]  }
   0xd   :  { %3161 = vmatpush3.bf16.msra.mxu1 %v3497_v11  ;;  %3140 = vmatprep.subr.bf16.mxu0 %v3498_v12  ;;  %v15_v32 = vld [vmem:[%s4620_s0] sm:$0xff]  ;;  %v16_v33 = vld [vmem:[%s4620_s0 + $0x8] sm:$0xff]  ;;  %v3526_v42 = vld [vmem:[%s4619_s1 + $0x170] sm:$0xff]  }
   0xe   :  { %3162 = vmatprep.subr.bf16.mxu1 %v3499_v13  ;;  %v2846_v34 = vcombine.low %v15_v32, %v15_v32  ;;  %v2847_v35 = vcombine.high %v15_v32, %v15_v32  ;;  %v2848_v36 = vcombine.low %v16_v33, %v16_v33  ;;  %v2849_v37 = vcombine.high %v16_v33, %v16_v33  ;;  %v3527_v43 = vld [vmem:[%s4619_s1 + $0x1f0] sm:$0xff]   ;;  %v3530_v46 = vld [vmem:[%s4619_s1 + $0x168] sm:$0xff]   ;;  %v3534_v50 = vld [vmem:[%s4619_s1 + $0x160] sm:$0xff]  }
   0xf   :  { %v3528_v44 = vld [vmem:[%s4619_s1 + $0x130] sm:$0xff]   ;;  %v3531_v47 = vld [vmem:[%s4619_s1 + $0x1e8] sm:$0xff]   ;;  %v3535_v51 = vld [vmem:[%s4619_s1 + $0x1e0] sm:$0xff]  }
  0x10   :  { %3141 = vmatpush3.bf16.msra.mxu0 %v3500_v14  ;;  %2230 = vmatprep.mubr.bf16.mxu0 %v2847_v35  ;;  %v3529_v45 = vld [vmem:[%s4619_s1 + $0x1b0] sm:$0xff]   ;;  %v3532_v48 = vld [vmem:[%s4619_s1 + $0x128] sm:$0xff]   ;;  %v3536_v52 = vld [vmem:[%s4619_s1 + $0x120] sm:$0xff]  }
  0x11   :  { %3163 = vmatpush3.bf16.msra.mxu1 %v3501_v15  ;;  %3142 = vmatprep.subr.bf16.mxu0 %v3502_v16  ;;  %v3533_v49 = vld [vmem:[%s4619_s1 + $0x1a8] sm:$0xff]   ;;  %v3537_v53 = vld [vmem:[%s4619_s1 + $0x1a0] sm:$0xff]   ;;  %v3538_v54 = vld [vmem:[%s4619_s1 + $0x158] sm:$0xff]  }
  0x12   :  { %3164 = vmatprep.subr.bf16.mxu1 %v3503_v17  ;;  %2270 = vmatprep.mubr.bf16.mxu1 %v2849_v37  ;;  %v3539_v55 = vld [vmem:[%s4619_s1 + $0x1d8] sm:$0xff]   ;;  %v3542_v58 = vld [vmem:[%s4619_s1 + $0x150] sm:$0xff]   ;;  %v3546_v62 = vld [vmem:[%s4619_s1 + $0x148] sm:$0xff]  }
  0x13   :  { %v3540_v56 = vld [vmem:[%s4619_s1 + $0x118] sm:$0xff]   ;;  %v3543_v59 = vld [vmem:[%s4619_s1 + $0x1d0] sm:$0xff]   ;;  %v3547_v63 = vld [vmem:[%s4619_s1 + $0x1c8] sm:$0xff]  }
  0x14   :  { %3143 = vmatpush3.bf16.msra.mxu0 %v3504_v18  ;;  %v3541_v57 = vld [vmem:[%s4619_s1 + $0x198] sm:$0xff]   ;;  %v3544_v60 = vld [vmem:[%s4619_s1 + $0x110] sm:$0xff]   ;;  %v3548_v0 = vld [vmem:[%s4619_s1 + $0x108] sm:$0xff]  }
  0x15   :  { %3165 = vmatpush3.bf16.msra.mxu1 %v3505_v19  ;;  %3144 = vmatprep.subr.bf16.mxu0 %v3506_v20  ;;  %v3545_v61 = vld [vmem:[%s4619_s1 + $0x190] sm:$0xff]   ;;  %v3549_v1 = vld [vmem:[%s4619_s1 + $0x188] sm:$0xff]   ;;  %v3550_v2 = vld [vmem:[%s4619_s1 + $0x140] sm:$0xff]  }
  0x16   :  { %3166 = vmatprep.subr.bf16.mxu1 %v3507_v21  ;;  %v3551_v3 = vld [vmem:[%s4619_s1 + $0x1c0] sm:$0xff]   ;;  %v17_v6 = vld [vmem:[%s4620_s0 + $0x10] sm:$0xff]  ;;  %v18_v9 = vld [vmem:[%s4620_s0 + $0x18] sm:$0xff] }
  0x17   :  { %v3552_v4 = vld [vmem:[%s4619_s1 + $0x100] sm:$0xff]   ;;  %v2850_v7 = vcombine.low %v17_v6, %v17_v6  ;;  %v2851_v8 = vcombine.high %v17_v6, %v17_v6  ;;  %v2852_v10 = vcombine.low %v18_v9, %v18_v9  ;;  %v2853_v11 = vcombine.high %v18_v9, %v18_v9  ;;  %v3558_v12 = vld [vmem:[%s4619_s1 + $0x278] sm:$0xff]   ;;  %v3562_v16 = vld [vmem:[%s4619_s1 + $0x270] sm:$0xff]  }
  0x18   :  { %3145 = vmatpush3.bf16.msra.mxu0 %v3508_v22  ;;  %v3553_v5 = vld [vmem:[%s4619_s1 + $0x180] sm:$0xff]   ;;  %v3559_v13 = vld [vmem:[%s4619_s1 + $0x2f8] sm:$0xff]   ;;  %v3563_v17 = vld [vmem:[%s4619_s1 + $0x2f0] sm:$0xff]  }
  0x19   :  { %3167 = vmatpush3.bf16.msra.mxu1 %v3509_v23  ;;  %3146 = vmatprep.subr.bf16.mxu0 %v3510_v24  ;;  %v3560_v14 = vld [vmem:[%s4619_s1 + $0x238] sm:$0xff]   ;;  %v3564_v18 = vld [vmem:[%s4619_s1 + $0x230] sm:$0xff]   ;;  %v3566_v20 = vld [vmem:[%s4619_s1 + $0x268] sm:$0xff]  }
  0x1a   :  { %3168 = vmatprep.subr.bf16.mxu1 %v3511_v25  ;;  %v3561_v15 = vld [vmem:[%s4619_s1 + $0x2b8] sm:$0xff]   ;;  %v3565_v19 = vld [vmem:[%s4619_s1 + $0x2b0] sm:$0xff]   ;;  %v3567_v21 = vld [vmem:[%s4619_s1 + $0x2e8] sm:$0xff]  }
  0x1b   :  { %v3568_v22 = vld [vmem:[%s4619_s1 + $0x228] sm:$0xff]   ;;  %v3570_v24 = vld [vmem:[%s4619_s1 + $0x260] sm:$0xff]   ;;  %v3578_v32 = vld [vmem:[%s4619_s1 + $0x250] sm:$0xff]  }
  0x1c   :  { %3147 = vmatpush3.bf16.msra.mxu0 %v3512_v26  ;;  %v3569_v23 = vld [vmem:[%s4619_s1 + $0x2a8] sm:$0xff]   ;;  %v3571_v25 = vld [vmem:[%s4619_s1 + $0x2e0] sm:$0xff]   ;;  %v3579_v33 = vld [vmem:[%s4619_s1 + $0x2d0] sm:$0xff]  }
  0x1d   :  { %3169 = vmatpush3.bf16.msra.mxu1 %v3513_v27  ;;  %3148 = vmatprep.subr.bf16.mxu0 %v3514_v28  ;;  %v3572_v26 = vld [vmem:[%s4619_s1 + $0x220] sm:$0xff]   ;;  %v3574_v28 = vld [vmem:[%s4619_s1 + $0x258] sm:$0xff]   ;;  %v3581_v35 = vld [vmem:[%s4619_s1 + $0x290] sm:$0xff]  }
  0x1e   :  { %3170 = vmatprep.subr.bf16.mxu1 %v3515_v29  ;;  %v3573_v27 = vld [vmem:[%s4619_s1 + $0x2a0] sm:$0xff]   ;;  %v3575_v29 = vld [vmem:[%s4619_s1 + $0x2d8] sm:$0xff]   ;;  %v3583_v37 = vld [vmem:[%s4619_s1 + $0x2c8] sm:$0xff]  }
  0x1f   :  { %v3614_v6 = vld [vmem:[%s4619_s1 + $0x350] sm:$0xff]  }
  0x20   :  { %3149 = vmatpush3.bf16.msra.mxu0 %v3516_v30  ;;  %v3576_v30 = vld [vmem:[%s4619_s1 + $0x218] sm:$0xff]   ;;  %v3617_v9 = vld [vmem:[%s4619_s1 + $0x390] sm:$0xff]  }
  0x21   :  { %3171 = vmatpush3.bf16.msra.mxu1 %v3517_v31  ;;  %3178 = vmatprep.subr.bf16.mxu0 %v3522_v38  ;;  %v3577_v31 = vld [vmem:[%s4619_s1 + $0x298] sm:$0xff]   ;;  %v3584_v38 = vld [vmem:[%s4619_s1 + $0x208] sm:$0xff]  }
  0x22   :  { %3200 = vmatprep.subr.bf16.mxu1 %v3523_v39  ;;  %v3585_v39 = vld [vmem:[%s4619_s1 + $0x288] sm:$0xff]  }
  0x23   :  { %2231 = vmatmul.mubr.bf16.vlgmr.msra.gmra.mxu0 %v2846_v34  ;;  %v3580_v34 = vld [vmem:[%s4619_s1 + $0x210] sm:$0xff]  }
  0x24   :  { %2271 = vmatmul.mubr.bf16.vlgmr.msra.gmra.mxu1 %v2848_v36  ;;  %3179 = vmatpush3.bf16.msra.mxu0 %v3524_v40  ;;  %v3582_v36 = vld [vmem:[%s4619_s1 + $0x248] sm:$0xff]   ;;  %v3586_v40 = vld [vmem:[%s4619_s1 + $0x240] sm:$0xff]  }
  0x25   :  { %3201 = vmatpush3.bf16.msra.mxu1 %v3525_v41  ;;  %3180 = vmatprep.subr.bf16.mxu0 %v3526_v42  ;;  %v3587_v41 = vld [vmem:[%s4619_s1 + $0x2c0] sm:$0xff]  }
  0x26   :  { %3202 = vmatprep.subr.bf16.mxu1 %v3527_v43  ;;  %2310 = vmatprep.mubr.bf16.mxu0 %v2851_v8  ;;  %v3588_v42 = vld [vmem:[%s4619_s1 + $0x200] sm:$0xff]   ;;  %v3616_v8 = vld [vmem:[%s4619_s1 + $0x310] sm:$0xff]  }
  0x27   :  { %2350 = vmatprep.mubr.bf16.mxu1 %v2853_v11  ;;  %v3589_v43 = vld [vmem:[%s4619_s1 + $0x280] sm:$0xff]   ;;  %v3619_v11 = vld [vmem:[%s4619_s1 + $0x3c8] sm:$0xff]  }
  0x28   :  { %3181 = vmatpush3.bf16.msra.mxu0 %v3528_v44  ;;  %v19_v44 = vld [vmem:[%s4620_s0 + $0x20] sm:$0xff] }
  0x29   :  { %3203 = vmatpush3.bf16.msra.mxu1 %v3529_v45  ;;  %3182 = vmatprep.subr.bf16.mxu0 %v3530_v46  ;;  %v20_v45 = vld [vmem:[%s4620_s0 + $0x28] sm:$0xff]  ;;  %v2854_v46 = vcombine.low %v19_v44, %v19_v44 }
  0x2a   :  { %3204 = vmatprep.subr.bf16.mxu1 %v3531_v47  ;;  %v2855_v47 = vcombine.high %v19_v44, %v19_v44  ;;  %v3650_v44 = vld [vmem:[%s4619_s1 + $0x450] sm:$0xff]  }
  0x2c   :  { %3183 = vmatpush3.bf16.msra.mxu0 %v3532_v48  ;;  %v2856_v48 = vcombine.low %v20_v45, %v20_v45 }
  0x2d   :  { %3205 = vmatpush3.bf16.msra.mxu1 %v3533_v49  ;;  %3184 = vmatprep.subr.bf16.mxu0 %v3534_v50  ;;  %v2857_v49 = vcombine.high %v20_v45, %v20_v45  ;;  %v3594_v50 = vld [vmem:[%s4619_s1 + $0x378] sm:$0xff]   ;;  %v3651_v45 = vld [vmem:[%s4619_s1 + $0x4d0] sm:$0xff]  }
  0x2e   :  { %3206 = vmatprep.subr.bf16.mxu1 %v3535_v51  ;;  %v3595_v51 = vld [vmem:[%s4619_s1 + $0x3f8] sm:$0xff]  }
  0x30   :  { %3185 = vmatpush3.bf16.msra.mxu0 %v3536_v52  ;;  %v3596_v52 = vld [vmem:[%s4619_s1 + $0x338] sm:$0xff]  }
  0x31   :  { %3207 = vmatpush3.bf16.msra.mxu1 %v3537_v53  ;;  %3186 = vmatprep.subr.bf16.mxu0 %v3538_v54  ;;  %v3597_v53 = vld [vmem:[%s4619_s1 + $0x3b8] sm:$0xff]   ;;  %v3598_v54 = vld [vmem:[%s4619_s1 + $0x370] sm:$0xff]  }
  0x32   :  { %3208 = vmatprep.subr.bf16.mxu1 %v3539_v55  ;;  %v3599_v55 = vld [vmem:[%s4619_s1 + $0x3f0] sm:$0xff]  }
  0x34   :  { %3187 = vmatpush3.bf16.msra.mxu0 %v3540_v56  ;;  %v3600_v56 = vld [vmem:[%s4619_s1 + $0x330] sm:$0xff]  }
  0x35   :  { %3209 = vmatpush3.bf16.msra.mxu1 %v3541_v57  ;;  %3188 = vmatprep.subr.bf16.mxu0 %v3542_v58  ;;  %v3601_v57 = vld [vmem:[%s4619_s1 + $0x3b0] sm:$0xff]   ;;  %v3602_v58 = vld [vmem:[%s4619_s1 + $0x368] sm:$0xff]  }
  0x36   :  { %3210 = vmatprep.subr.bf16.mxu1 %v3543_v59  ;;  %v3603_v59 = vld [vmem:[%s4619_s1 + $0x3e8] sm:$0xff]  }
  0x38   :  { %3189 = vmatpush3.bf16.msra.mxu0 %v3544_v60  ;;  %v3604_v60 = vld [vmem:[%s4619_s1 + $0x328] sm:$0xff]  }
  0x39   :  { %3211 = vmatpush3.bf16.msra.mxu1 %v3545_v61  ;;  %3190 = vmatprep.subr.bf16.mxu0 %v3546_v62  ;;  %v3605_v61 = vld [vmem:[%s4619_s1 + $0x3a8] sm:$0xff]   ;;  %v3606_v62 = vld [vmem:[%s4619_s1 + $0x360] sm:$0xff]  }
  0x3a   :  { %3212 = vmatprep.subr.bf16.mxu1 %v3547_v63  ;;  %v3607_v63 = vld [vmem:[%s4619_s1 + $0x3e0] sm:$0xff]  }
  0x3c   :  { %3191 = vmatpush3.bf16.msra.mxu0 %v3548_v0  ;;  %v3608_v0 = vld [vmem:[%s4619_s1 + $0x320] sm:$0xff]  }
  0x3d   :  { %3213 = vmatpush3.bf16.msra.mxu1 %v3549_v1  ;;  %3192 = vmatprep.subr.bf16.mxu0 %v3550_v2  ;;  %v3609_v1 = vld [vmem:[%s4619_s1 + $0x3a0] sm:$0xff]   ;;  %v3610_v2 = vld [vmem:[%s4619_s1 + $0x358] sm:$0xff]  }
  0x3e   :  { %3214 = vmatprep.subr.bf16.mxu1 %v3551_v3  ;;  %v3611_v3 = vld [vmem:[%s4619_s1 + $0x3d8] sm:$0xff]  }
  0x40   :  { %3193 = vmatpush3.bf16.msra.mxu0 %v3552_v4  ;;  %v3612_v4 = vld [vmem:[%s4619_s1 + $0x318] sm:$0xff]  }
  0x41   :  { %3215 = vmatpush3.bf16.msra.mxu1 %v3553_v5  ;;  %3222 = vmatprep.subr.bf16.mxu0 %v3558_v12  ;;  %v3613_v5 = vld [vmem:[%s4619_s1 + $0x398] sm:$0xff]   ;;  %v3620_v12 = vld [vmem:[%s4619_s1 + $0x308] sm:$0xff]  }
  0x42   :  { %3244 = vmatprep.subr.bf16.mxu1 %v3559_v13  ;;  %v3621_v13 = vld [vmem:[%s4619_s1 + $0x388] sm:$0xff]  }
  0x43   :  { %2311 = vmatmul.mubr.bf16.vlgmr.msra.gmra.mxu0 %v2850_v7  ;;  %v3615_v7 = vld [vmem:[%s4619_s1 + $0x3d0] sm:$0xff]  }
  0x44   :  { %2351 = vmatmul.mubr.bf16.vlgmr.msra.gmra.mxu1 %v2852_v10  ;;  %3223 = vmatpush3.bf16.msra.mxu0 %v3560_v14  ;;  %v3618_v10 = vld [vmem:[%s4619_s1 + $0x348] sm:$0xff]   ;;  %v3622_v14 = vld [vmem:[%s4619_s1 + $0x340] sm:$0xff]  }
  0x45   :  { %3245 = vmatpush3.bf16.msra.mxu1 %v3561_v15  ;;  %3224 = vmatprep.subr.bf16.mxu0 %v3562_v16  ;;  %v3623_v15 = vld [vmem:[%s4619_s1 + $0x3c0] sm:$0xff]  }
  0x46   :  { %3246 = vmatprep.subr.bf16.mxu1 %v3563_v17  ;;  %2390 = vmatprep.mubr.bf16.mxu0 %v2855_v47  ;;  %v3624_v16 = vld [vmem:[%s4619_s1 + $0x300] sm:$0xff]   ;;  %v3653_v47 = vld [vmem:[%s4619_s1 + $0x490] sm:$0xff]  }
  0x47   :  { %2430 = vmatprep.mubr.bf16.mxu1 %v2857_v49  ;;  %v3625_v17 = vld [vmem:[%s4619_s1 + $0x380] sm:$0xff]   ;;  %v3655_v49 = vld [vmem:[%s4619_s1 + $0x4c8] sm:$0xff]  }
  0x48   :  { %3225 = vmatpush3.bf16.msra.mxu0 %v3564_v18  ;;  %v21_v18 = vld [vmem:[%s4620_s0 + $0x30] sm:$0xff] }
  0x49   :  { %3247 = vmatpush3.bf16.msra.mxu1 %v3565_v19  ;;  %3226 = vmatprep.subr.bf16.mxu0 %v3566_v20  ;;  %v22_v19 = vld [vmem:[%s4620_s0 + $0x38] sm:$0xff]  ;;  %v2858_v20 = vcombine.low %v21_v18, %v21_v18 }
  0x4a   :  { %3248 = vmatprep.subr.bf16.mxu1 %v3567_v21  ;;  %v2859_v21 = vcombine.high %v21_v18, %v21_v18  ;;  %v3686_v18 = vld [vmem:[%s4619_s1 + $0x550] sm:$0xff]  }
  0x4c   :  { %3227 = vmatpush3.bf16.msra.mxu0 %v3568_v22  ;;  %v2860_v22 = vcombine.low %v22_v19, %v22_v19 }
  0x4d   :  { %3249 = vmatpush3.bf16.msra.mxu1 %v3569_v23  ;;  %3228 = vmatprep.subr.bf16.mxu0 %v3570_v24  ;;  %v3630_v23 = vld [vmem:[%s4619_s1 + $0x478] sm:$0xff]   ;;  %v2861_v24 = vcombine.high %v22_v19, %v22_v19  ;;  %v3687_v19 = vld [vmem:[%s4619_s1 + $0x5d0] sm:$0xff]  }
  0x4e   :  { %3250 = vmatprep.subr.bf16.mxu1 %v3571_v25  ;;  %v3631_v25 = vld [vmem:[%s4619_s1 + $0x4f8] sm:$0xff]  }
  0x50   :  { %3229 = vmatpush3.bf16.msra.mxu0 %v3572_v26  ;;  %v3632_v26 = vld [vmem:[%s4619_s1 + $0x438] sm:$0xff]  }
  0x51   :  { %3251 = vmatpush3.bf16.msra.mxu1 %v3573_v27  ;;  %3230 = vmatprep.subr.bf16.mxu0 %v3574_v28  ;;  %v3633_v27 = vld [vmem:[%s4619_s1 + $0x4b8] sm:$0xff]   ;;  %v3634_v28 = vld [vmem:[%s4619_s1 + $0x470] sm:$0xff]  }
  0x52   :  { %3252 = vmatprep.subr.bf16.mxu1 %v3575_v29  ;;  %v3635_v29 = vld [vmem:[%s4619_s1 + $0x4f0] sm:$0xff]  }
  0x54   :  { %3231 = vmatpush3.bf16.msra.mxu0 %v3576_v30  ;;  %v3636_v30 = vld [vmem:[%s4619_s1 + $0x430] sm:$0xff]  }
  0x55   :  { %3253 = vmatpush3.bf16.msra.mxu1 %v3577_v31  ;;  %3232 = vmatprep.subr.bf16.mxu0 %v3578_v32  ;;  %v3637_v31 = vld [vmem:[%s4619_s1 + $0x4b0] sm:$0xff]   ;;  %v3638_v32 = vld [vmem:[%s4619_s1 + $0x468] sm:$0xff]  }
  0x56   :  { %3254 = vmatprep.subr.bf16.mxu1 %v3579_v33  ;;  %v3639_v33 = vld [vmem:[%s4619_s1 + $0x4e8] sm:$0xff]  }
  0x58   :  { %3233 = vmatpush3.bf16.msra.mxu0 %v3580_v34  ;;  %v3640_v34 = vld [vmem:[%s4619_s1 + $0x428] sm:$0xff]  }
  0x59   :  { %3255 = vmatpush3.bf16.msra.mxu1 %v3581_v35  ;;  %3234 = vmatprep.subr.bf16.mxu0 %v3582_v36  ;;  %v3641_v35 = vld [vmem:[%s4619_s1 + $0x4a8] sm:$0xff]   ;;  %v3642_v36 = vld [vmem:[%s4619_s1 + $0x460] sm:$0xff]  }
  0x5a   :  { %3256 = vmatprep.subr.bf16.mxu1 %v3583_v37  ;;  %v3643_v37 = vld [vmem:[%s4619_s1 + $0x4e0] sm:$0xff]  }
  0x5c   :  { %3235 = vmatpush3.bf16.msra.mxu0 %v3584_v38  ;;  %v3644_v38 = vld [vmem:[%s4619_s1 + $0x420] sm:$0xff]  }
  0x5d   :  { %3257 = vmatpush3.bf16.msra.mxu1 %v3585_v39  ;;  %3236 = vmatprep.subr.bf16.mxu0 %v3586_v40  ;;  %v3645_v39 = vld [vmem:[%s4619_s1 + $0x4a0] sm:$0xff]   ;;  %v3646_v40 = vld [vmem:[%s4619_s1 + $0x458] sm:$0xff]  }
  0x5e   :  { %3258 = vmatprep.subr.bf16.mxu1 %v3587_v41  ;;  %v3647_v41 = vld [vmem:[%s4619_s1 + $0x4d8] sm:$0xff]  }
  0x60   :  { %3237 = vmatpush3.bf16.msra.mxu0 %v3588_v42  ;;  %v3648_v42 = vld [vmem:[%s4619_s1 + $0x418] sm:$0xff]  }
  0x61   :  { %3259 = vmatpush3.bf16.msra.mxu1 %v3589_v43  ;;  %3266 = vmatprep.subr.bf16.mxu0 %v3594_v50  ;;  %v3649_v43 = vld [vmem:[%s4619_s1 + $0x498] sm:$0xff]   ;;  %v3656_v50 = vld [vmem:[%s4619_s1 + $0x408] sm:$0xff]  }
  0x62   :  { %3288 = vmatprep.subr.bf16.mxu1 %v3595_v51  ;;  %v3657_v51 = vld [vmem:[%s4619_s1 + $0x488] sm:$0xff]  }
  0x63   :  { %2391 = vmatmul.mubr.bf16.vlgmr.msra.gmra.mxu0 %v2854_v46  ;;  %v3652_v46 = vld [vmem:[%s4619_s1 + $0x410] sm:$0xff]  }
  0x64   :  { %2431 = vmatmul.mubr.bf16.vlgmr.msra.gmra.mxu1 %v2856_v48  ;;  %3267 = vmatpush3.bf16.msra.mxu0 %v3596_v52  ;;  %v3654_v48 = vld [vmem:[%s4619_s1 + $0x448] sm:$0xff]   ;;  %v3658_v52 = vld [vmem:[%s4619_s1 + $0x440] sm:$0xff]  }
  0x65   :  { %3289 = vmatpush3.bf16.msra.mxu1 %v3597_v53  ;;  %3268 = vmatprep.subr.bf16.mxu0 %v3598_v54  ;;  %v3659_v53 = vld [vmem:[%s4619_s1 + $0x4c0] sm:$0xff]  }
  0x66   :  { %3290 = vmatprep.subr.bf16.mxu1 %v3599_v55  ;;  %2470 = vmatprep.mubr.bf16.mxu0 %v2859_v21  ;;  %v3660_v54 = vld [vmem:[%s4619_s1 + $0x400] sm:$0xff]   ;;  %v3689_v21 = vld [vmem:[%s4619_s1 + $0x590] sm:$0xff]  }
  0x67   :  { %2510 = vmatprep.mubr.bf16.mxu1 %v2861_v24  ;;  %v3661_v55 = vld [vmem:[%s4619_s1 + $0x480] sm:$0xff]   ;;  %v3692_v24 = vld [vmem:[%s4619_s1 + $0x508] sm:$0xff]  }
  0x68   :  { %3269 = vmatpush3.bf16.msra.mxu0 %v3600_v56  ;;  %v23_v56 = vld [vmem:[%s4620_s0 + $0x40] sm:$0xff] }
  0x69   :  { %3291 = vmatpush3.bf16.msra.mxu1 %v3601_v57  ;;  %3270 = vmatprep.subr.bf16.mxu0 %v3602_v58  ;;  %v2862_v57 = vcombine.low %v23_v56, %v23_v56  ;;  %v2863_v58 = vcombine.high %v23_v56, %v23_v56  ;;  %v3722_v56 = vld [vmem:[%s4619_s1 + $0x650] sm:$0xff]  }
  0x6a   :  { %3292 = vmatprep.subr.bf16.mxu1 %v3603_v59  ;;  %v24_v59 = vld [vmem:[%s4620_s0 + $0x48] sm:$0xff] }
  0x6c   :  { %3271 = vmatpush3.bf16.msra.mxu0 %v3604_v60  ;;  %v2864_v60 = vcombine.low %v24_v59, %v24_v59 }
  0x6d   :  { %3293 = vmatpush3.bf16.msra.mxu1 %v3605_v61  ;;  %3272 = vmatprep.subr.bf16.mxu0 %v3606_v62  ;;  %v2865_v61 = vcombine.high %v24_v59, %v24_v59  ;;  %v3666_v62 = vld [vmem:[%s4619_s1 + $0x578] sm:$0xff]   ;;  %v3725_v59 = vld [vmem:[%s4619_s1 + $0x690] sm:$0xff]  }
  0x6e   :  { %3294 = vmatprep.subr.bf16.mxu1 %v3607_v63  ;;  %v3667_v63 = vld [vmem:[%s4619_s1 + $0x5f8] sm:$0xff]  }
  0x70   :  { %3273 = vmatpush3.bf16.msra.mxu0 %v3608_v0  ;;  %v3668_v0 = vld [vmem:[%s4619_s1 + $0x538] sm:$0xff]  }
  0x71   :  { %3295 = vmatpush3.bf16.msra.mxu1 %v3609_v1  ;;  %3274 = vmatprep.subr.bf16.mxu0 %v3610_v2  ;;  %v3669_v1 = vld [vmem:[%s4619_s1 + $0x5b8] sm:$0xff]   ;;  %v3670_v2 = vld [vmem:[%s4619_s1 + $0x570] sm:$0xff]  }
  0x72   :  { %3296 = vmatprep.subr.bf16.mxu1 %v3611_v3  ;;  %v3671_v3 = vld [vmem:[%s4619_s1 + $0x5f0] sm:$0xff]  }
  0x74   :  { %3275 = vmatpush3.bf16.msra.mxu0 %v3612_v4  ;;  %v3672_v4 = vld [vmem:[%s4619_s1 + $0x530] sm:$0xff]  }
  0x75   :  { %3297 = vmatpush3.bf16.msra.mxu1 %v3613_v5  ;;  %3276 = vmatprep.subr.bf16.mxu0 %v3614_v6  ;;  %v3673_v5 = vld [vmem:[%s4619_s1 + $0x5b0] sm:$0xff]   ;;  %v3674_v6 = vld [vmem:[%s4619_s1 + $0x568] sm:$0xff]  }
  0x76   :  { %3298 = vmatprep.subr.bf16.mxu1 %v3615_v7  ;;  %v3675_v7 = vld [vmem:[%s4619_s1 + $0x5e8] sm:$0xff]  }
  0x78   :  { %3277 = vmatpush3.bf16.msra.mxu0 %v3616_v8  ;;  %v3676_v8 = vld [vmem:[%s4619_s1 + $0x528] sm:$0xff]  }
  0x79   :  { %3299 = vmatpush3.bf16.msra.mxu1 %v3617_v9  ;;  %3278 = vmatprep.subr.bf16.mxu0 %v3618_v10  ;;  %v3677_v9 = vld [vmem:[%s4619_s1 + $0x5a8] sm:$0xff]   ;;  %v3678_v10 = vld [vmem:[%s4619_s1 + $0x560] sm:$0xff]  }
  0x7a   :  { %3300 = vmatprep.subr.bf16.mxu1 %v3619_v11  ;;  %v3679_v11 = vld [vmem:[%s4619_s1 + $0x5e0] sm:$0xff]  }
  0x7c   :  { %3279 = vmatpush3.bf16.msra.mxu0 %v3620_v12  ;;  %v3680_v12 = vld [vmem:[%s4619_s1 + $0x520] sm:$0xff]  }
  0x7d   :  { %3301 = vmatpush3.bf16.msra.mxu1 %v3621_v13  ;;  %3280 = vmatprep.subr.bf16.mxu0 %v3622_v14  ;;  %v3681_v13 = vld [vmem:[%s4619_s1 + $0x5a0] sm:$0xff]   ;;  %v3682_v14 = vld [vmem:[%s4619_s1 + $0x558] sm:$0xff]  }
  0x7e   :  { %3302 = vmatprep.subr.bf16.mxu1 %v3623_v15  ;;  %v3683_v15 = vld [vmem:[%s4619_s1 + $0x5d8] sm:$0xff]  }
  0x80   :  { %3281 = vmatpush3.bf16.msra.mxu0 %v3624_v16  ;;  %v3684_v16 = vld [vmem:[%s4619_s1 + $0x518] sm:$0xff]  }
  0x81   :  { %3303 = vmatpush3.bf16.msra.mxu1 %v3625_v17  ;;  %3310 = vmatprep.subr.bf16.mxu0 %v3630_v23  ;;  %v3685_v17 = vld [vmem:[%s4619_s1 + $0x598] sm:$0xff]   ;;  %v3691_v23 = vld [vmem:[%s4619_s1 + $0x5c8] sm:$0xff]  }
  0x82   :  { %3332 = vmatprep.subr.bf16.mxu1 %v3631_v25  ;;  %v3693_v25 = vld [vmem:[%s4619_s1 + $0x588] sm:$0xff]  }
  0x83   :  { %2471 = vmatmul.mubr.bf16.vlgmr.msra.gmra.mxu0 %v2858_v20  ;;  %v3688_v20 = vld [vmem:[%s4619_s1 + $0x510] sm:$0xff]  }
  0x84   :  { %2511 = vmatmul.mubr.bf16.vlgmr.msra.gmra.mxu1 %v2860_v22  ;;  %3311 = vmatpush3.bf16.msra.mxu0 %v3632_v26  ;;  %v3690_v22 = vld [vmem:[%s4619_s1 + $0x548] sm:$0xff]   ;;  %v3694_v26 = vld [vmem:[%s4619_s1 + $0x540] sm:$0xff]  }
  0x85   :  { %3333 = vmatpush3.bf16.msra.mxu1 %v3633_v27  ;;  %3312 = vmatprep.subr.bf16.mxu0 %v3634_v28  ;;  %v3695_v27 = vld [vmem:[%s4619_s1 + $0x5c0] sm:$0xff]  }
  0x86   :  { %3334 = vmatprep.subr.bf16.mxu1 %v3635_v29  ;;  %2550 = vmatprep.mubr.bf16.mxu0 %v2863_v58  ;;  %v3696_v28 = vld [vmem:[%s4619_s1 + $0x500] sm:$0xff]   ;;  %v3724_v58 = vld [vmem:[%s4619_s1 + $0x610] sm:$0xff]  }
  0x87   :  { %2590 = vmatprep.mubr.bf16.mxu1 %v2865_v61  ;;  %v3697_v29 = vld [vmem:[%s4619_s1 + $0x580] sm:$0xff]   ;;  %v3727_v61 = vld [vmem:[%s4619_s1 + $0x6c8] sm:$0xff]  }
  0x88   :  { %3313 = vmatpush3.bf16.msra.mxu0 %v3636_v30  ;;  %v25_v30 = vld [vmem:[%s4620_s0 + $0x50] sm:$0xff] }
  0x89   :  { %3335 = vmatpush3.bf16.msra.mxu1 %v3637_v31  ;;  %3314 = vmatprep.subr.bf16.mxu0 %v3638_v32  ;;  %v26_v31 = vld [vmem:[%s4620_s0 + $0x58] sm:$0xff]  ;;  %v2866_v32 = vcombine.low %v25_v30, %v25_v30 }
  0x8a   :  { %3336 = vmatprep.subr.bf16.mxu1 %v3639_v33  ;;  %v2867_v33 = vcombine.high %v25_v30, %v25_v30  ;;  %v3745_v30 = vld [vmem:[%s4619_s1 + $0x7b0] sm:$0xff]  }
  0x8c   :  { %3315 = vmatpush3.bf16.msra.mxu0 %v3640_v34  ;;  %v2868_v34 = vcombine.low %v26_v31, %v26_v31 }
  0x8d   :  { %3337 = vmatpush3.bf16.msra.mxu1 %v3641_v35  ;;  %3316 = vmatprep.subr.bf16.mxu0 %v3642_v36  ;;  %v2869_v35 = vcombine.high %v26_v31, %v26_v31  ;;  %v3702_v36 = vld [vmem:[%s4619_s1 + $0x678] sm:$0xff]   ;;  %v3746_v31 = vld [vmem:[%s4619_s1 + $0x768] sm:$0xff]  }
  0x8e   :  { %3338 = vmatprep.subr.bf16.mxu1 %v3643_v37  ;;  %v3703_v37 = vld [vmem:[%s4619_s1 + $0x6f8] sm:$0xff]  }
  0x90   :  { %3317 = vmatpush3.bf16.msra.mxu0 %v3644_v38  ;;  %v3704_v38 = vld [vmem:[%s4619_s1 + $0x638] sm:$0xff]  }
  0x91   :  { %3339 = vmatpush3.bf16.msra.mxu1 %v3645_v39  ;;  %3318 = vmatprep.subr.bf16.mxu0 %v3646_v40  ;;  %v3705_v39 = vld [vmem:[%s4619_s1 + $0x6b8] sm:$0xff]   ;;  %v3706_v40 = vld [vmem:[%s4619_s1 + $0x670] sm:$0xff]  }
  0x92   :  { %3340 = vmatprep.subr.bf16.mxu1 %v3647_v41  ;;  %v3707_v41 = vld [vmem:[%s4619_s1 + $0x6f0] sm:$0xff]  }
  0x94   :  { %3319 = vmatpush3.bf16.msra.mxu0 %v3648_v42  ;;  %v3708_v42 = vld [vmem:[%s4619_s1 + $0x630] sm:$0xff]  }
  0x95   :  { %3341 = vmatpush3.bf16.msra.mxu1 %v3649_v43  ;;  %3320 = vmatprep.subr.bf16.mxu0 %v3650_v44  ;;  %v3709_v43 = vld [vmem:[%s4619_s1 + $0x6b0] sm:$0xff]   ;;  %v3710_v44 = vld [vmem:[%s4619_s1 + $0x668] sm:$0xff]  }
  0x96   :  { %3342 = vmatprep.subr.bf16.mxu1 %v3651_v45  ;;  %v3711_v45 = vld [vmem:[%s4619_s1 + $0x6e8] sm:$0xff]  }
  0x98   :  { %3321 = vmatpush3.bf16.msra.mxu0 %v3652_v46  ;;  %v3712_v46 = vld [vmem:[%s4619_s1 + $0x628] sm:$0xff]  }
  0x99   :  { %3343 = vmatpush3.bf16.msra.mxu1 %v3653_v47  ;;  %3322 = vmatprep.subr.bf16.mxu0 %v3654_v48  ;;  %v3713_v47 = vld [vmem:[%s4619_s1 + $0x6a8] sm:$0xff]   ;;  %v3714_v48 = vld [vmem:[%s4619_s1 + $0x660] sm:$0xff]  }
  0x9a   :  { %3344 = vmatprep.subr.bf16.mxu1 %v3655_v49  ;;  %v3715_v49 = vld [vmem:[%s4619_s1 + $0x6e0] sm:$0xff]  }
  0x9c   :  { %3323 = vmatpush3.bf16.msra.mxu0 %v3656_v50  ;;  %v3716_v50 = vld [vmem:[%s4619_s1 + $0x620] sm:$0xff]  }
  0x9d   :  { %3345 = vmatpush3.bf16.msra.mxu1 %v3657_v51  ;;  %3324 = vmatprep.subr.bf16.mxu0 %v3658_v52  ;;  %v3717_v51 = vld [vmem:[%s4619_s1 + $0x6a0] sm:$0xff]   ;;  %v3718_v52 = vld [vmem:[%s4619_s1 + $0x658] sm:$0xff]  }
  0x9e   :  { %3346 = vmatprep.subr.bf16.mxu1 %v3659_v53  ;;  %v3719_v53 = vld [vmem:[%s4619_s1 + $0x6d8] sm:$0xff]  }
  0xa0   :  { %3325 = vmatpush3.bf16.msra.mxu0 %v3660_v54  ;;  %v3720_v54 = vld [vmem:[%s4619_s1 + $0x618] sm:$0xff]  }
  0xa1   :  { %3347 = vmatpush3.bf16.msra.mxu1 %v3661_v55  ;;  %3354 = vmatprep.subr.bf16.mxu0 %v3666_v62  ;;  %v3721_v55 = vld [vmem:[%s4619_s1 + $0x698] sm:$0xff]   ;;  %v3728_v62 = vld [vmem:[%s4619_s1 + $0x608] sm:$0xff]  }
  0xa2   :  { %3376 = vmatprep.subr.bf16.mxu1 %v3667_v63  ;;  %v3729_v63 = vld [vmem:[%s4619_s1 + $0x688] sm:$0xff]  }
  0xa3   :  { %2551 = vmatmul.mubr.bf16.vlgmr.msra.gmra.mxu0 %v2862_v57  ;;  %v3723_v57 = vld [vmem:[%s4619_s1 + $0x6d0] sm:$0xff]  }
  0xa4   :  { %2591 = vmatmul.mubr.bf16.vlgmr.msra.gmra.mxu1 %v2864_v60  ;;  %3355 = vmatpush3.bf16.msra.mxu0 %v3668_v0  ;;  %v3726_v60 = vld [vmem:[%s4619_s1 + $0x648] sm:$0xff]   ;;  %v3730_v0 = vld [vmem:[%s4619_s1 + $0x640] sm:$0xff]  }
  0xa5   :  { %3377 = vmatpush3.bf16.msra.mxu1 %v3669_v1  ;;  %3356 = vmatprep.subr.bf16.mxu0 %v3670_v2  ;;  %v3731_v1 = vld [vmem:[%s4619_s1 + $0x6c0] sm:$0xff]  }
  0xa6   :  { %3378 = vmatprep.subr.bf16.mxu1 %v3671_v3  ;;  %2630 = vmatprep.mubr.bf16.mxu0 %v2867_v33  ;;  %v3732_v2 = vld [vmem:[%s4619_s1 + $0x600] sm:$0xff]   ;;  %v3748_v33 = vld [vmem:[%s4619_s1 + $0x728] sm:$0xff]  }
  0xa7   :  { %2670 = vmatprep.mubr.bf16.mxu1 %v2869_v35  ;;  %v3733_v3 = vld [vmem:[%s4619_s1 + $0x680] sm:$0xff]  }
  0xa8   :  { %3357 = vmatpush3.bf16.msra.mxu0 %v3672_v4  ;;  %v27_v4 = vld [vmem:[%s4620_s0 + $0x60] sm:$0xff] }
  0xa9   :  { %3379 = vmatpush3.bf16.msra.mxu1 %v3673_v5  ;;  %3358 = vmatprep.subr.bf16.mxu0 %v3674_v6  ;;  %v28_v5 = vld [vmem:[%s4620_s0 + $0x68] sm:$0xff]  ;;  %v3750_v35 = vld [vmem:[%s4619_s1 + $0x760] sm:$0xff]  }
  0xaa   :  { %3380 = vmatprep.subr.bf16.mxu1 %v3675_v7 }
  0xac   :  { %3359 = vmatpush3.bf16.msra.mxu0 %v3676_v8  ;;  %v2870_v8 = vcombine.low %v27_v4, %v27_v4 }
  0xad   :  { %3381 = vmatpush3.bf16.msra.mxu1 %v3677_v9  ;;  %3360 = vmatprep.subr.bf16.mxu0 %v3678_v10  ;;  %v2871_v9 = vcombine.high %v27_v4, %v27_v4  ;;  %v2872_v10 = vcombine.low %v28_v5, %v28_v5 }
  0xae   :  { %3382 = vmatprep.subr.bf16.mxu1 %v3679_v11  ;;  %v3738_v11 = vld [vmem:[%s4619_s1 + $0x778] sm:$0xff]  }
  0xb0   :  { %3361 = vmatpush3.bf16.msra.mxu0 %v3680_v12  ;;  %v2873_v12 = vcombine.high %v28_v5, %v28_v5 }
  0xb1   :  { %3383 = vmatpush3.bf16.msra.mxu1 %v3681_v13  ;;  %3362 = vmatprep.subr.bf16.mxu0 %v3682_v14  ;;  %v3739_v13 = vld [vmem:[%s4619_s1 + $0x7f8] sm:$0xff]  }
  0xb2   :  { %3384 = vmatprep.subr.bf16.mxu1 %v3683_v15 }
  0xb4   :  { %3363 = vmatpush3.bf16.msra.mxu0 %v3684_v16  ;;  %v3740_v16 = vld [vmem:[%s4619_s1 + $0x738] sm:$0xff]  }
  0xb5   :  { %3385 = vmatpush3.bf16.msra.mxu1 %v3685_v17  ;;  %3364 = vmatprep.subr.bf16.mxu0 %v3686_v18 }
  0xb6   :  { %3386 = vmatprep.subr.bf16.mxu1 %v3687_v19  ;;  %v3741_v19 = vld [vmem:[%s4619_s1 + $0x7b8] sm:$0xff]  }
  0xb8   :  { %3365 = vmatpush3.bf16.msra.mxu0 %v3688_v20  ;;  %v2845_v20 = vld [vmem:[%s4621_s2] ss:$0 sm:$0xff] }
  0xb9   :  { %3387 = vmatpush3.bf16.msra.mxu1 %v3689_v21  ;;  %3366 = vmatprep.subr.bf16.mxu0 %v3690_v22 }
  0xba   :  { %3388 = vmatprep.subr.bf16.mxu1 %v3691_v23 }
  0xbc   :  { %3367 = vmatpush3.bf16.msra.mxu0 %v3692_v24  ;;  %v3742_v24 = vld [vmem:[%s4619_s1 + $0x770] sm:$0xff]  }
  0xbd   :  { %3389 = vmatpush3.bf16.msra.mxu1 %v3693_v25  ;;  %3368 = vmatprep.subr.bf16.mxu0 %v3694_v26  ;;  %v3743_v25 = vld [vmem:[%s4619_s1 + $0x7f0] sm:$0xff]  }
  0xbe   :  { %3390 = vmatprep.subr.bf16.mxu1 %v3695_v27 }
  0xc0   :  { %3369 = vmatpush3.bf16.msra.mxu0 %v3696_v28 }
  0xc1   :  { %3391 = vmatpush3.bf16.msra.mxu1 %v3697_v29  ;;  %3398 = vmatprep.subr.bf16.mxu0 %v3702_v36  ;;  %v3744_v29 = vld [vmem:[%s4619_s1 + $0x730] sm:$0xff]   ;;  %v3751_v36 = vld [vmem:[%s4619_s1 + $0x7e0] sm:$0xff]  }
  0xc2   :  { %3420 = vmatprep.subr.bf16.mxu1 %v3703_v37  ;;  %v3752_v37 = vld [vmem:[%s4619_s1 + $0x720] sm:$0xff]  }
  0xc3   :  { %2631 = vmatmul.mubr.bf16.vlgmr.msra.gmra.mxu0 %v2866_v32  ;;  %v3747_v32 = vld [vmem:[%s4619_s1 + $0x7e8] sm:$0xff]  }
  0xc4   :  { %2671 = vmatmul.mubr.bf16.vlgmr.msra.gmra.mxu1 %v2868_v34  ;;  %3399 = vmatpush3.bf16.msra.mxu0 %v3704_v38  ;;  %v3749_v34 = vld [vmem:[%s4619_s1 + $0x7a8] sm:$0xff]   ;;  %v3753_v38 = vld [vmem:[%s4619_s1 + $0x7a0] sm:$0xff]  }
  0xc5   :  { %3421 = vmatpush3.bf16.msra.mxu1 %v3705_v39  ;;  %3400 = vmatprep.subr.bf16.mxu0 %v3706_v40  ;;  %v3754_v39 = vld [vmem:[%s4619_s1 + $0x758] sm:$0xff]  }
  0xc6   :  { %3422 = vmatprep.subr.bf16.mxu1 %v3707_v41  ;;  %2710 = vmatprep.mubr.bf16.mxu0 %v2871_v9  ;;  %v3755_v40 = vld [vmem:[%s4619_s1 + $0x7d8] sm:$0xff]  }
  0xc7   :  { %2750 = vmatprep.mubr.bf16.mxu1 %v2873_v12  ;;  %v3756_v41 = vld [vmem:[%s4619_s1 + $0x718] sm:$0xff]  }
  0xc8   :  { %3401 = vmatpush3.bf16.msra.mxu0 %v3708_v42  ;;  %v3757_v42 = vld [vmem:[%s4619_s1 + $0x798] sm:$0xff]  }
  0xc9   :  { %3423 = vmatpush3.bf16.msra.mxu1 %v3709_v43  ;;  %3402 = vmatprep.subr.bf16.mxu0 %v3710_v44  ;;  %v3758_v43 = vld [vmem:[%s4619_s1 + $0x750] sm:$0xff]  }
  0xca   :  { %3424 = vmatprep.subr.bf16.mxu1 %v3711_v45  ;;  %v3759_v44 = vld [vmem:[%s4619_s1 + $0x7d0] sm:$0xff]  }
  0xcb   :  { %v3760_v45 = vld [vmem:[%s4619_s1 + $0x710] sm:$0xff]  }
  0xcc   :  { %3403 = vmatpush3.bf16.msra.mxu0 %v3712_v46  ;;  %v3761_v46 = vld [vmem:[%s4619_s1 + $0x790] sm:$0xff]  }
  0xcd   :  { %3425 = vmatpush3.bf16.msra.mxu1 %v3713_v47  ;;  %3404 = vmatprep.subr.bf16.mxu0 %v3714_v48  ;;  %v3762_v47 = vld [vmem:[%s4619_s1 + $0x748] sm:$0xff]  }
  0xce   :  { %3426 = vmatprep.subr.bf16.mxu1 %v3715_v49  ;;  %v3763_v48 = vld [vmem:[%s4619_s1 + $0x7c8] sm:$0xff]  }
  0xcf   :  { %v3764_v49 = vld [vmem:[%s4619_s1 + $0x708] sm:$0xff]  }
  0xd0   :  { %3405 = vmatpush3.bf16.msra.mxu0 %v3716_v50  ;;  %v3765_v50 = vld [vmem:[%s4619_s1 + $0x788] sm:$0xff]  }
  0xd1   :  { %3427 = vmatpush3.bf16.msra.mxu1 %v3717_v51  ;;  %3406 = vmatprep.subr.bf16.mxu0 %v3718_v52  ;;  %v3766_v51 = vld [vmem:[%s4619_s1 + $0x740] sm:$0xff]  }
  0xd2   :  { %3428 = vmatprep.subr.bf16.mxu1 %v3719_v53  ;;  %v3767_v52 = vld [vmem:[%s4619_s1 + $0x7c0] sm:$0xff]  }
  0xd3   :  { %v3768_v53 = vld [vmem:[%s4619_s1 + $0x700] sm:$0xff]  }
  0xd4   :  { %3407 = vmatpush3.bf16.msra.mxu0 %v3720_v54  ;;  %v3769_v54 = vld [vmem:[%s4619_s1 + $0x780] sm:$0xff]  }
  0xd5   :  { %3429 = vmatpush3.bf16.msra.mxu1 %v3721_v55  ;;  %3408 = vmatprep.subr.bf16.mxu0 %v3722_v56  ;;  %v29_v55 = vld [vmem:[%s4620_s0 + $0x70] sm:$0xff]  ;;  %v30_v56 = vld [vmem:[%s4620_s0 + $0x78] sm:$0xff] }
  0xd6   :  { %3430 = vmatprep.subr.bf16.mxu1 %v3723_v57 }
  0xd8   :  { %3409 = vmatpush3.bf16.msra.mxu0 %v3724_v58 }
  0xd9   :  { %3431 = vmatpush3.bf16.msra.mxu1 %v3725_v59  ;;  %3410 = vmatprep.subr.bf16.mxu0 %v3726_v60  ;;  %v2874_v59 = vcombine.low %v29_v55, %v29_v55  ;;  %v2875_v60 = vcombine.high %v29_v55, %v29_v55 }
  0xda   :  { %3432 = vmatprep.subr.bf16.mxu1 %v3727_v61  ;;  %v2876_v61 = vcombine.low %v30_v56, %v30_v56 }
  0xdc   :  { %3411 = vmatpush3.bf16.msra.mxu0 %v3728_v62  ;;  %v2877_v62 = vcombine.high %v30_v56, %v30_v56 }
  0xdd   :  { %3433 = vmatpush3.bf16.msra.mxu1 %v3729_v63  ;;  %3412 = vmatprep.subr.bf16.mxu0 %v3730_v0 }
  0xde   :  { %3434 = vmatprep.subr.bf16.mxu1 %v3731_v1 }
  0xe0   :  { %3413 = vmatpush3.bf16.msra.mxu0 %v3732_v2 }
  0xe1   :  { %3435 = vmatpush3.bf16.msra.mxu1 %v3733_v3  ;;  %3442 = vmatprep.subr.bf16.mxu0 %v3738_v11 }
  0xe2   :  { %3464 = vmatprep.subr.bf16.mxu1 %v3739_v13 }
  0xe3   :  { %v3150_v6 = vpop.f32.mrf.mxu0  ;;  %2711 = vmatmul.mubr.bf16.vlgmr.msra.gmra.mxu0 %v2870_v8 }
  0xe4   :  { %v3172_v7 = vpop.f32.mrf.mxu1  ;;  %2751 = vmatmul.mubr.bf16.vlgmr.msra.gmra.mxu1 %v2872_v10  ;;  %3443 = vmatpush3.bf16.msra.mxu0 %v3740_v16 }
  0xe5   :  { %v3151_v14 = vpop.f32.mrf.mxu0  ;;  %3465 = vmatpush3.bf16.msra.mxu1 %v3741_v19  ;;  %3444 = vmatprep.subr.bf16.mxu0 %v3742_v24 }
  0xe6   :  { %v3173_v15 = vpop.f32.mrf.mxu1  ;;  %v3152_v17 = vadd.f32 %v3151_v14, %v3150_v6  ;;  %3466 = vmatprep.subr.bf16.mxu1 %v3743_v25  ;;  %2790 = vmatprep.mubr.bf16.mxu0 %v2875_v60 }
  0xe7   :  { %v3174_v18 = vadd.f32 %v3173_v15, %v3172_v7  ;;  %v3153_v21 = vpop.f32.mrf.mxu0  ;;  %2830 = vmatprep.mubr.bf16.mxu1 %v2877_v62 }
  0xe8   :  { %v3175_v22 = vpop.f32.mrf.mxu1  ;;  %v2233_v23 = vadd.f32 %v3152_v17, %v2845_v20  ;;  %3445 = vmatpush3.bf16.msra.mxu0 %v3744_v29 }
  0xe9   :  { %v3154_v26 = vpop.f32.mrf.mxu0  ;;  %3467 = vmatpush3.bf16.msra.mxu1 %v3745_v30  ;;  %3446 = vmatprep.subr.bf16.mxu0 %v3746_v31 }
  0xea   :  { %v3176_v27 = vpop.f32.mrf.mxu1  ;;  %v4529_v28 = vadd.f32 %v3174_v18, %v2233_v23  ;;  %3468 = vmatprep.subr.bf16.mxu1 %v3747_v32 }
  0xec   :  { %3447 = vmatpush3.bf16.msra.mxu0 %v3748_v33 }
  0xed   :  { %3469 = vmatpush3.bf16.msra.mxu1 %v3749_v34  ;;  %3448 = vmatprep.subr.bf16.mxu0 %v3750_v35 }
  0xee   :  { %3470 = vmatprep.subr.bf16.mxu1 %v3751_v36 }
  0xf0   :  { %3449 = vmatpush3.bf16.msra.mxu0 %v3752_v37 }
  0xf1   :  { %3471 = vmatpush3.bf16.msra.mxu1 %v3753_v38  ;;  %3450 = vmatprep.subr.bf16.mxu0 %v3754_v39 }
  0xf2   :  { %3472 = vmatprep.subr.bf16.mxu1 %v3755_v40 }
  0xf4   :  { %3451 = vmatpush3.bf16.msra.mxu0 %v3756_v41 }
  0xf5   :  { %3473 = vmatpush3.bf16.msra.mxu1 %v3757_v42  ;;  %3452 = vmatprep.subr.bf16.mxu0 %v3758_v43 }
  0xf6   :  { %3474 = vmatprep.subr.bf16.mxu1 %v3759_v44 }
  0xf8   :  { %3453 = vmatpush3.bf16.msra.mxu0 %v3760_v45 }
  0xf9   :  { %3475 = vmatpush3.bf16.msra.mxu1 %v3761_v46  ;;  %3454 = vmatprep.subr.bf16.mxu0 %v3762_v47 }
  0xfa   :  { %3476 = vmatprep.subr.bf16.mxu1 %v3763_v48 }
  0xfc   :  { %3455 = vmatpush3.bf16.msra.mxu0 %v3764_v49 }
  0xfd   :  { %3477 = vmatpush3.bf16.msra.mxu1 %v3765_v50  ;;  %3456 = vmatprep.subr.bf16.mxu0 %v3766_v51 }
  0xfe   :  { %3478 = vmatprep.subr.bf16.mxu1 %v3767_v52 }
 0x100   :  { %3457 = vmatpush3.bf16.msra.mxu0 %v3768_v53 }
 0x101   :  { %3479 = vmatpush3.bf16.msra.mxu1 %v3769_v54 }
 0x103   :  { %v3194_v57 = vpop.f32.mrf.mxu0  ;;  %2791 = vmatmul.mubr.bf16.vlgmr.msra.gmra.mxu0 %v2874_v59 }
 0x104   :  { %v3216_v58 = vpop.f32.mrf.mxu1  ;;  %2831 = vmatmul.mubr.bf16.vlgmr.msra.gmra.mxu1 %v2876_v61 }
 0x105   :  { %v3195_v63 = vpop.f32.mrf.mxu0 }
 0x106   :  { %v3217_v0 = vpop.f32.mrf.mxu1  ;;  %v3196_v1 = vadd.f32 %v3195_v63, %v3194_v57 }
 0x107   :  { %v3218_v2 = vadd.f32 %v3217_v0, %v3216_v58  ;;  %v3197_v3 = vpop.f32.mrf.mxu0 }
 0x108   :  { %v3219_v4 = vpop.f32.mrf.mxu1  ;;  %v2313_v5 = vadd.f32 %v3196_v1, %v4529_v28 }
 0x109   :  { %v3198_v6 = vpop.f32.mrf.mxu0 }
 0x10a   :  { %v3220_v7 = vpop.f32.mrf.mxu1  ;;  %v2353_v8 = vadd.f32 %v3218_v2, %v2313_v5 }
 0x123   :  { %v3238_v9 = vpop.f32.mrf.mxu0 }
 0x124   :  { %v3260_v10 = vpop.f32.mrf.mxu1 }
 0x125   :  { %v3239_v11 = vpop.f32.mrf.mxu0 }
 0x126   :  { %v3240_v12 = vadd.f32 %v3239_v11, %v3238_v9  ;;  %v3261_v13 = vpop.f32.mrf.mxu1 }
 0x127   :  { %v3262_v14 = vadd.f32 %v3261_v13, %v3260_v10  ;;  %v3241_v15 = vpop.f32.mrf.mxu0 }
 0x128   :  { %v2393_v16 = vadd.f32 %v3240_v12, %v2353_v8  ;;  %v3263_v17 = vpop.f32.mrf.mxu1 }
 0x129   :  { %v3242_v18 = vpop.f32.mrf.mxu0 }
 0x12a   :  { %v2433_v19 = vadd.f32 %v3262_v14, %v2393_v16  ;;  %v3264_v20 = vpop.f32.mrf.mxu1 }
 0x143   :  { %v3282_v21 = vpop.f32.mrf.mxu0 }
 0x144   :  { %v3304_v22 = vpop.f32.mrf.mxu1 }
 0x145   :  { %v3283_v23 = vpop.f32.mrf.mxu0 }
 0x146   :  { %v3284_v24 = vadd.f32 %v3283_v23, %v3282_v21  ;;  %v3305_v25 = vpop.f32.mrf.mxu1 }
 0x147   :  { %v3306_v26 = vadd.f32 %v3305_v25, %v3304_v22  ;;  %v3285_v27 = vpop.f32.mrf.mxu0 }
 0x148   :  { %v2473_v28 = vadd.f32 %v3284_v24, %v2433_v19  ;;  %v3307_v29 = vpop.f32.mrf.mxu1 }
 0x149   :  { %v3286_v30 = vpop.f32.mrf.mxu0 }
 0x14a   :  { %v2513_v31 = vadd.f32 %v3306_v26, %v2473_v28  ;;  %v3308_v32 = vpop.f32.mrf.mxu1 }
 0x163   :  { %v3326_v33 = vpop.f32.mrf.mxu0 }
 0x164   :  { %v3348_v34 = vpop.f32.mrf.mxu1 }
 0x165   :  { %v3327_v35 = vpop.f32.mrf.mxu0 }
 0x166   :  { %v3349_v36 = vpop.f32.mrf.mxu1  ;;  %v3328_v37 = vadd.f32 %v3327_v35, %v3326_v33 }
 0x167   :  { %v3350_v38 = vadd.f32 %v3349_v36, %v3348_v34  ;;  %v3329_v39 = vpop.f32.mrf.mxu0 }
 0x168   :  { %v3351_v40 = vpop.f32.mrf.mxu1  ;;  %v2553_v41 = vadd.f32 %v3328_v37, %v2513_v31 }
 0x169   :  { %v3330_v42 = vpop.f32.mrf.mxu0 }
 0x16a   :  { %v3352_v43 = vpop.f32.mrf.mxu1  ;;  %v2593_v44 = vadd.f32 %v3350_v38, %v2553_v41 }
 0x183   :  { %v3370_v45 = vpop.f32.mrf.mxu0 }
 0x184   :  { %v3392_v46 = vpop.f32.mrf.mxu1 }
 0x185   :  { %v3371_v47 = vpop.f32.mrf.mxu0 }
 0x186   :  { %v3393_v48 = vpop.f32.mrf.mxu1  ;;  %v3372_v61 = vadd.f32 %v3371_v47, %v3370_v45 }
 0x187   :  { %v3373_v49 = vpop.f32.mrf.mxu0  ;;  %v3394_v63 = vadd.f32 %v3393_v48, %v3392_v46 }
 0x188   :  { %v3395_v50 = vpop.f32.mrf.mxu1  ;;  %v2633_v62 = vadd.f32 %v3372_v61, %v2593_v44 }
 0x189   :  { %v3374_v51 = vpop.f32.mrf.mxu0 }
 0x18a   :  { %v3396_v52 = vpop.f32.mrf.mxu1  ;;  %v2673_v1 = vadd.f32 %v3394_v63, %v2633_v62 }
 0x1a3   :  { %v3414_v53 = vpop.f32.mrf.mxu0 }
 0x1a4   :  { %v3436_v54 = vpop.f32.mrf.mxu1 }
 0x1a5   :  { %v3415_v55 = vpop.f32.mrf.mxu0 }
 0x1a6   :  { %v3437_v56 = vpop.f32.mrf.mxu1  ;;  %v3416_v0 = vadd.f32 %v3415_v55, %v3414_v53 }
 0x1a7   :  { %v3417_v57 = vpop.f32.mrf.mxu0  ;;  %v3438_v3 = vadd.f32 %v3437_v56, %v3436_v54 }
 0x1a8   :  { %v3439_v58 = vpop.f32.mrf.mxu1  ;;  %v2713_v2 = vadd.f32 %v3416_v0, %v2673_v1 }
 0x1a9   :  { %v3418_v59 = vpop.f32.mrf.mxu0 }
 0x1aa   :  { %v3440_v60 = vpop.f32.mrf.mxu1  ;;  %v2753_v7 = vadd.f32 %v3438_v3, %v2713_v2 }
 0x1c3   :  { %v3458_v4 = vpop.f32.mrf.mxu0 }
 0x1c4   :  { %v3480_v5 = vpop.f32.mrf.mxu1 }
 0x1c5   :  { %v3459_v6 = vpop.f32.mrf.mxu0 }
 0x1c6   :  { %v3460_v8 = vadd.f32 %v3459_v6, %v3458_v4  ;;  %v3481_v9 = vpop.f32.mrf.mxu1 }
 0x1c7   :  { %v3461_v10 = vpop.f32.mrf.mxu0  ;;  %v3482_v12 = vadd.f32 %v3481_v9, %v3480_v5 }
 0x1c8   :  { %v2793_v11 = vadd.f32 %v3460_v8, %v2753_v7  ;;  %v3483_v13 = vpop.f32.mrf.mxu1 }
 0x1c9   :  { %v3462_v14 = vpop.f32.mrf.mxu0 }
 0x1ca   :  { %v2833_v15 = vadd.f32 %v3482_v12, %v2793_v11  ;;  %v3484_v16 = vpop.f32.mrf.mxu1 }
 0x1cc   :  { %v2838_v17 = vmax.f32 %v2833_v15, 0.0 }
 0x1ce   :  { %v2839_v18 = vpack.c.bf16 %v2838_v17, %v2838_v17 }
 0x1d0   :  { %2840 = vst [vmem:[%s4622_s3] sm:$0xf] %v2839_v18 }

</bundles_post_ra>
